<compile_context>
chip_gen: v5e
topology: v5e:2x2
jax: 0.10.0
libtpu: 0.0.40
codegen_flags: <defaults>
</compile_context>

<pallas_src>
import functools

import jax
import jax.numpy as jnp
from jax.experimental import pallas as pl
from jax.experimental.pallas import tpu as pltpu

N_CLASS = 41


# ---------------------------------------------------------------------------
# Pallas tiled matmul kernel:  C = relu?(A @ B + bias),  A/B bf16, acc f32
# ---------------------------------------------------------------------------
def _mm_kernel(a_ref, b_ref, bias_ref, o_ref, acc_ref, *, relu):
    @pl.when(pl.program_id(2) == 0)
    def _():
        acc_ref[...] = jnp.zeros_like(acc_ref)

    acc_ref[...] += jnp.dot(a_ref[...], b_ref[...],
                            preferred_element_type=jnp.float32)

    @pl.when(pl.program_id(2) == pl.num_programs(2) - 1)
    def _():
        r = acc_ref[...] + bias_ref[...]          # f32 epilogue on the accumulator
        if relu:
            r = jnp.maximum(r, 0.0)
        o_ref[...] = r.astype(o_ref.dtype)


def _round_up(x, m):
    return (x + m - 1) // m * m


def _choose_tile(dim, base, target):
    """Pad `dim` to a multiple of `base`; pick the largest tile <= target that
    is a multiple of `base` and divides the padded dim (so no extra padding)."""
    dp = _round_up(dim, base)
    best = base
    t = base
    while t <= min(target, dp):
        if dp % t == 0:
            best = t
        t += base
    return best, dp


def pallas_matmul(a, b, bias=None, relu=False, out_dtype=jnp.float32):
    """a: (M, K), b: (K, N), bias: (N,) or None -> (M, N) of out_dtype.
    Operands are cast to bf16 for the MXU; accumulation is f32."""
    M, K = a.shape
    K2, N = b.shape
    assert K == K2

    a = a.astype(jnp.bfloat16)
    b = b.astype(jnp.bfloat16)

    tm, Mp = _choose_tile(M, 16, 256)     # sublane-aligned for bf16/f32
    tn, Np = _choose_tile(N, 128, 256)    # lane-aligned, MXU-friendly
    tk, Kp = _choose_tile(K, 128, 1024)   # few K-steps, still small VMEM tiles

    if (Mp, Kp) != (M, K):
        a = jnp.pad(a, ((0, Mp - M), (0, Kp - K)))
    if (Kp, Np) != (K, N):
        b = jnp.pad(b, ((0, Kp - K), (0, Np - N)))

    if bias is None:
        bias_p = jnp.zeros((1, Np), jnp.float32)
    else:
        bias_p = bias.astype(jnp.float32).reshape(1, N)
        if Np != N:
            bias_p = jnp.pad(bias_p, ((0, 0), (0, Np - N)))

    grid = (Mp // tm, Np // tn, Kp // tk)
    out = pl.pallas_call(
        functools.partial(_mm_kernel, relu=relu),
        out_shape=jax.ShapeDtypeStruct((Mp, Np), out_dtype),
        grid_spec=pltpu.PrefetchScalarGridSpec(
            num_scalar_prefetch=0,
            grid=grid,
            in_specs=[
                pl.BlockSpec((tm, tk), lambda i, j, k: (i, k)),
                pl.BlockSpec((tk, tn), lambda i, j, k: (k, j)),
                pl.BlockSpec((1, tn), lambda i, j, k: (0, j)),
            ],
            out_specs=pl.BlockSpec((tm, tn), lambda i, j, k: (i, j)),
            scratch_shapes=[pltpu.VMEM((tm, tn), jnp.float32)],
        ),
        compiler_params=pltpu.CompilerParams(
            dimension_semantics=("parallel", "parallel", "arbitrary")),
    )(a, b, bias_p)

    if (Mp, Np) != (M, N):
        out = out[:M, :N]
    return out


# ---------------------------------------------------------------------------
# Conv2d in NHWC via (im2col for KxK / plain reshape for 1x1) + Pallas GEMM
# ---------------------------------------------------------------------------
def conv2d(x, w, b, stride=1, padding=0, dilation=1, relu=False,
           out_dtype=jnp.bfloat16):
    """x: (N, H, W, Cin) NHWC; w: (Cout, Cin, kh, kw) (PyTorch layout); b: (Cout,)."""
    n, h, wdt, cin = x.shape
    cout, _, kh, kw = w.shape
    ho = (h + 2 * padding - dilation * (kh - 1) - 1) // stride + 1
    wo = (wdt + 2 * padding - dilation * (kw - 1) - 1) // stride + 1

    if kh == 1 and kw == 1 and padding == 0:
        xs = x[:, ::stride, ::stride, :] if stride > 1 else x
        col = xs.reshape(n * ho * wo, cin)
        wmat = w.reshape(cout, cin).T                       # (Cin, Cout)
    else:
        # TODO(synk): im2col matrix still materialized in HBM for KxK convs;
        # a fully fused shifted-window conv kernel would remove this traffic.
        xp = jnp.pad(x, ((0, 0), (padding, padding), (padding, padding), (0, 0)))
        patches = []
        for i in range(kh):
            for j in range(kw):
                h0, w0 = i * dilation, j * dilation
                patches.append(
                    xp[:, h0:h0 + stride * (ho - 1) + 1:stride,
                           w0:w0 + stride * (wo - 1) + 1:stride, :])
        col = jnp.stack(patches, axis=3)                    # (N, Ho, Wo, kh*kw, Cin)
        col = col.reshape(n * ho * wo, kh * kw * cin)
        wmat = jnp.transpose(w, (2, 3, 1, 0)).reshape(kh * kw * cin, cout)

    out = pallas_matmul(col, wmat, bias=b, relu=relu, out_dtype=out_dtype)
    return out.reshape(n, ho, wo, cout)


def maxpool2d_nhwc(x, k=3, stride=2, pad=1):
    # glue: tiny 3x3 window max, not a hot path
    neg = jnp.asarray(jnp.finfo(x.dtype).min, x.dtype)
    xp = jnp.pad(x, ((0, 0), (pad, pad), (pad, pad), (0, 0)), constant_values=neg)
    ho = (x.shape[1] + 2 * pad - k) // stride + 1
    wo = (x.shape[2] + 2 * pad - k) // stride + 1
    vals = []
    for i in range(k):
        for j in range(k):
            vals.append(xp[:, i:i + stride * (ho - 1) + 1:stride,
                              j:j + stride * (wo - 1) + 1:stride, :])
    return jnp.max(jnp.stack(vals, 0), axis=0)


# ---------------------------------------------------------------------------
# Bilinear interpolation (align_corners=True), NHWC, gather + lerp (VPU glue)
# ---------------------------------------------------------------------------
def _axis_weights(out_size, in_size):
    if in_size == 1 or out_size == 1:
        lo = jnp.zeros((out_size,), jnp.int32)
        return lo, lo, jnp.zeros((out_size,), jnp.float32)
    pos = jnp.arange(out_size, dtype=jnp.float32) * (in_size - 1) / (out_size - 1)
    lo = jnp.clip(jnp.floor(pos).astype(jnp.int32), 0, in_size - 2)
    frac = pos - lo.astype(jnp.float32)
    return lo, lo + 1, frac


def interpolate_bilinear_nhwc(x, out_hw):
    n, hi, wi, c = x.shape
    ho, wo = out_hw
    if hi == 1 and wi == 1:                       # global-pool branch: pure broadcast
        return jnp.broadcast_to(x.astype(jnp.float32), (n, ho, wo, c))
    x = x.astype(jnp.float32)
    h_lo, h_hi, h_f = _axis_weights(ho, hi)
    w_lo, w_hi, w_f = _axis_weights(wo, wi)
    t = (x[:, h_lo] * (1.0 - h_f)[None, :, None, None]
         + x[:, h_hi] * h_f[None, :, None, None])
    out = (t[:, :, w_lo] * (1.0 - w_f)[None, None, :, None]
           + t[:, :, w_hi] * w_f[None, None, :, None])
    return out


# ---------------------------------------------------------------------------
# Parameters (deterministic synthetic init)
# ---------------------------------------------------------------------------
def _init_conv(key, cout, cin, kh, kw):
    fan_in = cin * kh * kw
    w = jax.random.normal(key, (cout, cin, kh, kw), jnp.float32) * jnp.sqrt(2.0 / fan_in)
    b = jnp.zeros((cout,), jnp.float32)
    return w, b


def init_params(key):
    specs = {
        "conv1":      (64, 3, 7, 7),
        "layer1":     (256, 64, 1, 1),
        "layer2":     (512, 256, 3, 3),
        "layer3":     (2048, 512, 3, 3),
        "aspp1":      (256, 2048, 1, 1),
        "aspp2":      (256, 2048, 3, 3),
        "aspp3":      (256, 2048, 3, 3),
        "aspp4":      (256, 2048, 3, 3),
        "aspp_pool":  (256, 2048, 1, 1),
        "aspp_out":   (256, 1280, 1, 1),
        "dec_low":    (48, 256, 1, 1),
        "dec_conv1":  (256, 304, 3, 3),
        "dec_conv2":  (256, 256, 3, 3),
        "head_seg":   (N_CLASS, 256, 1, 1),
        "head_depth": (1, 256, 1, 1),
    }
    keys = jax.random.split(key, len(specs))
    return {name: _init_conv(k, *shape) for (name, shape), k in zip(specs.items(), keys)}


# ---------------------------------------------------------------------------
# Forward pass (reconstruction=False, transpose=False) — NCHW in / NCHW out
# ---------------------------------------------------------------------------
def deeplab_forward(x, p):
    input_res = x.shape[-2:]
    h = jnp.transpose(x, (0, 2, 3, 1)).astype(jnp.bfloat16)   # NCHW -> NHWC once

    # --- Encoder (simplified ResNet-style backbone, channel-faithful) ---
    h = conv2d(h, *p["conv1"], stride=2, padding=3, relu=True)        # (N,H/2,W/2,64)
    h = maxpool2d_nhwc(h)                                             # (N,H/4,W/4,64)
    low_level_feat = conv2d(h, *p["layer1"], relu=True)               # (N,H/4,W/4,256)
    h = conv2d(low_level_feat, *p["layer2"], stride=2, padding=1, relu=True)  # H/8,512
    h = conv2d(h, *p["layer3"], stride=2, padding=1, relu=True)       # (N,H/16,W/16,2048)

    # --- ASPP(2048 -> 256) ---
    b1 = conv2d(h, *p["aspp1"], relu=True)
    b2 = conv2d(h, *p["aspp2"], padding=6, dilation=6, relu=True)
    b3 = conv2d(h, *p["aspp3"], padding=12, dilation=12, relu=True)
    b4 = conv2d(h, *p["aspp4"], padding=18, dilation=18, relu=True)
    gp = jnp.mean(h.astype(jnp.float32), axis=(1, 2), keepdims=True)  # global avg pool
    b5 = conv2d(gp, *p["aspp_pool"], relu=True)                       # (N,1,1,256)
    b5 = jnp.broadcast_to(b5, b1.shape)                               # resize == broadcast
    a = jnp.concatenate([b1, b2, b3, b4, b5], axis=-1)                # (N,H/16,W/16,1280)
    a = conv2d(a, *p["aspp_out"], relu=True)                          # (N,H/16,W/16,256)

    # --- Shared decoder -> seg / depth heads ---
    low48 = conv2d(low_level_feat, *p["dec_low"], relu=True)          # (N,H/4,W/4,48)
    up = interpolate_bilinear_nhwc(a, low_level_feat.shape[1:3]).astype(jnp.bfloat16)
    d = jnp.concatenate([up, low48], axis=-1)                         # (N,H/4,W/4,304)
    d = conv2d(d, *p["dec_conv1"], padding=1, relu=True)
    d = conv2d(d, *p["dec_conv2"], padding=1, relu=True)
    seg = conv2d(d, *p["head_seg"], out_dtype=jnp.float32)            # (N,H/4,W/4,41)
    depth = conv2d(d, *p["head_depth"], out_dtype=jnp.float32)        # (N,H/4,W/4,1)

    # --- Upsample to input resolution (bilinear, align_corners=True) + squeeze ---
    out_seg = interpolate_bilinear_nhwc(seg, input_res)               # (N,H,W,41)
    out_depth = interpolate_bilinear_nhwc(depth, input_res)           # (N,H,W,1)
    out_seg = jnp.transpose(out_seg, (0, 3, 1, 2))                    # back to NCHW
    out_depth = jnp.transpose(out_depth, (0, 3, 1, 2))
    return jnp.squeeze(out_seg), jnp.squeeze(out_depth)

# TODO(synk): Encoder/ASPP/SharedDecoder internals are not in the reference file;
# a standard DeepLabV3+ structure with matching channel counts is used here.


if __name__ == "__main__":
    key = jax.random.PRNGKey(0)
    pkey, xkey = jax.random.split(key)
    params = init_params(pkey)

    # Small input consistent with the module: NCHW, RGB, spatial 32 (=> /16 = 2).
    x = jax.random.normal(xkey, (2, 3, 32, 32), jnp.float32)

    fwd = jax.jit(deeplab_forward)
    out_seg, out_depth = fwd(x, params)
    jax.block_until_ready(out_seg)
    jax.block_until_ready(out_depth)

    assert out_seg.shape == (2, N_CLASS, 32, 32), out_seg.shape
    assert out_depth.shape == (2, 32, 32), out_depth.shape
    assert bool(jnp.all(jnp.isfinite(out_seg))) and bool(jnp.all(jnp.isfinite(out_depth)))
    print("KERNEL_OK")
</pallas_src>

<mosaic_0001>
module attributes {stable_mosaic.version = 11 : i64} {
  func.func @_mm_kernel(%arg0: i32, %arg1: i32, %arg2: i32, %arg3: memref<256x256xbf16, #tpu.memory_space<vmem>>, %arg4: memref<256x128xbf16, #tpu.memory_space<vmem>>, %arg5: memref<1x128xf32, #tpu.memory_space<vmem>>, %arg6: memref<256x128xbf16, #tpu.memory_space<vmem>>, %arg7: memref<256x128xf32, #tpu.memory_space<vmem>>) attributes {dimension_semantics = [#tpu.dimension_semantics<parallel>, #tpu.dimension_semantics<parallel>, #tpu.dimension_semantics<arbitrary>], iteration_bounds = array<i64: 2, 1, 1>, scalar_prefetch = 0 : i64, scratch_operands = 1 : i64, tpu.core_type = #tpu.core_type<tc>, window_params = [{transform_indices = @transform_0, window_bounds = array<i64: 256, 256>}, {transform_indices = @transform_1, window_bounds = array<i64: 256, 128>}, {transform_indices = @transform_2, window_bounds = array<i64: 1, 128>}, {transform_indices = @transform_3, window_bounds = array<i64: 256, 128>}]} {
    %c0_i32 = arith.constant 0 : i32
    %0 = arith.cmpi eq, %arg2, %c0_i32 : i32
    %1 = arith.extui %0 : i1 to i32
    %c0_i32_0 = arith.constant 0 : i32
    %2 = arith.cmpi ne, %1, %c0_i32_0 : i32
    scf.if %2 {
      %cst_10 = arith.constant 0.000000e+00 : f32
      %12 = vector.broadcast %cst_10 : f32 to vector<256x128xf32>
      %c0_11 = arith.constant 0 : index
      %c0_12 = arith.constant 0 : index
      %13 = vector.load %arg7[%c0_11, %c0_12] : memref<256x128xf32, #tpu.memory_space<vmem>>, vector<256x128xf32>
      tpu.vector_store %arg7[%c0_11, %c0_12], %12 {strides = array<i32>} : memref<256x128xf32, #tpu.memory_space<vmem>>, vector<256x128xf32>,
    } else {
    }
    %c0 = arith.constant 0 : index
    %c0_1 = arith.constant 0 : index
    %3 = vector.load %arg7[%c0, %c0_1] : memref<256x128xf32, #tpu.memory_space<vmem>>, vector<256x128xf32>
    %c0_2 = arith.constant 0 : index
    %c0_3 = arith.constant 0 : index
    %4 = vector.load %arg3[%c0_2, %c0_3] : memref<256x256xbf16, #tpu.memory_space<vmem>>, vector<256x256xbf16>
    %c0_4 = arith.constant 0 : index
    %c0_5 = arith.constant 0 : index
    %5 = vector.load %arg4[%c0_4, %c0_5] : memref<256x128xbf16, #tpu.memory_space<vmem>>, vector<256x128xbf16>
    %cst = arith.constant dense<0.000000e+00> : vector<256x128xf32>
    %6 = tpu.matmul %4, %5, %cst {dimension_numbers = #tpu.dot_dimension_numbers<[1], [0], [0], [1], [0, 0, 1, 1], [], []>} : vector<256x256xbf16>, vector<256x128xbf16>, vector<256x128xf32> -> vector<256x128xf32>
    %7 = arith.addf %3, %6 : vector<256x128xf32>
    %c0_6 = arith.constant 0 : index
    %c0_7 = arith.constant 0 : index
    %8 = vector.load %arg7[%c0_6, %c0_7] : memref<256x128xf32, #tpu.memory_space<vmem>>, vector<256x128xf32>
    tpu.vector_store %arg7[%c0_6, %c0_7], %7 {strides = array<i32>} : memref<256x128xf32, #tpu.memory_space<vmem>>, vector<256x128xf32>,
    %c0_i32_8 = arith.constant 0 : i32
    %9 = arith.cmpi eq, %arg2, %c0_i32_8 : i32
    %10 = arith.extui %9 : i1 to i32
    %c0_i32_9 = arith.constant 0 : i32
    %11 = arith.cmpi ne, %10, %c0_i32_9 : i32
    scf.if %11 {
      %c0_10 = arith.constant 0 : index
      %c0_11 = arith.constant 0 : index
      %12 = vector.load %arg7[%c0_10, %c0_11] : memref<256x128xf32, #tpu.memory_space<vmem>>, vector<256x128xf32>
      %c0_12 = arith.constant 0 : index
      %c0_13 = arith.constant 0 : index
      %13 = vector.load %arg5[%c0_12, %c0_13] : memref<1x128xf32, #tpu.memory_space<vmem>>, vector<1x128xf32>
      %14 = vector.broadcast %13 : vector<1x128xf32> to vector<256x128xf32>
      %15 = arith.addf %12, %14 : vector<256x128xf32>
      %cst_14 = arith.constant 0.000000e+00 : f32
      %16 = vector.broadcast %cst_14 : f32 to vector<256x128xf32>
      %17 = arith.maximumf %15, %16 : vector<256x128xf32>
      %18 = arith.truncf %17 : vector<256x128xf32> to vector<256x128xbf16>
      %c0_15 = arith.constant 0 : index
      %c0_16 = arith.constant 0 : index
      %19 = vector.load %arg6[%c0_15, %c0_16] : memref<256x128xbf16, #tpu.memory_space<vmem>>, vector<256x128xbf16>
      tpu.vector_store %arg6[%c0_15, %c0_16], %18 {strides = array<i32>} : memref<256x128xbf16, #tpu.memory_space<vmem>>, vector<256x128xbf16>,
    } else {
    }
    return
  }
  func.func @transform_0(%arg0: i32, %arg1: i32, %arg2: i32) -> (i32, i32) {
    %c0_i32 = arith.constant 0 : i32
    return %arg0, %arg2 : i32, i32
  }
  func.func @transform_1(%arg0: i32, %arg1: i32, %arg2: i32) -> (i32, i32) {
    %c0_i32 = arith.constant 0 : i32
    return %arg2, %arg1 : i32, i32
  }
  func.func @transform_2(%arg0: i32, %arg1: i32, %arg2: i32) -> (i32, i32) {
    %c0_i32 = arith.constant 0 : i32
    %c0_i32_0 = arith.constant 0 : i32
    return %c0_i32, %arg1 : i32, i32
  }
  func.func @transform_3(%arg0: i32, %arg1: i32, %arg2: i32) -> (i32, i32) {
    %c0_i32 = arith.constant 0 : i32
    return %arg0, %arg1 : i32, i32
  }
}

module attributes {stable_mosaic.version = 11 : i64} {
  func.func @_mm_kernel(%arg0: i32, %arg1: i32, %arg2: i32, %arg3: memref<128x128xbf16, #tpu.memory_space<vmem>>, %arg4: memref<128x256xbf16, #tpu.memory_space<vmem>>, %arg5: memref<1x256xf32, #tpu.memory_space<vmem>>, %arg6: memref<128x256xbf16, #tpu.memory_space<vmem>>, %arg7: memref<128x256xf32, #tpu.memory_space<vmem>>) attributes {dimension_semantics = [#tpu.dimension_semantics<parallel>, #tpu.dimension_semantics<parallel>, #tpu.dimension_semantics<arbitrary>], iteration_bounds = array<i64: 1, 1, 1>, scalar_prefetch = 0 : i64, scratch_operands = 1 : i64, tpu.core_type = #tpu.core_type<tc>, window_params = [{transform_indices = @transform_0, window_bounds = array<i64: 128, 128>}, {transform_indices = @transform_1, window_bounds = array<i64: 128, 256>}, {transform_indices = @transform_2, window_bounds = array<i64: 1, 256>}, {transform_indices = @transform_3, window_bounds = array<i64: 128, 256>}]} {
    %c0_i32 = arith.constant 0 : i32
    %0 = arith.cmpi eq, %arg2, %c0_i32 : i32
    %1 = arith.extui %0 : i1 to i32
    %c0_i32_0 = arith.constant 0 : i32
    %2 = arith.cmpi ne, %1, %c0_i32_0 : i32
    scf.if %2 {
      %cst_10 = arith.constant 0.000000e+00 : f32
      %12 = vector.broadcast %cst_10 : f32 to vector<128x256xf32>
      %c0_11 = arith.constant 0 : index
      %c0_12 = arith.constant 0 : index
      %13 = vector.load %arg7[%c0_11, %c0_12] : memref<128x256xf32, #tpu.memory_space<vmem>>, vector<128x256xf32>
      tpu.vector_store %arg7[%c0_11, %c0_12], %12 {strides = array<i32>} : memref<128x256xf32, #tpu.memory_space<vmem>>, vector<128x256xf32>,
    } else {
    }
    %c0 = arith.constant 0 : index
    %c0_1 = arith.constant 0 : index
    %3 = vector.load %arg7[%c0, %c0_1] : memref<128x256xf32, #tpu.memory_space<vmem>>, vector<128x256xf32>
    %c0_2 = arith.constant 0 : index
    %c0_3 = arith.constant 0 : index
    %4 = vector.load %arg3[%c0_2, %c0_3] : memref<128x128xbf16, #tpu.memory_space<vmem>>, vector<128x128xbf16>
    %c0_4 = arith.constant 0 : index
    %c0_5 = arith.constant 0 : index
    %5 = vector.load %arg4[%c0_4, %c0_5] : memref<128x256xbf16, #tpu.memory_space<vmem>>, vector<128x256xbf16>
    %cst = arith.constant dense<0.000000e+00> : vector<128x256xf32>
    %6 = tpu.matmul %4, %5, %cst {dimension_numbers = #tpu.dot_dimension_numbers<[1], [0], [0], [1], [0, 0, 1, 1], [], []>} : vector<128x128xbf16>, vector<128x256xbf16>, vector<128x256xf32> -> vector<128x256xf32>
    %7 = arith.addf %3, %6 : vector<128x256xf32>
    %c0_6 = arith.constant 0 : index
    %c0_7 = arith.constant 0 : index
    %8 = vector.load %arg7[%c0_6, %c0_7] : memref<128x256xf32, #tpu.memory_space<vmem>>, vector<128x256xf32>
    tpu.vector_store %arg7[%c0_6, %c0_7], %7 {strides = array<i32>} : memref<128x256xf32, #tpu.memory_space<vmem>>, vector<128x256xf32>,
    %c0_i32_8 = arith.constant 0 : i32
    %9 = arith.cmpi eq, %arg2, %c0_i32_8 : i32
    %10 = arith.extui %9 : i1 to i32
    %c0_i32_9 = arith.constant 0 : i32
    %11 = arith.cmpi ne, %10, %c0_i32_9 : i32
    scf.if %11 {
      %c0_10 = arith.constant 0 : index
      %c0_11 = arith.constant 0 : index
      %12 = vector.load %arg7[%c0_10, %c0_11] : memref<128x256xf32, #tpu.memory_space<vmem>>, vector<128x256xf32>
      %c0_12 = arith.constant 0 : index
      %c0_13 = arith.constant 0 : index
      %13 = vector.load %arg5[%c0_12, %c0_13] : memref<1x256xf32, #tpu.memory_space<vmem>>, vector<1x256xf32>
      %14 = vector.broadcast %13 : vector<1x256xf32> to vector<128x256xf32>
      %15 = arith.addf %12, %14 : vector<128x256xf32>
      %cst_14 = arith.constant 0.000000e+00 : f32
      %16 = vector.broadcast %cst_14 : f32 to vector<128x256xf32>
      %17 = arith.maximumf %15, %16 : vector<128x256xf32>
      %18 = arith.truncf %17 : vector<128x256xf32> to vector<128x256xbf16>
      %c0_15 = arith.constant 0 : index
      %c0_16 = arith.constant 0 : index
      %19 = vector.load %arg6[%c0_15, %c0_16] : memref<128x256xbf16, #tpu.memory_space<vmem>>, vector<128x256xbf16>
      tpu.vector_store %arg6[%c0_15, %c0_16], %18 {strides = array<i32>} : memref<128x256xbf16, #tpu.memory_space<vmem>>, vector<128x256xbf16>,
    } else {
    }
    return
  }
  func.func @transform_0(%arg0: i32, %arg1: i32, %arg2: i32) -> (i32, i32) {
    %c0_i32 = arith.constant 0 : i32
    return %arg0, %arg2 : i32, i32
  }
  func.func @transform_1(%arg0: i32, %arg1: i32, %arg2: i32) -> (i32, i32) {
    %c0_i32 = arith.constant 0 : i32
    return %arg2, %arg1 : i32, i32
  }
  func.func @transform_2(%arg0: i32, %arg1: i32, %arg2: i32) -> (i32, i32) {
    %c0_i32 = arith.constant 0 : i32
    %c0_i32_0 = arith.constant 0 : i32
    return %c0_i32, %arg1 : i32, i32
  }
  func.func @transform_3(%arg0: i32, %arg1: i32, %arg2: i32) -> (i32, i32) {
    %c0_i32 = arith.constant 0 : i32
    return %arg0, %arg1 : i32, i32
  }
}

module attributes {stable_mosaic.version = 11 : i64} {
  func.func @_mm_kernel(%arg0: i32, %arg1: i32, %arg2: i32, %arg3: memref<128x256xbf16, #tpu.memory_space<vmem>>, %arg4: memref<256x128xbf16, #tpu.memory_space<vmem>>, %arg5: memref<1x128xf32, #tpu.memory_space<vmem>>, %arg6: memref<128x128xbf16, #tpu.memory_space<vmem>>, %arg7: memref<128x128xf32, #tpu.memory_space<vmem>>) attributes {dimension_semantics = [#tpu.dimension_semantics<parallel>, #tpu.dimension_semantics<parallel>, #tpu.dimension_semantics<arbitrary>], iteration_bounds = array<i64: 1, 1, 1>, scalar_prefetch = 0 : i64, scratch_operands = 1 : i64, tpu.core_type = #tpu.core_type<tc>, window_params = [{transform_indices = @transform_0, window_bounds = array<i64: 128, 256>}, {transform_indices = @transform_1, window_bounds = array<i64: 256, 128>}, {transform_indices = @transform_2, window_bounds = array<i64: 1, 128>}, {transform_indices = @transform_3, window_bounds = array<i64: 128, 128>}]} {
    %c0_i32 = arith.constant 0 : i32
    %0 = arith.cmpi eq, %arg2, %c0_i32 : i32
    %1 = arith.extui %0 : i1 to i32
    %c0_i32_0 = arith.constant 0 : i32
    %2 = arith.cmpi ne, %1, %c0_i32_0 : i32
    scf.if %2 {
      %cst_10 = arith.constant 0.000000e+00 : f32
      %12 = vector.broadcast %cst_10 : f32 to vector<128x128xf32>
      %c0_11 = arith.constant 0 : index
      %c0_12 = arith.constant 0 : index
      %13 = vector.load %arg7[%c0_11, %c0_12] : memref<128x128xf32, #tpu.memory_space<vmem>>, vector<128x128xf32>
      tpu.vector_store %arg7[%c0_11, %c0_12], %12 {strides = array<i32>} : memref<128x128xf32, #tpu.memory_space<vmem>>, vector<128x128xf32>,
    } else {
    }
    %c0 = arith.constant 0 : index
    %c0_1 = arith.constant 0 : index
    %3 = vector.load %arg7[%c0, %c0_1] : memref<128x128xf32, #tpu.memory_space<vmem>>, vector<128x128xf32>
    %c0_2 = arith.constant 0 : index
    %c0_3 = arith.constant 0 : index
    %4 = vector.load %arg3[%c0_2, %c0_3] : memref<128x256xbf16, #tpu.memory_space<vmem>>, vector<128x256xbf16>
    %c0_4 = arith.constant 0 : index
    %c0_5 = arith.constant 0 : index
    %5 = vector.load %arg4[%c0_4, %c0_5] : memref<256x128xbf16, #tpu.memory_space<vmem>>, vector<256x128xbf16>
    %cst = arith.constant dense<0.000000e+00> : vector<128x128xf32>
    %6 = tpu.matmul %4, %5, %cst {dimension_numbers = #tpu.dot_dimension_numbers<[1], [0], [0], [1], [0, 0, 1, 1], [], []>} : vector<128x256xbf16>, vector<256x128xbf16>, vector<128x128xf32> -> vector<128x128xf32>
    %7 = arith.addf %3, %6 : vector<128x128xf32>
    %c0_6 = arith.constant 0 : index
    %c0_7 = arith.constant 0 : index
    %8 = vector.load %arg7[%c0_6, %c0_7] : memref<128x128xf32, #tpu.memory_space<vmem>>, vector<128x128xf32>
    tpu.vector_store %arg7[%c0_6, %c0_7], %7 {strides = array<i32>} : memref<128x128xf32, #tpu.memory_space<vmem>>, vector<128x128xf32>,
    %c0_i32_8 = arith.constant 0 : i32
    %9 = arith.cmpi eq, %arg2, %c0_i32_8 : i32
    %10 = arith.extui %9 : i1 to i32
    %c0_i32_9 = arith.constant 0 : i32
    %11 = arith.cmpi ne, %10, %c0_i32_9 : i32
    scf.if %11 {
      %c0_10 = arith.constant 0 : index
      %c0_11 = arith.constant 0 : index
      %12 = vector.load %arg7[%c0_10, %c0_11] : memref<128x128xf32, #tpu.memory_space<vmem>>, vector<128x128xf32>
      %c0_12 = arith.constant 0 : index
      %c0_13 = arith.constant 0 : index
      %13 = vector.load %arg5[%c0_12, %c0_13] : memref<1x128xf32, #tpu.memory_space<vmem>>, vector<1x128xf32>
      %14 = vector.broadcast %13 : vector<1x128xf32> to vector<128x128xf32>
      %15 = arith.addf %12, %14 : vector<128x128xf32>
      %cst_14 = arith.constant 0.000000e+00 : f32
      %16 = vector.broadcast %cst_14 : f32 to vector<128x128xf32>
      %17 = arith.maximumf %15, %16 : vector<128x128xf32>
      %18 = arith.truncf %17 : vector<128x128xf32> to vector<128x128xbf16>
      %c0_15 = arith.constant 0 : index
      %c0_16 = arith.constant 0 : index
      %19 = vector.load %arg6[%c0_15, %c0_16] : memref<128x128xbf16, #tpu.memory_space<vmem>>, vector<128x128xbf16>
      tpu.vector_store %arg6[%c0_15, %c0_16], %18 {strides = array<i32>} : memref<128x128xbf16, #tpu.memory_space<vmem>>, vector<128x128xbf16>,
    } else {
    }
    return
  }
  func.func @transform_0(%arg0: i32, %arg1: i32, %arg2: i32) -> (i32, i32) {
    %c0_i32 = arith.constant 0 : i32
    return %arg0, %arg2 : i32, i32
  }
  func.func @transform_1(%arg0: i32, %arg1: i32, %arg2: i32) -> (i32, i32) {
    %c0_i32 = arith.constant 0 : i32
    return %arg2, %arg1 : i32, i32
  }
  func.func @transform_2(%arg0: i32, %arg1: i32, %arg2: i32) -> (i32, i32) {
    %c0_i32 = arith.constant 0 : i32
    %c0_i32_0 = arith.constant 0 : i32
    return %c0_i32, %arg1 : i32, i32
  }
  func.func @transform_3(%arg0: i32, %arg1: i32, %arg2: i32) -> (i32, i32) {
    %c0_i32 = arith.constant 0 : i32
    return %arg0, %arg1 : i32, i32
  }
}

module attributes {stable_mosaic.version = 11 : i64} {
  func.func @_mm_kernel(%arg0: i32, %arg1: i32, %arg2: i32, %arg3: memref<32x768xbf16, #tpu.memory_space<vmem>>, %arg4: memref<768x256xbf16, #tpu.memory_space<vmem>>, %arg5: memref<1x256xf32, #tpu.memory_space<vmem>>, %arg6: memref<32x256xbf16, #tpu.memory_space<vmem>>, %arg7: memref<32x256xf32, #tpu.memory_space<vmem>>) attributes {dimension_semantics = [#tpu.dimension_semantics<parallel>, #tpu.dimension_semantics<parallel>, #tpu.dimension_semantics<arbitrary>], iteration_bounds = array<i64: 1, 2, 3>, scalar_prefetch = 0 : i64, scratch_operands = 1 : i64, tpu.core_type = #tpu.core_type<tc>, window_params = [{transform_indices = @transform_0, window_bounds = array<i64: 32, 768>}, {transform_indices = @transform_1, window_bounds = array<i64: 768, 256>}, {transform_indices = @transform_2, window_bounds = array<i64: 1, 256>}, {transform_indices = @transform_3, window_bounds = array<i64: 32, 256>}]} {
    %c0_i32 = arith.constant 0 : i32
    %0 = arith.cmpi eq, %arg2, %c0_i32 : i32
    %1 = arith.extui %0 : i1 to i32
    %c0_i32_0 = arith.constant 0 : i32
    %2 = arith.cmpi ne, %1, %c0_i32_0 : i32
    scf.if %2 {
      %cst_9 = arith.constant 0.000000e+00 : f32
      %12 = vector.broadcast %cst_9 : f32 to vector<32x256xf32>
      %c0_10 = arith.constant 0 : index
      %c0_11 = arith.constant 0 : index
      %13 = vector.load %arg7[%c0_10, %c0_11] : memref<32x256xf32, #tpu.memory_space<vmem>>, vector<32x256xf32>
      tpu.vector_store %arg7[%c0_10, %c0_11], %12 {strides = array<i32>} : memref<32x256xf32, #tpu.memory_space<vmem>>, vector<32x256xf32>,
    } else {
    }
    %c0 = arith.constant 0 : index
    %c0_1 = arith.constant 0 : index
    %3 = vector.load %arg7[%c0, %c0_1] : memref<32x256xf32, #tpu.memory_space<vmem>>, vector<32x256xf32>
    %c0_2 = arith.constant 0 : index
    %c0_3 = arith.constant 0 : index
    %4 = vector.load %arg3[%c0_2, %c0_3] : memref<32x768xbf16, #tpu.memory_space<vmem>>, vector<32x768xbf16>
    %c0_4 = arith.constant 0 : index
    %c0_5 = arith.constant 0 : index
    %5 = vector.load %arg4[%c0_4, %c0_5] : memref<768x256xbf16, #tpu.memory_space<vmem>>, vector<768x256xbf16>
    %cst = arith.constant dense<0.000000e+00> : vector<32x256xf32>
    %6 = tpu.matmul %4, %5, %cst {dimension_numbers = #tpu.dot_dimension_numbers<[1], [0], [0], [1], [0, 0, 1, 1], [], []>} : vector<32x768xbf16>, vector<768x256xbf16>, vector<32x256xf32> -> vector<32x256xf32>
    %7 = arith.addf %3, %6 : vector<32x256xf32>
    %c0_6 = arith.constant 0 : index
    %c0_7 = arith.constant 0 : index
    %8 = vector.load %arg7[%c0_6, %c0_7] : memref<32x256xf32, #tpu.memory_space<vmem>>, vector<32x256xf32>
    tpu.vector_store %arg7[%c0_6, %c0_7], %7 {strides = array<i32>} : memref<32x256xf32, #tpu.memory_space<vmem>>, vector<32x256xf32>,
    %c2_i32 = arith.constant 2 : i32
    %9 = arith.cmpi eq, %arg2, %c2_i32 : i32
    %10 = arith.extui %9 : i1 to i32
    %c0_i32_8 = arith.constant 0 : i32
    %11 = arith.cmpi ne, %10, %c0_i32_8 : i32
    scf.if %11 {
      %c0_9 = arith.constant 0 : index
      %c0_10 = arith.constant 0 : index
      %12 = vector.load %arg7[%c0_9, %c0_10] : memref<32x256xf32, #tpu.memory_space<vmem>>, vector<32x256xf32>
      %c0_11 = arith.constant 0 : index
      %c0_12 = arith.constant 0 : index
      %13 = vector.load %arg5[%c0_11, %c0_12] : memref<1x256xf32, #tpu.memory_space<vmem>>, vector<1x256xf32>
      %14 = vector.broadcast %13 : vector<1x256xf32> to vector<32x256xf32>
      %15 = arith.addf %12, %14 : vector<32x256xf32>
      %cst_13 = arith.constant 0.000000e+00 : f32
      %16 = vector.broadcast %cst_13 : f32 to vector<32x256xf32>
      %17 = arith.maximumf %15, %16 : vector<32x256xf32>
      %18 = arith.truncf %17 : vector<32x256xf32> to vector<32x256xbf16>
      %c0_14 = arith.constant 0 : index
      %c0_15 = arith.constant 0 : index
      %19 = vector.load %arg6[%c0_14, %c0_15] : memref<32x256xbf16, #tpu.memory_space<vmem>>, vector<32x256xbf16>
      tpu.vector_store %arg6[%c0_14, %c0_15], %18 {strides = array<i32>} : memref<32x256xbf16, #tpu.memory_space<vmem>>, vector<32x256xbf16>,
    } else {
    }
    return
  }
  func.func @transform_0(%arg0: i32, %arg1: i32, %arg2: i32) -> (i32, i32) {
    %c0_i32 = arith.constant 0 : i32
    return %arg0, %arg2 : i32, i32
  }
  func.func @transform_1(%arg0: i32, %arg1: i32, %arg2: i32) -> (i32, i32) {
    %c0_i32 = arith.constant 0 : i32
    return %arg2, %arg1 : i32, i32
  }
  func.func @transform_2(%arg0: i32, %arg1: i32, %arg2: i32) -> (i32, i32) {
    %c0_i32 = arith.constant 0 : i32
    %c0_i32_0 = arith.constant 0 : i32
    return %c0_i32, %arg1 : i32, i32
  }
  func.func @transform_3(%arg0: i32, %arg1: i32, %arg2: i32) -> (i32, i32) {
    %c0_i32 = arith.constant 0 : i32
    return %arg0, %arg1 : i32, i32
  }
}

module attributes {stable_mosaic.version = 11 : i64} {
  func.func @_mm_kernel(%arg0: i32, %arg1: i32, %arg2: i32, %arg3: memref<16x768xbf16, #tpu.memory_space<vmem>>, %arg4: memref<768x256xbf16, #tpu.memory_space<vmem>>, %arg5: memref<1x256xf32, #tpu.memory_space<vmem>>, %arg6: memref<16x256xbf16, #tpu.memory_space<vmem>>, %arg7: memref<16x256xf32, #tpu.memory_space<vmem>>) attributes {dimension_semantics = [#tpu.dimension_semantics<parallel>, #tpu.dimension_semantics<parallel>, #tpu.dimension_semantics<arbitrary>], iteration_bounds = array<i64: 1, 8, 6>, scalar_prefetch = 0 : i64, scratch_operands = 1 : i64, tpu.core_type = #tpu.core_type<tc>, window_params = [{transform_indices = @transform_0, window_bounds = array<i64: 16, 768>}, {transform_indices = @transform_1, window_bounds = array<i64: 768, 256>}, {transform_indices = @transform_2, window_bounds = array<i64: 1, 256>}, {transform_indices = @transform_3, window_bounds = array<i64: 16, 256>}]} {
    %c0_i32 = arith.constant 0 : i32
    %0 = arith.cmpi eq, %arg2, %c0_i32 : i32
    %1 = arith.extui %0 : i1 to i32
    %c0_i32_0 = arith.constant 0 : i32
    %2 = arith.cmpi ne, %1, %c0_i32_0 : i32
    scf.if %2 {
      %cst_9 = arith.constant 0.000000e+00 : f32
      %12 = vector.broadcast %cst_9 : f32 to vector<16x256xf32>
      %c0_10 = arith.constant 0 : index
      %c0_11 = arith.constant 0 : index
      %13 = vector.load %arg7[%c0_10, %c0_11] : memref<16x256xf32, #tpu.memory_space<vmem>>, vector<16x256xf32>
      tpu.vector_store %arg7[%c0_10, %c0_11], %12 {strides = array<i32>} : memref<16x256xf32, #tpu.memory_space<vmem>>, vector<16x256xf32>,
    } else {
    }
    %c0 = arith.constant 0 : index
    %c0_1 = arith.constant 0 : index
    %3 = vector.load %arg7[%c0, %c0_1] : memref<16x256xf32, #tpu.memory_space<vmem>>, vector<16x256xf32>
    %c0_2 = arith.constant 0 : index
    %c0_3 = arith.constant 0 : index
    %4 = vector.load %arg3[%c0_2, %c0_3] : memref<16x768xbf16, #tpu.memory_space<vmem>>, vector<16x768xbf16>
    %c0_4 = arith.constant 0 : index
    %c0_5 = arith.constant 0 : index
    %5 = vector.load %arg4[%c0_4, %c0_5] : memref<768x256xbf16, #tpu.memory_space<vmem>>, vector<768x256xbf16>
    %cst = arith.constant dense<0.000000e+00> : vector<16x256xf32>
    %6 = tpu.matmul %4, %5, %cst {dimension_numbers = #tpu.dot_dimension_numbers<[1], [0], [0], [1], [0, 0, 1, 1], [], []>} : vector<16x768xbf16>, vector<768x256xbf16>, vector<16x256xf32> -> vector<16x256xf32>
    %7 = arith.addf %3, %6 : vector<16x256xf32>
    %c0_6 = arith.constant 0 : index
    %c0_7 = arith.constant 0 : index
    %8 = vector.load %arg7[%c0_6, %c0_7] : memref<16x256xf32, #tpu.memory_space<vmem>>, vector<16x256xf32>
    tpu.vector_store %arg7[%c0_6, %c0_7], %7 {strides = array<i32>} : memref<16x256xf32, #tpu.memory_space<vmem>>, vector<16x256xf32>,
    %c5_i32 = arith.constant 5 : i32
    %9 = arith.cmpi eq, %arg2, %c5_i32 : i32
    %10 = arith.extui %9 : i1 to i32
    %c0_i32_8 = arith.constant 0 : i32
    %11 = arith.cmpi ne, %10, %c0_i32_8 : i32
    scf.if %11 {
      %c0_9 = arith.constant 0 : index
      %c0_10 = arith.constant 0 : index
      %12 = vector.load %arg7[%c0_9, %c0_10] : memref<16x256xf32, #tpu.memory_space<vmem>>, vector<16x256xf32>
      %c0_11 = arith.constant 0 : index
      %c0_12 = arith.constant 0 : index
      %13 = vector.load %arg5[%c0_11, %c0_12] : memref<1x256xf32, #tpu.memory_space<vmem>>, vector<1x256xf32>
      %14 = vector.broadcast %13 : vector<1x256xf32> to vector<16x256xf32>
      %15 = arith.addf %12, %14 : vector<16x256xf32>
      %cst_13 = arith.constant 0.000000e+00 : f32
      %16 = vector.broadcast %cst_13 : f32 to vector<16x256xf32>
      %17 = arith.maximumf %15, %16 : vector<16x256xf32>
      %18 = arith.truncf %17 : vector<16x256xf32> to vector<16x256xbf16>
      %c0_14 = arith.constant 0 : index
      %c0_15 = arith.constant 0 : index
      %19 = vector.load %arg6[%c0_14, %c0_15] : memref<16x256xbf16, #tpu.memory_space<vmem>>, vector<16x256xbf16>
      tpu.vector_store %arg6[%c0_14, %c0_15], %18 {strides = array<i32>} : memref<16x256xbf16, #tpu.memory_space<vmem>>, vector<16x256xbf16>,
    } else {
    }
    return
  }
  func.func @transform_0(%arg0: i32, %arg1: i32, %arg2: i32) -> (i32, i32) {
    %c0_i32 = arith.constant 0 : i32
    return %arg0, %arg2 : i32, i32
  }
  func.func @transform_1(%arg0: i32, %arg1: i32, %arg2: i32) -> (i32, i32) {
    %c0_i32 = arith.constant 0 : i32
    return %arg2, %arg1 : i32, i32
  }
  func.func @transform_2(%arg0: i32, %arg1: i32, %arg2: i32) -> (i32, i32) {
    %c0_i32 = arith.constant 0 : i32
    %c0_i32_0 = arith.constant 0 : i32
    return %c0_i32, %arg1 : i32, i32
  }
  func.func @transform_3(%arg0: i32, %arg1: i32, %arg2: i32) -> (i32, i32) {
    %c0_i32 = arith.constant 0 : i32
    return %arg0, %arg1 : i32, i32
  }
}

module attributes {stable_mosaic.version = 11 : i64} {
  func.func @_mm_kernel(%arg0: i32, %arg1: i32, %arg2: i32, %arg3: memref<16x1024xbf16, #tpu.memory_space<vmem>>, %arg4: memref<1024x256xbf16, #tpu.memory_space<vmem>>, %arg5: memref<1x256xf32, #tpu.memory_space<vmem>>, %arg6: memref<16x256xbf16, #tpu.memory_space<vmem>>, %arg7: memref<16x256xf32, #tpu.memory_space<vmem>>) attributes {dimension_semantics = [#tpu.dimension_semantics<parallel>, #tpu.dimension_semantics<parallel>, #tpu.dimension_semantics<arbitrary>], iteration_bounds = array<i64: 1, 1, 2>, scalar_prefetch = 0 : i64, scratch_operands = 1 : i64, tpu.core_type = #tpu.core_type<tc>, window_params = [{transform_indices = @transform_0, window_bounds = array<i64: 16, 1024>}, {transform_indices = @transform_1, window_bounds = array<i64: 1024, 256>}, {transform_indices = @transform_2, window_bounds = array<i64: 1, 256>}, {transform_indices = @transform_3, window_bounds = array<i64: 16, 256>}]} {
    %c0_i32 = arith.constant 0 : i32
    %0 = arith.cmpi eq, %arg2, %c0_i32 : i32
    %1 = arith.extui %0 : i1 to i32
    %c0_i32_0 = arith.constant 0 : i32
    %2 = arith.cmpi ne, %1, %c0_i32_0 : i32
    scf.if %2 {
      %cst_9 = arith.constant 0.000000e+00 : f32
      %12 = vector.broadcast %cst_9 : f32 to vector<16x256xf32>
      %c0_10 = arith.constant 0 : index
      %c0_11 = arith.constant 0 : index
      %13 = vector.load %arg7[%c0_10, %c0_11] : memref<16x256xf32, #tpu.memory_space<vmem>>, vector<16x256xf32>
      tpu.vector_store %arg7[%c0_10, %c0_11], %12 {strides = array<i32>} : memref<16x256xf32, #tpu.memory_space<vmem>>, vector<16x256xf32>,
    } else {
    }
    %c0 = arith.constant 0 : index
    %c0_1 = arith.constant 0 : index
    %3 = vector.load %arg7[%c0, %c0_1] : memref<16x256xf32, #tpu.memory_space<vmem>>, vector<16x256xf32>
    %c0_2 = arith.constant 0 : index
    %c0_3 = arith.constant 0 : index
    %4 = vector.load %arg3[%c0_2, %c0_3] : memref<16x1024xbf16, #tpu.memory_space<vmem>>, vector<16x1024xbf16>
    %c0_4 = arith.constant 0 : index
    %c0_5 = arith.constant 0 : index
    %5 = vector.load %arg4[%c0_4, %c0_5] : memref<1024x256xbf16, #tpu.memory_space<vmem>>, vector<1024x256xbf16>
    %cst = arith.constant dense<0.000000e+00> : vector<16x256xf32>
    %6 = tpu.matmul %4, %5, %cst {dimension_numbers = #tpu.dot_dimension_numbers<[1], [0], [0], [1], [0, 0, 1, 1], [], []>} : vector<16x1024xbf16>, vector<1024x256xbf16>, vector<16x256xf32> -> vector<16x256xf32>
    %7 = arith.addf %3, %6 : vector<16x256xf32>
    %c0_6 = arith.constant 0 : index
    %c0_7 = arith.constant 0 : index
    %8 = vector.load %arg7[%c0_6, %c0_7] : memref<16x256xf32, #tpu.memory_space<vmem>>, vector<16x256xf32>
    tpu.vector_store %arg7[%c0_6, %c0_7], %7 {strides = array<i32>} : memref<16x256xf32, #tpu.memory_space<vmem>>, vector<16x256xf32>,
    %c1_i32 = arith.constant 1 : i32
    %9 = arith.cmpi eq, %arg2, %c1_i32 : i32
    %10 = arith.extui %9 : i1 to i32
    %c0_i32_8 = arith.constant 0 : i32
    %11 = arith.cmpi ne, %10, %c0_i32_8 : i32
    scf.if %11 {
      %c0_9 = arith.constant 0 : index
      %c0_10 = arith.constant 0 : index
      %12 = vector.load %arg7[%c0_9, %c0_10] : memref<16x256xf32, #tpu.memory_space<vmem>>, vector<16x256xf32>
      %c0_11 = arith.constant 0 : index
      %c0_12 = arith.constant 0 : index
      %13 = vector.load %arg5[%c0_11, %c0_12] : memref<1x256xf32, #tpu.memory_space<vmem>>, vector<1x256xf32>
      %14 = vector.broadcast %13 : vector<1x256xf32> to vector<16x256xf32>
      %15 = arith.addf %12, %14 : vector<16x256xf32>
      %cst_13 = arith.constant 0.000000e+00 : f32
      %16 = vector.broadcast %cst_13 : f32 to vector<16x256xf32>
      %17 = arith.maximumf %15, %16 : vector<16x256xf32>
      %18 = arith.truncf %17 : vector<16x256xf32> to vector<16x256xbf16>
      %c0_14 = arith.constant 0 : index
      %c0_15 = arith.constant 0 : index
      %19 = vector.load %arg6[%c0_14, %c0_15] : memref<16x256xbf16, #tpu.memory_space<vmem>>, vector<16x256xbf16>
      tpu.vector_store %arg6[%c0_14, %c0_15], %18 {strides = array<i32>} : memref<16x256xbf16, #tpu.memory_space<vmem>>, vector<16x256xbf16>,
    } else {
    }
    return
  }
  func.func @transform_0(%arg0: i32, %arg1: i32, %arg2: i32) -> (i32, i32) {
    %c0_i32 = arith.constant 0 : i32
    return %arg0, %arg2 : i32, i32
  }
  func.func @transform_1(%arg0: i32, %arg1: i32, %arg2: i32) -> (i32, i32) {
    %c0_i32 = arith.constant 0 : i32
    return %arg2, %arg1 : i32, i32
  }
  func.func @transform_2(%arg0: i32, %arg1: i32, %arg2: i32) -> (i32, i32) {
    %c0_i32 = arith.constant 0 : i32
    %c0_i32_0 = arith.constant 0 : i32
    return %c0_i32, %arg1 : i32, i32
  }
  func.func @transform_3(%arg0: i32, %arg1: i32, %arg2: i32) -> (i32, i32) {
    %c0_i32 = arith.constant 0 : i32
    return %arg0, %arg1 : i32, i32
  }
}

module attributes {stable_mosaic.version = 11 : i64} {
  func.func @_mm_kernel(%arg0: i32, %arg1: i32, %arg2: i32, %arg3: memref<16x1024xbf16, #tpu.memory_space<vmem>>, %arg4: memref<1024x256xbf16, #tpu.memory_space<vmem>>, %arg5: memref<1x256xf32, #tpu.memory_space<vmem>>, %arg6: memref<16x256xbf16, #tpu.memory_space<vmem>>, %arg7: memref<16x256xf32, #tpu.memory_space<vmem>>) attributes {dimension_semantics = [#tpu.dimension_semantics<parallel>, #tpu.dimension_semantics<parallel>, #tpu.dimension_semantics<arbitrary>], iteration_bounds = array<i64: 1, 1, 18>, scalar_prefetch = 0 : i64, scratch_operands = 1 : i64, tpu.core_type = #tpu.core_type<tc>, window_params = [{transform_indices = @transform_0, window_bounds = array<i64: 16, 1024>}, {transform_indices = @transform_1, window_bounds = array<i64: 1024, 256>}, {transform_indices = @transform_2, window_bounds = array<i64: 1, 256>}, {transform_indices = @transform_3, window_bounds = array<i64: 16, 256>}]} {
    %c0_i32 = arith.constant 0 : i32
    %0 = arith.cmpi eq, %arg2, %c0_i32 : i32
    %1 = arith.extui %0 : i1 to i32
    %c0_i32_0 = arith.constant 0 : i32
    %2 = arith.cmpi ne, %1, %c0_i32_0 : i32
    scf.if %2 {
      %cst_9 = arith.constant 0.000000e+00 : f32
      %12 = vector.broadcast %cst_9 : f32 to vector<16x256xf32>
      %c0_10 = arith.constant 0 : index
      %c0_11 = arith.constant 0 : index
      %13 = vector.load %arg7[%c0_10, %c0_11] : memref<16x256xf32, #tpu.memory_space<vmem>>, vector<16x256xf32>
      tpu.vector_store %arg7[%c0_10, %c0_11], %12 {strides = array<i32>} : memref<16x256xf32, #tpu.memory_space<vmem>>, vector<16x256xf32>,
    } else {
    }
    %c0 = arith.constant 0 : index
    %c0_1 = arith.constant 0 : index
    %3 = vector.load %arg7[%c0, %c0_1] : memref<16x256xf32, #tpu.memory_space<vmem>>, vector<16x256xf32>
    %c0_2 = arith.constant 0 : index
    %c0_3 = arith.constant 0 : index
    %4 = vector.load %arg3[%c0_2, %c0_3] : memref<16x1024xbf16, #tpu.memory_space<vmem>>, vector<16x1024xbf16>
    %c0_4 = arith.constant 0 : index
    %c0_5 = arith.constant 0 : index
    %5 = vector.load %arg4[%c0_4, %c0_5] : memref<1024x256xbf16, #tpu.memory_space<vmem>>, vector<1024x256xbf16>
    %cst = arith.constant dense<0.000000e+00> : vector<16x256xf32>
    %6 = tpu.matmul %4, %5, %cst {dimension_numbers = #tpu.dot_dimension_numbers<[1], [0], [0], [1], [0, 0, 1, 1], [], []>} : vector<16x1024xbf16>, vector<1024x256xbf16>, vector<16x256xf32> -> vector<16x256xf32>
    %7 = arith.addf %3, %6 : vector<16x256xf32>
    %c0_6 = arith.constant 0 : index
    %c0_7 = arith.constant 0 : index
    %8 = vector.load %arg7[%c0_6, %c0_7] : memref<16x256xf32, #tpu.memory_space<vmem>>, vector<16x256xf32>
    tpu.vector_store %arg7[%c0_6, %c0_7], %7 {strides = array<i32>} : memref<16x256xf32, #tpu.memory_space<vmem>>, vector<16x256xf32>,
    %c17_i32 = arith.constant 17 : i32
    %9 = arith.cmpi eq, %arg2, %c17_i32 : i32
    %10 = arith.extui %9 : i1 to i32
    %c0_i32_8 = arith.constant 0 : i32
    %11 = arith.cmpi ne, %10, %c0_i32_8 : i32
    scf.if %11 {
      %c0_9 = arith.constant 0 : index
      %c0_10 = arith.constant 0 : index
      %12 = vector.load %arg7[%c0_9, %c0_10] : memref<16x256xf32, #tpu.memory_space<vmem>>, vector<16x256xf32>
      %c0_11 = arith.constant 0 : index
      %c0_12 = arith.constant 0 : index
      %13 = vector.load %arg5[%c0_11, %c0_12] : memref<1x256xf32, #tpu.memory_space<vmem>>, vector<1x256xf32>
      %14 = vector.broadcast %13 : vector<1x256xf32> to vector<16x256xf32>
      %15 = arith.addf %12, %14 : vector<16x256xf32>
      %cst_13 = arith.constant 0.000000e+00 : f32
      %16 = vector.broadcast %cst_13 : f32 to vector<16x256xf32>
      %17 = arith.maximumf %15, %16 : vector<16x256xf32>
      %18 = arith.truncf %17 : vector<16x256xf32> to vector<16x256xbf16>
      %c0_14 = arith.constant 0 : index
      %c0_15 = arith.constant 0 : index
      %19 = vector.load %arg6[%c0_14, %c0_15] : memref<16x256xbf16, #tpu.memory_space<vmem>>, vector<16x256xbf16>
      tpu.vector_store %arg6[%c0_14, %c0_15], %18 {strides = array<i32>} : memref<16x256xbf16, #tpu.memory_space<vmem>>, vector<16x256xbf16>,
    } else {
    }
    return
  }
  func.func @transform_0(%arg0: i32, %arg1: i32, %arg2: i32) -> (i32, i32) {
    %c0_i32 = arith.constant 0 : i32
    return %arg0, %arg2 : i32, i32
  }
  func.func @transform_1(%arg0: i32, %arg1: i32, %arg2: i32) -> (i32, i32) {
    %c0_i32 = arith.constant 0 : i32
    return %arg2, %arg1 : i32, i32
  }
  func.func @transform_2(%arg0: i32, %arg1: i32, %arg2: i32) -> (i32, i32) {
    %c0_i32 = arith.constant 0 : i32
    %c0_i32_0 = arith.constant 0 : i32
    return %c0_i32, %arg1 : i32, i32
  }
  func.func @transform_3(%arg0: i32, %arg1: i32, %arg2: i32) -> (i32, i32) {
    %c0_i32 = arith.constant 0 : i32
    return %arg0, %arg1 : i32, i32
  }
}

module attributes {stable_mosaic.version = 11 : i64} {
  func.func @_mm_kernel(%arg0: i32, %arg1: i32, %arg2: i32, %arg3: memref<16x640xbf16, #tpu.memory_space<vmem>>, %arg4: memref<640x256xbf16, #tpu.memory_space<vmem>>, %arg5: memref<1x256xf32, #tpu.memory_space<vmem>>, %arg6: memref<16x256xbf16, #tpu.memory_space<vmem>>, %arg7: memref<16x256xf32, #tpu.memory_space<vmem>>) attributes {dimension_semantics = [#tpu.dimension_semantics<parallel>, #tpu.dimension_semantics<parallel>, #tpu.dimension_semantics<arbitrary>], iteration_bounds = array<i64: 1, 1, 2>, scalar_prefetch = 0 : i64, scratch_operands = 1 : i64, tpu.core_type = #tpu.core_type<tc>, window_params = [{transform_indices = @transform_0, window_bounds = array<i64: 16, 640>}, {transform_indices = @transform_1, window_bounds = array<i64: 640, 256>}, {transform_indices = @transform_2, window_bounds = array<i64: 1, 256>}, {transform_indices = @transform_3, window_bounds = array<i64: 16, 256>}]} {
    %c0_i32 = arith.constant 0 : i32
    %0 = arith.cmpi eq, %arg2, %c0_i32 : i32
    %1 = arith.extui %0 : i1 to i32
    %c0_i32_0 = arith.constant 0 : i32
    %2 = arith.cmpi ne, %1, %c0_i32_0 : i32
    scf.if %2 {
      %cst_9 = arith.constant 0.000000e+00 : f32
      %12 = vector.broadcast %cst_9 : f32 to vector<16x256xf32>
      %c0_10 = arith.constant 0 : index
      %c0_11 = arith.constant 0 : index
      %13 = vector.load %arg7[%c0_10, %c0_11] : memref<16x256xf32, #tpu.memory_space<vmem>>, vector<16x256xf32>
      tpu.vector_store %arg7[%c0_10, %c0_11], %12 {strides = array<i32>} : memref<16x256xf32, #tpu.memory_space<vmem>>, vector<16x256xf32>,
    } else {
    }
    %c0 = arith.constant 0 : index
    %c0_1 = arith.constant 0 : index
    %3 = vector.load %arg7[%c0, %c0_1] : memref<16x256xf32, #tpu.memory_space<vmem>>, vector<16x256xf32>
    %c0_2 = arith.constant 0 : index
    %c0_3 = arith.constant 0 : index
    %4 = vector.load %arg3[%c0_2, %c0_3] : memref<16x640xbf16, #tpu.memory_space<vmem>>, vector<16x640xbf16>
    %c0_4 = arith.constant 0 : index
    %c0_5 = arith.constant 0 : index
    %5 = vector.load %arg4[%c0_4, %c0_5] : memref<640x256xbf16, #tpu.memory_space<vmem>>, vector<640x256xbf16>
    %cst = arith.constant dense<0.000000e+00> : vector<16x256xf32>
    %6 = tpu.matmul %4, %5, %cst {dimension_numbers = #tpu.dot_dimension_numbers<[1], [0], [0], [1], [0, 0, 1, 1], [], []>} : vector<16x640xbf16>, vector<640x256xbf16>, vector<16x256xf32> -> vector<16x256xf32>
    %7 = arith.addf %3, %6 : vector<16x256xf32>
    %c0_6 = arith.constant 0 : index
    %c0_7 = arith.constant 0 : index
    %8 = vector.load %arg7[%c0_6, %c0_7] : memref<16x256xf32, #tpu.memory_space<vmem>>, vector<16x256xf32>
    tpu.vector_store %arg7[%c0_6, %c0_7], %7 {strides = array<i32>} : memref<16x256xf32, #tpu.memory_space<vmem>>, vector<16x256xf32>,
    %c1_i32 = arith.constant 1 : i32
    %9 = arith.cmpi eq, %arg2, %c1_i32 : i32
    %10 = arith.extui %9 : i1 to i32
    %c0_i32_8 = arith.constant 0 : i32
    %11 = arith.cmpi ne, %10, %c0_i32_8 : i32
    scf.if %11 {
      %c0_9 = arith.constant 0 : index
      %c0_10 = arith.constant 0 : index
      %12 = vector.load %arg7[%c0_9, %c0_10] : memref<16x256xf32, #tpu.memory_space<vmem>>, vector<16x256xf32>
      %c0_11 = arith.constant 0 : index
      %c0_12 = arith.constant 0 : index
      %13 = vector.load %arg5[%c0_11, %c0_12] : memref<1x256xf32, #tpu.memory_space<vmem>>, vector<1x256xf32>
      %14 = vector.broadcast %13 : vector<1x256xf32> to vector<16x256xf32>
      %15 = arith.addf %12, %14 : vector<16x256xf32>
      %cst_13 = arith.constant 0.000000e+00 : f32
      %16 = vector.broadcast %cst_13 : f32 to vector<16x256xf32>
      %17 = arith.maximumf %15, %16 : vector<16x256xf32>
      %18 = arith.truncf %17 : vector<16x256xf32> to vector<16x256xbf16>
      %c0_14 = arith.constant 0 : index
      %c0_15 = arith.constant 0 : index
      %19 = vector.load %arg6[%c0_14, %c0_15] : memref<16x256xbf16, #tpu.memory_space<vmem>>, vector<16x256xbf16>
      tpu.vector_store %arg6[%c0_14, %c0_15], %18 {strides = array<i32>} : memref<16x256xbf16, #tpu.memory_space<vmem>>, vector<16x256xbf16>,
    } else {
    }
    return
  }
  func.func @transform_0(%arg0: i32, %arg1: i32, %arg2: i32) -> (i32, i32) {
    %c0_i32 = arith.constant 0 : i32
    return %arg0, %arg2 : i32, i32
  }
  func.func @transform_1(%arg0: i32, %arg1: i32, %arg2: i32) -> (i32, i32) {
    %c0_i32 = arith.constant 0 : i32
    return %arg2, %arg1 : i32, i32
  }
  func.func @transform_2(%arg0: i32, %arg1: i32, %arg2: i32) -> (i32, i32) {
    %c0_i32 = arith.constant 0 : i32
    %c0_i32_0 = arith.constant 0 : i32
    return %c0_i32, %arg1 : i32, i32
  }
  func.func @transform_3(%arg0: i32, %arg1: i32, %arg2: i32) -> (i32, i32) {
    %c0_i32 = arith.constant 0 : i32
    return %arg0, %arg1 : i32, i32
  }
}

module attributes {stable_mosaic.version = 11 : i64} {
  func.func @_mm_kernel(%arg0: i32, %arg1: i32, %arg2: i32, %arg3: memref<128x256xbf16, #tpu.memory_space<vmem>>, %arg4: memref<256x256xbf16, #tpu.memory_space<vmem>>, %arg5: memref<1x256xf32, #tpu.memory_space<vmem>>, %arg6: memref<128x256xbf16, #tpu.memory_space<vmem>>, %arg7: memref<128x256xf32, #tpu.memory_space<vmem>>) attributes {dimension_semantics = [#tpu.dimension_semantics<parallel>, #tpu.dimension_semantics<parallel>, #tpu.dimension_semantics<arbitrary>], iteration_bounds = array<i64: 1, 1, 11>, scalar_prefetch = 0 : i64, scratch_operands = 1 : i64, tpu.core_type = #tpu.core_type<tc>, window_params = [{transform_indices = @transform_0, window_bounds = array<i64: 128, 256>}, {transform_indices = @transform_1, window_bounds = array<i64: 256, 256>}, {transform_indices = @transform_2, window_bounds = array<i64: 1, 256>}, {transform_indices = @transform_3, window_bounds = array<i64: 128, 256>}]} {
    %c0_i32 = arith.constant 0 : i32
    %0 = arith.cmpi eq, %arg2, %c0_i32 : i32
    %1 = arith.extui %0 : i1 to i32
    %c0_i32_0 = arith.constant 0 : i32
    %2 = arith.cmpi ne, %1, %c0_i32_0 : i32
    scf.if %2 {
      %cst_9 = arith.constant 0.000000e+00 : f32
      %12 = vector.broadcast %cst_9 : f32 to vector<128x256xf32>
      %c0_10 = arith.constant 0 : index
      %c0_11 = arith.constant 0 : index
      %13 = vector.load %arg7[%c0_10, %c0_11] : memref<128x256xf32, #tpu.memory_space<vmem>>, vector<128x256xf32>
      tpu.vector_store %arg7[%c0_10, %c0_11], %12 {strides = array<i32>} : memref<128x256xf32, #tpu.memory_space<vmem>>, vector<128x256xf32>,
    } else {
    }
    %c0 = arith.constant 0 : index
    %c0_1 = arith.constant 0 : index
    %3 = vector.load %arg7[%c0, %c0_1] : memref<128x256xf32, #tpu.memory_space<vmem>>, vector<128x256xf32>
    %c0_2 = arith.constant 0 : index
    %c0_3 = arith.constant 0 : index
    %4 = vector.load %arg3[%c0_2, %c0_3] : memref<128x256xbf16, #tpu.memory_space<vmem>>, vector<128x256xbf16>
    %c0_4 = arith.constant 0 : index
    %c0_5 = arith.constant 0 : index
    %5 = vector.load %arg4[%c0_4, %c0_5] : memref<256x256xbf16, #tpu.memory_space<vmem>>, vector<256x256xbf16>
    %cst = arith.constant dense<0.000000e+00> : vector<128x256xf32>
    %6 = tpu.matmul %4, %5, %cst {dimension_numbers = #tpu.dot_dimension_numbers<[1], [0], [0], [1], [0, 0, 1, 1], [], []>} : vector<128x256xbf16>, vector<256x256xbf16>, vector<128x256xf32> -> vector<128x256xf32>
    %7 = arith.addf %3, %6 : vector<128x256xf32>
    %c0_6 = arith.constant 0 : index
    %c0_7 = arith.constant 0 : index
    %8 = vector.load %arg7[%c0_6, %c0_7] : memref<128x256xf32, #tpu.memory_space<vmem>>, vector<128x256xf32>
    tpu.vector_store %arg7[%c0_6, %c0_7], %7 {strides = array<i32>} : memref<128x256xf32, #tpu.memory_space<vmem>>, vector<128x256xf32>,
    %c10_i32 = arith.constant 10 : i32
    %9 = arith.cmpi eq, %arg2, %c10_i32 : i32
    %10 = arith.extui %9 : i1 to i32
    %c0_i32_8 = arith.constant 0 : i32
    %11 = arith.cmpi ne, %10, %c0_i32_8 : i32
    scf.if %11 {
      %c0_9 = arith.constant 0 : index
      %c0_10 = arith.constant 0 : index
      %12 = vector.load %arg7[%c0_9, %c0_10] : memref<128x256xf32, #tpu.memory_space<vmem>>, vector<128x256xf32>
      %c0_11 = arith.constant 0 : index
      %c0_12 = arith.constant 0 : index
      %13 = vector.load %arg5[%c0_11, %c0_12] : memref<1x256xf32, #tpu.memory_space<vmem>>, vector<1x256xf32>
      %14 = vector.broadcast %13 : vector<1x256xf32> to vector<128x256xf32>
      %15 = arith.addf %12, %14 : vector<128x256xf32>
      %cst_13 = arith.constant 0.000000e+00 : f32
      %16 = vector.broadcast %cst_13 : f32 to vector<128x256xf32>
      %17 = arith.maximumf %15, %16 : vector<128x256xf32>
      %18 = arith.truncf %17 : vector<128x256xf32> to vector<128x256xbf16>
      %c0_14 = arith.constant 0 : index
      %c0_15 = arith.constant 0 : index
      %19 = vector.load %arg6[%c0_14, %c0_15] : memref<128x256xbf16, #tpu.memory_space<vmem>>, vector<128x256xbf16>
      tpu.vector_store %arg6[%c0_14, %c0_15], %18 {strides = array<i32>} : memref<128x256xbf16, #tpu.memory_space<vmem>>, vector<128x256xbf16>,
    } else {
    }
    return
  }
  func.func @transform_0(%arg0: i32, %arg1: i32, %arg2: i32) -> (i32, i32) {
    %c0_i32 = arith.constant 0 : i32
    return %arg0, %arg2 : i32, i32
  }
  func.func @transform_1(%arg0: i32, %arg1: i32, %arg2: i32) -> (i32, i32) {
    %c0_i32 = arith.constant 0 : i32
    return %arg2, %arg1 : i32, i32
  }
  func.func @transform_2(%arg0: i32, %arg1: i32, %arg2: i32) -> (i32, i32) {
    %c0_i32 = arith.constant 0 : i32
    %c0_i32_0 = arith.constant 0 : i32
    return %c0_i32, %arg1 : i32, i32
  }
  func.func @transform_3(%arg0: i32, %arg1: i32, %arg2: i32) -> (i32, i32) {
    %c0_i32 = arith.constant 0 : i32
    return %arg0, %arg1 : i32, i32
  }
}

module attributes {stable_mosaic.version = 11 : i64} {
  func.func @_mm_kernel(%arg0: i32, %arg1: i32, %arg2: i32, %arg3: memref<128x768xbf16, #tpu.memory_space<vmem>>, %arg4: memref<768x256xbf16, #tpu.memory_space<vmem>>, %arg5: memref<1x256xf32, #tpu.memory_space<vmem>>, %arg6: memref<128x256xbf16, #tpu.memory_space<vmem>>, %arg7: memref<128x256xf32, #tpu.memory_space<vmem>>) attributes {dimension_semantics = [#tpu.dimension_semantics<parallel>, #tpu.dimension_semantics<parallel>, #tpu.dimension_semantics<arbitrary>], iteration_bounds = array<i64: 1, 1, 3>, scalar_prefetch = 0 : i64, scratch_operands = 1 : i64, tpu.core_type = #tpu.core_type<tc>, window_params = [{transform_indices = @transform_0, window_bounds = array<i64: 128, 768>}, {transform_indices = @transform_1, window_bounds = array<i64: 768, 256>}, {transform_indices = @transform_2, window_bounds = array<i64: 1, 256>}, {transform_indices = @transform_3, window_bounds = array<i64: 128, 256>}]} {
    %c0_i32 = arith.constant 0 : i32
    %0 = arith.cmpi eq, %arg2, %c0_i32 : i32
    %1 = arith.extui %0 : i1 to i32
    %c0_i32_0 = arith.constant 0 : i32
    %2 = arith.cmpi ne, %1, %c0_i32_0 : i32
    scf.if %2 {
      %cst_9 = arith.constant 0.000000e+00 : f32
      %12 = vector.broadcast %cst_9 : f32 to vector<128x256xf32>
      %c0_10 = arith.constant 0 : index
      %c0_11 = arith.constant 0 : index
      %13 = vector.load %arg7[%c0_10, %c0_11] : memref<128x256xf32, #tpu.memory_space<vmem>>, vector<128x256xf32>
      tpu.vector_store %arg7[%c0_10, %c0_11], %12 {strides = array<i32>} : memref<128x256xf32, #tpu.memory_space<vmem>>, vector<128x256xf32>,
    } else {
    }
    %c0 = arith.constant 0 : index
    %c0_1 = arith.constant 0 : index
    %3 = vector.load %arg7[%c0, %c0_1] : memref<128x256xf32, #tpu.memory_space<vmem>>, vector<128x256xf32>
    %c0_2 = arith.constant 0 : index
    %c0_3 = arith.constant 0 : index
    %4 = vector.load %arg3[%c0_2, %c0_3] : memref<128x768xbf16, #tpu.memory_space<vmem>>, vector<128x768xbf16>
    %c0_4 = arith.constant 0 : index
    %c0_5 = arith.constant 0 : index
    %5 = vector.load %arg4[%c0_4, %c0_5] : memref<768x256xbf16, #tpu.memory_space<vmem>>, vector<768x256xbf16>
    %cst = arith.constant dense<0.000000e+00> : vector<128x256xf32>
    %6 = tpu.matmul %4, %5, %cst {dimension_numbers = #tpu.dot_dimension_numbers<[1], [0], [0], [1], [0, 0, 1, 1], [], []>} : vector<128x768xbf16>, vector<768x256xbf16>, vector<128x256xf32> -> vector<128x256xf32>
    %7 = arith.addf %3, %6 : vector<128x256xf32>
    %c0_6 = arith.constant 0 : index
    %c0_7 = arith.constant 0 : index
    %8 = vector.load %arg7[%c0_6, %c0_7] : memref<128x256xf32, #tpu.memory_space<vmem>>, vector<128x256xf32>
    tpu.vector_store %arg7[%c0_6, %c0_7], %7 {strides = array<i32>} : memref<128x256xf32, #tpu.memory_space<vmem>>, vector<128x256xf32>,
    %c2_i32 = arith.constant 2 : i32
    %9 = arith.cmpi eq, %arg2, %c2_i32 : i32
    %10 = arith.extui %9 : i1 to i32
    %c0_i32_8 = arith.constant 0 : i32
    %11 = arith.cmpi ne, %10, %c0_i32_8 : i32
    scf.if %11 {
      %c0_9 = arith.constant 0 : index
      %c0_10 = arith.constant 0 : index
      %12 = vector.load %arg7[%c0_9, %c0_10] : memref<128x256xf32, #tpu.memory_space<vmem>>, vector<128x256xf32>
      %c0_11 = arith.constant 0 : index
      %c0_12 = arith.constant 0 : index
      %13 = vector.load %arg5[%c0_11, %c0_12] : memref<1x256xf32, #tpu.memory_space<vmem>>, vector<1x256xf32>
      %14 = vector.broadcast %13 : vector<1x256xf32> to vector<128x256xf32>
      %15 = arith.addf %12, %14 : vector<128x256xf32>
      %cst_13 = arith.constant 0.000000e+00 : f32
      %16 = vector.broadcast %cst_13 : f32 to vector<128x256xf32>
      %17 = arith.maximumf %15, %16 : vector<128x256xf32>
      %18 = arith.truncf %17 : vector<128x256xf32> to vector<128x256xbf16>
      %c0_14 = arith.constant 0 : index
      %c0_15 = arith.constant 0 : index
      %19 = vector.load %arg6[%c0_14, %c0_15] : memref<128x256xbf16, #tpu.memory_space<vmem>>, vector<128x256xbf16>
      tpu.vector_store %arg6[%c0_14, %c0_15], %18 {strides = array<i32>} : memref<128x256xbf16, #tpu.memory_space<vmem>>, vector<128x256xbf16>,
    } else {
    }
    return
  }
  func.func @transform_0(%arg0: i32, %arg1: i32, %arg2: i32) -> (i32, i32) {
    %c0_i32 = arith.constant 0 : i32
    return %arg0, %arg2 : i32, i32
  }
  func.func @transform_1(%arg0: i32, %arg1: i32, %arg2: i32) -> (i32, i32) {
    %c0_i32 = arith.constant 0 : i32
    return %arg2, %arg1 : i32, i32
  }
  func.func @transform_2(%arg0: i32, %arg1: i32, %arg2: i32) -> (i32, i32) {
    %c0_i32 = arith.constant 0 : i32
    %c0_i32_0 = arith.constant 0 : i32
    return %c0_i32, %arg1 : i32, i32
  }
  func.func @transform_3(%arg0: i32, %arg1: i32, %arg2: i32) -> (i32, i32) {
    %c0_i32 = arith.constant 0 : i32
    return %arg0, %arg1 : i32, i32
  }
}

module attributes {stable_mosaic.version = 11 : i64} {
  func.func @_mm_kernel(%arg0: i32, %arg1: i32, %arg2: i32, %arg3: memref<128x256xbf16, #tpu.memory_space<vmem>>, %arg4: memref<256x128xbf16, #tpu.memory_space<vmem>>, %arg5: memref<1x128xf32, #tpu.memory_space<vmem>>, %arg6: memref<128x128xf32, #tpu.memory_space<vmem>>, %arg7: memref<128x128xf32, #tpu.memory_space<vmem>>) attributes {dimension_semantics = [#tpu.dimension_semantics<parallel>, #tpu.dimension_semantics<parallel>, #tpu.dimension_semantics<arbitrary>], iteration_bounds = array<i64: 1, 1, 1>, scalar_prefetch = 0 : i64, scratch_operands = 1 : i64, tpu.core_type = #tpu.core_type<tc>, window_params = [{transform_indices = @transform_0, window_bounds = array<i64: 128, 256>}, {transform_indices = @transform_1, window_bounds = array<i64: 256, 128>}, {transform_indices = @transform_2, window_bounds = array<i64: 1, 128>}, {transform_indices = @transform_3, window_bounds = array<i64: 128, 128>}]} {
    %c0_i32 = arith.constant 0 : i32
    %0 = arith.cmpi eq, %arg2, %c0_i32 : i32
    %1 = arith.extui %0 : i1 to i32
    %c0_i32_0 = arith.constant 0 : i32
    %2 = arith.cmpi ne, %1, %c0_i32_0 : i32
    scf.if %2 {
      %cst_10 = arith.constant 0.000000e+00 : f32
      %12 = vector.broadcast %cst_10 : f32 to vector<128x128xf32>
      %c0_11 = arith.constant 0 : index
      %c0_12 = arith.constant 0 : index
      %13 = vector.load %arg7[%c0_11, %c0_12] : memref<128x128xf32, #tpu.memory_space<vmem>>, vector<128x128xf32>
      tpu.vector_store %arg7[%c0_11, %c0_12], %12 {strides = array<i32>} : memref<128x128xf32, #tpu.memory_space<vmem>>, vector<128x128xf32>,
    } else {
    }
    %c0 = arith.constant 0 : index
    %c0_1 = arith.constant 0 : index
    %3 = vector.load %arg7[%c0, %c0_1] : memref<128x128xf32, #tpu.memory_space<vmem>>, vector<128x128xf32>
    %c0_2 = arith.constant 0 : index
    %c0_3 = arith.constant 0 : index
    %4 = vector.load %arg3[%c0_2, %c0_3] : memref<128x256xbf16, #tpu.memory_space<vmem>>, vector<128x256xbf16>
    %c0_4 = arith.constant 0 : index
    %c0_5 = arith.constant 0 : index
    %5 = vector.load %arg4[%c0_4, %c0_5] : memref<256x128xbf16, #tpu.memory_space<vmem>>, vector<256x128xbf16>
    %cst = arith.constant dense<0.000000e+00> : vector<128x128xf32>
    %6 = tpu.matmul %4, %5, %cst {dimension_numbers = #tpu.dot_dimension_numbers<[1], [0], [0], [1], [0, 0, 1, 1], [], []>} : vector<128x256xbf16>, vector<256x128xbf16>, vector<128x128xf32> -> vector<128x128xf32>
    %7 = arith.addf %3, %6 : vector<128x128xf32>
    %c0_6 = arith.constant 0 : index
    %c0_7 = arith.constant 0 : index
    %8 = vector.load %arg7[%c0_6, %c0_7] : memref<128x128xf32, #tpu.memory_space<vmem>>, vector<128x128xf32>
    tpu.vector_store %arg7[%c0_6, %c0_7], %7 {strides = array<i32>} : memref<128x128xf32, #tpu.memory_space<vmem>>, vector<128x128xf32>,
    %c0_i32_8 = arith.constant 0 : i32
    %9 = arith.cmpi eq, %arg2, %c0_i32_8 : i32
    %10 = arith.extui %9 : i1 to i32
    %c0_i32_9 = arith.constant 0 : i32
    %11 = arith.cmpi ne, %10, %c0_i32_9 : i32
    scf.if %11 {
      %c0_10 = arith.constant 0 : index
      %c0_11 = arith.constant 0 : index
      %12 = vector.load %arg7[%c0_10, %c0_11] : memref<128x128xf32, #tpu.memory_space<vmem>>, vector<128x128xf32>
      %c0_12 = arith.constant 0 : index
      %c0_13 = arith.constant 0 : index
      %13 = vector.load %arg5[%c0_12, %c0_13] : memref<1x128xf32, #tpu.memory_space<vmem>>, vector<1x128xf32>
      %14 = vector.broadcast %13 : vector<1x128xf32> to vector<128x128xf32>
      %15 = arith.addf %12, %14 : vector<128x128xf32>
      %c0_14 = arith.constant 0 : index
      %c0_15 = arith.constant 0 : index
      %16 = vector.load %arg6[%c0_14, %c0_15] : memref<128x128xf32, #tpu.memory_space<vmem>>, vector<128x128xf32>
      tpu.vector_store %arg6[%c0_14, %c0_15], %15 {strides = array<i32>} : memref<128x128xf32, #tpu.memory_space<vmem>>, vector<128x128xf32>,
    } else {
    }
    return
  }
  func.func @transform_0(%arg0: i32, %arg1: i32, %arg2: i32) -> (i32, i32) {
    %c0_i32 = arith.constant 0 : i32
    return %arg0, %arg2 : i32, i32
  }
  func.func @transform_1(%arg0: i32, %arg1: i32, %arg2: i32) -> (i32, i32) {
    %c0_i32 = arith.constant 0 : i32
    return %arg2, %arg1 : i32, i32
  }
  func.func @transform_2(%arg0: i32, %arg1: i32, %arg2: i32) -> (i32, i32) {
    %c0_i32 = arith.constant 0 : i32
    %c0_i32_0 = arith.constant 0 : i32
    return %c0_i32, %arg1 : i32, i32
  }
  func.func @transform_3(%arg0: i32, %arg1: i32, %arg2: i32) -> (i32, i32) {
    %c0_i32 = arith.constant 0 : i32
    return %arg0, %arg1 : i32, i32
  }
}

</mosaic_0001>

<bundles_post_ra>
// kernel: deeplab_forward.15
= control target key start
LH: loop header
LB: loop body
LE: loop exit
PB: predicated region body
PF: predicated region fallthrough
CT: control target
= control target key end

     0   :  { %s1613_s12 = smov 0   ;;  %s1615_s13 = smov 0   ;;  %s1822_s0 = inlined_call_operand.vmem [shape: bf16[512,256], index: 0, kind: input, shape index: {}]   ;;  %s1823_s1 = inlined_call_operand.vmem [shape: bf16[256,128], index: 1, kind: input, shape index: {}]   ;;  %s1824_s2 = inlined_call_operand.vmem [shape: f32[1,128], index: 2, kind: input, shape index: {}]   ;;  %s1825_s3 = inlined_call_operand.vmem [shape: bf16[512,128], index: 3, kind: output, shape index: {}]  }
   0x1   :  { %s1617_s14 = smov 0  }
   0x2 LB: > { %s32_s15 = sadd.s32 1, %s1587_s13  ;;  %p1184_p0 = scmp.ge.s32.totalorder %s1591_s14, 1  ;;  %s1591_s14 = sphi %s1617_s14, %s13_s14   ;;  %s1587_s13 = sphi %s1615_s13, %s1827_s13   ;;  %s1583_s12 = sphi %s1613_s12, %s1826_s12  }
   0x3   : > { %p34_p1 = scmp.ge.s32.totalorder %s32_s15, 2  ;;  %p191_p2 = scmp.lt.s32.totalorder %s1591_s14, 3 }
   0x5   : > { %s1829_s15 = smov (%p34_p1, %s32_s15), 0  ;;  %p192_p3 = pnand %p1184_p0, %p191_p2 }
   0x6   : > { %s1185_s28 = sshll.u32 (!%p192_p3), %s1583_s12, 5 }
   0x7   : > { %195 = sbr.rel (%p192_p3) target bundleno = 306 (0x132), region = 32  ;;  %p236_p4 = scmp.lt.s32.totalorder (!%p192_p3), %s1185_s28, 63 }
   0xc   : > { %v1424_v0 = vld [vmem:[%s1823_s1 + $0x38] sm:$0xff]  ;;  %v1423_v2 = vld [vmem:[%s1823_s1 + $0x30] sm:$0xff]  ;;  %v1422_v4 = vld [vmem:[%s1823_s1 + $0x28] sm:$0xff]  ;;  %s1831_s28 = smov (!%p236_p4, %s1185_s28), 63 }
   0xd   : > { %v1432_v1 = vld [vmem:[%s1823_s1 + $0x78] sm:$0xff]  ;;  %655 = vmatpush.bf16.msra.mxu0 %v1424_v0  ;;  %1528 = vmatpush.bf16.msra.mxu2 %v1424_v0  ;;  %v1431_v3 = vld [vmem:[%s1823_s1 + $0x70] sm:$0xff]  ;;  %v1430_v5 = vld [vmem:[%s1823_s1 + $0x68] sm:$0xff]  ;;  %s1384_s17 = sshll.u32 %s1831_s28, 3  ;;  %s1189_s5 = sshll.u32 %s1831_s28, 2 }
   0xe   : > { %744 = vmatpush.bf16.msra.mxu1 %v1432_v1  ;;  %1536 = vmatpush.bf16.msra.mxu3 %v1432_v1  ;;  %v1421_v6 = vld [vmem:[%s1823_s1 + $0x20] sm:$0xff]  ;;  %v1420_v8 = vld [vmem:[%s1823_s1 + $0x18] sm:$0xff]  ;;  %v1419_v10 = vld [vmem:[%s1823_s1 + $0x10] sm:$0xff]  ;;  %s1679_s22 = scalar_lea.vmem %s1822_s0, %s1384_s17  ;;  %s1765_s8 = scalar_lea.vmem %s1825_s3, %s1189_s5 }
   0xf   : > { %v1429_v7 = vld [vmem:[%s1823_s1 + $0x60] sm:$0xff]  ;;  %v1428_v9 = vld [vmem:[%s1823_s1 + $0x58] sm:$0xff]  ;;  %v1427_v11 = vld [vmem:[%s1823_s1 + $0x50] sm:$0xff] }
  0x10   : > { %v1418_v12 = vld [vmem:[%s1823_s1 + $0x8] sm:$0xff]  ;;  %v1417_v14 = vld [vmem:[%s1823_s1] sm:$0xff]  ;;  %v1200_v28 = vld [vmem:[%s1679_s22 + $0x10] sm:$0xf] }
  0x11   : > { %656 = vmatpush.bf16.msra.mxu0 %v1423_v2  ;;  %1529 = vmatpush.bf16.msra.mxu2 %v1423_v2  ;;  %v1426_v13 = vld [vmem:[%s1823_s1 + $0x48] sm:$0xff]  ;;  %v1425_v15 = vld [vmem:[%s1823_s1 + $0x40] sm:$0xff]  ;;  %v1388_v29 = vld [vmem:[%s1679_s22 + $0x14] sm:$0xf0] }
  0x12   : > { %745 = vmatpush.bf16.msra.mxu1 %v1431_v3  ;;  %1537 = vmatpush.bf16.msra.mxu3 %v1431_v3  ;;  %v1192_v16 = vld [vmem:[%s1679_s22] sm:$0xf]  ;;  %v1386_v17 = vld [vmem:[%s1679_s22 + $0x4] sm:$0xf0]  ;;  %v1385_v20 = vld [vmem:[%s1679_s22 + $0x4] sm:$0xf]  ;;  %v1201_v36 = vor.u32 %v1388_v29, %v1200_v28 }
  0x13   : > { %v1256_v18 = vld [vmem:[%s1679_s22 + $0x80] sm:$0xf]  ;;  %v1402_v19 = vld [vmem:[%s1679_s22 + $0x84] sm:$0xf0]  ;;  %v1194_v21 = vld [vmem:[%s1679_s22 + $0x8] sm:$0xf0]  ;;  %v1193_v24 = vor.u32 %v1386_v17, %v1192_v16 }
  0x14   : > { %v1401_v22 = vld [vmem:[%s1679_s22 + $0x84] sm:$0xf]  ;;  %v1258_v23 = vld [vmem:[%s1679_s22 + $0x88] sm:$0xf0]  ;;  %v1257_v25 = vor.u32 %v1402_v19, %v1256_v18  ;;  %v1197_v26 = vor.u32 %v1385_v20, %v1194_v21  ;;  %v1264_v30 = vld [vmem:[%s1679_s22 + $0x90] sm:$0xf] }
  0x15   : > { %657 = vmatpush.bf16.msra.mxu0 %v1422_v4  ;;  %1530 = vmatpush.bf16.msra.mxu2 %v1422_v4  ;;  %v1261_v27 = vor.u32 %v1401_v22, %v1258_v23  ;;  %v1404_v31 = vld [vmem:[%s1679_s22 + $0x94] sm:$0xf0]  ;;  %v1387_v32 = vld [vmem:[%s1679_s22 + $0x14] sm:$0xf]  ;;  %v1202_v33 = vld [vmem:[%s1679_s22 + $0x18] sm:$0xf0] }
  0x16   : > { %746 = vmatpush.bf16.msra.mxu1 %v1430_v5  ;;  %1538 = vmatpush.bf16.msra.mxu3 %v1430_v5  ;;  %v1403_v34 = vld [vmem:[%s1679_s22 + $0x94] sm:$0xf]  ;;  %v1266_v35 = vld [vmem:[%s1679_s22 + $0x98] sm:$0xf0]  ;;  %v1265_v37 = vor.u32 %v1404_v31, %v1264_v30  ;;  %v1205_v38 = vor.u32 %v1387_v32, %v1202_v33  ;;  %v1208_v40 = vld [vmem:[%s1679_s22 + $0x20] sm:$0xf] }
  0x17   : > { %v1269_v39 = vor.u32 %v1403_v34, %v1266_v35  ;;  %v1390_v41 = vld [vmem:[%s1679_s22 + $0x24] sm:$0xf0]  ;;  %v1272_v42 = vld [vmem:[%s1679_s22 + $0xa0] sm:$0xf]  ;;  %v1389_v44 = vld [vmem:[%s1679_s22 + $0x24] sm:$0xf] }
  0x18   : > { %v1406_v43 = vld [vmem:[%s1679_s22 + $0xa4] sm:$0xf0]  ;;  %v1210_v45 = vld [vmem:[%s1679_s22 + $0x28] sm:$0xf0]  ;;  %v1405_v46 = vld [vmem:[%s1679_s22 + $0xa4] sm:$0xf]  ;;  %v1209_v48 = vor.u32 %v1390_v41, %v1208_v40 }
  0x19   : > { %658 = vmatpush.bf16.msra.mxu0 %v1421_v6  ;;  %1531 = vmatpush.bf16.msra.mxu2 %v1421_v6  ;;  %v1274_v47 = vld [vmem:[%s1679_s22 + $0xa8] sm:$0xf0]  ;;  %v1273_v49 = vor.u32 %v1406_v43, %v1272_v42  ;;  %v1213_v50 = vor.u32 %v1389_v44, %v1210_v45  ;;  %v1216_v52 = vld [vmem:[%s1679_s22 + $0x30] sm:$0xf]  ;;  %v1392_v53 = vld [vmem:[%s1679_s22 + $0x34] sm:$0xf0] }
  0x1a   : > { %747 = vmatpush.bf16.msra.mxu1 %v1429_v7  ;;  %1539 = vmatpush.bf16.msra.mxu3 %v1429_v7  ;;  %v1277_v51 = vor.u32 %v1405_v46, %v1274_v47  ;;  %v1280_v54 = vld [vmem:[%s1679_s22 + $0xb0] sm:$0xf]  ;;  %v1408_v55 = vld [vmem:[%s1679_s22 + $0xb4] sm:$0xf0]  ;;  %v1391_v56 = vld [vmem:[%s1679_s22 + $0x34] sm:$0xf]  ;;  %v1217_v60 = vor.u32 %v1392_v53, %v1216_v52 }
  0x1b   : > { %v1218_v57 = vld [vmem:[%s1679_s22 + $0x38] sm:$0xf0]  ;;  %v1407_v58 = vld [vmem:[%s1679_s22 + $0xb4] sm:$0xf]  ;;  %v1281_v61 = vor.u32 %v1408_v55, %v1280_v54  ;;  %v1224_v0 = vld [vmem:[%s1679_s22 + $0x40] sm:$0xf] }
  0x1c   : > { %v1282_v59 = vld [vmem:[%s1679_s22 + $0xb8] sm:$0xf0]  ;;  %v1221_v62 = vor.u32 %v1391_v56, %v1218_v57  ;;  %v1394_v1 = vld [vmem:[%s1679_s22 + $0x44] sm:$0xf0]  ;;  %v1288_v2 = vld [vmem:[%s1679_s22 + $0xc0] sm:$0xf] }
  0x1d   : > { %659 = vmatpush.bf16.msra.mxu0 %v1420_v8  ;;  %1532 = vmatpush.bf16.msra.mxu2 %v1420_v8  ;;  %v1285_v63 = vor.u32 %v1407_v58, %v1282_v59  ;;  %v1410_v3 = vld [vmem:[%s1679_s22 + $0xc4] sm:$0xf0]  ;;  %v1393_v4 = vld [vmem:[%s1679_s22 + $0x44] sm:$0xf]  ;;  %v1226_v5 = vld [vmem:[%s1679_s22 + $0x48] sm:$0xf0]  ;;  %v1225_v8 = vor.u32 %v1394_v1, %v1224_v0 }
  0x1e   : > { %748 = vmatpush.bf16.msra.mxu1 %v1428_v9  ;;  %1540 = vmatpush.bf16.msra.mxu3 %v1428_v9  ;;  %v1409_v6 = vld [vmem:[%s1679_s22 + $0xc4] sm:$0xf]  ;;  %v1290_v7 = vld [vmem:[%s1679_s22 + $0xc8] sm:$0xf0]  ;;  %v1289_v9 = vor.u32 %v1410_v3, %v1288_v2  ;;  %v1395_v16 = vld [vmem:[%s1679_s22 + $0x54] sm:$0xf] }
  0x1f   : > { %v1234_v17 = vld [vmem:[%s1679_s22 + $0x58] sm:$0xf0]  ;;  %v1411_v18 = vld [vmem:[%s1679_s22 + $0xd4] sm:$0xf]  ;;  %v1397_v28 = vld [vmem:[%s1679_s22 + $0x64] sm:$0xf] }
  0x20   : > { %v1298_v19 = vld [vmem:[%s1679_s22 + $0xd8] sm:$0xf0]  ;;  %v1237_v22 = vor.u32 %v1395_v16, %v1234_v17  ;;  %v1242_v29 = vld [vmem:[%s1679_s22 + $0x68] sm:$0xf0]  ;;  %v1413_v30 = vld [vmem:[%s1679_s22 + $0xe4] sm:$0xf] }
  0x21   : > { %660 = vmatpush.bf16.msra.mxu0 %v1419_v10  ;;  %1533 = vmatpush.bf16.msra.mxu2 %v1419_v10  ;;  %v1229_v10 = vor.u32 %v1393_v4, %v1226_v5  ;;  %v1301_v23 = vor.u32 %v1411_v18, %v1298_v19  ;;  %v1306_v31 = vld [vmem:[%s1679_s22 + $0xe8] sm:$0xf0]  ;;  %v1245_v34 = vor.u32 %v1397_v28, %v1242_v29  ;;  %v1399_v40 = vld [vmem:[%s1679_s22 + $0x74] sm:$0xf]  ;;  %v1250_v41 = vld [vmem:[%s1679_s22 + $0x78] sm:$0xf0] }
  0x22   : > { %749 = vmatpush.bf16.msra.mxu1 %v1427_v11  ;;  %1541 = vmatpush.bf16.msra.mxu3 %v1427_v11  ;;  %v1293_v11 = vor.u32 %v1409_v6, %v1290_v7  ;;  %v1309_v35 = vor.u32 %v1413_v30, %v1306_v31  ;;  %v1415_v42 = vld [vmem:[%s1679_s22 + $0xf4] sm:$0xf]  ;;  %v1314_v43 = vld [vmem:[%s1679_s22 + $0xf8] sm:$0xf0]  ;;  %v1253_v46 = vor.u32 %v1399_v40, %v1250_v41 }
  0x23   : > { %v1317_v47 = vor.u32 %v1415_v42, %v1314_v43 }
  0x25   : > { %661 = vmatpush.bf16.msra.mxu0 %v1418_v12  ;;  %1534 = vmatpush.bf16.msra.mxu2 %v1418_v12  ;;  %v1232_v12 = vld [vmem:[%s1679_s22 + $0x50] sm:$0xf] }
  0x26   : > { %750 = vmatpush.bf16.msra.mxu1 %v1426_v13  ;;  %1542 = vmatpush.bf16.msra.mxu3 %v1426_v13  ;;  %v1396_v13 = vld [vmem:[%s1679_s22 + $0x54] sm:$0xf0] }
  0x27   : > { %v1233_v20 = vor.u32 %v1396_v13, %v1232_v12 }
  0x29   : > { %662 = vmatpush.bf16.msra.mxu0 %v1417_v14  ;;  %1535 = vmatpush.bf16.msra.mxu2 %v1417_v14  ;;  %v1296_v14 = vld [vmem:[%s1679_s22 + $0xd0] sm:$0xf] }
  0x2a   : > { %751 = vmatpush.bf16.msra.mxu1 %v1425_v15  ;;  %1543 = vmatpush.bf16.msra.mxu3 %v1425_v15  ;;  %v1412_v15 = vld [vmem:[%s1679_s22 + $0xd4] sm:$0xf0] }
  0x2b   : > { %v1297_v21 = vor.u32 %v1412_v15, %v1296_v14 }
  0x2c   : > { %663 = vmatmul.bf16.vlgmr.msra.gmra.mxu0 %v1193_v24  ;;  %703 = vmatmul.bf16.vlgmr.msra.gmra.mxu2 %v1257_v25  ;;  %v1240_v24 = vld [vmem:[%s1679_s22 + $0x60] sm:$0xf]  ;;  %v1398_v25 = vld [vmem:[%s1679_s22 + $0x64] sm:$0xf0] }
  0x2d   : > { %752 = vmatmul.bf16.vlgmr.msra.gmra.mxu1 %v1197_v26  ;;  %792 = vmatmul.bf16.vlgmr.msra.gmra.mxu3 %v1261_v27  ;;  %v1304_v26 = vld [vmem:[%s1679_s22 + $0xe0] sm:$0xf]  ;;  %v1414_v27 = vld [vmem:[%s1679_s22 + $0xe4] sm:$0xf0]  ;;  %v1241_v32 = vor.u32 %v1398_v25, %v1240_v24 }
  0x2e   : > { %v1305_v33 = vor.u32 %v1414_v27, %v1304_v26 }
  0x3c   : > { %668 = vmatmul.bf16.gmra.mxu0 %v1201_v36  ;;  %708 = vmatmul.bf16.gmra.mxu2 %v1265_v37  ;;  %v1248_v36 = vld [vmem:[%s1679_s22 + $0x70] sm:$0xf]  ;;  %v1400_v37 = vld [vmem:[%s1679_s22 + $0x74] sm:$0xf0] }
  0x3d   : > { %757 = vmatmul.bf16.gmra.mxu1 %v1205_v38  ;;  %797 = vmatmul.bf16.gmra.mxu3 %v1269_v39  ;;  %v1312_v38 = vld [vmem:[%s1679_s22 + $0xf0] sm:$0xf]  ;;  %v1416_v39 = vld [vmem:[%s1679_s22 + $0xf4] sm:$0xf0]  ;;  %v1249_v44 = vor.u32 %v1400_v37, %v1248_v36 }
  0x3e   : > { %v1313_v45 = vor.u32 %v1416_v39, %v1312_v38 }
  0x4c   : > { %673 = vmatmul.bf16.gmra.mxu0 %v1209_v48  ;;  %713 = vmatmul.bf16.gmra.mxu2 %v1273_v49 }
  0x4d   : > { %762 = vmatmul.bf16.gmra.mxu1 %v1213_v50  ;;  %802 = vmatmul.bf16.gmra.mxu3 %v1277_v51  ;;  %v1757_v51 = vld [vmem:[%s1824_s2] ss:$0 sm:$0xff] }
  0x5c   : > { %678 = vmatmul.bf16.gmra.mxu0 %v1217_v60  ;;  %718 = vmatmul.bf16.gmra.mxu2 %v1281_v61 }
  0x5d   : > { %767 = vmatmul.bf16.gmra.mxu1 %v1221_v62  ;;  %807 = vmatmul.bf16.gmra.mxu3 %v1285_v63 }
  0x6c   : > { %683 = vmatmul.bf16.gmra.mxu0 %v1225_v8  ;;  %723 = vmatmul.bf16.gmra.mxu2 %v1289_v9 }
  0x6d   : > { %772 = vmatmul.bf16.gmra.mxu1 %v1229_v10  ;;  %812 = vmatmul.bf16.gmra.mxu3 %v1293_v11 }
  0x7c   : > { %688 = vmatmul.bf16.gmra.mxu0 %v1233_v20  ;;  %728 = vmatmul.bf16.gmra.mxu2 %v1297_v21 }
  0x7d   : > { %777 = vmatmul.bf16.gmra.mxu1 %v1237_v22  ;;  %817 = vmatmul.bf16.gmra.mxu3 %v1301_v23 }
  0x8c   : > { %693 = vmatmul.bf16.gmra.mxu0 %v1241_v32  ;;  %733 = vmatmul.bf16.gmra.mxu2 %v1305_v33 }
  0x8d   : > { %782 = vmatmul.bf16.gmra.mxu1 %v1245_v34  ;;  %822 = vmatmul.bf16.gmra.mxu3 %v1309_v35 }
  0x9c   : > { %698 = vmatmul.bf16.gmra.mxu0 %v1249_v44  ;;  %738 = vmatmul.bf16.gmra.mxu2 %v1313_v45 }
  0x9d   : > { %787 = vmatmul.bf16.gmra.mxu1 %v1253_v46  ;;  %827 = vmatmul.bf16.gmra.mxu3 %v1317_v47 }
  0xa9   : > { %v664_v48 = vpop.f32.mrf.mxu0 }
  0xaa   : > { %v753_v49 = vpop.f32.mrf.mxu1 }
  0xab   : > { %v754_v50 = vadd.f32 %v753_v49, %v664_v48 }
  0xad   : > { %v936_v56 = vadd.f32 %v1757_v51, %v754_v50 }
  0xaf   : > { %v704_v52 = vpop.f32.mrf.mxu2  ;;  %v968_v60 = vmax.f32 %v936_v56, 0.0 }
  0xb0   : > { %v793_v53 = vpop.f32.mrf.mxu3 }
  0xb1   : > { %v666_v54 = vpop.f32.mrf.mxu0  ;;  %v794_v58 = vadd.f32 %v793_v53, %v704_v52 }
  0xb2   : > { %v755_v55 = vpop.f32.mrf.mxu1 }
  0xb3   : > { %v756_v57 = vadd.f32 %v755_v55, %v666_v54  ;;  %v952_v0 = vadd.f32 %v1757_v51, %v794_v58 }
  0xb5   : > { %v937_v59 = vadd.f32 %v1757_v51, %v756_v57  ;;  %v984_v6 = vmax.f32 %v952_v0, 0.0 }
  0xb7   : > { %v969_v61 = vmax.f32 %v937_v59, 0.0  ;;  %v706_v62 = vpop.f32.mrf.mxu2 }
  0xb8   : > { %v795_v63 = vpop.f32.mrf.mxu3 }
  0xb9   : > { %v1436_v1 = vpack.c.bf16 %v969_v61, %v968_v60  ;;  %v796_v2 = vadd.f32 %v795_v63, %v706_v62  ;;  %v669_v3 = vpop.f32.mrf.mxu0 }
  0xba   : > { %v758_v4 = vpop.f32.mrf.mxu1 }
  0xbb   : > { %1437 = vst [vmem:[%s1765_s8] sm:$0xff] %v1436_v1   ;;  %v953_v5 = vadd.f32 %v1757_v51, %v796_v2  ;;  %v759_v9 = vadd.f32 %v758_v4, %v669_v3 }
  0xbd   : > { %v985_v7 = vmax.f32 %v953_v5, 0.0  ;;  %v938_v14 = vadd.f32 %v1757_v51, %v759_v9 }
  0xbf   : > { %v1476_v8 = vpack.c.bf16 %v985_v7, %v984_v6  ;;  %v709_v10 = vpop.f32.mrf.mxu2  ;;  %v970_v18 = vmax.f32 %v938_v14, 0.0 }
  0xc0   : > { %v798_v11 = vpop.f32.mrf.mxu3 }
  0xc1   : > { %1520 = vst [vmem:[%s1765_s8 + $0x40] sm:$0xff] %v1476_v8   ;;  %v671_v12 = vpop.f32.mrf.mxu0  ;;  %v799_v16 = vadd.f32 %v798_v11, %v709_v10 }
  0xc2   : > { %v760_v13 = vpop.f32.mrf.mxu1 }
  0xc3   : > { %v761_v15 = vadd.f32 %v760_v13, %v671_v12  ;;  %v954_v22 = vadd.f32 %v1757_v51, %v799_v16 }
  0xc5   : > { %v939_v17 = vadd.f32 %v1757_v51, %v761_v15  ;;  %v986_v28 = vmax.f32 %v954_v22, 0.0 }
  0xc7   : > { %v971_v19 = vmax.f32 %v939_v17, 0.0  ;;  %v711_v20 = vpop.f32.mrf.mxu2 }
  0xc8   : > { %v800_v21 = vpop.f32.mrf.mxu3 }
  0xc9   : > { %v1441_v23 = vpack.c.bf16 %v971_v19, %v970_v18  ;;  %v801_v24 = vadd.f32 %v800_v21, %v711_v20  ;;  %v674_v25 = vpop.f32.mrf.mxu0 }
  0xca   : > { %v763_v26 = vpop.f32.mrf.mxu1 }
  0xcb   : > { %1513 = vst [vmem:[%s1765_s8 + $0x8] sm:$0xff] %v1441_v23   ;;  %v955_v27 = vadd.f32 %v1757_v51, %v801_v24  ;;  %v764_v31 = vadd.f32 %v763_v26, %v674_v25 }
  0xcd   : > { %v987_v29 = vmax.f32 %v955_v27, 0.0  ;;  %v940_v36 = vadd.f32 %v1757_v51, %v764_v31 }
  0xcf   : > { %v1481_v30 = vpack.c.bf16 %v987_v29, %v986_v28  ;;  %v714_v32 = vpop.f32.mrf.mxu2  ;;  %v972_v40 = vmax.f32 %v940_v36, 0.0 }
  0xd0   : > { %v803_v33 = vpop.f32.mrf.mxu3 }
  0xd1   : > { %1521 = vst [vmem:[%s1765_s8 + $0x48] sm:$0xff] %v1481_v30   ;;  %v676_v34 = vpop.f32.mrf.mxu0  ;;  %v804_v38 = vadd.f32 %v803_v33, %v714_v32 }
  0xd2   : > { %v765_v35 = vpop.f32.mrf.mxu1 }
  0xd3   : > { %v766_v37 = vadd.f32 %v765_v35, %v676_v34  ;;  %v956_v44 = vadd.f32 %v1757_v51, %v804_v38 }
  0xd5   : > { %v941_v39 = vadd.f32 %v1757_v51, %v766_v37  ;;  %v988_v50 = vmax.f32 %v956_v44, 0.0 }
  0xd7   : > { %v973_v41 = vmax.f32 %v941_v39, 0.0  ;;  %v716_v42 = vpop.f32.mrf.mxu2 }
  0xd8   : > { %v805_v43 = vpop.f32.mrf.mxu3 }
  0xd9   : > { %v1446_v45 = vpack.c.bf16 %v973_v41, %v972_v40  ;;  %v806_v46 = vadd.f32 %v805_v43, %v716_v42  ;;  %v679_v47 = vpop.f32.mrf.mxu0 }
  0xda   : > { %v768_v48 = vpop.f32.mrf.mxu1 }
  0xdb   : > { %1514 = vst [vmem:[%s1765_s8 + $0x10] sm:$0xff] %v1446_v45   ;;  %v957_v49 = vadd.f32 %v1757_v51, %v806_v46  ;;  %v769_v54 = vadd.f32 %v768_v48, %v679_v47 }
  0xdd   : > { %v989_v52 = vmax.f32 %v957_v49, 0.0  ;;  %v942_v59 = vadd.f32 %v1757_v51, %v769_v54 }
  0xdf   : > { %v1486_v53 = vpack.c.bf16 %v989_v52, %v988_v50  ;;  %v719_v55 = vpop.f32.mrf.mxu2  ;;  %v974_v63 = vmax.f32 %v942_v59, 0.0 }
  0xe0   : > { %v808_v56 = vpop.f32.mrf.mxu3 }
  0xe1   : > { %1522 = vst [vmem:[%s1765_s8 + $0x50] sm:$0xff] %v1486_v53   ;;  %v681_v57 = vpop.f32.mrf.mxu0  ;;  %v809_v61 = vadd.f32 %v808_v56, %v719_v55 }
  0xe2   : > { %v770_v58 = vpop.f32.mrf.mxu1 }
  0xe3   : > { %v771_v60 = vadd.f32 %v770_v58, %v681_v57  ;;  %v958_v3 = vadd.f32 %v1757_v51, %v809_v61 }
  0xe5   : > { %v943_v62 = vadd.f32 %v1757_v51, %v771_v60  ;;  %v990_v9 = vmax.f32 %v958_v3, 0.0 }
  0xe7   : > { %v975_v0 = vmax.f32 %v943_v62, 0.0  ;;  %v721_v1 = vpop.f32.mrf.mxu2 }
  0xe8   : > { %v810_v2 = vpop.f32.mrf.mxu3 }
  0xe9   : > { %v1451_v4 = vpack.c.bf16 %v975_v0, %v974_v63  ;;  %v811_v5 = vadd.f32 %v810_v2, %v721_v1  ;;  %v684_v6 = vpop.f32.mrf.mxu0 }
  0xea   : > { %v773_v7 = vpop.f32.mrf.mxu1 }
  0xeb   : > { %1515 = vst [vmem:[%s1765_s8 + $0x18] sm:$0xff] %v1451_v4   ;;  %v959_v8 = vadd.f32 %v1757_v51, %v811_v5  ;;  %v774_v12 = vadd.f32 %v773_v7, %v684_v6 }
  0xed   : > { %v991_v10 = vmax.f32 %v959_v8, 0.0  ;;  %v944_v17 = vadd.f32 %v1757_v51, %v774_v12 }
  0xef   : > { %v1491_v11 = vpack.c.bf16 %v991_v10, %v990_v9  ;;  %v724_v13 = vpop.f32.mrf.mxu2  ;;  %v976_v21 = vmax.f32 %v944_v17, 0.0 }
  0xf0   : > { %v813_v14 = vpop.f32.mrf.mxu3 }
  0xf1   : > { %1523 = vst [vmem:[%s1765_s8 + $0x58] sm:$0xff] %v1491_v11   ;;  %v686_v15 = vpop.f32.mrf.mxu0  ;;  %v814_v19 = vadd.f32 %v813_v14, %v724_v13 }
  0xf2   : > { %v775_v16 = vpop.f32.mrf.mxu1 }
  0xf3   : > { %v776_v18 = vadd.f32 %v775_v16, %v686_v15  ;;  %v960_v25 = vadd.f32 %v1757_v51, %v814_v19 }
  0xf5   : > { %v945_v20 = vadd.f32 %v1757_v51, %v776_v18  ;;  %v992_v31 = vmax.f32 %v960_v25, 0.0 }
  0xf7   : > { %v977_v22 = vmax.f32 %v945_v20, 0.0  ;;  %v726_v23 = vpop.f32.mrf.mxu2 }
  0xf8   : > { %v815_v24 = vpop.f32.mrf.mxu3 }
  0xf9   : > { %v1456_v26 = vpack.c.bf16 %v977_v22, %v976_v21  ;;  %v816_v27 = vadd.f32 %v815_v24, %v726_v23  ;;  %v689_v28 = vpop.f32.mrf.mxu0 }
  0xfa   : > { %v778_v29 = vpop.f32.mrf.mxu1 }
  0xfb   : > { %1516 = vst [vmem:[%s1765_s8 + $0x20] sm:$0xff] %v1456_v26   ;;  %v961_v30 = vadd.f32 %v1757_v51, %v816_v27  ;;  %v779_v34 = vadd.f32 %v778_v29, %v689_v28 }
  0xfd   : > { %v993_v32 = vmax.f32 %v961_v30, 0.0  ;;  %v946_v39 = vadd.f32 %v1757_v51, %v779_v34 }
  0xff   : > { %v1496_v33 = vpack.c.bf16 %v993_v32, %v992_v31  ;;  %v729_v35 = vpop.f32.mrf.mxu2  ;;  %v978_v43 = vmax.f32 %v946_v39, 0.0 }
 0x100   : > { %v818_v36 = vpop.f32.mrf.mxu3 }
 0x101   : > { %1524 = vst [vmem:[%s1765_s8 + $0x60] sm:$0xff] %v1496_v33   ;;  %v691_v37 = vpop.f32.mrf.mxu0  ;;  %v819_v41 = vadd.f32 %v818_v36, %v729_v35 }
 0x102   : > { %v780_v38 = vpop.f32.mrf.mxu1 }
 0x103   : > { %v781_v40 = vadd.f32 %v780_v38, %v691_v37  ;;  %v962_v47 = vadd.f32 %v1757_v51, %v819_v41 }
 0x105   : > { %v947_v42 = vadd.f32 %v1757_v51, %v781_v40  ;;  %v994_v54 = vmax.f32 %v962_v47, 0.0 }
 0x107   : > { %v979_v44 = vmax.f32 %v947_v42, 0.0  ;;  %v731_v45 = vpop.f32.mrf.mxu2 }
 0x108   : > { %v820_v46 = vpop.f32.mrf.mxu3 }
 0x109   : > { %v1461_v48 = vpack.c.bf16 %v979_v44, %v978_v43  ;;  %v821_v49 = vadd.f32 %v820_v46, %v731_v45  ;;  %v694_v50 = vpop.f32.mrf.mxu0 }
 0x10a   : > { %v783_v52 = vpop.f32.mrf.mxu1 }
 0x10b   : > { %1517 = vst [vmem:[%s1765_s8 + $0x28] sm:$0xff] %v1461_v48   ;;  %v963_v53 = vadd.f32 %v1757_v51, %v821_v49  ;;  %v784_v57 = vadd.f32 %v783_v52, %v694_v50 }
 0x10d   : > { %v995_v55 = vmax.f32 %v963_v53, 0.0  ;;  %v948_v62 = vadd.f32 %v1757_v51, %v784_v57 }
 0x10f   : > { %v1501_v56 = vpack.c.bf16 %v995_v55, %v994_v54  ;;  %v734_v58 = vpop.f32.mrf.mxu2  ;;  %v980_v2 = vmax.f32 %v948_v62, 0.0 }
 0x110   : > { %v823_v59 = vpop.f32.mrf.mxu3 }
 0x111   : > { %1525 = vst [vmem:[%s1765_s8 + $0x68] sm:$0xff] %v1501_v56   ;;  %v696_v60 = vpop.f32.mrf.mxu0  ;;  %v824_v0 = vadd.f32 %v823_v59, %v734_v58 }
 0x112   : > { %v785_v61 = vpop.f32.mrf.mxu1 }
 0x113   : > { %v786_v63 = vadd.f32 %v785_v61, %v696_v60  ;;  %v964_v6 = vadd.f32 %v1757_v51, %v824_v0 }
 0x115   : > { %v949_v1 = vadd.f32 %v1757_v51, %v786_v63  ;;  %v996_v12 = vmax.f32 %v964_v6, 0.0 }
 0x117   : > { %v981_v3 = vmax.f32 %v949_v1, 0.0  ;;  %v736_v4 = vpop.f32.mrf.mxu2 }
 0x118   : > { %v825_v5 = vpop.f32.mrf.mxu3 }
 0x119   : > { %v1466_v7 = vpack.c.bf16 %v981_v3, %v980_v2  ;;  %v826_v8 = vadd.f32 %v825_v5, %v736_v4  ;;  %v699_v9 = vpop.f32.mrf.mxu0 }
 0x11a   : > { %v788_v10 = vpop.f32.mrf.mxu1 }
 0x11b   : > { %1518 = vst [vmem:[%s1765_s8 + $0x30] sm:$0xff] %v1466_v7   ;;  %v965_v11 = vadd.f32 %v1757_v51, %v826_v8  ;;  %v789_v15 = vadd.f32 %v788_v10, %v699_v9 }
 0x11d   : > { %v997_v13 = vmax.f32 %v965_v11, 0.0  ;;  %v950_v20 = vadd.f32 %v1757_v51, %v789_v15 }
 0x11f   : > { %v1506_v14 = vpack.c.bf16 %v997_v13, %v996_v12  ;;  %v739_v16 = vpop.f32.mrf.mxu2  ;;  %v982_v24 = vmax.f32 %v950_v20, 0.0 }
 0x120   : > { %v828_v17 = vpop.f32.mrf.mxu3 }
 0x121   : > { %1526 = vst [vmem:[%s1765_s8 + $0x70] sm:$0xff] %v1506_v14   ;;  %v701_v18 = vpop.f32.mrf.mxu0  ;;  %v829_v22 = vadd.f32 %v828_v17, %v739_v16 }
 0x122   : > { %v790_v19 = vpop.f32.mrf.mxu1 }
 0x123   : > { %v791_v21 = vadd.f32 %v790_v19, %v701_v18  ;;  %v966_v28 = vadd.f32 %v1757_v51, %v829_v22 }
 0x125   : > { %v951_v23 = vadd.f32 %v1757_v51, %v791_v21  ;;  %v998_v32 = vmax.f32 %v966_v28, 0.0 }
 0x127   : > { %v983_v25 = vmax.f32 %v951_v23, 0.0  ;;  %v741_v26 = vpop.f32.mrf.mxu2 }
 0x128   : > { %v830_v27 = vpop.f32.mrf.mxu3 }
 0x129   : > { %v1471_v29 = vpack.c.bf16 %v983_v25, %v982_v24  ;;  %v831_v30 = vadd.f32 %v830_v27, %v741_v26 }
 0x12b   : > { %1519 = vst [vmem:[%s1765_s8 + $0x38] sm:$0xff] %v1471_v29   ;;  %v967_v31 = vadd.f32 %v1757_v51, %v831_v30 }
 0x12d   : > { %v999_v33 = vmax.f32 %v967_v31, 0.0 }
 0x12f   : > { %v1511_v34 = vpack.c.bf16 %v999_v33, %v998_v32 }
 0x131   : > { %1527 = vst [vmem:[%s1765_s8 + $0x78] sm:$0xff] %v1511_v34  }
 0x132 PF: > { %s13_s14 = sadd.s32 1, %s1591_s14   ;;  %s1826_s12 = smov %s1587_s13 }
 0x133   : > { %p10_p5 = scmp.ge.s32.totalorder %s13_s14, 4   ;;  %s1827_s13 = smov %s1829_s15 }
 0x135   :  { %12 = sbr.rel (!%p10_p5) target bundleno = 2 (0x2), region = 76 }

// kernel: deeplab_forward.16
= control target key start
LH: loop header
LB: loop body
LE: loop exit
PB: predicated region body
PF: predicated region fallthrough
CT: control target
= control target key end

     0   :  { %s908_s1 = inlined_call_operand.vmem [shape: bf16[128,256], index: 1, kind: input, shape index: {}]   ;;  %s909_s0 = inlined_call_operand.vmem [shape: bf16[128,128], index: 0, kind: input, shape index: {}]   ;;  %s910_s2 = inlined_call_operand.vmem [shape: f32[1,256], index: 2, kind: input, shape index: {}]   ;;  %s911_s3 = inlined_call_operand.vmem [shape: bf16[128,256], index: 3, kind: output, shape index: {}]  }
   0x1   :  { %v635_v0 = vld [vmem:[%s908_s1 + $0x70] sm:$0xf]  ;;  %v664_v1 = vld [vmem:[%s908_s1 + $0x74] sm:$0xf0]  ;;  %v663_v2 = vld [vmem:[%s908_s1 + $0x74] sm:$0xf] }
   0x2   :  { %v636_v3 = vor.u32 %v664_v1, %v635_v0  ;;  %v637_v4 = vld [vmem:[%s908_s1 + $0x78] sm:$0xf0]  ;;  %v627_v5 = vld [vmem:[%s908_s1 + $0x60] sm:$0xf]  ;;  %v662_v6 = vld [vmem:[%s908_s1 + $0x64] sm:$0xf0] }
   0x3   :  { %v640_v7 = vor.u32 %v663_v2, %v637_v4  ;;  %v661_v8 = vld [vmem:[%s908_s1 + $0x64] sm:$0xf]  ;;  %v629_v9 = vld [vmem:[%s908_s1 + $0x68] sm:$0xf0]  ;;  %v628_v10 = vor.u32 %v662_v6, %v627_v5  ;;  %v619_v12 = vld [vmem:[%s908_s1 + $0x50] sm:$0xf] }
   0x4   :  { %242 = vmatpush.bf16.msra.mxu0 %v636_v3  ;;  %665 = vmatpush.bf16.msra.mxu2 %v636_v3  ;;  %v632_v11 = vor.u32 %v661_v8, %v629_v9  ;;  %v660_v13 = vld [vmem:[%s908_s1 + $0x54] sm:$0xf0]  ;;  %v659_v14 = vld [vmem:[%s908_s1 + $0x54] sm:$0xf]  ;;  %v621_v15 = vld [vmem:[%s908_s1 + $0x58] sm:$0xf0] }
   0x5   :  { %291 = vmatpush.bf16.msra.mxu1 %v640_v7  ;;  %673 = vmatpush.bf16.msra.mxu3 %v640_v7  ;;  %v620_v16 = vor.u32 %v660_v13, %v619_v12  ;;  %v624_v17 = vor.u32 %v659_v14, %v621_v15  ;;  %v611_v18 = vld [vmem:[%s908_s1 + $0x40] sm:$0xf]  ;;  %v658_v19 = vld [vmem:[%s908_s1 + $0x44] sm:$0xf0]  ;;  %v657_v20 = vld [vmem:[%s908_s1 + $0x44] sm:$0xf] }
   0x6   :  { %v613_v21 = vld [vmem:[%s908_s1 + $0x48] sm:$0xf0]  ;;  %v612_v22 = vor.u32 %v658_v19, %v611_v18  ;;  %v603_v24 = vld [vmem:[%s908_s1 + $0x30] sm:$0xf]  ;;  %v656_v25 = vld [vmem:[%s908_s1 + $0x34] sm:$0xf0] }
   0x7   :  { %v616_v23 = vor.u32 %v657_v20, %v613_v21  ;;  %v655_v26 = vld [vmem:[%s908_s1 + $0x34] sm:$0xf]  ;;  %v605_v27 = vld [vmem:[%s908_s1 + $0x38] sm:$0xf0]  ;;  %v604_v28 = vor.u32 %v656_v25, %v603_v24  ;;  %v595_v30 = vld [vmem:[%s908_s1 + $0x20] sm:$0xf] }
   0x8   :  { %243 = vmatpush.bf16.msra.mxu0 %v628_v10  ;;  %666 = vmatpush.bf16.msra.mxu2 %v628_v10  ;;  %v608_v29 = vor.u32 %v655_v26, %v605_v27  ;;  %v654_v31 = vld [vmem:[%s908_s1 + $0x24] sm:$0xf0]  ;;  %v653_v32 = vld [vmem:[%s908_s1 + $0x24] sm:$0xf]  ;;  %v597_v33 = vld [vmem:[%s908_s1 + $0x28] sm:$0xf0] }
   0x9   :  { %292 = vmatpush.bf16.msra.mxu1 %v632_v11  ;;  %674 = vmatpush.bf16.msra.mxu3 %v632_v11  ;;  %v596_v34 = vor.u32 %v654_v31, %v595_v30  ;;  %v600_v35 = vor.u32 %v653_v32, %v597_v33  ;;  %v587_v36 = vld [vmem:[%s908_s1 + $0x10] sm:$0xf]  ;;  %v652_v37 = vld [vmem:[%s908_s1 + $0x14] sm:$0xf0]  ;;  %v651_v38 = vld [vmem:[%s908_s1 + $0x14] sm:$0xf] }
   0xa   :  { %v589_v39 = vld [vmem:[%s908_s1 + $0x18] sm:$0xf0]  ;;  %v588_v40 = vor.u32 %v652_v37, %v587_v36  ;;  %v579_v42 = vld [vmem:[%s908_s1] sm:$0xf]  ;;  %v650_v43 = vld [vmem:[%s908_s1 + $0x4] sm:$0xf0] }
   0xb   :  { %v592_v41 = vor.u32 %v651_v38, %v589_v39  ;;  %v649_v44 = vld [vmem:[%s908_s1 + $0x4] sm:$0xf]  ;;  %v581_v45 = vld [vmem:[%s908_s1 + $0x8] sm:$0xf0]  ;;  %v580_v46 = vor.u32 %v650_v43, %v579_v42  ;;  %v643_v52 = vld [vmem:[%s909_s0 + $0x10] sm:$0xff] }
   0xc   :  { %244 = vmatpush.bf16.msra.mxu0 %v620_v16  ;;  %667 = vmatpush.bf16.msra.mxu2 %v620_v16  ;;  %v584_v47 = vor.u32 %v649_v44, %v581_v45  ;;  %v641_v48 = vld [vmem:[%s909_s0] sm:$0xff]  ;;  %v642_v50 = vld [vmem:[%s909_s0 + $0x8] sm:$0xff]  ;;  %v647_v53 = vld [vmem:[%s909_s0 + $0x30] sm:$0xff] }
   0xd   :  { %293 = vmatpush.bf16.msra.mxu1 %v624_v17  ;;  %675 = vmatpush.bf16.msra.mxu3 %v624_v17  ;;  %v645_v49 = vld [vmem:[%s909_s0 + $0x20] sm:$0xff]  ;;  %v646_v51 = vld [vmem:[%s909_s0 + $0x28] sm:$0xff]  ;;  %v644_v54 = vld [vmem:[%s909_s0 + $0x18] sm:$0xff] }
   0xe   :  { %v648_v55 = vld [vmem:[%s909_s0 + $0x38] sm:$0xff]  ;;  %v439_v56 = vld [vmem:[%s910_s2] sm:$0x3] }
   0xf   :  { %v824_v57 = vperm.slane %v439_v56, 0  ;;  %v826_v58 = vperm.slane %v439_v56, 1 }
  0x10   :  { %245 = vmatpush.bf16.msra.mxu0 %v612_v22  ;;  %668 = vmatpush.bf16.msra.mxu2 %v612_v22 }
  0x11   :  { %294 = vmatpush.bf16.msra.mxu1 %v616_v23  ;;  %676 = vmatpush.bf16.msra.mxu3 %v616_v23 }
  0x14   :  { %246 = vmatpush.bf16.msra.mxu0 %v604_v28  ;;  %669 = vmatpush.bf16.msra.mxu2 %v604_v28 }
  0x15   :  { %295 = vmatpush.bf16.msra.mxu1 %v608_v29  ;;  %677 = vmatpush.bf16.msra.mxu3 %v608_v29 }
  0x18   :  { %247 = vmatpush.bf16.msra.mxu0 %v596_v34  ;;  %670 = vmatpush.bf16.msra.mxu2 %v596_v34 }
  0x19   :  { %296 = vmatpush.bf16.msra.mxu1 %v600_v35  ;;  %678 = vmatpush.bf16.msra.mxu3 %v600_v35 }
  0x1c   :  { %248 = vmatpush.bf16.msra.mxu0 %v588_v40  ;;  %671 = vmatpush.bf16.msra.mxu2 %v588_v40 }
  0x1d   :  { %297 = vmatpush.bf16.msra.mxu1 %v592_v41  ;;  %679 = vmatpush.bf16.msra.mxu3 %v592_v41 }
  0x20   :  { %249 = vmatpush.bf16.msra.mxu0 %v580_v46  ;;  %672 = vmatpush.bf16.msra.mxu2 %v580_v46 }
  0x21   :  { %298 = vmatpush.bf16.msra.mxu1 %v584_v47  ;;  %680 = vmatpush.bf16.msra.mxu3 %v584_v47 }
  0x23   :  { %250 = vmatmul.bf16.vlgmr.msra.gmra.mxu0 %v641_v48  ;;  %270 = vmatmul.bf16.vlgmr.msra.gmra.mxu2 %v645_v49 }
  0x24   :  { %299 = vmatmul.bf16.vlgmr.msra.gmra.mxu1 %v641_v48  ;;  %319 = vmatmul.bf16.vlgmr.msra.gmra.mxu3 %v645_v49 }
  0x33   :  { %255 = vmatmul.bf16.gmra.mxu0 %v642_v50  ;;  %275 = vmatmul.bf16.gmra.mxu2 %v646_v51 }
  0x34   :  { %304 = vmatmul.bf16.gmra.mxu1 %v642_v50  ;;  %324 = vmatmul.bf16.gmra.mxu3 %v646_v51 }
  0x43   :  { %260 = vmatmul.bf16.gmra.mxu0 %v643_v52  ;;  %280 = vmatmul.bf16.gmra.mxu2 %v647_v53 }
  0x44   :  { %309 = vmatmul.bf16.gmra.mxu1 %v643_v52  ;;  %329 = vmatmul.bf16.gmra.mxu3 %v647_v53 }
  0x53   :  { %265 = vmatmul.bf16.gmra.mxu0 %v644_v54  ;;  %285 = vmatmul.bf16.gmra.mxu2 %v648_v55 }
  0x54   :  { %314 = vmatmul.bf16.gmra.mxu1 %v644_v54  ;;  %334 = vmatmul.bf16.gmra.mxu3 %v648_v55 }
  0xa0   :  { %v251_v59 = vpop.f32.mrf.mxu0 }
  0xa1   :  { %v445_v60 = vadd.f32 %v824_v57, %v251_v59  ;;  %v300_v61 = vpop.f32.mrf.mxu1 }
  0xa2   :  { %v446_v62 = vadd.f32 %v826_v58, %v300_v61 }
  0xa3   :  { %v477_v63 = vmax.f32 %v445_v60, 0.0 }
  0xa4   :  { %v478_v0 = vmax.f32 %v446_v62, 0.0 }
  0xa6   :  { %v509_v1 = vpack.c.bf16 %v478_v0, %v477_v63  ;;  %v271_v2 = vpop.f32.mrf.mxu2 }
  0xa7   :  { %v461_v3 = vadd.f32 %v824_v57, %v271_v2  ;;  %v320_v4 = vpop.f32.mrf.mxu3 }
  0xa8   :  { %525 = vst [vmem:[%s911_s3] sm:$0xff] %v509_v1  ;;  %v462_v5 = vadd.f32 %v826_v58, %v320_v4  ;;  %v253_v6 = vpop.f32.mrf.mxu0 }
  0xa9   :  { %v493_v7 = vmax.f32 %v461_v3, 0.0  ;;  %v447_v8 = vadd.f32 %v824_v57, %v253_v6  ;;  %v302_v9 = vpop.f32.mrf.mxu1 }
  0xaa   :  { %v494_v10 = vmax.f32 %v462_v5, 0.0  ;;  %v448_v11 = vadd.f32 %v826_v58, %v302_v9 }
  0xab   :  { %v479_v12 = vmax.f32 %v447_v8, 0.0 }
  0xac   :  { %v517_v13 = vpack.c.bf16 %v494_v10, %v493_v7  ;;  %v480_v14 = vmax.f32 %v448_v11, 0.0 }
  0xae   :  { %533 = vst [vmem:[%s911_s3 + $0x40] sm:$0xff] %v517_v13  ;;  %v510_v15 = vpack.c.bf16 %v480_v14, %v479_v12  ;;  %v273_v16 = vpop.f32.mrf.mxu2 }
  0xaf   :  { %v463_v17 = vadd.f32 %v824_v57, %v273_v16  ;;  %v322_v18 = vpop.f32.mrf.mxu3 }
  0xb0   :  { %526 = vst [vmem:[%s911_s3 + $0x8] sm:$0xff] %v510_v15  ;;  %v464_v19 = vadd.f32 %v826_v58, %v322_v18  ;;  %v256_v20 = vpop.f32.mrf.mxu0 }
  0xb1   :  { %v495_v21 = vmax.f32 %v463_v17, 0.0  ;;  %v449_v22 = vadd.f32 %v824_v57, %v256_v20  ;;  %v305_v23 = vpop.f32.mrf.mxu1 }
  0xb2   :  { %v496_v24 = vmax.f32 %v464_v19, 0.0  ;;  %v450_v25 = vadd.f32 %v826_v58, %v305_v23 }
  0xb3   :  { %v481_v26 = vmax.f32 %v449_v22, 0.0 }
  0xb4   :  { %v518_v27 = vpack.c.bf16 %v496_v24, %v495_v21  ;;  %v482_v28 = vmax.f32 %v450_v25, 0.0 }
  0xb6   :  { %534 = vst [vmem:[%s911_s3 + $0x48] sm:$0xff] %v518_v27  ;;  %v511_v29 = vpack.c.bf16 %v482_v28, %v481_v26  ;;  %v276_v30 = vpop.f32.mrf.mxu2 }
  0xb7   :  { %v465_v31 = vadd.f32 %v824_v57, %v276_v30  ;;  %v325_v32 = vpop.f32.mrf.mxu3 }
  0xb8   :  { %527 = vst [vmem:[%s911_s3 + $0x10] sm:$0xff] %v511_v29  ;;  %v466_v33 = vadd.f32 %v826_v58, %v325_v32  ;;  %v258_v34 = vpop.f32.mrf.mxu0 }
  0xb9   :  { %v497_v35 = vmax.f32 %v465_v31, 0.0  ;;  %v451_v36 = vadd.f32 %v824_v57, %v258_v34  ;;  %v307_v37 = vpop.f32.mrf.mxu1 }
  0xba   :  { %v498_v38 = vmax.f32 %v466_v33, 0.0  ;;  %v452_v39 = vadd.f32 %v826_v58, %v307_v37 }
  0xbb   :  { %v483_v40 = vmax.f32 %v451_v36, 0.0 }
  0xbc   :  { %v519_v41 = vpack.c.bf16 %v498_v38, %v497_v35  ;;  %v484_v42 = vmax.f32 %v452_v39, 0.0 }
  0xbe   :  { %535 = vst [vmem:[%s911_s3 + $0x50] sm:$0xff] %v519_v41  ;;  %v512_v43 = vpack.c.bf16 %v484_v42, %v483_v40  ;;  %v278_v44 = vpop.f32.mrf.mxu2 }
  0xbf   :  { %v467_v45 = vadd.f32 %v824_v57, %v278_v44  ;;  %v327_v46 = vpop.f32.mrf.mxu3 }
  0xc0   :  { %528 = vst [vmem:[%s911_s3 + $0x18] sm:$0xff] %v512_v43  ;;  %v468_v47 = vadd.f32 %v826_v58, %v327_v46  ;;  %v261_v48 = vpop.f32.mrf.mxu0 }
  0xc1   :  { %v499_v49 = vmax.f32 %v467_v45, 0.0  ;;  %v453_v50 = vadd.f32 %v824_v57, %v261_v48  ;;  %v310_v51 = vpop.f32.mrf.mxu1 }
  0xc2   :  { %v500_v52 = vmax.f32 %v468_v47, 0.0  ;;  %v454_v53 = vadd.f32 %v826_v58, %v310_v51 }
  0xc3   :  { %v485_v54 = vmax.f32 %v453_v50, 0.0 }
  0xc4   :  { %v520_v55 = vpack.c.bf16 %v500_v52, %v499_v49  ;;  %v486_v56 = vmax.f32 %v454_v53, 0.0 }
  0xc6   :  { %536 = vst [vmem:[%s911_s3 + $0x58] sm:$0xff] %v520_v55  ;;  %v513_v59 = vpack.c.bf16 %v486_v56, %v485_v54  ;;  %v281_v60 = vpop.f32.mrf.mxu2 }
  0xc7   :  { %v469_v61 = vadd.f32 %v824_v57, %v281_v60  ;;  %v330_v62 = vpop.f32.mrf.mxu3 }
  0xc8   :  { %529 = vst [vmem:[%s911_s3 + $0x20] sm:$0xff] %v513_v59  ;;  %v470_v63 = vadd.f32 %v826_v58, %v330_v62  ;;  %v263_v0 = vpop.f32.mrf.mxu0 }
  0xc9   :  { %v501_v1 = vmax.f32 %v469_v61, 0.0  ;;  %v455_v2 = vadd.f32 %v824_v57, %v263_v0  ;;  %v312_v3 = vpop.f32.mrf.mxu1 }
  0xca   :  { %v502_v4 = vmax.f32 %v470_v63, 0.0  ;;  %v456_v5 = vadd.f32 %v826_v58, %v312_v3 }
  0xcb   :  { %v487_v6 = vmax.f32 %v455_v2, 0.0 }
  0xcc   :  { %v521_v7 = vpack.c.bf16 %v502_v4, %v501_v1  ;;  %v488_v8 = vmax.f32 %v456_v5, 0.0 }
  0xce   :  { %537 = vst [vmem:[%s911_s3 + $0x60] sm:$0xff] %v521_v7  ;;  %v514_v9 = vpack.c.bf16 %v488_v8, %v487_v6  ;;  %v283_v10 = vpop.f32.mrf.mxu2 }
  0xcf   :  { %v471_v11 = vadd.f32 %v824_v57, %v283_v10  ;;  %v332_v12 = vpop.f32.mrf.mxu3 }
  0xd0   :  { %530 = vst [vmem:[%s911_s3 + $0x28] sm:$0xff] %v514_v9  ;;  %v472_v13 = vadd.f32 %v826_v58, %v332_v12  ;;  %v266_v14 = vpop.f32.mrf.mxu0 }
  0xd1   :  { %v503_v15 = vmax.f32 %v471_v11, 0.0  ;;  %v457_v16 = vadd.f32 %v824_v57, %v266_v14  ;;  %v315_v17 = vpop.f32.mrf.mxu1 }
  0xd2   :  { %v504_v18 = vmax.f32 %v472_v13, 0.0  ;;  %v458_v19 = vadd.f32 %v826_v58, %v315_v17 }
  0xd3   :  { %v489_v20 = vmax.f32 %v457_v16, 0.0 }
  0xd4   :  { %v522_v21 = vpack.c.bf16 %v504_v18, %v503_v15  ;;  %v490_v22 = vmax.f32 %v458_v19, 0.0 }
  0xd6   :  { %538 = vst [vmem:[%s911_s3 + $0x68] sm:$0xff] %v522_v21  ;;  %v515_v23 = vpack.c.bf16 %v490_v22, %v489_v20  ;;  %v286_v24 = vpop.f32.mrf.mxu2 }
  0xd7   :  { %v473_v25 = vadd.f32 %v824_v57, %v286_v24  ;;  %v335_v26 = vpop.f32.mrf.mxu3 }
  0xd8   :  { %531 = vst [vmem:[%s911_s3 + $0x30] sm:$0xff] %v515_v23  ;;  %v474_v27 = vadd.f32 %v826_v58, %v335_v26  ;;  %v268_v28 = vpop.f32.mrf.mxu0 }
  0xd9   :  { %v505_v29 = vmax.f32 %v473_v25, 0.0  ;;  %v459_v30 = vadd.f32 %v824_v57, %v268_v28  ;;  %v317_v31 = vpop.f32.mrf.mxu1 }
  0xda   :  { %v506_v32 = vmax.f32 %v474_v27, 0.0  ;;  %v460_v33 = vadd.f32 %v826_v58, %v317_v31 }
  0xdb   :  { %v491_v34 = vmax.f32 %v459_v30, 0.0 }
  0xdc   :  { %v523_v35 = vpack.c.bf16 %v506_v32, %v505_v29  ;;  %v492_v36 = vmax.f32 %v460_v33, 0.0 }
  0xde   :  { %539 = vst [vmem:[%s911_s3 + $0x70] sm:$0xff] %v523_v35  ;;  %v516_v37 = vpack.c.bf16 %v492_v36, %v491_v34  ;;  %v288_v38 = vpop.f32.mrf.mxu2 }
  0xdf   :  { %v475_v39 = vadd.f32 %v824_v57, %v288_v38  ;;  %v337_v40 = vpop.f32.mrf.mxu3 }
  0xe0   :  { %532 = vst [vmem:[%s911_s3 + $0x38] sm:$0xff] %v516_v37  ;;  %v476_v41 = vadd.f32 %v826_v58, %v337_v40 }
  0xe1   :  { %v507_v42 = vmax.f32 %v475_v39, 0.0 }
  0xe2   :  { %v508_v43 = vmax.f32 %v476_v41, 0.0 }
  0xe4   :  { %v524_v44 = vpack.c.bf16 %v508_v43, %v507_v42 }
  0xe6   :  { %540 = vst [vmem:[%s911_s3 + $0x78] sm:$0xff] %v524_v44 }

// kernel: deeplab_forward.25
= control target key start
LH: loop header
LB: loop body
LE: loop exit
PB: predicated region body
PF: predicated region fallthrough
CT: control target
= control target key end

     0   :  { %s928_s1 = inlined_call_operand.vmem [shape: bf16[256,128], index: 1, kind: input, shape index: {}]   ;;  %s929_s0 = inlined_call_operand.vmem [shape: bf16[128,256], index: 0, kind: input, shape index: {}]   ;;  %s930_s2 = inlined_call_operand.vmem [shape: f32[1,128], index: 2, kind: input, shape index: {}]   ;;  %s931_s3 = inlined_call_operand.vmem [shape: bf16[128,128], index: 3, kind: output, shape index: {}]  }
   0x1   :  { %v646_v0 = vld [vmem:[%s928_s1 + $0x38] sm:$0xff]  ;;  %v645_v2 = vld [vmem:[%s928_s1 + $0x30] sm:$0xff]  ;;  %v644_v4 = vld [vmem:[%s928_s1 + $0x28] sm:$0xff] }
   0x2   :  { %v654_v1 = vld [vmem:[%s928_s1 + $0x78] sm:$0xff]  ;;  %274 = vmatpush.bf16.msra.mxu0 %v646_v0  ;;  %702 = vmatpush.bf16.msra.mxu2 %v646_v0  ;;  %v653_v3 = vld [vmem:[%s928_s1 + $0x70] sm:$0xff]  ;;  %v652_v5 = vld [vmem:[%s928_s1 + $0x68] sm:$0xff] }
   0x3   :  { %323 = vmatpush.bf16.msra.mxu1 %v654_v1  ;;  %710 = vmatpush.bf16.msra.mxu3 %v654_v1  ;;  %v643_v6 = vld [vmem:[%s928_s1 + $0x20] sm:$0xff]  ;;  %v642_v8 = vld [vmem:[%s928_s1 + $0x18] sm:$0xff]  ;;  %v641_v10 = vld [vmem:[%s928_s1 + $0x10] sm:$0xff] }
   0x4   :  { %v651_v7 = vld [vmem:[%s928_s1 + $0x60] sm:$0xff]  ;;  %v650_v9 = vld [vmem:[%s928_s1 + $0x58] sm:$0xff]  ;;  %v649_v11 = vld [vmem:[%s928_s1 + $0x50] sm:$0xff] }
   0x5   :  { %v640_v12 = vld [vmem:[%s928_s1 + $0x8] sm:$0xff]  ;;  %v639_v14 = vld [vmem:[%s928_s1] sm:$0xff]  ;;  %v505_v28 = vld [vmem:[%s929_s0 + $0x10] sm:$0xf] }
   0x6   :  { %275 = vmatpush.bf16.msra.mxu0 %v645_v2  ;;  %703 = vmatpush.bf16.msra.mxu2 %v645_v2  ;;  %v648_v13 = vld [vmem:[%s928_s1 + $0x48] sm:$0xff]  ;;  %v647_v15 = vld [vmem:[%s928_s1 + $0x40] sm:$0xff]  ;;  %v626_v29 = vld [vmem:[%s929_s0 + $0x14] sm:$0xf0] }
   0x7   :  { %324 = vmatpush.bf16.msra.mxu1 %v653_v3  ;;  %711 = vmatpush.bf16.msra.mxu3 %v653_v3  ;;  %v497_v16 = vld [vmem:[%s929_s0] sm:$0xf]  ;;  %v624_v17 = vld [vmem:[%s929_s0 + $0x4] sm:$0xf0]  ;;  %v623_v20 = vld [vmem:[%s929_s0 + $0x4] sm:$0xf]  ;;  %v506_v36 = vor.u32 %v626_v29, %v505_v28 }
   0x8   :  { %v529_v18 = vld [vmem:[%s929_s0 + $0x40] sm:$0xf]  ;;  %v632_v19 = vld [vmem:[%s929_s0 + $0x44] sm:$0xf0]  ;;  %v499_v21 = vld [vmem:[%s929_s0 + $0x8] sm:$0xf0]  ;;  %v498_v24 = vor.u32 %v624_v17, %v497_v16 }
   0x9   :  { %v631_v22 = vld [vmem:[%s929_s0 + $0x44] sm:$0xf]  ;;  %v531_v23 = vld [vmem:[%s929_s0 + $0x48] sm:$0xf0]  ;;  %v530_v25 = vor.u32 %v632_v19, %v529_v18  ;;  %v502_v26 = vor.u32 %v623_v20, %v499_v21  ;;  %v537_v30 = vld [vmem:[%s929_s0 + $0x50] sm:$0xf] }
   0xa   :  { %276 = vmatpush.bf16.msra.mxu0 %v644_v4  ;;  %704 = vmatpush.bf16.msra.mxu2 %v644_v4  ;;  %v534_v27 = vor.u32 %v631_v22, %v531_v23  ;;  %v634_v31 = vld [vmem:[%s929_s0 + $0x54] sm:$0xf0]  ;;  %v625_v32 = vld [vmem:[%s929_s0 + $0x14] sm:$0xf]  ;;  %v507_v33 = vld [vmem:[%s929_s0 + $0x18] sm:$0xf0] }
   0xb   :  { %325 = vmatpush.bf16.msra.mxu1 %v652_v5  ;;  %712 = vmatpush.bf16.msra.mxu3 %v652_v5  ;;  %v633_v34 = vld [vmem:[%s929_s0 + $0x54] sm:$0xf]  ;;  %v539_v35 = vld [vmem:[%s929_s0 + $0x58] sm:$0xf0]  ;;  %v538_v37 = vor.u32 %v634_v31, %v537_v30  ;;  %v510_v38 = vor.u32 %v625_v32, %v507_v33  ;;  %v513_v40 = vld [vmem:[%s929_s0 + $0x20] sm:$0xf] }
   0xc   :  { %v542_v39 = vor.u32 %v633_v34, %v539_v35  ;;  %v628_v41 = vld [vmem:[%s929_s0 + $0x24] sm:$0xf0]  ;;  %v545_v42 = vld [vmem:[%s929_s0 + $0x60] sm:$0xf]  ;;  %v627_v44 = vld [vmem:[%s929_s0 + $0x24] sm:$0xf] }
   0xd   :  { %v636_v43 = vld [vmem:[%s929_s0 + $0x64] sm:$0xf0]  ;;  %v515_v45 = vld [vmem:[%s929_s0 + $0x28] sm:$0xf0]  ;;  %v635_v46 = vld [vmem:[%s929_s0 + $0x64] sm:$0xf]  ;;  %v514_v48 = vor.u32 %v628_v41, %v513_v40 }
   0xe   :  { %277 = vmatpush.bf16.msra.mxu0 %v643_v6  ;;  %705 = vmatpush.bf16.msra.mxu2 %v643_v6  ;;  %v547_v47 = vld [vmem:[%s929_s0 + $0x68] sm:$0xf0]  ;;  %v546_v49 = vor.u32 %v636_v43, %v545_v42  ;;  %v518_v50 = vor.u32 %v627_v44, %v515_v45  ;;  %v521_v52 = vld [vmem:[%s929_s0 + $0x30] sm:$0xf]  ;;  %v630_v53 = vld [vmem:[%s929_s0 + $0x34] sm:$0xf0] }
   0xf   :  { %326 = vmatpush.bf16.msra.mxu1 %v651_v7  ;;  %713 = vmatpush.bf16.msra.mxu3 %v651_v7  ;;  %v550_v51 = vor.u32 %v635_v46, %v547_v47  ;;  %v553_v54 = vld [vmem:[%s929_s0 + $0x70] sm:$0xf]  ;;  %v638_v55 = vld [vmem:[%s929_s0 + $0x74] sm:$0xf0]  ;;  %v629_v56 = vld [vmem:[%s929_s0 + $0x34] sm:$0xf]  ;;  %v522_v60 = vor.u32 %v630_v53, %v521_v52 }
  0x10   :  { %v523_v57 = vld [vmem:[%s929_s0 + $0x38] sm:$0xf0]  ;;  %v637_v58 = vld [vmem:[%s929_s0 + $0x74] sm:$0xf]  ;;  %v554_v61 = vor.u32 %v638_v55, %v553_v54  ;;  %v886_v3 = vld [vmem:[%s930_s2] ss:$0 sm:$0xff] }
  0x11   :  { %v555_v59 = vld [vmem:[%s929_s0 + $0x78] sm:$0xf0]  ;;  %v526_v62 = vor.u32 %v629_v56, %v523_v57 }
  0x12   :  { %278 = vmatpush.bf16.msra.mxu0 %v642_v8  ;;  %706 = vmatpush.bf16.msra.mxu2 %v642_v8  ;;  %v558_v63 = vor.u32 %v637_v58, %v555_v59 }
  0x13   :  { %327 = vmatpush.bf16.msra.mxu1 %v650_v9  ;;  %714 = vmatpush.bf16.msra.mxu3 %v650_v9 }
  0x16   :  { %279 = vmatpush.bf16.msra.mxu0 %v641_v10  ;;  %707 = vmatpush.bf16.msra.mxu2 %v641_v10 }
  0x17   :  { %328 = vmatpush.bf16.msra.mxu1 %v649_v11  ;;  %715 = vmatpush.bf16.msra.mxu3 %v649_v11 }
  0x1a   :  { %280 = vmatpush.bf16.msra.mxu0 %v640_v12  ;;  %708 = vmatpush.bf16.msra.mxu2 %v640_v12 }
  0x1b   :  { %329 = vmatpush.bf16.msra.mxu1 %v648_v13  ;;  %716 = vmatpush.bf16.msra.mxu3 %v648_v13 }
  0x1e   :  { %281 = vmatpush.bf16.msra.mxu0 %v639_v14  ;;  %709 = vmatpush.bf16.msra.mxu2 %v639_v14 }
  0x1f   :  { %330 = vmatpush.bf16.msra.mxu1 %v647_v15  ;;  %717 = vmatpush.bf16.msra.mxu3 %v647_v15 }
  0x21   :  { %282 = vmatmul.bf16.vlgmr.msra.gmra.mxu0 %v498_v24  ;;  %302 = vmatmul.bf16.vlgmr.msra.gmra.mxu2 %v530_v25 }
  0x22   :  { %331 = vmatmul.bf16.vlgmr.msra.gmra.mxu1 %v502_v26  ;;  %351 = vmatmul.bf16.vlgmr.msra.gmra.mxu3 %v534_v27 }
  0x31   :  { %287 = vmatmul.bf16.gmra.mxu0 %v506_v36  ;;  %307 = vmatmul.bf16.gmra.mxu2 %v538_v37 }
  0x32   :  { %336 = vmatmul.bf16.gmra.mxu1 %v510_v38  ;;  %356 = vmatmul.bf16.gmra.mxu3 %v542_v39 }
  0x41   :  { %292 = vmatmul.bf16.gmra.mxu0 %v514_v48  ;;  %312 = vmatmul.bf16.gmra.mxu2 %v546_v49 }
  0x42   :  { %341 = vmatmul.bf16.gmra.mxu1 %v518_v50  ;;  %361 = vmatmul.bf16.gmra.mxu3 %v550_v51 }
  0x51   :  { %297 = vmatmul.bf16.gmra.mxu0 %v522_v60  ;;  %317 = vmatmul.bf16.gmra.mxu2 %v554_v61 }
  0x52   :  { %346 = vmatmul.bf16.gmra.mxu1 %v526_v62  ;;  %366 = vmatmul.bf16.gmra.mxu3 %v558_v63 }
  0x9e   :  { %v283_v0 = vpop.f32.mrf.mxu0 }
  0x9f   :  { %v332_v1 = vpop.f32.mrf.mxu1 }
  0xa0   :  { %v333_v2 = vadd.f32 %v332_v1, %v283_v0 }
  0xa2   :  { %v427_v8 = vadd.f32 %v886_v3, %v333_v2 }
  0xa4   :  { %v303_v4 = vpop.f32.mrf.mxu2  ;;  %v443_v12 = vmax.f32 %v427_v8, 0.0 }
  0xa5   :  { %v352_v5 = vpop.f32.mrf.mxu3 }
  0xa6   :  { %v285_v6 = vpop.f32.mrf.mxu0  ;;  %v353_v10 = vadd.f32 %v352_v5, %v303_v4 }
  0xa7   :  { %v334_v7 = vpop.f32.mrf.mxu1 }
  0xa8   :  { %v335_v9 = vadd.f32 %v334_v7, %v285_v6  ;;  %v435_v16 = vadd.f32 %v886_v3, %v353_v10 }
  0xaa   :  { %v428_v11 = vadd.f32 %v886_v3, %v335_v9  ;;  %v451_v22 = vmax.f32 %v435_v16, 0.0 }
  0xac   :  { %v444_v13 = vmax.f32 %v428_v11, 0.0  ;;  %v305_v14 = vpop.f32.mrf.mxu2 }
  0xad   :  { %v354_v15 = vpop.f32.mrf.mxu3 }
  0xae   :  { %v658_v17 = vpack.c.bf16 %v444_v13, %v443_v12  ;;  %v355_v18 = vadd.f32 %v354_v15, %v305_v14  ;;  %v288_v19 = vpop.f32.mrf.mxu0 }
  0xaf   :  { %v337_v20 = vpop.f32.mrf.mxu1 }
  0xb0   :  { %659 = vst [vmem:[%s931_s3] sm:$0xff] %v658_v17   ;;  %v436_v21 = vadd.f32 %v886_v3, %v355_v18  ;;  %v338_v25 = vadd.f32 %v337_v20, %v288_v19 }
  0xb2   :  { %v452_v23 = vmax.f32 %v436_v21, 0.0  ;;  %v429_v30 = vadd.f32 %v886_v3, %v338_v25 }
  0xb4   :  { %v678_v24 = vpack.c.bf16 %v452_v23, %v451_v22  ;;  %v308_v26 = vpop.f32.mrf.mxu2  ;;  %v445_v34 = vmax.f32 %v429_v30, 0.0 }
  0xb5   :  { %v357_v27 = vpop.f32.mrf.mxu3 }
  0xb6   :  { %698 = vst [vmem:[%s931_s3 + $0x20] sm:$0xff] %v678_v24   ;;  %v290_v28 = vpop.f32.mrf.mxu0  ;;  %v358_v32 = vadd.f32 %v357_v27, %v308_v26 }
  0xb7   :  { %v339_v29 = vpop.f32.mrf.mxu1 }
  0xb8   :  { %v340_v31 = vadd.f32 %v339_v29, %v290_v28  ;;  %v437_v38 = vadd.f32 %v886_v3, %v358_v32 }
  0xba   :  { %v430_v33 = vadd.f32 %v886_v3, %v340_v31  ;;  %v453_v44 = vmax.f32 %v437_v38, 0.0 }
  0xbc   :  { %v446_v35 = vmax.f32 %v430_v33, 0.0  ;;  %v310_v36 = vpop.f32.mrf.mxu2 }
  0xbd   :  { %v359_v37 = vpop.f32.mrf.mxu3 }
  0xbe   :  { %v663_v39 = vpack.c.bf16 %v446_v35, %v445_v34  ;;  %v360_v40 = vadd.f32 %v359_v37, %v310_v36  ;;  %v293_v41 = vpop.f32.mrf.mxu0 }
  0xbf   :  { %v342_v42 = vpop.f32.mrf.mxu1 }
  0xc0   :  { %695 = vst [vmem:[%s931_s3 + $0x8] sm:$0xff] %v663_v39   ;;  %v438_v43 = vadd.f32 %v886_v3, %v360_v40  ;;  %v343_v47 = vadd.f32 %v342_v42, %v293_v41 }
  0xc2   :  { %v454_v45 = vmax.f32 %v438_v43, 0.0  ;;  %v431_v52 = vadd.f32 %v886_v3, %v343_v47 }
  0xc4   :  { %v683_v46 = vpack.c.bf16 %v454_v45, %v453_v44  ;;  %v313_v48 = vpop.f32.mrf.mxu2  ;;  %v447_v56 = vmax.f32 %v431_v52, 0.0 }
  0xc5   :  { %v362_v49 = vpop.f32.mrf.mxu3 }
  0xc6   :  { %699 = vst [vmem:[%s931_s3 + $0x28] sm:$0xff] %v683_v46   ;;  %v295_v50 = vpop.f32.mrf.mxu0  ;;  %v363_v54 = vadd.f32 %v362_v49, %v313_v48 }
  0xc7   :  { %v344_v51 = vpop.f32.mrf.mxu1 }
  0xc8   :  { %v345_v53 = vadd.f32 %v344_v51, %v295_v50  ;;  %v439_v60 = vadd.f32 %v886_v3, %v363_v54 }
  0xca   :  { %v432_v55 = vadd.f32 %v886_v3, %v345_v53  ;;  %v455_v2 = vmax.f32 %v439_v60, 0.0 }
  0xcc   :  { %v448_v57 = vmax.f32 %v432_v55, 0.0  ;;  %v315_v58 = vpop.f32.mrf.mxu2 }
  0xcd   :  { %v364_v59 = vpop.f32.mrf.mxu3 }
  0xce   :  { %v668_v61 = vpack.c.bf16 %v448_v57, %v447_v56  ;;  %v365_v62 = vadd.f32 %v364_v59, %v315_v58  ;;  %v298_v63 = vpop.f32.mrf.mxu0 }
  0xcf   :  { %v347_v0 = vpop.f32.mrf.mxu1 }
  0xd0   :  { %696 = vst [vmem:[%s931_s3 + $0x10] sm:$0xff] %v668_v61   ;;  %v440_v1 = vadd.f32 %v886_v3, %v365_v62  ;;  %v348_v6 = vadd.f32 %v347_v0, %v298_v63 }
  0xd2   :  { %v456_v4 = vmax.f32 %v440_v1, 0.0  ;;  %v433_v11 = vadd.f32 %v886_v3, %v348_v6 }
  0xd4   :  { %v688_v5 = vpack.c.bf16 %v456_v4, %v455_v2  ;;  %v318_v7 = vpop.f32.mrf.mxu2  ;;  %v449_v15 = vmax.f32 %v433_v11, 0.0 }
  0xd5   :  { %v367_v8 = vpop.f32.mrf.mxu3 }
  0xd6   :  { %700 = vst [vmem:[%s931_s3 + $0x30] sm:$0xff] %v688_v5   ;;  %v300_v9 = vpop.f32.mrf.mxu0  ;;  %v368_v13 = vadd.f32 %v367_v8, %v318_v7 }
  0xd7   :  { %v349_v10 = vpop.f32.mrf.mxu1 }
  0xd8   :  { %v350_v12 = vadd.f32 %v349_v10, %v300_v9  ;;  %v441_v19 = vadd.f32 %v886_v3, %v368_v13 }
  0xda   :  { %v434_v14 = vadd.f32 %v886_v3, %v350_v12  ;;  %v457_v23 = vmax.f32 %v441_v19, 0.0 }
  0xdc   :  { %v450_v16 = vmax.f32 %v434_v14, 0.0  ;;  %v320_v17 = vpop.f32.mrf.mxu2 }
  0xdd   :  { %v369_v18 = vpop.f32.mrf.mxu3 }
  0xde   :  { %v673_v20 = vpack.c.bf16 %v450_v16, %v449_v15  ;;  %v370_v21 = vadd.f32 %v369_v18, %v320_v17 }
  0xe0   :  { %697 = vst [vmem:[%s931_s3 + $0x18] sm:$0xff] %v673_v20   ;;  %v442_v22 = vadd.f32 %v886_v3, %v370_v21 }
  0xe2   :  { %v458_v24 = vmax.f32 %v442_v22, 0.0 }
  0xe4   :  { %v693_v25 = vpack.c.bf16 %v458_v24, %v457_v23 }
  0xe6   :  { %701 = vst [vmem:[%s931_s3 + $0x38] sm:$0xff] %v693_v25  }

// kernel: deeplab_forward.17
= control target key start
LH: loop header
LB: loop body
LE: loop exit
PB: predicated region body
PF: predicated region fallthrough
CT: control target
= control target key end

     0   :  { %s3219_s0 = inlined_call_operand.vmem [shape: bf16[32,2304], index: 0, kind: input, shape index: {}]   ;;  %s3220_s1 = inlined_call_operand.vmem [shape: bf16[2304,512], index: 1, kind: input, shape index: {}]   ;;  %s3221_s2 = inlined_call_operand.vmem [shape: f32[1,512], index: 2, kind: input, shape index: {}]   ;;  %s3222_s3 = inlined_call_operand.vmem [shape: bf16[32,512], index: 3, kind: output, shape index: {}]  }
   0x1   :  { %3224 = sst [smem:[#allocation7_spill]] %s3219_s0 }
   0x2   :  { %3225 = sst [smem:[#allocation8_spill]] %s3220_s1 }
   0x3   :  { %s2581_s12 = smov 0   ;;  %s2583_s13 = smov 0  }
   0x4   :  { %s2585_s14 = smov 0   ;;  %s2587_s15 = smov 0  }
   0x5   :  { %s2589_s16 = smov 0   ;;  %s2591_s17 = smov 0  }
   0x6   :  { %s2593_s18 = smov 0   ;;  %s2595_s19 = smov 0  }
   0x7   :  { %s2597_s20 = smov 0   ;;  %s2599_s21 = smov 0  }
   0x8   :  { %s2601_s22 = smov 0  }
   0x9 LB: > { %s1818_s23 = sadd.s32 4294967295, %s2558_s22   ;;  %s25_s24 = sadd.s32 1, %s2550_s20  ;;  %s2558_s22 = sphi %s2601_s22, %s13_s22   ;;  %s2554_s21 = sphi %s2599_s21, %s3242_s21   ;;  %s2550_s20 = sphi %s2597_s20, %s3241_s20   ;;  %s2546_s19 = sphi %s2595_s19, %s3240_s19   ;;  %s2542_s18 = sphi %s2593_s18, %s3239_s18   ;;  %s2538_s17 = sphi %s2591_s17, %s3238_s17   ;;  %s2534_s16 = sphi %s2589_s16, %s3237_s16   ;;  %s2530_s15 = sphi %s2587_s15, %s3236_s15   ;;  %s2526_s14 = sphi %s2585_s14, %s3235_s14   ;;  %s2522_s13 = sphi %s2583_s13, %s3234_s13   ;;  %s2518_s12 = sphi %s2581_s12, %s3233_s12  }
   0xa   : > { %p26_p0 = scmp.ge.s32.totalorder %s25_s24, 3  ;;  %s28_s25 = sadd.s32 1, %s2554_s21 }
   0xb   : > { %s41_s26 = sadd.s32 1, %s2538_s17  ;;  %p48_p1 = scmp.ne.s32.totalorder %s2538_s17, %s2534_s16 }
   0xc   : > { %s3244_s24 = smov (%p26_p0, %s25_s24), 0  ;;  %s3246_s25 = smov (!%p26_p0, %s28_s25), %s2554_s21 }
   0xd   : > { %s37_s27 = ssub.s32 %s2550_s20, %s3244_s24  ;;  %p49_p2 = scmp.eq.s32.totalorder %s2558_s22, 0 }
   0xe   : > { %p30_p3 = scmp.ge.s32.totalorder %s3246_s25, 2  ;;  %p39_p4 = scmp.eq.s32.totalorder %s37_s27, 0 }
   0xf   : > { %p2648_p5 = por %p49_p2, %p48_p1  ;;  %s69_s29 = sadd.s32 1, %s2530_s15 }
  0x10   : > { %s3248_s25 = smov (%p30_p3, %s3246_s25), 0  ;;  %p76_p6 = scmp.ne.s32.totalorder %s2530_s15, %s2526_s14 }
  0x11   : > { %3227 = sst [smem:[#allocation6_spill]] %s3248_s25  ;;  %s65_s4 = ssub.s32 %s2554_s21, %s3248_s25 }
  0x12   : > { %s2656_s30 = scalar_select %p39_p4, %s2538_s17, %s41_s26  }
  0x13   : > { %s66_s5 = sor.u32 %s65_s4, %s37_s27  ;;  %p121_p7 = scmp.eq.s32.totalorder %s65_s4, 0 }
  0x14   : > { %p67_p8 = scmp.eq.s32.totalorder %s66_s5, 0  ;;  %p2662_p9 = por %p76_p6, %p49_p2 }
  0x15   : > { %s123_s7 = sadd.s32 1, %s2522_s13  ;;  %p133_p10 = scmp.ne.s32.totalorder %s2522_s13, %s2518_s12 }
  0x16   : > { %s2670_s8 = scalar_select %p67_p8, %s2530_s15, %s69_s29  }
  0x17   : > { %s2673_s9 = scalar_select %p121_p7, %s2522_s13, %s123_s7  }
  0x18   : > { %p134_p11 = scmp.eq.s32.totalorder %s1818_s23, 5  ;;  %p1821_p13 = scmp.ge.s32.totalorder %s2558_s22, 6 }
  0x1a   : > { %p2675_p12 = por %p134_p11, %p133_p10  ;;  %156 = sbr.rel (%p1821_p13) target bundleno = 158 (0x9e), region = 16 }
  0x1f   : > { %159 = sbr.rel (!%p2648_p5) target bundleno = 52 (0x34), region = 20  ;;  %s161_s11 = sand.u32 (%p2648_p5), 1, %s2538_s17  }
  0x20   : > { %s2268_s26 = smul.u32 (%p2648_p5), 24, %s2550_s20  ;;  %s3230_s0 = sld [smem:[#allocation7_spill]] (%p2648_p5) }
  0x21   : > { %s2379_s27 = smul.u32 (%p2648_p5), 96, %s161_s11 }
  0x23   : > { %s163_s23 = scalar_lea.vmem (%p2648_p5), [#allocation3], %s2379_s27 }
  0x26   : > { %s169_s5 = scalar_lea.vmem %s3230_s0, %s2268_s26 }
  0x27   : > { %v182_v0 = vld [vmem:[%s169_s5] sm:$0xff]  ;;  %v184_v1 = vld [vmem:[%s169_s5 + $0x8] sm:$0xff]  ;;  %v186_v2 = vld [vmem:[%s169_s5 + $0x10] sm:$0xff] }
  0x28   : > { %183 = vst [vmem:[%s163_s23] sm:$0xff] %v182_v0  ;;  %v188_v3 = vld [vmem:[%s169_s5 + $0x48] sm:$0xff]  ;;  %v190_v4 = vld [vmem:[%s169_s5 + $0x50] sm:$0xff]  ;;  %v192_v5 = vld [vmem:[%s169_s5 + $0x58] sm:$0xff] }
  0x29   : > { %185 = vst [vmem:[%s163_s23 + $0x8] sm:$0xff] %v184_v1  ;;  %v194_v6 = vld [vmem:[%s169_s5 + $0x90] sm:$0xff]  ;;  %v196_v7 = vld [vmem:[%s169_s5 + $0x98] sm:$0xff]  ;;  %v198_v8 = vld [vmem:[%s169_s5 + $0xa0] sm:$0xff] }
  0x2a   : > { %187 = vst [vmem:[%s163_s23 + $0x10] sm:$0xff] %v186_v2  ;;  %v200_v9 = vld [vmem:[%s169_s5 + $0xd8] sm:$0xff]  ;;  %v202_v10 = vld [vmem:[%s169_s5 + $0xe0] sm:$0xff]  ;;  %v204_v11 = vld [vmem:[%s169_s5 + $0xe8] sm:$0xff] }
  0x2b   : > { %189 = vst [vmem:[%s163_s23 + $0x18] sm:$0xff] %v188_v3 }
  0x2c   : > { %191 = vst [vmem:[%s163_s23 + $0x20] sm:$0xff] %v190_v4 }
  0x2d   : > { %193 = vst [vmem:[%s163_s23 + $0x28] sm:$0xff] %v192_v5 }
  0x2e   : > { %195 = vst [vmem:[%s163_s23 + $0x30] sm:$0xff] %v194_v6 }
  0x2f   : > { %197 = vst [vmem:[%s163_s23 + $0x38] sm:$0xff] %v196_v7 }
  0x30   : > { %199 = vst [vmem:[%s163_s23 + $0x40] sm:$0xff] %v198_v8 }
  0x31   : > { %201 = vst [vmem:[%s163_s23 + $0x48] sm:$0xff] %v200_v9 }
  0x32   : > { %203 = vst [vmem:[%s163_s23 + $0x50] sm:$0xff] %v202_v10 }
  0x33   : > { %205 = vst [vmem:[%s163_s23 + $0x58] sm:$0xff] %v204_v11 }
  0x34 PF: > { %211 = sbr.rel (!%p2662_p9) target bundleno = 158 (0x9e), region = 43  ;;  %s213_s28 = sand.u32 (%p2662_p9), 1, %s2530_s15  }
  0x35   : > { %s2380_s7 = smul.u32 (%p2662_p9), 768, %s213_s28  ;;  %s1823_s11 = sshll.u32 (%p2662_p9), %s2554_s21, 1 }
  0x36   : > { %s2269_s26 = smul.u32 (%p2662_p9), 384, %s2550_s20  ;;  %s3231_s1 = sld [smem:[#allocation8_spill]] (%p2662_p9) }
  0x37   : > { %s2700_s6 = scalar_lea.vmem (%p2662_p9), [#allocation4], %s2380_s7 }
  0x38   : > { %s219_s27 = sadd.s32 (%p2662_p9), %s2269_s26, %s1823_s11 }
  0x39   : > { %s1825_s29 = sshll.u32 %s219_s27, 2 }
  0x3c   : > { %s2695_s5 = scalar_lea.vmem %s3231_s1, %s1825_s29 }
  0x3d   : > { %v440_v12 = vld [vmem:[%s2695_s5] sm:$0xff]  ;;  %v442_v13 = vld [vmem:[%s2695_s5 + $0x10] sm:$0xff] }
  0x3e   : > { %v444_v14 = vld [vmem:[%s2695_s5 + $0x20] sm:$0xff]  ;;  %441 = vst [vmem:[%s2700_s6] sm:$0xff] %v440_v12  ;;  %v446_v15 = vld [vmem:[%s2695_s5 + $0x30] sm:$0xff] }
  0x3f   : > { %443 = vst [vmem:[%s2700_s6 + $0x8] sm:$0xff] %v442_v13  ;;  %v448_v16 = vld [vmem:[%s2695_s5 + $0x40] sm:$0xff]  ;;  %v450_v17 = vld [vmem:[%s2695_s5 + $0x50] sm:$0xff] }
  0x40   : > { %445 = vst [vmem:[%s2700_s6 + $0x10] sm:$0xff] %v444_v14  ;;  %v452_v18 = vld [vmem:[%s2695_s5 + $0x60] sm:$0xff]  ;;  %v454_v19 = vld [vmem:[%s2695_s5 + $0x70] sm:$0xff] }
  0x41   : > { %447 = vst [vmem:[%s2700_s6 + $0x18] sm:$0xff] %v446_v15  ;;  %v456_v20 = vld [vmem:[%s2695_s5 + $0x80] sm:$0xff]  ;;  %v458_v21 = vld [vmem:[%s2695_s5 + $0x90] sm:$0xff] }
  0x42   : > { %449 = vst [vmem:[%s2700_s6 + $0x20] sm:$0xff] %v448_v16  ;;  %v460_v22 = vld [vmem:[%s2695_s5 + $0xa0] sm:$0xff]  ;;  %v462_v23 = vld [vmem:[%s2695_s5 + $0xb0] sm:$0xff] }
  0x43   : > { %451 = vst [vmem:[%s2700_s6 + $0x28] sm:$0xff] %v450_v17  ;;  %v464_v24 = vld [vmem:[%s2695_s5 + $0xc0] sm:$0xff]  ;;  %v466_v25 = vld [vmem:[%s2695_s5 + $0xd0] sm:$0xff] }
  0x44   : > { %453 = vst [vmem:[%s2700_s6 + $0x30] sm:$0xff] %v452_v18  ;;  %v468_v26 = vld [vmem:[%s2695_s5 + $0xe0] sm:$0xff]  ;;  %v470_v27 = vld [vmem:[%s2695_s5 + $0xf0] sm:$0xff] }
  0x45   : > { %455 = vst [vmem:[%s2700_s6 + $0x38] sm:$0xff] %v454_v19  ;;  %v472_v28 = vld [vmem:[%s2695_s5 + $0x100] sm:$0xff]  ;;  %v474_v29 = vld [vmem:[%s2695_s5 + $0x110] sm:$0xff] }
  0x46   : > { %457 = vst [vmem:[%s2700_s6 + $0x40] sm:$0xff] %v456_v20  ;;  %v476_v30 = vld [vmem:[%s2695_s5 + $0x120] sm:$0xff]  ;;  %v478_v31 = vld [vmem:[%s2695_s5 + $0x130] sm:$0xff] }
  0x47   : > { %459 = vst [vmem:[%s2700_s6 + $0x48] sm:$0xff] %v458_v21  ;;  %v480_v32 = vld [vmem:[%s2695_s5 + $0x140] sm:$0xff]  ;;  %v482_v33 = vld [vmem:[%s2695_s5 + $0x150] sm:$0xff] }
  0x48   : > { %461 = vst [vmem:[%s2700_s6 + $0x50] sm:$0xff] %v460_v22  ;;  %v484_v34 = vld [vmem:[%s2695_s5 + $0x160] sm:$0xff]  ;;  %v486_v35 = vld [vmem:[%s2695_s5 + $0x170] sm:$0xff] }
  0x49   : > { %463 = vst [vmem:[%s2700_s6 + $0x58] sm:$0xff] %v462_v23  ;;  %v488_v36 = vld [vmem:[%s2695_s5 + $0x180] sm:$0xff]  ;;  %v490_v37 = vld [vmem:[%s2695_s5 + $0x190] sm:$0xff] }
  0x4a   : > { %465 = vst [vmem:[%s2700_s6 + $0x60] sm:$0xff] %v464_v24  ;;  %v492_v38 = vld [vmem:[%s2695_s5 + $0x1a0] sm:$0xff]  ;;  %v494_v39 = vld [vmem:[%s2695_s5 + $0x1b0] sm:$0xff] }
  0x4b   : > { %467 = vst [vmem:[%s2700_s6 + $0x68] sm:$0xff] %v466_v25  ;;  %v496_v40 = vld [vmem:[%s2695_s5 + $0x1c0] sm:$0xff]  ;;  %v498_v41 = vld [vmem:[%s2695_s5 + $0x1d0] sm:$0xff] }
  0x4c   : > { %469 = vst [vmem:[%s2700_s6 + $0x70] sm:$0xff] %v468_v26  ;;  %v500_v42 = vld [vmem:[%s2695_s5 + $0x1e0] sm:$0xff]  ;;  %v502_v43 = vld [vmem:[%s2695_s5 + $0x1f0] sm:$0xff] }
  0x4d   : > { %471 = vst [vmem:[%s2700_s6 + $0x78] sm:$0xff] %v470_v27  ;;  %v504_v44 = vld [vmem:[%s2695_s5 + $0x200] sm:$0xff]  ;;  %v506_v45 = vld [vmem:[%s2695_s5 + $0x210] sm:$0xff] }
  0x4e   : > { %473 = vst [vmem:[%s2700_s6 + $0x80] sm:$0xff] %v472_v28  ;;  %v508_v46 = vld [vmem:[%s2695_s5 + $0x220] sm:$0xff]  ;;  %v510_v47 = vld [vmem:[%s2695_s5 + $0x230] sm:$0xff] }
  0x4f   : > { %475 = vst [vmem:[%s2700_s6 + $0x88] sm:$0xff] %v474_v29  ;;  %v512_v48 = vld [vmem:[%s2695_s5 + $0x240] sm:$0xff]  ;;  %v514_v49 = vld [vmem:[%s2695_s5 + $0x250] sm:$0xff] }
  0x50   : > { %477 = vst [vmem:[%s2700_s6 + $0x90] sm:$0xff] %v476_v30  ;;  %v516_v50 = vld [vmem:[%s2695_s5 + $0x260] sm:$0xff]  ;;  %v518_v51 = vld [vmem:[%s2695_s5 + $0x270] sm:$0xff] }
  0x51   : > { %479 = vst [vmem:[%s2700_s6 + $0x98] sm:$0xff] %v478_v31  ;;  %v520_v52 = vld [vmem:[%s2695_s5 + $0x280] sm:$0xff]  ;;  %v522_v53 = vld [vmem:[%s2695_s5 + $0x290] sm:$0xff] }
  0x52   : > { %481 = vst [vmem:[%s2700_s6 + $0xa0] sm:$0xff] %v480_v32  ;;  %v524_v54 = vld [vmem:[%s2695_s5 + $0x2a0] sm:$0xff]  ;;  %v526_v55 = vld [vmem:[%s2695_s5 + $0x2b0] sm:$0xff] }
  0x53   : > { %483 = vst [vmem:[%s2700_s6 + $0xa8] sm:$0xff] %v482_v33  ;;  %v528_v56 = vld [vmem:[%s2695_s5 + $0x2c0] sm:$0xff]  ;;  %v530_v57 = vld [vmem:[%s2695_s5 + $0x2d0] sm:$0xff] }
  0x54   : > { %485 = vst [vmem:[%s2700_s6 + $0xb0] sm:$0xff] %v484_v34  ;;  %v532_v58 = vld [vmem:[%s2695_s5 + $0x2e0] sm:$0xff]  ;;  %v534_v59 = vld [vmem:[%s2695_s5 + $0x2f0] sm:$0xff] }
  0x55   : > { %487 = vst [vmem:[%s2700_s6 + $0xb8] sm:$0xff] %v486_v35  ;;  %v536_v60 = vld [vmem:[%s2695_s5 + $0x300] sm:$0xff]  ;;  %v538_v61 = vld [vmem:[%s2695_s5 + $0x310] sm:$0xff] }
  0x56   : > { %489 = vst [vmem:[%s2700_s6 + $0xc0] sm:$0xff] %v488_v36  ;;  %v540_v62 = vld [vmem:[%s2695_s5 + $0x320] sm:$0xff]  ;;  %v542_v63 = vld [vmem:[%s2695_s5 + $0x330] sm:$0xff] }
  0x57   : > { %491 = vst [vmem:[%s2700_s6 + $0xc8] sm:$0xff] %v490_v37  ;;  %v544_v0 = vld [vmem:[%s2695_s5 + $0x340] sm:$0xff]  ;;  %v546_v1 = vld [vmem:[%s2695_s5 + $0x350] sm:$0xff] }
  0x58   : > { %493 = vst [vmem:[%s2700_s6 + $0xd0] sm:$0xff] %v492_v38  ;;  %v548_v2 = vld [vmem:[%s2695_s5 + $0x360] sm:$0xff]  ;;  %v550_v3 = vld [vmem:[%s2695_s5 + $0x370] sm:$0xff] }
  0x59   : > { %495 = vst [vmem:[%s2700_s6 + $0xd8] sm:$0xff] %v494_v39  ;;  %v552_v4 = vld [vmem:[%s2695_s5 + $0x380] sm:$0xff]  ;;  %v554_v5 = vld [vmem:[%s2695_s5 + $0x390] sm:$0xff] }
  0x5a   : > { %497 = vst [vmem:[%s2700_s6 + $0xe0] sm:$0xff] %v496_v40  ;;  %v556_v6 = vld [vmem:[%s2695_s5 + $0x3a0] sm:$0xff]  ;;  %v558_v7 = vld [vmem:[%s2695_s5 + $0x3b0] sm:$0xff] }
  0x5b   : > { %499 = vst [vmem:[%s2700_s6 + $0xe8] sm:$0xff] %v498_v41  ;;  %v560_v8 = vld [vmem:[%s2695_s5 + $0x3c0] sm:$0xff]  ;;  %v562_v9 = vld [vmem:[%s2695_s5 + $0x3d0] sm:$0xff] }
  0x5c   : > { %501 = vst [vmem:[%s2700_s6 + $0xf0] sm:$0xff] %v500_v42  ;;  %v564_v10 = vld [vmem:[%s2695_s5 + $0x3e0] sm:$0xff]  ;;  %v566_v11 = vld [vmem:[%s2695_s5 + $0x3f0] sm:$0xff] }
  0x5d   : > { %503 = vst [vmem:[%s2700_s6 + $0xf8] sm:$0xff] %v502_v43  ;;  %v568_v12 = vld [vmem:[%s2695_s5 + $0x400] sm:$0xff]  ;;  %v570_v13 = vld [vmem:[%s2695_s5 + $0x410] sm:$0xff] }
  0x5e   : > { %505 = vst [vmem:[%s2700_s6 + $0x100] sm:$0xff] %v504_v44  ;;  %v572_v14 = vld [vmem:[%s2695_s5 + $0x420] sm:$0xff]  ;;  %v574_v15 = vld [vmem:[%s2695_s5 + $0x430] sm:$0xff] }
  0x5f   : > { %507 = vst [vmem:[%s2700_s6 + $0x108] sm:$0xff] %v506_v45  ;;  %v576_v16 = vld [vmem:[%s2695_s5 + $0x440] sm:$0xff]  ;;  %v578_v17 = vld [vmem:[%s2695_s5 + $0x450] sm:$0xff] }
  0x60   : > { %509 = vst [vmem:[%s2700_s6 + $0x110] sm:$0xff] %v508_v46  ;;  %v580_v18 = vld [vmem:[%s2695_s5 + $0x460] sm:$0xff]  ;;  %v582_v19 = vld [vmem:[%s2695_s5 + $0x470] sm:$0xff] }
  0x61   : > { %511 = vst [vmem:[%s2700_s6 + $0x118] sm:$0xff] %v510_v47  ;;  %v584_v20 = vld [vmem:[%s2695_s5 + $0x480] sm:$0xff]  ;;  %v586_v21 = vld [vmem:[%s2695_s5 + $0x490] sm:$0xff] }
  0x62   : > { %513 = vst [vmem:[%s2700_s6 + $0x120] sm:$0xff] %v512_v48  ;;  %v588_v22 = vld [vmem:[%s2695_s5 + $0x4a0] sm:$0xff]  ;;  %v590_v23 = vld [vmem:[%s2695_s5 + $0x4b0] sm:$0xff] }
  0x63   : > { %515 = vst [vmem:[%s2700_s6 + $0x128] sm:$0xff] %v514_v49  ;;  %v592_v24 = vld [vmem:[%s2695_s5 + $0x4c0] sm:$0xff]  ;;  %v594_v25 = vld [vmem:[%s2695_s5 + $0x4d0] sm:$0xff] }
  0x64   : > { %517 = vst [vmem:[%s2700_s6 + $0x130] sm:$0xff] %v516_v50  ;;  %v596_v26 = vld [vmem:[%s2695_s5 + $0x4e0] sm:$0xff]  ;;  %v598_v27 = vld [vmem:[%s2695_s5 + $0x4f0] sm:$0xff] }
  0x65   : > { %519 = vst [vmem:[%s2700_s6 + $0x138] sm:$0xff] %v518_v51  ;;  %v600_v28 = vld [vmem:[%s2695_s5 + $0x500] sm:$0xff]  ;;  %v602_v29 = vld [vmem:[%s2695_s5 + $0x510] sm:$0xff] }
  0x66   : > { %521 = vst [vmem:[%s2700_s6 + $0x140] sm:$0xff] %v520_v52  ;;  %v604_v30 = vld [vmem:[%s2695_s5 + $0x520] sm:$0xff]  ;;  %v606_v31 = vld [vmem:[%s2695_s5 + $0x530] sm:$0xff] }
  0x67   : > { %523 = vst [vmem:[%s2700_s6 + $0x148] sm:$0xff] %v522_v53  ;;  %v608_v32 = vld [vmem:[%s2695_s5 + $0x540] sm:$0xff]  ;;  %v610_v33 = vld [vmem:[%s2695_s5 + $0x550] sm:$0xff] }
  0x68   : > { %525 = vst [vmem:[%s2700_s6 + $0x150] sm:$0xff] %v524_v54  ;;  %v612_v34 = vld [vmem:[%s2695_s5 + $0x560] sm:$0xff]  ;;  %v614_v35 = vld [vmem:[%s2695_s5 + $0x570] sm:$0xff] }
  0x69   : > { %527 = vst [vmem:[%s2700_s6 + $0x158] sm:$0xff] %v526_v55  ;;  %v616_v36 = vld [vmem:[%s2695_s5 + $0x580] sm:$0xff]  ;;  %v618_v37 = vld [vmem:[%s2695_s5 + $0x590] sm:$0xff] }
  0x6a   : > { %529 = vst [vmem:[%s2700_s6 + $0x160] sm:$0xff] %v528_v56  ;;  %v620_v38 = vld [vmem:[%s2695_s5 + $0x5a0] sm:$0xff]  ;;  %v622_v39 = vld [vmem:[%s2695_s5 + $0x5b0] sm:$0xff] }
  0x6b   : > { %531 = vst [vmem:[%s2700_s6 + $0x168] sm:$0xff] %v530_v57  ;;  %v624_v40 = vld [vmem:[%s2695_s5 + $0x5c0] sm:$0xff]  ;;  %v626_v41 = vld [vmem:[%s2695_s5 + $0x5d0] sm:$0xff] }
  0x6c   : > { %533 = vst [vmem:[%s2700_s6 + $0x170] sm:$0xff] %v532_v58  ;;  %v628_v42 = vld [vmem:[%s2695_s5 + $0x5e0] sm:$0xff]  ;;  %v630_v43 = vld [vmem:[%s2695_s5 + $0x5f0] sm:$0xff] }
  0x6d   : > { %535 = vst [vmem:[%s2700_s6 + $0x178] sm:$0xff] %v534_v59 }
  0x6e   : > { %537 = vst [vmem:[%s2700_s6 + $0x180] sm:$0xff] %v536_v60 }
  0x6f   : > { %539 = vst [vmem:[%s2700_s6 + $0x188] sm:$0xff] %v538_v61 }
  0x70   : > { %541 = vst [vmem:[%s2700_s6 + $0x190] sm:$0xff] %v540_v62 }
  0x71   : > { %543 = vst [vmem:[%s2700_s6 + $0x198] sm:$0xff] %v542_v63 }
  0x72   : > { %545 = vst [vmem:[%s2700_s6 + $0x1a0] sm:$0xff] %v544_v0 }
  0x73   : > { %547 = vst [vmem:[%s2700_s6 + $0x1a8] sm:$0xff] %v546_v1 }
  0x74   : > { %549 = vst [vmem:[%s2700_s6 + $0x1b0] sm:$0xff] %v548_v2 }
  0x75   : > { %551 = vst [vmem:[%s2700_s6 + $0x1b8] sm:$0xff] %v550_v3 }
  0x76   : > { %553 = vst [vmem:[%s2700_s6 + $0x1c0] sm:$0xff] %v552_v4 }
  0x77   : > { %555 = vst [vmem:[%s2700_s6 + $0x1c8] sm:$0xff] %v554_v5 }
  0x78   : > { %557 = vst [vmem:[%s2700_s6 + $0x1d0] sm:$0xff] %v556_v6 }
  0x79   : > { %559 = vst [vmem:[%s2700_s6 + $0x1d8] sm:$0xff] %v558_v7 }
  0x7a   : > { %561 = vst [vmem:[%s2700_s6 + $0x1e0] sm:$0xff] %v560_v8 }
  0x7b   : > { %563 = vst [vmem:[%s2700_s6 + $0x1e8] sm:$0xff] %v562_v9 }
  0x7c   : > { %565 = vst [vmem:[%s2700_s6 + $0x1f0] sm:$0xff] %v564_v10 }
  0x7d   : > { %567 = vst [vmem:[%s2700_s6 + $0x1f8] sm:$0xff] %v566_v11 }
  0x7e   : > { %569 = vst [vmem:[%s2700_s6 + $0x200] sm:$0xff] %v568_v12 }
  0x7f   : > { %571 = vst [vmem:[%s2700_s6 + $0x208] sm:$0xff] %v570_v13 }
  0x80   : > { %573 = vst [vmem:[%s2700_s6 + $0x210] sm:$0xff] %v572_v14 }
  0x81   : > { %575 = vst [vmem:[%s2700_s6 + $0x218] sm:$0xff] %v574_v15 }
  0x82   : > { %577 = vst [vmem:[%s2700_s6 + $0x220] sm:$0xff] %v576_v16 }
  0x83   : > { %579 = vst [vmem:[%s2700_s6 + $0x228] sm:$0xff] %v578_v17 }
  0x84   : > { %581 = vst [vmem:[%s2700_s6 + $0x230] sm:$0xff] %v580_v18 }
  0x85   : > { %583 = vst [vmem:[%s2700_s6 + $0x238] sm:$0xff] %v582_v19 }
  0x86   : > { %585 = vst [vmem:[%s2700_s6 + $0x240] sm:$0xff] %v584_v20 }
  0x87   : > { %587 = vst [vmem:[%s2700_s6 + $0x248] sm:$0xff] %v586_v21 }
  0x88   : > { %589 = vst [vmem:[%s2700_s6 + $0x250] sm:$0xff] %v588_v22 }
  0x89   : > { %591 = vst [vmem:[%s2700_s6 + $0x258] sm:$0xff] %v590_v23 }
  0x8a   : > { %593 = vst [vmem:[%s2700_s6 + $0x260] sm:$0xff] %v592_v24 }
  0x8b   : > { %595 = vst [vmem:[%s2700_s6 + $0x268] sm:$0xff] %v594_v25 }
  0x8c   : > { %597 = vst [vmem:[%s2700_s6 + $0x270] sm:$0xff] %v596_v26 }
  0x8d   : > { %599 = vst [vmem:[%s2700_s6 + $0x278] sm:$0xff] %v598_v27 }
  0x8e   : > { %601 = vst [vmem:[%s2700_s6 + $0x280] sm:$0xff] %v600_v28 }
  0x8f   : > { %603 = vst [vmem:[%s2700_s6 + $0x288] sm:$0xff] %v602_v29 }
  0x90   : > { %605 = vst [vmem:[%s2700_s6 + $0x290] sm:$0xff] %v604_v30 }
  0x91   : > { %607 = vst [vmem:[%s2700_s6 + $0x298] sm:$0xff] %v606_v31 }
  0x92   : > { %609 = vst [vmem:[%s2700_s6 + $0x2a0] sm:$0xff] %v608_v32 }
  0x93   : > { %611 = vst [vmem:[%s2700_s6 + $0x2a8] sm:$0xff] %v610_v33 }
  0x94   : > { %613 = vst [vmem:[%s2700_s6 + $0x2b0] sm:$0xff] %v612_v34 }
  0x95   : > { %615 = vst [vmem:[%s2700_s6 + $0x2b8] sm:$0xff] %v614_v35 }
  0x96   : > { %617 = vst [vmem:[%s2700_s6 + $0x2c0] sm:$0xff] %v616_v36 }
  0x97   : > { %619 = vst [vmem:[%s2700_s6 + $0x2c8] sm:$0xff] %v618_v37 }
  0x98   : > { %621 = vst [vmem:[%s2700_s6 + $0x2d0] sm:$0xff] %v620_v38 }
  0x99   : > { %623 = vst [vmem:[%s2700_s6 + $0x2d8] sm:$0xff] %v622_v39 }
  0x9a   : > { %625 = vst [vmem:[%s2700_s6 + $0x2e0] sm:$0xff] %v624_v40 }
  0x9b   : > { %627 = vst [vmem:[%s2700_s6 + $0x2e8] sm:$0xff] %v626_v41 }
  0x9c   : > { %629 = vst [vmem:[%s2700_s6 + $0x2f0] sm:$0xff] %v628_v42 }
  0x9d   : > { %631 = vst [vmem:[%s2700_s6 + $0x2f8] sm:$0xff] %v630_v43 }
  0x9e PF: > { %p1826_p0 = scmp.ge.s32.totalorder %s2558_s22, 1  ;;  %p644_p1 = scmp.lt.s32.totalorder %s2558_s22, 7 }
  0xa0   : > { %p645_p2 = pnand %p1826_p0, %p644_p1 }
  0xa1   : > { %s651_s0 = sand.u32 (!%p645_p2), 1, %s2534_s16   ;;  %s658_s23 = sand.u32 (!%p645_p2), 1, %s2526_s14  }
  0xa2   : > { %648 = sbr.rel (%p645_p2) target bundleno = 468 (0x1d4), region = 85  ;;  %s685_s7 = sand.u32 (!%p645_p2), 1, %s2518_s12  }
  0xa3   : > { %s2381_s28 = smul.u32 (!%p645_p2), 96, %s651_s0  ;;  %s1827_s26 = sshll.u32 (!%p645_p2), %s685_s7, 5 }
  0xa4   : > { %s2382_s11 = smul.u32 (!%p645_p2), 768, %s658_s23  ;;  %s1828_s27 = sshll.u32 (!%p645_p2), %s2546_s19, 1 }
  0xa5   : > { %p693_p3 = scmp.lt.s32.totalorder (!%p645_p2), %s1828_s27, 3  ;;  %s2903_s6 = scalar_lea.vmem (!%p645_p2), [#allocation3], %s2381_s28 }
  0xa6   : > { %s2905_s1 = scalar_lea.vmem (!%p645_p2), [#allocation4], %s2382_s11  ;;  %s2907_s25 = scalar_lea.vmem (!%p645_p2), [#allocation5], %s1827_s26 }
  0xa7   : > { %s3250_s27 = smov (!%p693_p3, %s1828_s27), 3  ;;  %p1829_p4 = scmp.ne.s32.totalorder %s2542_s18, 0 }
  0xa8   : > { %s695_s5 = scalar_lea.vmem %s3221_s2, %s3250_s27 }
  0xa9   : > { %702 = sbr.rel (%p1829_p4) target bundleno = 183 (0xb7), region = 97 }
  0xae   : > { %v2560_v44 = vmov 0.0  }
  0xaf   : > { %703 = vst [vmem:[#allocation2 + $0x30] sm:$0xff] %v2560_v44 }
  0xb0   : > { %704 = vst [vmem:[#allocation2] sm:$0xff] %v2560_v44 }
  0xb1   : > { %705 = vst [vmem:[#allocation2 + $0x18] sm:$0xff] %v2560_v44 }
  0xb2   : > { %706 = vst [vmem:[#allocation2 + $0x10] sm:$0xff] %v2560_v44 }
  0xb3   : > { %707 = vst [vmem:[#allocation2 + $0x8] sm:$0xff] %v2560_v44 }
  0xb4   : > { %708 = vst [vmem:[#allocation2 + $0x20] sm:$0xff] %v2560_v44 }
  0xb5   : > { %709 = vst [vmem:[#allocation2 + $0x28] sm:$0xff] %v2560_v44 }
  0xb6   : > { %710 = vst [vmem:[#allocation2 + $0x38] sm:$0xff] %v2560_v44 }
  0xb7 PF: > { %v1936_v45 = vld [vmem:[%s2905_s1 + $0x70] sm:$0xf]  ;;  %v2297_v46 = vld [vmem:[%s2905_s1 + $0x74] sm:$0xf0]  ;;  %v1928_v56 = vld [vmem:[%s2905_s1 + $0x60] sm:$0xf] }
  0xb8   : > { %v2000_v47 = vld [vmem:[%s2905_s1 + $0xf0] sm:$0xf]  ;;  %v1937_v48 = vor.u32 %v2297_v46, %v1936_v45  ;;  %v2313_v49 = vld [vmem:[%s2905_s1 + $0xf4] sm:$0xf0]  ;;  %v2295_v58 = vld [vmem:[%s2905_s1 + $0x64] sm:$0xf0] }
  0xb9   : > { %v2064_v50 = vld [vmem:[%s2905_s1 + $0x170] sm:$0xf]  ;;  %v2329_v51 = vld [vmem:[%s2905_s1 + $0x174] sm:$0xf0]  ;;  %v2001_v52 = vor.u32 %v2313_v49, %v2000_v47  ;;  %v1992_v59 = vld [vmem:[%s2905_s1 + $0xe0] sm:$0xf]  ;;  %v1929_v61 = vor.u32 %v2295_v58, %v1928_v56 }
  0xba   : > { %v2065_v53 = vor.u32 %v2329_v51, %v2064_v50  ;;  %v2128_v54 = vld [vmem:[%s2905_s1 + $0x1f0] sm:$0xf]  ;;  %v2345_v55 = vld [vmem:[%s2905_s1 + $0x1f4] sm:$0xf0]  ;;  %1367 = vmatpush.bf16.msra.mxu0 %v1937_v48  ;;  %v2311_v60 = vld [vmem:[%s2905_s1 + $0xe4] sm:$0xf0] }
  0xbb   : > { %v2129_v57 = vor.u32 %v2345_v55, %v2128_v54  ;;  %1386 = vmatpush.bf16.msra.mxu1 %v2001_v52  ;;  %v1993_v62 = vor.u32 %v2311_v60, %v1992_v59  ;;  %v2056_v63 = vld [vmem:[%s2905_s1 + $0x160] sm:$0xf]  ;;  %v2327_v0 = vld [vmem:[%s2905_s1 + $0x164] sm:$0xf0]  ;;  %v1920_v4 = vld [vmem:[%s2905_s1 + $0x50] sm:$0xf] }
  0xbc   : > { %1405 = vmatpush.bf16.msra.mxu2 %v2065_v53  ;;  %v2120_v1 = vld [vmem:[%s2905_s1 + $0x1e0] sm:$0xf]  ;;  %v2057_v2 = vor.u32 %v2327_v0, %v2056_v63  ;;  %v2343_v3 = vld [vmem:[%s2905_s1 + $0x1e4] sm:$0xf0]  ;;  %v2293_v5 = vld [vmem:[%s2905_s1 + $0x54] sm:$0xf0] }
  0xbd   : > { %1424 = vmatpush.bf16.msra.mxu3 %v2129_v57  ;;  %v2121_v6 = vor.u32 %v2343_v3, %v2120_v1  ;;  %v1984_v7 = vld [vmem:[%s2905_s1 + $0xd0] sm:$0xf]  ;;  %v2309_v8 = vld [vmem:[%s2905_s1 + $0xd4] sm:$0xf0]  ;;  %v1921_v10 = vor.u32 %v2293_v5, %v1920_v4  ;;  %v1912_v16 = vld [vmem:[%s2905_s1 + $0x40] sm:$0xf] }
  0xbe   : > { %v2048_v9 = vld [vmem:[%s2905_s1 + $0x150] sm:$0xf]  ;;  %1368 = vmatpush.bf16.msra.mxu0 %v1929_v61  ;;  %v2325_v11 = vld [vmem:[%s2905_s1 + $0x154] sm:$0xf0]  ;;  %v1985_v14 = vor.u32 %v2309_v8, %v1984_v7  ;;  %v2291_v17 = vld [vmem:[%s2905_s1 + $0x44] sm:$0xf0] }
  0xbf   : > { %v2112_v12 = vld [vmem:[%s2905_s1 + $0x1d0] sm:$0xf]  ;;  %v2341_v13 = vld [vmem:[%s2905_s1 + $0x1d4] sm:$0xf0]  ;;  %1387 = vmatpush.bf16.msra.mxu1 %v1993_v62  ;;  %v2049_v15 = vor.u32 %v2325_v11, %v2048_v9  ;;  %v1976_v18 = vld [vmem:[%s2905_s1 + $0xc0] sm:$0xf]  ;;  %v1913_v25 = vor.u32 %v2291_v17, %v1912_v16 }
  0xc0   : > { %1406 = vmatpush.bf16.msra.mxu2 %v2057_v2  ;;  %v2113_v19 = vor.u32 %v2341_v13, %v2112_v12  ;;  %v2307_v20 = vld [vmem:[%s2905_s1 + $0xc4] sm:$0xf0]  ;;  %v2040_v21 = vld [vmem:[%s2905_s1 + $0x140] sm:$0xf]  ;;  %v1904_v28 = vld [vmem:[%s2905_s1 + $0x30] sm:$0xf] }
  0xc1   : > { %1425 = vmatpush.bf16.msra.mxu3 %v2121_v6  ;;  %v2323_v22 = vld [vmem:[%s2905_s1 + $0x144] sm:$0xf0]  ;;  %v2104_v23 = vld [vmem:[%s2905_s1 + $0x1c0] sm:$0xf]  ;;  %v1977_v26 = vor.u32 %v2307_v20, %v1976_v18  ;;  %v2289_v29 = vld [vmem:[%s2905_s1 + $0x34] sm:$0xf0] }
  0xc2   : > { %v2339_v24 = vld [vmem:[%s2905_s1 + $0x1c4] sm:$0xf0]  ;;  %1369 = vmatpush.bf16.msra.mxu0 %v1921_v10  ;;  %v2041_v27 = vor.u32 %v2323_v22, %v2040_v21  ;;  %v1968_v30 = vld [vmem:[%s2905_s1 + $0xb0] sm:$0xf]  ;;  %v2305_v32 = vld [vmem:[%s2905_s1 + $0xb4] sm:$0xf0]  ;;  %v1905_v37 = vor.u32 %v2289_v29, %v1904_v28 }
  0xc3   : > { %1388 = vmatpush.bf16.msra.mxu1 %v1985_v14  ;;  %v2105_v31 = vor.u32 %v2339_v24, %v2104_v23  ;;  %v2032_v33 = vld [vmem:[%s2905_s1 + $0x130] sm:$0xf]  ;;  %v2321_v34 = vld [vmem:[%s2905_s1 + $0x134] sm:$0xf0]  ;;  %v1969_v38 = vor.u32 %v2305_v32, %v1968_v30  ;;  %v1896_v40 = vld [vmem:[%s2905_s1 + $0x20] sm:$0xf] }
  0xc4   : > { %1407 = vmatpush.bf16.msra.mxu2 %v2049_v15  ;;  %v2096_v35 = vld [vmem:[%s2905_s1 + $0x1b0] sm:$0xf]  ;;  %v2337_v36 = vld [vmem:[%s2905_s1 + $0x1b4] sm:$0xf0]  ;;  %v2033_v39 = vor.u32 %v2321_v34, %v2032_v33  ;;  %v2287_v41 = vld [vmem:[%s2905_s1 + $0x24] sm:$0xf0] }
  0xc5   : > { %1426 = vmatpush.bf16.msra.mxu3 %v2113_v19  ;;  %v1960_v42 = vld [vmem:[%s2905_s1 + $0xa0] sm:$0xf]  ;;  %v2097_v43 = vor.u32 %v2337_v36, %v2096_v35  ;;  %v2303_v44 = vld [vmem:[%s2905_s1 + $0xa4] sm:$0xf0]  ;;  %v1897_v49 = vor.u32 %v2287_v41, %v1896_v40  ;;  %v1888_v52 = vld [vmem:[%s2905_s1 + $0x10] sm:$0xf] }
  0xc6   : > { %1370 = vmatpush.bf16.msra.mxu0 %v1913_v25  ;;  %v2024_v45 = vld [vmem:[%s2905_s1 + $0x120] sm:$0xf]  ;;  %v2319_v46 = vld [vmem:[%s2905_s1 + $0x124] sm:$0xf0]  ;;  %v1961_v50 = vor.u32 %v2303_v44, %v1960_v42  ;;  %v2285_v53 = vld [vmem:[%s2905_s1 + $0x14] sm:$0xf0] }
  0xc7   : > { %1389 = vmatpush.bf16.msra.mxu1 %v1977_v26  ;;  %v2088_v47 = vld [vmem:[%s2905_s1 + $0x1a0] sm:$0xf]  ;;  %v2335_v48 = vld [vmem:[%s2905_s1 + $0x1a4] sm:$0xf0]  ;;  %v2025_v51 = vor.u32 %v2319_v46, %v2024_v45  ;;  %v1952_v54 = vld [vmem:[%s2905_s1 + $0x90] sm:$0xf]  ;;  %v1889_v62 = vor.u32 %v2285_v53, %v1888_v52 }
  0xc8   : > { %1408 = vmatpush.bf16.msra.mxu2 %v2041_v27  ;;  %v2089_v55 = vor.u32 %v2335_v48, %v2088_v47  ;;  %v2301_v56 = vld [vmem:[%s2905_s1 + $0x94] sm:$0xf0]  ;;  %v2016_v57 = vld [vmem:[%s2905_s1 + $0x110] sm:$0xf]  ;;  %v1880_v61 = vld [vmem:[%s2905_s1] sm:$0xf] }
  0xc9   : > { %1427 = vmatpush.bf16.msra.mxu3 %v2105_v31  ;;  %v2317_v58 = vld [vmem:[%s2905_s1 + $0x114] sm:$0xf0]  ;;  %v2080_v59 = vld [vmem:[%s2905_s1 + $0x190] sm:$0xf]  ;;  %v2283_v63 = vld [vmem:[%s2905_s1 + $0x4] sm:$0xf0]  ;;  %v1953_v2 = vor.u32 %v2301_v56, %v1952_v54 }
  0xca   : > { %1371 = vmatpush.bf16.msra.mxu0 %v1905_v37  ;;  %v2333_v60 = vld [vmem:[%s2905_s1 + $0x194] sm:$0xf0]  ;;  %v1944_v0 = vld [vmem:[%s2905_s1 + $0x80] sm:$0xf]  ;;  %v2299_v1 = vld [vmem:[%s2905_s1 + $0x84] sm:$0xf0]  ;;  %v2017_v3 = vor.u32 %v2317_v58, %v2016_v57  ;;  %v1881_v15 = vor.u32 %v2283_v63, %v1880_v61 }
  0xcb   : > { %1390 = vmatpush.bf16.msra.mxu1 %v1969_v38  ;;  %v2008_v4 = vld [vmem:[%s2905_s1 + $0x100] sm:$0xf]  ;;  %v2315_v5 = vld [vmem:[%s2905_s1 + $0x104] sm:$0xf0]  ;;  %v2081_v7 = vor.u32 %v2333_v60, %v2080_v59  ;;  %v2273_v10 = vld [vmem:[%s2903_s6 + $0x14] sm:$0xf0]  ;;  %v1945_v19 = vor.u32 %v2299_v1, %v1944_v0 }
  0xcc   : > { %1409 = vmatpush.bf16.msra.mxu2 %v2033_v39  ;;  %v2072_v6 = vld [vmem:[%s2905_s1 + $0x180] sm:$0xf]  ;;  %v2331_v8 = vld [vmem:[%s2905_s1 + $0x184] sm:$0xf0]  ;;  %v2270_v11 = vld [vmem:[%s2903_s6 + $0x4] sm:$0xf]  ;;  %v2009_v20 = vor.u32 %v2315_v5, %v2008_v4 }
  0xcd   : > { %1428 = vmatpush.bf16.msra.mxu3 %v2097_v43  ;;  %v1832_v9 = vld [vmem:[%s2903_s6] sm:$0xf]  ;;  %v1834_v12 = vld [vmem:[%s2903_s6 + $0x18] sm:$0xf0]  ;;  %v2296_v13 = vld [vmem:[%s2905_s1 + $0x74] sm:$0xf]  ;;  %v2073_v24 = vor.u32 %v2331_v8, %v2072_v6 }
  0xce   : > { %1372 = vmatpush.bf16.msra.mxu0 %v1897_v49  ;;  %v1938_v14 = vld [vmem:[%s2905_s1 + $0x78] sm:$0xf0]  ;;  %v1840_v16 = vld [vmem:[%s2903_s6 + $0x8] sm:$0xf]  ;;  %v2256_v17 = vld [vmem:[%s2905_s1 + $0x2f0] sm:$0xf]  ;;  %v2989_v29 = vor.u32 %v2273_v10, %v1832_v9  ;;  %v2994_v34 = vor.u32 %v2270_v11, %v1834_v12 }
  0xcf   : > { %1391 = vmatpush.bf16.msra.mxu1 %v1961_v50  ;;  %v2377_v18 = vld [vmem:[%s2905_s1 + $0x2f4] sm:$0xf0]  ;;  %v2274_v21 = vld [vmem:[%s2903_s6 + $0x1c] sm:$0xf0]  ;;  %v2271_v22 = vld [vmem:[%s2903_s6 + $0xc] sm:$0xf]  ;;  %v1941_v25 = vor.u32 %v2296_v13, %v1938_v14 }
  0xd0   : > { %1410 = vmatpush.bf16.msra.mxu2 %v2025_v51  ;;  %v1842_v23 = vld [vmem:[%s2903_s6 + $0x20] sm:$0xf0]  ;;  %v2192_v26 = vld [vmem:[%s2905_s1 + $0x270] sm:$0xf]  ;;  %v2361_v27 = vld [vmem:[%s2905_s1 + $0x274] sm:$0xf0]  ;;  %v2257_v30 = vor.u32 %v2377_v18, %v2256_v17  ;;  %v2996_v35 = vor.u32 %v2274_v21, %v1840_v16 }
  0xd1   : > { %1429 = vmatpush.bf16.msra.mxu3 %v2089_v55  ;;  %v2312_v28 = vld [vmem:[%s2905_s1 + $0xf4] sm:$0xf]  ;;  %v2002_v31 = vld [vmem:[%s2905_s1 + $0xf8] sm:$0xf0]  ;;  %v2294_v32 = vld [vmem:[%s2905_s1 + $0x64] sm:$0xf]  ;;  %v3000_v38 = vor.u32 %v2271_v22, %v1842_v23  ;;  %v2193_v39 = vor.u32 %v2361_v27, %v2192_v26 }
  0xd2   : > { %1373 = vmatpush.bf16.msra.mxu0 %v1889_v62  ;;  %v1930_v33 = vld [vmem:[%s2905_s1 + $0x68] sm:$0xf0]  ;;  %v2248_v36 = vld [vmem:[%s2905_s1 + $0x2e0] sm:$0xf]  ;;  %v2375_v37 = vld [vmem:[%s2905_s1 + $0x2e4] sm:$0xf0]  ;;  %v2005_v40 = vor.u32 %v2312_v28, %v2002_v31 }
  0xd3   : > { %1392 = vmatpush.bf16.msra.mxu1 %v1953_v2  ;;  %v1933_v41 = vor.u32 %v2294_v32, %v1930_v33  ;;  %v2184_v42 = vld [vmem:[%s2905_s1 + $0x260] sm:$0xf]  ;;  %v2359_v43 = vld [vmem:[%s2905_s1 + $0x264] sm:$0xf0]  ;;  %v2310_v44 = vld [vmem:[%s2905_s1 + $0xe4] sm:$0xf]  ;;  %v2249_v45 = vor.u32 %v2375_v37, %v2248_v36 }
  0xd4   : > { %1411 = vmatpush.bf16.msra.mxu2 %v2017_v3  ;;  %v1994_v46 = vld [vmem:[%s2905_s1 + $0xe8] sm:$0xf0]  ;;  %v2292_v47 = vld [vmem:[%s2905_s1 + $0x54] sm:$0xf]  ;;  %v1922_v48 = vld [vmem:[%s2905_s1 + $0x58] sm:$0xf0]  ;;  %v2185_v51 = vor.u32 %v2359_v43, %v2184_v42 }
  0xd5   : > { %1430 = vmatpush.bf16.msra.mxu3 %v2081_v7  ;;  %v2240_v49 = vld [vmem:[%s2905_s1 + $0x2d0] sm:$0xf]  ;;  %v2373_v50 = vld [vmem:[%s2905_s1 + $0x2d4] sm:$0xf0]  ;;  %v1997_v52 = vor.u32 %v2310_v44, %v1994_v46  ;;  %v1925_v53 = vor.u32 %v2292_v47, %v1922_v48  ;;  %v2308_v56 = vld [vmem:[%s2905_s1 + $0xd4] sm:$0xf] }
  0xd6   : > { %1374 = vmatpush.bf16.msra.mxu0 %v1881_v15  ;;  %v2176_v54 = vld [vmem:[%s2905_s1 + $0x250] sm:$0xf]  ;;  %v2357_v55 = vld [vmem:[%s2905_s1 + $0x254] sm:$0xf0]  ;;  %v2241_v57 = vor.u32 %v2373_v50, %v2240_v49  ;;  %v1986_v58 = vld [vmem:[%s2905_s1 + $0xd8] sm:$0xf0] }
  0xd7   : > { %1393 = vmatpush.bf16.msra.mxu1 %v1945_v19  ;;  %v2290_v59 = vld [vmem:[%s2905_s1 + $0x44] sm:$0xf]  ;;  %v1914_v60 = vld [vmem:[%s2905_s1 + $0x48] sm:$0xf0]  ;;  %v2232_v61 = vld [vmem:[%s2905_s1 + $0x2c0] sm:$0xf]  ;;  %v2177_v63 = vor.u32 %v2357_v55, %v2176_v54  ;;  %v1989_v3 = vor.u32 %v2308_v56, %v1986_v58 }
  0xd8   : > { %1412 = vmatpush.bf16.msra.mxu2 %v2009_v20  ;;  %v2371_v62 = vld [vmem:[%s2905_s1 + $0x2c4] sm:$0xf0]  ;;  %v2168_v0 = vld [vmem:[%s2905_s1 + $0x240] sm:$0xf]  ;;  %v2306_v2 = vld [vmem:[%s2905_s1 + $0xc4] sm:$0xf]  ;;  %v1917_v4 = vor.u32 %v2290_v59, %v1914_v60 }
  0xd9   : > { %1431 = vmatpush.bf16.msra.mxu3 %v2073_v24  ;;  %1375 = vmatmul.bf16.vlgmr.msra.gmra.mxu0 %v2989_v29  ;;  %v2355_v1 = vld [vmem:[%s2905_s1 + $0x244] sm:$0xf0]  ;;  %v1978_v5 = vld [vmem:[%s2905_s1 + $0xc8] sm:$0xf0]  ;;  %v1856_v6 = vld [vmem:[%s2903_s6 + $0x30] sm:$0xf]  ;;  %v2233_v8 = vor.u32 %v2371_v62, %v2232_v61 }
  0xda   : > { %1394 = vmatmul.bf16.vlgmr.msra.gmra.mxu1 %v2994_v34  ;;  %1443 = vmatpush.bf16.msrb.mxu0 %v2193_v39  ;;  %v2279_v7 = vld [vmem:[%s2903_s6 + $0x44] sm:$0xf0]  ;;  %v2276_v9 = vld [vmem:[%s2903_s6 + $0x34] sm:$0xf]  ;;  %v1858_v10 = vld [vmem:[%s2903_s6 + $0x48] sm:$0xf0]  ;;  %v2169_v16 = vor.u32 %v2355_v1, %v2168_v0  ;;  %v1981_v20 = vor.u32 %v2306_v2, %v1978_v5 }
  0xdb   : > { %1462 = vmatpush.bf16.msrb.mxu1 %v2257_v30  ;;  %1413 = vmatmul.bf16.vlgmr.msra.gmra.mxu2 %v2996_v35  ;;  %v2288_v11 = vld [vmem:[%s2905_s1 + $0x34] sm:$0xf]  ;;  %v1906_v12 = vld [vmem:[%s2905_s1 + $0x38] sm:$0xf0]  ;;  %v1864_v13 = vld [vmem:[%s2903_s6 + $0x38] sm:$0xf]  ;;  %v3046_v31 = vor.u32 %v2276_v9, %v1858_v10 }
  0xdc   : > { %1481 = vmatpush.bf16.msrb.mxu2 %v1941_v25  ;;  %1432 = vmatmul.bf16.vlgmr.msra.gmra.mxu3 %v3000_v38  ;;  %v2224_v14 = vld [vmem:[%s2905_s1 + $0x2b0] sm:$0xf]  ;;  %v2369_v15 = vld [vmem:[%s2905_s1 + $0x2b4] sm:$0xf0]  ;;  %v2277_v18 = vld [vmem:[%s2903_s6 + $0x3c] sm:$0xf]  ;;  %v1909_v21 = vor.u32 %v2288_v11, %v1906_v12  ;;  %v3041_v25 = vor.u32 %v2279_v7, %v1856_v6 }
  0xdd   : > { %1500 = vmatpush.bf16.msrb.mxu3 %v2005_v40  ;;  %v2280_v17 = vld [vmem:[%s2903_s6 + $0x4c] sm:$0xf0]  ;;  %v1866_v19 = vld [vmem:[%s2903_s6 + $0x50] sm:$0xf0]  ;;  %v2353_v23 = vld [vmem:[%s2905_s1 + $0x234] sm:$0xf0]  ;;  %v2225_v26 = vor.u32 %v2369_v15, %v2224_v14 }
  0xde   : > { %1444 = vmatpush.bf16.msrb.mxu0 %v2185_v51  ;;  %v2160_v22 = vld [vmem:[%s2905_s1 + $0x230] sm:$0xf]  ;;  %v2304_v24 = vld [vmem:[%s2905_s1 + $0xb4] sm:$0xf]  ;;  %v1970_v27 = vld [vmem:[%s2905_s1 + $0xb8] sm:$0xf0]  ;;  %v3048_v32 = vor.u32 %v2280_v17, %v1864_v13  ;;  %v3052_v37 = vor.u32 %v2277_v18, %v1866_v19 }
  0xdf   : > { %1463 = vmatpush.bf16.msrb.mxu1 %v2249_v45  ;;  %v2286_v28 = vld [vmem:[%s2905_s1 + $0x24] sm:$0xf]  ;;  %v1898_v30 = vld [vmem:[%s2905_s1 + $0x28] sm:$0xf0]  ;;  %v2216_v33 = vld [vmem:[%s2905_s1 + $0x2a0] sm:$0xf]  ;;  %v2161_v39 = vor.u32 %v2353_v23, %v2160_v22  ;;  %v1973_v40 = vor.u32 %v2304_v24, %v1970_v27 }
  0xe0   : > { %1482 = vmatpush.bf16.msrb.mxu2 %v1933_v41  ;;  %v2367_v36 = vld [vmem:[%s2905_s1 + $0x2a4] sm:$0xf0]  ;;  %v1901_v41 = vor.u32 %v2286_v28, %v1898_v30  ;;  %v2152_v42 = vld [vmem:[%s2905_s1 + $0x220] sm:$0xf]  ;;  %v2302_v44 = vld [vmem:[%s2905_s1 + $0xa4] sm:$0xf] }
  0xe1   : > { %1501 = vmatpush.bf16.msrb.mxu3 %v1997_v52  ;;  %v2351_v43 = vld [vmem:[%s2905_s1 + $0x224] sm:$0xf0]  ;;  %v2217_v45 = vor.u32 %v2367_v36, %v2216_v33  ;;  %v1962_v46 = vld [vmem:[%s2905_s1 + $0xa8] sm:$0xf0]  ;;  %v2284_v47 = vld [vmem:[%s2905_s1 + $0x14] sm:$0xf] }
  0xe2   : > { %1445 = vmatpush.bf16.msrb.mxu0 %v2177_v63  ;;  %v1890_v48 = vld [vmem:[%s2905_s1 + $0x18] sm:$0xf0]  ;;  %v2208_v49 = vld [vmem:[%s2905_s1 + $0x290] sm:$0xf]  ;;  %v2365_v50 = vld [vmem:[%s2905_s1 + $0x294] sm:$0xf0]  ;;  %v2153_v51 = vor.u32 %v2351_v43, %v2152_v42 }
  0xe3   : > { %1464 = vmatpush.bf16.msrb.mxu1 %v2241_v57  ;;  %v2144_v52 = vld [vmem:[%s2905_s1 + $0x210] sm:$0xf]  ;;  %v1893_v54 = vor.u32 %v2284_v47, %v1890_v48  ;;  %v2349_v55 = vld [vmem:[%s2905_s1 + $0x214] sm:$0xf0]  ;;  %v2300_v56 = vld [vmem:[%s2905_s1 + $0x94] sm:$0xf]  ;;  %v2209_v58 = vor.u32 %v2365_v50, %v2208_v49 }
  0xe4   : > { %1483 = vmatpush.bf16.msrb.mxu2 %v1925_v53  ;;  %v1965_v53 = vor.u32 %v2302_v44, %v1962_v46  ;;  %v1954_v57 = vld [vmem:[%s2905_s1 + $0x98] sm:$0xf0]  ;;  %v2282_v59 = vld [vmem:[%s2905_s1 + $0x4] sm:$0xf]  ;;  %v1882_v60 = vld [vmem:[%s2905_s1 + $0x8] sm:$0xf0]  ;;  %v2145_v1 = vor.u32 %v2349_v55, %v2144_v52 }
  0xe5   : > { %1502 = vmatpush.bf16.msrb.mxu3 %v1989_v3  ;;  %v2200_v61 = vld [vmem:[%s2905_s1 + $0x280] sm:$0xf]  ;;  %v2363_v62 = vld [vmem:[%s2905_s1 + $0x284] sm:$0xf0]  ;;  %v2360_v63 = vld [vmem:[%s2905_s1 + $0x274] sm:$0xf]  ;;  %v1957_v5 = vor.u32 %v2300_v56, %v1954_v57  ;;  %v1885_v6 = vor.u32 %v2282_v59, %v1882_v60 }
  0xe6   : > { %1446 = vmatpush.bf16.msrb.mxu0 %v2169_v16  ;;  %v2194_v0 = vld [vmem:[%s2905_s1 + $0x278] sm:$0xf0]  ;;  %v2136_v2 = vld [vmem:[%s2905_s1 + $0x200] sm:$0xf]  ;;  %v2344_v3 = vld [vmem:[%s2905_s1 + $0x1f4] sm:$0xf]  ;;  %v2201_v10 = vor.u32 %v2363_v62, %v2200_v61 }
  0xe7   : > { %1465 = vmatpush.bf16.msrb.mxu1 %v2233_v8  ;;  %v2347_v7 = vld [vmem:[%s2905_s1 + $0x204] sm:$0xf0]  ;;  %v2298_v8 = vld [vmem:[%s2905_s1 + $0x84] sm:$0xf]  ;;  %v1946_v9 = vld [vmem:[%s2905_s1 + $0x88] sm:$0xf0]  ;;  %v2197_v12 = vor.u32 %v2360_v63, %v2194_v0 }
  0xe8   : > { %1484 = vmatpush.bf16.msrb.mxu2 %v1917_v4  ;;  %v2130_v4 = vld [vmem:[%s2905_s1 + $0x1f8] sm:$0xf0]  ;;  %v1848_v11 = vld [vmem:[%s2903_s6 + $0x10] sm:$0xf]  ;;  %v2328_v13 = vld [vmem:[%s2905_s1 + $0x174] sm:$0xf]  ;;  %v1949_v24 = vor.u32 %v2298_v8, %v1946_v9 }
  0xe9   : > { %1503 = vmatpush.bf16.msrb.mxu3 %v1981_v20  ;;  %1380 = vmatmul.bf16.gmra.mxu0 %v3041_v25  ;;  %v2066_v14 = vld [vmem:[%s2905_s1 + $0x178] sm:$0xf0]  ;;  %v2376_v15 = vld [vmem:[%s2905_s1 + $0x2f4] sm:$0xf]  ;;  %v2133_v16 = vor.u32 %v2344_v3, %v2130_v4  ;;  %v2358_v18 = vld [vmem:[%s2905_s1 + $0x264] sm:$0xf]  ;;  %v2137_v20 = vor.u32 %v2347_v7, %v2136_v2 }
  0xea   : > { %1399 = vmatmul.bf16.gmra.mxu1 %v3046_v31  ;;  %1447 = vmatpush.bf16.msrb.mxu0 %v2161_v39  ;;  %v2258_v17 = vld [vmem:[%s2905_s1 + $0x2f8] sm:$0xf0]  ;;  %v2186_v19 = vld [vmem:[%s2905_s1 + $0x268] sm:$0xf0]  ;;  %v2272_v22 = vld [vmem:[%s2903_s6 + $0x14] sm:$0xf] }
  0xeb   : > { %1466 = vmatpush.bf16.msrb.mxu1 %v2225_v26  ;;  %1418 = vmatmul.bf16.gmra.mxu2 %v3048_v32  ;;  %v1850_v23 = vld [vmem:[%s2903_s6 + $0x28] sm:$0xf0]  ;;  %v2069_v26 = vor.u32 %v2328_v13, %v2066_v14  ;;  %v2326_v27 = vld [vmem:[%s2905_s1 + $0x164] sm:$0xf]  ;;  %v2261_v30 = vor.u32 %v2376_v15, %v2258_v17  ;;  %v2189_v33 = vor.u32 %v2358_v18, %v2186_v19  ;;  %v2356_v44 = vld [vmem:[%s2905_s1 + $0x254] sm:$0xf] }
  0xec   : > { %1485 = vmatpush.bf16.msrb.mxu2 %v1909_v21  ;;  %1437 = vmatmul.bf16.gmra.mxu3 %v3052_v37  ;;  %v2275_v21 = vld [vmem:[%s2903_s6 + $0x24] sm:$0xf0]  ;;  %v2058_v28 = vld [vmem:[%s2905_s1 + $0x168] sm:$0xf0]  ;;  %v2342_v36 = vld [vmem:[%s2905_s1 + $0x1e4] sm:$0xf]  ;;  %v3099_v42 = vor.u32 %v2272_v22, %v1850_v23 }
  0xed   : > { %1504 = vmatpush.bf16.msrb.mxu3 %v1973_v40  ;;  %v2122_v39 = vld [vmem:[%s2905_s1 + $0x1e8] sm:$0xf0]  ;;  %v2374_v40 = vld [vmem:[%s2905_s1 + $0x2e4] sm:$0xf]  ;;  %v2061_v46 = vor.u32 %v2326_v27, %v2058_v28  ;;  %v2324_v48 = vld [vmem:[%s2905_s1 + $0x154] sm:$0xf] }
  0xee   : > { %1448 = vmatpush.bf16.msrb.mxu0 %v2153_v51  ;;  %v2250_v43 = vld [vmem:[%s2905_s1 + $0x2e8] sm:$0xf0]  ;;  %v2125_v47 = vor.u32 %v2342_v36, %v2122_v39  ;;  %v2050_v49 = vld [vmem:[%s2905_s1 + $0x158] sm:$0xf0]  ;;  %v2340_v52 = vld [vmem:[%s2905_s1 + $0x1d4] sm:$0xf] }
  0xef   : > { %1467 = vmatpush.bf16.msrb.mxu1 %v2217_v45  ;;  %v2178_v45 = vld [vmem:[%s2905_s1 + $0x258] sm:$0xf0]  ;;  %v2253_v50 = vor.u32 %v2374_v40, %v2250_v43  ;;  %v2354_v56 = vld [vmem:[%s2905_s1 + $0x244] sm:$0xf]  ;;  %v2170_v57 = vld [vmem:[%s2905_s1 + $0x248] sm:$0xf0] }
  0xf0   : > { %1486 = vmatpush.bf16.msrb.mxu2 %v1901_v41  ;;  %v3097_v41 = vor.u32 %v2275_v21, %v1848_v11  ;;  %v2181_v51 = vor.u32 %v2356_v44, %v2178_v45  ;;  %v2242_v55 = vld [vmem:[%s2905_s1 + $0x2d8] sm:$0xf0]  ;;  %v2322_v60 = vld [vmem:[%s2905_s1 + $0x144] sm:$0xf]  ;;  %v2042_v61 = vld [vmem:[%s2905_s1 + $0x148] sm:$0xf0]  ;;  %v2173_v63 = vor.u32 %v2354_v56, %v2170_v57 }
  0xf1   : > { %1505 = vmatpush.bf16.msrb.mxu3 %v1965_v53  ;;  %v2114_v53 = vld [vmem:[%s2905_s1 + $0x1d8] sm:$0xf0]  ;;  %v2338_v0 = vld [vmem:[%s2905_s1 + $0x1c4] sm:$0xf]  ;;  %v2352_v2 = vld [vmem:[%s2905_s1 + $0x234] sm:$0xf]  ;;  %v2045_v4 = vor.u32 %v2322_v60, %v2042_v61 }
  0xf2   : > { %1449 = vmatpush.bf16.msrb.mxu0 %v2145_v1  ;;  %v2117_v59 = vor.u32 %v2340_v52, %v2114_v53  ;;  %v2106_v1 = vld [vmem:[%s2905_s1 + $0x1c8] sm:$0xf0]  ;;  %v2162_v3 = vld [vmem:[%s2905_s1 + $0x238] sm:$0xf0]  ;;  %v1872_v9 = vld [vmem:[%s2903_s6 + $0x40] sm:$0xf] }
  0xf3   : > { %1468 = vmatpush.bf16.msrb.mxu1 %v2209_v58  ;;  %v2053_v58 = vor.u32 %v2324_v48, %v2050_v49  ;;  %v2034_v7 = vld [vmem:[%s2905_s1 + $0x138] sm:$0xf0]  ;;  %v2336_v11 = vld [vmem:[%s2905_s1 + $0x1b4] sm:$0xf]  ;;  %v2350_v15 = vld [vmem:[%s2905_s1 + $0x224] sm:$0xf] }
  0xf4   : > { %1487 = vmatpush.bf16.msrb.mxu2 %v1893_v54  ;;  %v2372_v54 = vld [vmem:[%s2905_s1 + $0x2d4] sm:$0xf]  ;;  %v2226_v14 = vld [vmem:[%s2905_s1 + $0x2b8] sm:$0xf0]  ;;  %v2281_v17 = vld [vmem:[%s2903_s6 + $0x54] sm:$0xf0] }
  0xf5   : > { %1506 = vmatpush.bf16.msrb.mxu3 %v1957_v5  ;;  %v2245_v62 = vor.u32 %v2372_v54, %v2242_v55  ;;  %v2109_v5 = vor.u32 %v2338_v0, %v2106_v1  ;;  %v2368_v13 = vld [vmem:[%s2905_s1 + $0x2b4] sm:$0xf]  ;;  %v2278_v18 = vld [vmem:[%s2903_s6 + $0x44] sm:$0xf]  ;;  %v1874_v19 = vld [vmem:[%s2903_s6 + $0x58] sm:$0xf0] }
  0xf6   : > { %1450 = vmatpush.bf16.msrb.mxu0 %v2137_v20  ;;  %v2318_v22 = vld [vmem:[%s2905_s1 + $0x124] sm:$0xf]  ;;  %v2026_v23 = vld [vmem:[%s2905_s1 + $0x128] sm:$0xf0]  ;;  %v1877_v36 = vor.u32 %v2278_v18, %v1874_v19  ;;  %v2348_v40 = vld [vmem:[%s2905_s1 + $0x214] sm:$0xf] }
  0xf7   : > { %1469 = vmatpush.bf16.msrb.mxu1 %v2201_v10  ;;  %v2165_v10 = vor.u32 %v2352_v2, %v2162_v3  ;;  %v2334_v27 = vld [vmem:[%s2905_s1 + $0x1a4] sm:$0xf]  ;;  %v2090_v28 = vld [vmem:[%s2905_s1 + $0x1a8] sm:$0xf0]  ;;  %v2146_v43 = vld [vmem:[%s2905_s1 + $0x218] sm:$0xf0]  ;;  %v2029_v44 = vor.u32 %v2318_v22, %v2026_v23 }
  0xf8   : > { %1488 = vmatpush.bf16.msrb.mxu2 %v1885_v6  ;;  %v2320_v6 = vld [vmem:[%s2905_s1 + $0x134] sm:$0xf]  ;;  %v2218_v39 = vld [vmem:[%s2905_s1 + $0x2a8] sm:$0xf0]  ;;  %v2093_v45 = vor.u32 %v2334_v27, %v2090_v28  ;;  %v2149_v49 = vor.u32 %v2348_v40, %v2146_v43  ;;  %v2210_v53 = vld [vmem:[%s2905_s1 + $0x298] sm:$0xf0] }
  0xf9   : > { %1507 = vmatpush.bf16.msrb.mxu3 %v1949_v24  ;;  %1451 = vmatmul.bf16.vlgmr.msrb.gmra.mxu0 %v3097_v41  ;;  %v2037_v20 = vor.u32 %v2320_v6, %v2034_v7  ;;  %v2229_v24 = vor.u32 %v2368_v13, %v2226_v14  ;;  %v2364_v52 = vld [vmem:[%s2905_s1 + $0x294] sm:$0xf]  ;;  %v2346_v54 = vld [vmem:[%s2905_s1 + $0x204] sm:$0xf]  ;;  %v2138_v55 = vld [vmem:[%s2905_s1 + $0x208] sm:$0xf0] }
  0xfa   : > { %1519 = vmatpush.bf16.msra.mxu0 %v2069_v26  ;;  %1470 = vmatmul.bf16.vlgmr.msrb.gmra.mxu1 %v3099_v42  ;;  %v2141_v60 = vor.u32 %v2346_v54, %v2138_v55  ;;  %v2010_v61 = vld [vmem:[%s2905_s1 + $0x108] sm:$0xf0]  ;;  %v2362_v0 = vld [vmem:[%s2905_s1 + $0x284] sm:$0xf]  ;;  %v711_v18 = vld [vmem:[#allocation2 + $0x30] sm:$0xff]  ;;  %p2262_p5 = scmp.ne.s32.totalorder %s2542_s18, 2 }
  0xfb   : > { %1538 = vmatpush.bf16.msra.mxu1 %v2133_v16  ;;  %1489 = vmatmul.bf16.vlgmr.msrb.gmra.mxu2 %v2989_v29  ;;  %v2370_v29 = vld [vmem:[%s2905_s1 + $0x2c4] sm:$0xf]  ;;  %v2154_v16 = vld [vmem:[%s2905_s1 + $0x228] sm:$0xf0] }
  0xfc   : > { %1557 = vmatpush.bf16.msra.mxu2 %v2197_v12  ;;  %1508 = vmatmul.bf16.vlgmr.msrb.gmra.mxu3 %v2994_v34  ;;  %v2234_v34 = vld [vmem:[%s2905_s1 + $0x2c8] sm:$0xf0]  ;;  %v2098_v12 = vld [vmem:[%s2905_s1 + $0x1b8] sm:$0xf0]  ;;  %v2157_v26 = vor.u32 %v2350_v15, %v2154_v16 }
  0xfd   : > { %1576 = vmatpush.bf16.msra.mxu3 %v2261_v30  ;;  %v2237_v8 = vor.u32 %v2370_v29, %v2234_v34  ;;  %v2101_v21 = vor.u32 %v2336_v11, %v2098_v12  ;;  %v2366_v30 = vld [vmem:[%s2905_s1 + $0x2a4] sm:$0xf]  ;;  %v2202_v1 = vld [vmem:[%s2905_s1 + $0x288] sm:$0xf0] }
  0xfe   : > { %1520 = vmatpush.bf16.msra.mxu0 %v2061_v46  ;;  %v2316_v46 = vld [vmem:[%s2905_s1 + $0x114] sm:$0xf]  ;;  %v2221_v48 = vor.u32 %v2366_v30, %v2218_v39 }
  0xff   : > { %1539 = vmatpush.bf16.msra.mxu1 %v2125_v47  ;;  %v2018_v47 = vld [vmem:[%s2905_s1 + $0x118] sm:$0xf0] }
 0x100   : > { %1558 = vmatpush.bf16.msra.mxu2 %v2189_v33  ;;  %v1873_v33 = vor.u32 %v2281_v17, %v1872_v9  ;;  %v2021_v56 = vor.u32 %v2316_v46, %v2018_v47 }
 0x101   : > { %1577 = vmatpush.bf16.msra.mxu3 %v2253_v50  ;;  %v2332_v50 = vld [vmem:[%s2905_s1 + $0x194] sm:$0xf] }
 0x102   : > { %1521 = vmatpush.bf16.msra.mxu0 %v2053_v58  ;;  %v2314_v58 = vld [vmem:[%s2905_s1 + $0x104] sm:$0xf] }
 0x103   : > { %1540 = vmatpush.bf16.msra.mxu1 %v2117_v59  ;;  %v2213_v59 = vor.u32 %v2364_v52, %v2210_v53  ;;  %v2013_v29 = vor.u32 %v2314_v58, %v2010_v61 }
 0x104   : > { %1559 = vmatpush.bf16.msra.mxu2 %v2181_v51  ;;  %v2082_v51 = vld [vmem:[%s2905_s1 + $0x198] sm:$0xf0] }
 0x105   : > { %1578 = vmatpush.bf16.msra.mxu3 %v2245_v62  ;;  %v2085_v57 = vor.u32 %v2332_v50, %v2082_v51  ;;  %v2330_v62 = vld [vmem:[%s2905_s1 + $0x184] sm:$0xf]  ;;  %v715_v50 = vld [vmem:[#allocation2 + $0x8] sm:$0xff] }
 0x106   : > { %1522 = vmatpush.bf16.msra.mxu0 %v2045_v4 }
 0x107   : > { %1541 = vmatpush.bf16.msra.mxu1 %v2109_v5 }
 0x108   : > { %1560 = vmatpush.bf16.msra.mxu2 %v2173_v63  ;;  %v2074_v63 = vld [vmem:[%s2905_s1 + $0x188] sm:$0xf0] }
 0x109   : > { %1579 = vmatpush.bf16.msra.mxu3 %v2237_v8  ;;  %1456 = vmatmul.bf16.gmra.mxu0 %v1873_v33 }
 0x10a   : > { %1523 = vmatpush.bf16.msra.mxu0 %v2037_v20  ;;  %1475 = vmatmul.bf16.gmra.mxu1 %v1877_v36 }
 0x10b   : > { %1542 = vmatpush.bf16.msra.mxu1 %v2101_v21  ;;  %1494 = vmatmul.bf16.gmra.mxu2 %v3041_v25  ;;  %v2077_v25 = vor.u32 %v2330_v62, %v2074_v63 }
 0x10c   : > { %1561 = vmatpush.bf16.msra.mxu2 %v2165_v10  ;;  %1513 = vmatmul.bf16.gmra.mxu3 %v3046_v31  ;;  %v2205_v31 = vor.u32 %v2362_v0, %v2202_v1 }
 0x10d   : > { %1580 = vmatpush.bf16.msra.mxu3 %v2229_v24 }
 0x10e   : > { %1524 = vmatpush.bf16.msra.mxu0 %v2029_v44 }
 0x10f   : > { %1543 = vmatpush.bf16.msra.mxu1 %v2093_v45 }
 0x110   : > { %1562 = vmatpush.bf16.msra.mxu2 %v2157_v26 }
 0x111   : > { %1581 = vmatpush.bf16.msra.mxu3 %v2221_v48 }
 0x112   : > { %1525 = vmatpush.bf16.msra.mxu0 %v2021_v56 }
 0x113   : > { %1544 = vmatpush.bf16.msra.mxu1 %v2085_v57 }
 0x114   : > { %1563 = vmatpush.bf16.msra.mxu2 %v2149_v49 }
 0x115   : > { %1582 = vmatpush.bf16.msra.mxu3 %v2213_v59 }
 0x116   : > { %1526 = vmatpush.bf16.msra.mxu0 %v2013_v29 }
 0x117   : > { %1545 = vmatpush.bf16.msra.mxu1 %v2077_v25 }
 0x118   : > { %1564 = vmatpush.bf16.msra.mxu2 %v2141_v60  ;;  %v717_v60 = vld [vmem:[#allocation2 + $0x28] sm:$0xff] }
 0x119   : > { %1583 = vmatpush.bf16.msra.mxu3 %v2205_v31  ;;  %1527 = vmatmul.bf16.vlgmr.msra.gmra.mxu0 %v2996_v35 }
 0x11a   : > { %1546 = vmatmul.bf16.vlgmr.msra.gmra.mxu1 %v3000_v38 }
 0x11b   : > { %1565 = vmatmul.bf16.vlgmr.msra.gmra.mxu2 %v3097_v41 }
 0x11c   : > { %1584 = vmatmul.bf16.vlgmr.msra.gmra.mxu3 %v3099_v42 }
 0x129   : > { %1532 = vmatmul.bf16.gmra.mxu0 %v3048_v32 }
 0x12a   : > { %1551 = vmatmul.bf16.gmra.mxu1 %v3052_v37 }
 0x12b   : > { %1570 = vmatmul.bf16.gmra.mxu2 %v1873_v33  ;;  %v713_v33 = vld [vmem:[#allocation2 + $0x18] sm:$0xff] }
 0x12c   : > { %1589 = vmatmul.bf16.gmra.mxu3 %v1877_v36 }
 0x156   : > { %v1376_v34 = vpop.f32.mrf.mxu0 }
 0x157   : > { %v1395_v2 = vpop.f32.mrf.mxu1 }
 0x158   : > { %v1396_v11 = vadd.f32 %v1395_v2, %v1376_v34 }
 0x15e   : > { %v1414_v3 = vpop.f32.mrf.mxu2  ;;  %v1378_v5 = vpop.f32.mrf.mxu0 }
 0x15f   : > { %v1433_v4 = vpop.f32.mrf.mxu3  ;;  %v1397_v6 = vpop.f32.mrf.mxu1  ;;  %v1415_v32 = vadd.f32 %v1414_v3, %v1396_v11 }
 0x160   : > { %v1398_v16 = vadd.f32 %v1397_v6, %v1378_v5 }
 0x161   : > { %v1434_v37 = vadd.f32 %v1433_v4, %v1415_v32 }
 0x166   : > { %v1416_v7 = vpop.f32.mrf.mxu2  ;;  %v1381_v8 = vpop.f32.mrf.mxu0 }
 0x167   : > { %v1435_v35 = vpop.f32.mrf.mxu3  ;;  %v1400_v38 = vpop.f32.mrf.mxu1  ;;  %v1417_v19 = vadd.f32 %v1416_v7, %v1398_v16  ;;  %v712_v7 = vld [vmem:[#allocation2] sm:$0xff] }
 0x168   : > { %v1401_v28 = vadd.f32 %v1400_v38, %v1381_v8 }
 0x169   : > { %v1436_v22 = vadd.f32 %v1435_v35, %v1417_v19 }
 0x16e   : > { %v1419_v9 = vpop.f32.mrf.mxu2  ;;  %v1383_v10 = vpop.f32.mrf.mxu0 }
 0x16f   : > { %v1438_v41 = vpop.f32.mrf.mxu3  ;;  %v1402_v42 = vpop.f32.mrf.mxu1  ;;  %v1420_v36 = vadd.f32 %v1419_v9, %v1401_v28 }
 0x170   : > { %v1403_v48 = vadd.f32 %v1402_v42, %v1383_v10 }
 0x171   : > { %v1439_v43 = vadd.f32 %v1438_v41, %v1420_v36 }
 0x176   : > { %v1421_v12 = vpop.f32.mrf.mxu2  ;;  %v1452_v14 = vpop.f32.mrf.mxu0 }
 0x177   : > { %v1440_v13 = vpop.f32.mrf.mxu3  ;;  %v1471_v15 = vpop.f32.mrf.mxu1  ;;  %v1453_v17 = vadd.f32 %v1452_v14, %v1434_v37  ;;  %v1422_v51 = vadd.f32 %v1421_v12, %v1403_v48  ;;  %v714_v37 = vld [vmem:[#allocation2 + $0x10] sm:$0xff] }
 0x179   : > { %v1472_v20 = vadd.f32 %v1471_v15, %v1453_v17  ;;  %v1441_v54 = vadd.f32 %v1440_v13, %v1422_v51 }
 0x17b   : > { %v1595_v21 = vadd.f32 %v1472_v20, %v711_v18 }
 0x17d   : > { %1603 = vst [vmem:[#allocation2 + $0x30] sm:$0xff] %v1595_v21 }
 0x17e   : > { %v1490_v23 = vpop.f32.mrf.mxu2  ;;  %v1454_v26 = vpop.f32.mrf.mxu0 }
 0x17f   : > { %v1509_v24 = vpop.f32.mrf.mxu3  ;;  %v1473_v27 = vpop.f32.mrf.mxu1  ;;  %v1455_v30 = vadd.f32 %v1454_v26, %v1436_v22 }
 0x180   : > { %v1510_v1 = vadd.f32 %v1509_v24, %v1490_v23  ;;  %v716_v23 = vld [vmem:[#allocation2 + $0x20] sm:$0xff] }
 0x181   : > { %v1474_v39 = vadd.f32 %v1473_v27, %v1455_v30 }
 0x183   : > { %v1597_v40 = vadd.f32 %v1474_v39, %v713_v33  ;;  %v718_v39 = vld [vmem:[#allocation2 + $0x38] sm:$0xff] }
 0x185   : > { %1605 = vst [vmem:[#allocation2 + $0x18] sm:$0xff] %v1597_v40 }
 0x186   : > { %v1492_v44 = vpop.f32.mrf.mxu2  ;;  %v1457_v46 = vpop.f32.mrf.mxu0 }
 0x187   : > { %v1511_v45 = vpop.f32.mrf.mxu3  ;;  %v1476_v47 = vpop.f32.mrf.mxu1  ;;  %v1458_v49 = vadd.f32 %v1457_v46, %v1439_v43 }
 0x188   : > { %v1512_v4 = vadd.f32 %v1511_v45, %v1492_v44 }
 0x189   : > { %v1477_v52 = vadd.f32 %v1476_v47, %v1458_v49 }
 0x18b   : > { %v1599_v53 = vadd.f32 %v1477_v52, %v715_v50 }
 0x18d   : > { %1607 = vst [vmem:[#allocation2 + $0x8] sm:$0xff] %v1599_v53 }
 0x18e   : > { %v1495_v55 = vpop.f32.mrf.mxu2  ;;  %v1459_v57 = vpop.f32.mrf.mxu0 }
 0x18f   : > { %v1514_v56 = vpop.f32.mrf.mxu3  ;;  %v1478_v58 = vpop.f32.mrf.mxu1  ;;  %v1460_v59 = vadd.f32 %v1459_v57, %v1441_v54 }
 0x190   : > { %v1515_v11 = vadd.f32 %v1514_v56, %v1495_v55 }
 0x191   : > { %v1479_v61 = vadd.f32 %v1478_v58, %v1460_v59 }
 0x193   : > { %v1601_v62 = vadd.f32 %v1479_v61, %v717_v60 }
 0x195   : > { %1609 = vst [vmem:[#allocation2 + $0x28] sm:$0xff] %v1601_v62 }
 0x196   : > { %v1497_v63 = vpop.f32.mrf.mxu2  ;;  %v1528_v29 = vpop.f32.mrf.mxu0 }
 0x197   : > { %v1516_v0 = vpop.f32.mrf.mxu3  ;;  %v1547_v25 = vpop.f32.mrf.mxu1  ;;  %v1529_v31 = vadd.f32 %v1528_v29, %v1510_v1 }
 0x198   : > { %v1517_v20 = vadd.f32 %v1516_v0, %v1497_v63 }
 0x199   : > { %v1548_v34 = vadd.f32 %v1547_v25, %v1529_v31 }
 0x19e   : > { %v1566_v2 = vpop.f32.mrf.mxu2  ;;  %v1530_v6 = vpop.f32.mrf.mxu0 }
 0x19f   : > { %v1585_v3 = vpop.f32.mrf.mxu3  ;;  %v1567_v5 = vadd.f32 %v1566_v2, %v1548_v34  ;;  %v1549_v35 = vpop.f32.mrf.mxu1  ;;  %v1531_v38 = vadd.f32 %v1530_v6, %v1512_v4 }
 0x1a1   : > { %v1586_v8 = vadd.f32 %v1585_v3, %v1567_v5  ;;  %v1550_v41 = vadd.f32 %v1549_v35, %v1531_v38 }
 0x1a3   : > { %v1596_v9 = vadd.f32 %v1586_v8, %v712_v7 }
 0x1a5   : > { %1604 = vst [vmem:[#allocation2] sm:$0xff] %v1596_v9 }
 0x1a6   : > { %v1568_v10 = vpop.f32.mrf.mxu2  ;;  %v1533_v12 = vpop.f32.mrf.mxu0 }
 0x1a7   : > { %v1587_v42 = vpop.f32.mrf.mxu3  ;;  %v1569_v32 = vadd.f32 %v1568_v10, %v1550_v41  ;;  %v1534_v14 = vadd.f32 %v1533_v12, %v1515_v11  ;;  %v1552_v15 = vpop.f32.mrf.mxu1 }
 0x1a9   : > { %v1588_v13 = vadd.f32 %v1587_v42, %v1569_v32  ;;  %v1553_v17 = vadd.f32 %v1552_v15, %v1534_v14 }
 0x1ab   : > { %v1598_v16 = vadd.f32 %v1588_v13, %v714_v37 }
 0x1ad   : > { %1606 = vst [vmem:[#allocation2 + $0x10] sm:$0xff] %v1598_v16 }
 0x1ae   : > { %v1571_v18 = vpop.f32.mrf.mxu2  ;;  %v1535_v22 = vpop.f32.mrf.mxu0 }
 0x1af   : > { %v1590_v19 = vpop.f32.mrf.mxu3  ;;  %v1572_v21 = vadd.f32 %v1571_v18, %v1553_v17  ;;  %v1536_v26 = vadd.f32 %v1535_v22, %v1517_v20  ;;  %v1554_v28 = vpop.f32.mrf.mxu1 }
 0x1b1   : > { %v1591_v24 = vadd.f32 %v1590_v19, %v1572_v21  ;;  %v1555_v30 = vadd.f32 %v1554_v28, %v1536_v26 }
 0x1b3   : > { %v1600_v27 = vadd.f32 %v1591_v24, %v716_v23 }
 0x1b5   : > { %1608 = vst [vmem:[#allocation2 + $0x20] sm:$0xff] %v1600_v27 }
 0x1b6   : > { %v1573_v33 = vpop.f32.mrf.mxu2 }
 0x1b7   : > { %v1574_v36 = vadd.f32 %v1573_v33, %v1555_v30  ;;  %v1592_v40 = vpop.f32.mrf.mxu3 }
 0x1b9   : > { %v1593_v43 = vadd.f32 %v1592_v40, %v1574_v36  ;;  %1614 = sbr.rel (%p2262_p5) target bundleno = 460 (0x1cc), region = 101 }
 0x1bb   : > { %v1602_v44 = vadd.f32 %v1593_v43, %v718_v39 }
 0x1bd   : > { %1610 = vst [vmem:[#allocation2 + $0x38] sm:$0xff] %v1602_v44 }
 0x1be   : > { %v1615_v45 = vld [vmem:[#allocation2 + $0x30] sm:$0xff]  ;;  %v1616_v46 = vld [vmem:[#allocation2] sm:$0xff]  ;;  %v1617_v50 = vld [vmem:[#allocation2 + $0x18] sm:$0xff] }
 0x1bf   : > { %v1623_v47 = vld [vmem:[%s695_s5] sm:$0x3]  ;;  %v1618_v51 = vld [vmem:[#allocation2 + $0x10] sm:$0xff]  ;;  %v1619_v52 = vld [vmem:[#allocation2 + $0x8] sm:$0xff] }
 0x1c0   : > { %v1625_v48 = vperm.slane %v1623_v47, 0  ;;  %v1626_v49 = vperm.slane %v1623_v47, 1  ;;  %v1620_v53 = vld [vmem:[#allocation2 + $0x20] sm:$0xff]  ;;  %v1621_v54 = vld [vmem:[#allocation2 + $0x28] sm:$0xff] }
 0x1c2   : > { %v1629_v56 = vadd.f32 %v1625_v48, %v1615_v45  ;;  %v1630_v57 = vadd.f32 %v1626_v49, %v1616_v46  ;;  %v1631_v58 = vadd.f32 %v1625_v48, %v1617_v50  ;;  %v1632_v59 = vadd.f32 %v1626_v49, %v1618_v51 }
 0x1c3   : > { %v1633_v60 = vadd.f32 %v1625_v48, %v1619_v52  ;;  %v1634_v61 = vadd.f32 %v1626_v49, %v1620_v53  ;;  %v1635_v62 = vadd.f32 %v1625_v48, %v1621_v54 }
 0x1c4   : > { %v1622_v55 = vld [vmem:[#allocation2 + $0x38] sm:$0xff]  ;;  %v1637_v0 = vmax.f32 %v1629_v56, 0.0  ;;  %v1638_v1 = vmax.f32 %v1630_v57, 0.0  ;;  %v1639_v29 = vmax.f32 %v1631_v58, 0.0  ;;  %v1640_v25 = vmax.f32 %v1632_v59, 0.0 }
 0x1c5   : > { %v1636_v63 = vadd.f32 %v1626_v49, %v1622_v55  ;;  %v1641_v31 = vmax.f32 %v1633_v60, 0.0  ;;  %v1642_v34 = vmax.f32 %v1634_v61, 0.0  ;;  %v1643_v2 = vmax.f32 %v1635_v62, 0.0 }
 0x1c6   : > { %v1645_v4 = vpack.c.bf16 %v1638_v1, %v1637_v0  ;;  %v1646_v5 = vpack.c.bf16 %v1640_v25, %v1639_v29 }
 0x1c7   : > { %v1644_v3 = vmax.f32 %v1636_v63, 0.0  ;;  %v1647_v6 = vpack.c.bf16 %v1642_v34, %v1641_v31 }
 0x1c8   : > { %1649 = vst [vmem:[%s2907_s25] sm:$0xff] %v1645_v4 }
 0x1c9   : > { %v1648_v7 = vpack.c.bf16 %v1644_v3, %v1643_v2  ;;  %1650 = vst [vmem:[%s2907_s25 + $0x8] sm:$0xff] %v1646_v5 }
 0x1ca   : > { %1651 = vst [vmem:[%s2907_s25 + $0x10] sm:$0xff] %v1647_v6 }
 0x1cb   : > { %1652 = vst [vmem:[%s2907_s25 + $0x18] sm:$0xff] %v1648_v7 }
 0x1cc PF: > { %1659 = sbr.rel (!%p2675_p12) target bundleno = 468 (0x1d4), region = 105  ;;  %s2378_s14 = sshll.u32 (%p2675_p12), %s2546_s19, 3 }
 0x1cd   : > { %s1665_s0 = scalar_lea.vmem (%p2675_p12), %s3222_s3, %s2378_s14 }
 0x1cf   : > { %v1700_v35 = vld [vmem:[%s2907_s25] sm:$0xff] (%p2675_p12) }
 0x1d0   : > { %v1702_v8 = vld [vmem:[%s2907_s25 + $0x8] sm:$0xff] (%p2675_p12)  ;;  %1701 = vst [vmem:[%s1665_s0] sm:$0xff] (%p2675_p12), %v1700_v35 }
 0x1d1   : > { %v1704_v38 = vld [vmem:[%s2907_s25 + $0x10] sm:$0xff]  ;;  %1703 = vst [vmem:[%s1665_s0 + $0x10] sm:$0xff] %v1702_v8 }
 0x1d2   : > { %v1706_v9 = vld [vmem:[%s2907_s25 + $0x18] sm:$0xff]  ;;  %1705 = vst [vmem:[%s1665_s0 + $0x20] sm:$0xff] %v1704_v38 }
 0x1d3   : > { %1707 = vst [vmem:[%s1665_s0 + $0x30] sm:$0xff] %v1706_v9 }
 0x1d4 PF: > { %s13_s22 = sadd.s32 1, %s2558_s22   ;;  %s3232_s10 = sld [smem:[#allocation6_spill]] }
 0x1d5   : > { %p10_p6 = scmp.ge.s32.totalorder %s13_s22, 8   ;;  %s3233_s12 = smov %s2522_s13 }
 0x1d6   : > { %s3234_s13 = smov %s2673_s9  ;;  %s3235_s14 = smov %s2530_s15 }
 0x1d7   : > { %s3236_s15 = smov %s2670_s8  ;;  %s3237_s16 = smov %s2538_s17 }
 0x1d8   : > { %s3238_s17 = smov %s2656_s30  ;;  %s3239_s18 = smov %s2550_s20 }
 0x1d9   : > { %s3240_s19 = smov %s2554_s21  ;;  %s3241_s20 = smov %s3244_s24 }
 0x1da   : > { %s3242_s21 = smov %s3232_s10  ;;  %12 = sbr.rel (!%p10_p6) target bundleno = 9 (0x9), region = 185 }

// kernel: deeplab_forward.18
= control target key start
LH: loop header
LB: loop body
LE: loop exit
PB: predicated region body
PF: predicated region fallthrough
CT: control target
= control target key end

     0   :  { %s3009_s0 = inlined_call_operand.vmem [shape: bf16[16,4608], index: 0, kind: input, shape index: {}]   ;;  %s3010_s1 = inlined_call_operand.vmem [shape: bf16[4608,2048], index: 1, kind: input, shape index: {}]   ;;  %s3011_s2 = inlined_call_operand.vmem [shape: f32[1,2048], index: 2, kind: input, shape index: {}]   ;;  %s3012_s3 = inlined_call_operand.vmem [shape: bf16[16,2048], index: 3, kind: output, shape index: {}]  }
   0x1   :  { %3014 = sst [smem:[#allocation7_spill]] %s3009_s0 }
   0x2   :  { %3015 = sst [smem:[#allocation8_spill]] %s3010_s1 }
   0x3   :  { %s2403_s12 = smov 0   ;;  %s2405_s13 = smov 0  }
   0x4   :  { %s2407_s14 = smov 0   ;;  %s2409_s15 = smov 0  }
   0x5   :  { %s2411_s16 = smov 0   ;;  %s2413_s17 = smov 0  }
   0x6   :  { %s2415_s18 = smov 0   ;;  %s2417_s19 = smov 0  }
   0x7   :  { %s2419_s20 = smov 0   ;;  %s2421_s21 = smov 0  }
   0x8   :  { %s2423_s22 = smov 0  }
   0x9 LB: > { %s1670_s23 = sadd.s32 4294967295, %s2380_s22   ;;  %s25_s24 = sadd.s32 1, %s2372_s20  ;;  %s2380_s22 = sphi %s2423_s22, %s13_s22   ;;  %s2376_s21 = sphi %s2421_s21, %s3032_s21   ;;  %s2372_s20 = sphi %s2419_s20, %s3031_s20   ;;  %s2368_s19 = sphi %s2417_s19, %s3030_s19   ;;  %s2364_s18 = sphi %s2415_s18, %s3029_s18   ;;  %s2360_s17 = sphi %s2413_s17, %s3028_s17   ;;  %s2356_s16 = sphi %s2411_s16, %s3027_s16   ;;  %s2352_s15 = sphi %s2409_s15, %s3026_s15   ;;  %s2348_s14 = sphi %s2407_s14, %s3025_s14   ;;  %s2344_s13 = sphi %s2405_s13, %s3024_s13   ;;  %s2340_s12 = sphi %s2403_s12, %s3023_s12  }
   0xa   : > { %p26_p0 = scmp.ge.s32.totalorder %s25_s24, 6  ;;  %s28_s25 = sadd.s32 1, %s2376_s21 }
   0xb   : > { %s41_s26 = sadd.s32 1, %s2360_s17  ;;  %p48_p1 = scmp.ne.s32.totalorder %s2360_s17, %s2356_s16 }
   0xc   : > { %s3034_s24 = smov (%p26_p0, %s25_s24), 0  ;;  %s3036_s25 = smov (!%p26_p0, %s28_s25), %s2376_s21 }
   0xd   : > { %s37_s27 = ssub.s32 %s2372_s20, %s3034_s24  ;;  %p49_p2 = scmp.eq.s32.totalorder %s2380_s22, 0 }
   0xe   : > { %p30_p3 = scmp.ge.s32.totalorder %s3036_s25, 8  ;;  %p39_p4 = scmp.eq.s32.totalorder %s37_s27, 0 }
   0xf   : > { %p2470_p5 = por %p49_p2, %p48_p1  ;;  %s69_s29 = sadd.s32 1, %s2352_s15 }
  0x10   : > { %s3038_s25 = smov (%p30_p3, %s3036_s25), 0  ;;  %p76_p6 = scmp.ne.s32.totalorder %s2352_s15, %s2348_s14 }
  0x11   : > { %3017 = sst [smem:[#allocation6_spill]] %s3038_s25  ;;  %s65_s4 = ssub.s32 %s2376_s21, %s3038_s25 }
  0x12   : > { %s2478_s30 = scalar_select %p39_p4, %s2360_s17, %s41_s26  }
  0x13   : > { %s66_s5 = sor.u32 %s65_s4, %s37_s27  ;;  %p121_p7 = scmp.eq.s32.totalorder %s65_s4, 0 }
  0x14   : > { %p67_p8 = scmp.eq.s32.totalorder %s66_s5, 0  ;;  %p2484_p9 = por %p76_p6, %p49_p2 }
  0x15   : > { %s123_s7 = sadd.s32 1, %s2344_s13  ;;  %p133_p10 = scmp.ne.s32.totalorder %s2344_s13, %s2340_s12 }
  0x16   : > { %s2492_s8 = scalar_select %p67_p8, %s2352_s15, %s69_s29  }
  0x17   : > { %s2495_s9 = scalar_select %p121_p7, %s2344_s13, %s123_s7  }
  0x18   : > { %p134_p11 = scmp.eq.s32.totalorder %s1670_s23, 47  ;;  %p1673_p13 = scmp.ge.s32.totalorder %s2380_s22, 48 }
  0x1a   : > { %p2497_p12 = por %p134_p11, %p133_p10  ;;  %156 = sbr.rel (%p1673_p13) target bundleno = 152 (0x98), region = 16 }
  0x1f   : > { %159 = sbr.rel (!%p2470_p5) target bundleno = 46 (0x2e), region = 20  ;;  %s161_s11 = sand.u32 (%p2470_p5), 1, %s2360_s17  }
  0x20   : > { %s2096_s26 = smul.u32 (%p2470_p5), 24, %s2372_s20  ;;  %s3020_s0 = sld [smem:[#allocation7_spill]] (%p2470_p5) }
  0x21   : > { %s2201_s27 = smul.u32 (%p2470_p5), 48, %s161_s11 }
  0x23   : > { %s163_s23 = scalar_lea.vmem (%p2470_p5), [#allocation3], %s2201_s27 }
  0x26   : > { %s169_s5 = scalar_lea.vmem %s3020_s0, %s2096_s26 }
  0x27   : > { %v182_v0 = vld [vmem:[%s169_s5] sm:$0xff]  ;;  %v184_v1 = vld [vmem:[%s169_s5 + $0x8] sm:$0xff]  ;;  %v186_v2 = vld [vmem:[%s169_s5 + $0x10] sm:$0xff] }
  0x28   : > { %183 = vst [vmem:[%s163_s23] sm:$0xff] %v182_v0  ;;  %v188_v3 = vld [vmem:[%s169_s5 + $0x90] sm:$0xff]  ;;  %v190_v4 = vld [vmem:[%s169_s5 + $0x98] sm:$0xff]  ;;  %v192_v5 = vld [vmem:[%s169_s5 + $0xa0] sm:$0xff] }
  0x29   : > { %185 = vst [vmem:[%s163_s23 + $0x8] sm:$0xff] %v184_v1 }
  0x2a   : > { %187 = vst [vmem:[%s163_s23 + $0x10] sm:$0xff] %v186_v2 }
  0x2b   : > { %189 = vst [vmem:[%s163_s23 + $0x18] sm:$0xff] %v188_v3 }
  0x2c   : > { %191 = vst [vmem:[%s163_s23 + $0x20] sm:$0xff] %v190_v4 }
  0x2d   : > { %193 = vst [vmem:[%s163_s23 + $0x28] sm:$0xff] %v192_v5 }
  0x2e PF: > { %199 = sbr.rel (!%p2484_p9) target bundleno = 152 (0x98), region = 43  ;;  %s201_s28 = sand.u32 (%p2484_p9), 1, %s2352_s15  }
  0x2f   : > { %s2202_s7 = smul.u32 (%p2484_p9), 768, %s201_s28  ;;  %s1675_s11 = sshll.u32 (%p2484_p9), %s2376_s21, 1 }
  0x30   : > { %s2097_s26 = smul.u32 (%p2484_p9), 1536, %s2372_s20  ;;  %s3021_s1 = sld [smem:[#allocation8_spill]] (%p2484_p9) }
  0x31   : > { %s2522_s6 = scalar_lea.vmem (%p2484_p9), [#allocation4], %s2202_s7 }
  0x32   : > { %s207_s27 = sadd.s32 (%p2484_p9), %s2097_s26, %s1675_s11 }
  0x33   : > { %s1677_s29 = sshll.u32 %s207_s27, 2 }
  0x36   : > { %s2517_s5 = scalar_lea.vmem %s3021_s1, %s1677_s29 }
  0x37   : > { %v428_v6 = vld [vmem:[%s2517_s5] sm:$0xff] }
  0x38   : > { %v430_v7 = vld [vmem:[%s2517_s5 + $0x40] sm:$0xff]  ;;  %429 = vst [vmem:[%s2522_s6] sm:$0xff] %v428_v6 }
  0x39   : > { %v432_v8 = vld [vmem:[%s2517_s5 + $0x80] sm:$0xff]  ;;  %431 = vst [vmem:[%s2522_s6 + $0x8] sm:$0xff] %v430_v7 }
  0x3a   : > { %v434_v9 = vld [vmem:[%s2517_s5 + $0xc0] sm:$0xff]  ;;  %433 = vst [vmem:[%s2522_s6 + $0x10] sm:$0xff] %v432_v8 }
  0x3b   : > { %v436_v10 = vld [vmem:[%s2517_s5 + $0x100] sm:$0xff]  ;;  %435 = vst [vmem:[%s2522_s6 + $0x18] sm:$0xff] %v434_v9 }
  0x3c   : > { %v438_v11 = vld [vmem:[%s2517_s5 + $0x140] sm:$0xff]  ;;  %437 = vst [vmem:[%s2522_s6 + $0x20] sm:$0xff] %v436_v10 }
  0x3d   : > { %v440_v12 = vld [vmem:[%s2517_s5 + $0x180] sm:$0xff]  ;;  %439 = vst [vmem:[%s2522_s6 + $0x28] sm:$0xff] %v438_v11 }
  0x3e   : > { %v442_v13 = vld [vmem:[%s2517_s5 + $0x1c0] sm:$0xff]  ;;  %441 = vst [vmem:[%s2522_s6 + $0x30] sm:$0xff] %v440_v12 }
  0x3f   : > { %v444_v14 = vld [vmem:[%s2517_s5 + $0x200] sm:$0xff]  ;;  %443 = vst [vmem:[%s2522_s6 + $0x38] sm:$0xff] %v442_v13 }
  0x40   : > { %v446_v15 = vld [vmem:[%s2517_s5 + $0x240] sm:$0xff]  ;;  %445 = vst [vmem:[%s2522_s6 + $0x40] sm:$0xff] %v444_v14 }
  0x41   : > { %v448_v16 = vld [vmem:[%s2517_s5 + $0x280] sm:$0xff]  ;;  %447 = vst [vmem:[%s2522_s6 + $0x48] sm:$0xff] %v446_v15 }
  0x42   : > { %v450_v17 = vld [vmem:[%s2517_s5 + $0x2c0] sm:$0xff]  ;;  %449 = vst [vmem:[%s2522_s6 + $0x50] sm:$0xff] %v448_v16 }
  0x43   : > { %v452_v18 = vld [vmem:[%s2517_s5 + $0x300] sm:$0xff]  ;;  %451 = vst [vmem:[%s2522_s6 + $0x58] sm:$0xff] %v450_v17 }
  0x44   : > { %v454_v19 = vld [vmem:[%s2517_s5 + $0x340] sm:$0xff]  ;;  %453 = vst [vmem:[%s2522_s6 + $0x60] sm:$0xff] %v452_v18 }
  0x45   : > { %v456_v20 = vld [vmem:[%s2517_s5 + $0x380] sm:$0xff]  ;;  %455 = vst [vmem:[%s2522_s6 + $0x68] sm:$0xff] %v454_v19 }
  0x46   : > { %v458_v21 = vld [vmem:[%s2517_s5 + $0x3c0] sm:$0xff]  ;;  %457 = vst [vmem:[%s2522_s6 + $0x70] sm:$0xff] %v456_v20 }
  0x47   : > { %v460_v22 = vld [vmem:[%s2517_s5 + $0x400] sm:$0xff]  ;;  %459 = vst [vmem:[%s2522_s6 + $0x78] sm:$0xff] %v458_v21 }
  0x48   : > { %v462_v23 = vld [vmem:[%s2517_s5 + $0x440] sm:$0xff]  ;;  %461 = vst [vmem:[%s2522_s6 + $0x80] sm:$0xff] %v460_v22 }
  0x49   : > { %v464_v24 = vld [vmem:[%s2517_s5 + $0x480] sm:$0xff]  ;;  %463 = vst [vmem:[%s2522_s6 + $0x88] sm:$0xff] %v462_v23 }
  0x4a   : > { %v466_v25 = vld [vmem:[%s2517_s5 + $0x4c0] sm:$0xff]  ;;  %465 = vst [vmem:[%s2522_s6 + $0x90] sm:$0xff] %v464_v24 }
  0x4b   : > { %v468_v26 = vld [vmem:[%s2517_s5 + $0x500] sm:$0xff]  ;;  %467 = vst [vmem:[%s2522_s6 + $0x98] sm:$0xff] %v466_v25 }
  0x4c   : > { %v470_v27 = vld [vmem:[%s2517_s5 + $0x540] sm:$0xff]  ;;  %469 = vst [vmem:[%s2522_s6 + $0xa0] sm:$0xff] %v468_v26 }
  0x4d   : > { %v472_v28 = vld [vmem:[%s2517_s5 + $0x580] sm:$0xff]  ;;  %471 = vst [vmem:[%s2522_s6 + $0xa8] sm:$0xff] %v470_v27 }
  0x4e   : > { %v474_v29 = vld [vmem:[%s2517_s5 + $0x5c0] sm:$0xff]  ;;  %473 = vst [vmem:[%s2522_s6 + $0xb0] sm:$0xff] %v472_v28 }
  0x4f   : > { %v476_v30 = vld [vmem:[%s2517_s5 + $0x600] sm:$0xff]  ;;  %475 = vst [vmem:[%s2522_s6 + $0xb8] sm:$0xff] %v474_v29 }
  0x50   : > { %v478_v31 = vld [vmem:[%s2517_s5 + $0x640] sm:$0xff]  ;;  %477 = vst [vmem:[%s2522_s6 + $0xc0] sm:$0xff] %v476_v30 }
  0x51   : > { %v480_v32 = vld [vmem:[%s2517_s5 + $0x680] sm:$0xff]  ;;  %479 = vst [vmem:[%s2522_s6 + $0xc8] sm:$0xff] %v478_v31 }
  0x52   : > { %v482_v33 = vld [vmem:[%s2517_s5 + $0x6c0] sm:$0xff]  ;;  %481 = vst [vmem:[%s2522_s6 + $0xd0] sm:$0xff] %v480_v32 }
  0x53   : > { %v484_v34 = vld [vmem:[%s2517_s5 + $0x700] sm:$0xff]  ;;  %483 = vst [vmem:[%s2522_s6 + $0xd8] sm:$0xff] %v482_v33 }
  0x54   : > { %v486_v35 = vld [vmem:[%s2517_s5 + $0x740] sm:$0xff]  ;;  %485 = vst [vmem:[%s2522_s6 + $0xe0] sm:$0xff] %v484_v34 }
  0x55   : > { %v488_v36 = vld [vmem:[%s2517_s5 + $0x780] sm:$0xff]  ;;  %487 = vst [vmem:[%s2522_s6 + $0xe8] sm:$0xff] %v486_v35 }
  0x56   : > { %v490_v37 = vld [vmem:[%s2517_s5 + $0x7c0] sm:$0xff]  ;;  %489 = vst [vmem:[%s2522_s6 + $0xf0] sm:$0xff] %v488_v36 }
  0x57   : > { %v492_v38 = vld [vmem:[%s2517_s5 + $0x800] sm:$0xff]  ;;  %491 = vst [vmem:[%s2522_s6 + $0xf8] sm:$0xff] %v490_v37 }
  0x58   : > { %v494_v39 = vld [vmem:[%s2517_s5 + $0x840] sm:$0xff]  ;;  %493 = vst [vmem:[%s2522_s6 + $0x100] sm:$0xff] %v492_v38 }
  0x59   : > { %v496_v40 = vld [vmem:[%s2517_s5 + $0x880] sm:$0xff]  ;;  %495 = vst [vmem:[%s2522_s6 + $0x108] sm:$0xff] %v494_v39 }
  0x5a   : > { %v498_v41 = vld [vmem:[%s2517_s5 + $0x8c0] sm:$0xff]  ;;  %497 = vst [vmem:[%s2522_s6 + $0x110] sm:$0xff] %v496_v40 }
  0x5b   : > { %v500_v42 = vld [vmem:[%s2517_s5 + $0x900] sm:$0xff]  ;;  %499 = vst [vmem:[%s2522_s6 + $0x118] sm:$0xff] %v498_v41 }
  0x5c   : > { %v502_v43 = vld [vmem:[%s2517_s5 + $0x940] sm:$0xff]  ;;  %501 = vst [vmem:[%s2522_s6 + $0x120] sm:$0xff] %v500_v42 }
  0x5d   : > { %v504_v44 = vld [vmem:[%s2517_s5 + $0x980] sm:$0xff]  ;;  %503 = vst [vmem:[%s2522_s6 + $0x128] sm:$0xff] %v502_v43 }
  0x5e   : > { %v506_v45 = vld [vmem:[%s2517_s5 + $0x9c0] sm:$0xff]  ;;  %505 = vst [vmem:[%s2522_s6 + $0x130] sm:$0xff] %v504_v44 }
  0x5f   : > { %v508_v46 = vld [vmem:[%s2517_s5 + $0xa00] sm:$0xff]  ;;  %507 = vst [vmem:[%s2522_s6 + $0x138] sm:$0xff] %v506_v45 }
  0x60   : > { %v510_v47 = vld [vmem:[%s2517_s5 + $0xa40] sm:$0xff]  ;;  %509 = vst [vmem:[%s2522_s6 + $0x140] sm:$0xff] %v508_v46 }
  0x61   : > { %v512_v48 = vld [vmem:[%s2517_s5 + $0xa80] sm:$0xff]  ;;  %511 = vst [vmem:[%s2522_s6 + $0x148] sm:$0xff] %v510_v47 }
  0x62   : > { %v514_v49 = vld [vmem:[%s2517_s5 + $0xac0] sm:$0xff]  ;;  %513 = vst [vmem:[%s2522_s6 + $0x150] sm:$0xff] %v512_v48 }
  0x63   : > { %v516_v50 = vld [vmem:[%s2517_s5 + $0xb00] sm:$0xff]  ;;  %515 = vst [vmem:[%s2522_s6 + $0x158] sm:$0xff] %v514_v49 }
  0x64   : > { %v518_v51 = vld [vmem:[%s2517_s5 + $0xb40] sm:$0xff]  ;;  %517 = vst [vmem:[%s2522_s6 + $0x160] sm:$0xff] %v516_v50 }
  0x65   : > { %v520_v52 = vld [vmem:[%s2517_s5 + $0xb80] sm:$0xff]  ;;  %519 = vst [vmem:[%s2522_s6 + $0x168] sm:$0xff] %v518_v51 }
  0x66   : > { %v522_v53 = vld [vmem:[%s2517_s5 + $0xbc0] sm:$0xff]  ;;  %521 = vst [vmem:[%s2522_s6 + $0x170] sm:$0xff] %v520_v52 }
  0x67   : > { %v524_v54 = vld [vmem:[%s2517_s5 + $0xc00] sm:$0xff]  ;;  %523 = vst [vmem:[%s2522_s6 + $0x178] sm:$0xff] %v522_v53 }
  0x68   : > { %v526_v55 = vld [vmem:[%s2517_s5 + $0xc40] sm:$0xff]  ;;  %525 = vst [vmem:[%s2522_s6 + $0x180] sm:$0xff] %v524_v54 }
  0x69   : > { %v528_v56 = vld [vmem:[%s2517_s5 + $0xc80] sm:$0xff]  ;;  %527 = vst [vmem:[%s2522_s6 + $0x188] sm:$0xff] %v526_v55 }
  0x6a   : > { %v530_v57 = vld [vmem:[%s2517_s5 + $0xcc0] sm:$0xff]  ;;  %529 = vst [vmem:[%s2522_s6 + $0x190] sm:$0xff] %v528_v56 }
  0x6b   : > { %v532_v58 = vld [vmem:[%s2517_s5 + $0xd00] sm:$0xff]  ;;  %531 = vst [vmem:[%s2522_s6 + $0x198] sm:$0xff] %v530_v57 }
  0x6c   : > { %v534_v59 = vld [vmem:[%s2517_s5 + $0xd40] sm:$0xff]  ;;  %533 = vst [vmem:[%s2522_s6 + $0x1a0] sm:$0xff] %v532_v58 }
  0x6d   : > { %v536_v60 = vld [vmem:[%s2517_s5 + $0xd80] sm:$0xff]  ;;  %535 = vst [vmem:[%s2522_s6 + $0x1a8] sm:$0xff] %v534_v59 }
  0x6e   : > { %v538_v61 = vld [vmem:[%s2517_s5 + $0xdc0] sm:$0xff]  ;;  %537 = vst [vmem:[%s2522_s6 + $0x1b0] sm:$0xff] %v536_v60 }
  0x6f   : > { %v540_v62 = vld [vmem:[%s2517_s5 + $0xe00] sm:$0xff]  ;;  %539 = vst [vmem:[%s2522_s6 + $0x1b8] sm:$0xff] %v538_v61 }
  0x70   : > { %v542_v63 = vld [vmem:[%s2517_s5 + $0xe40] sm:$0xff]  ;;  %541 = vst [vmem:[%s2522_s6 + $0x1c0] sm:$0xff] %v540_v62 }
  0x71   : > { %v544_v0 = vld [vmem:[%s2517_s5 + $0xe80] sm:$0xff]  ;;  %543 = vst [vmem:[%s2522_s6 + $0x1c8] sm:$0xff] %v542_v63 }
  0x72   : > { %v546_v1 = vld [vmem:[%s2517_s5 + $0xec0] sm:$0xff]  ;;  %545 = vst [vmem:[%s2522_s6 + $0x1d0] sm:$0xff] %v544_v0 }
  0x73   : > { %v548_v2 = vld [vmem:[%s2517_s5 + $0xf00] sm:$0xff]  ;;  %547 = vst [vmem:[%s2522_s6 + $0x1d8] sm:$0xff] %v546_v1 }
  0x74   : > { %v550_v3 = vld [vmem:[%s2517_s5 + $0xf40] sm:$0xff]  ;;  %549 = vst [vmem:[%s2522_s6 + $0x1e0] sm:$0xff] %v548_v2 }
  0x75   : > { %v552_v4 = vld [vmem:[%s2517_s5 + $0xf80] sm:$0xff]  ;;  %551 = vst [vmem:[%s2522_s6 + $0x1e8] sm:$0xff] %v550_v3 }
  0x76   : > { %v554_v5 = vld [vmem:[%s2517_s5 + $0xfc0] sm:$0xff]  ;;  %553 = vst [vmem:[%s2522_s6 + $0x1f0] sm:$0xff] %v552_v4 }
  0x77   : > { %v556_v6 = vld [vmem:[%s2517_s5 + $0x1000] sm:$0xff]  ;;  %555 = vst [vmem:[%s2522_s6 + $0x1f8] sm:$0xff] %v554_v5 }
  0x78   : > { %v558_v7 = vld [vmem:[%s2517_s5 + $0x1040] sm:$0xff]  ;;  %557 = vst [vmem:[%s2522_s6 + $0x200] sm:$0xff] %v556_v6 }
  0x79   : > { %v560_v8 = vld [vmem:[%s2517_s5 + $0x1080] sm:$0xff]  ;;  %559 = vst [vmem:[%s2522_s6 + $0x208] sm:$0xff] %v558_v7 }
  0x7a   : > { %v562_v9 = vld [vmem:[%s2517_s5 + $0x10c0] sm:$0xff]  ;;  %561 = vst [vmem:[%s2522_s6 + $0x210] sm:$0xff] %v560_v8 }
  0x7b   : > { %v564_v10 = vld [vmem:[%s2517_s5 + $0x1100] sm:$0xff]  ;;  %563 = vst [vmem:[%s2522_s6 + $0x218] sm:$0xff] %v562_v9 }
  0x7c   : > { %v566_v11 = vld [vmem:[%s2517_s5 + $0x1140] sm:$0xff]  ;;  %565 = vst [vmem:[%s2522_s6 + $0x220] sm:$0xff] %v564_v10 }
  0x7d   : > { %v568_v12 = vld [vmem:[%s2517_s5 + $0x1180] sm:$0xff]  ;;  %567 = vst [vmem:[%s2522_s6 + $0x228] sm:$0xff] %v566_v11 }
  0x7e   : > { %v570_v13 = vld [vmem:[%s2517_s5 + $0x11c0] sm:$0xff]  ;;  %569 = vst [vmem:[%s2522_s6 + $0x230] sm:$0xff] %v568_v12 }
  0x7f   : > { %v572_v14 = vld [vmem:[%s2517_s5 + $0x1200] sm:$0xff]  ;;  %571 = vst [vmem:[%s2522_s6 + $0x238] sm:$0xff] %v570_v13 }
  0x80   : > { %v574_v15 = vld [vmem:[%s2517_s5 + $0x1240] sm:$0xff]  ;;  %573 = vst [vmem:[%s2522_s6 + $0x240] sm:$0xff] %v572_v14 }
  0x81   : > { %v576_v16 = vld [vmem:[%s2517_s5 + $0x1280] sm:$0xff]  ;;  %575 = vst [vmem:[%s2522_s6 + $0x248] sm:$0xff] %v574_v15 }
  0x82   : > { %v578_v17 = vld [vmem:[%s2517_s5 + $0x12c0] sm:$0xff]  ;;  %577 = vst [vmem:[%s2522_s6 + $0x250] sm:$0xff] %v576_v16 }
  0x83   : > { %v580_v18 = vld [vmem:[%s2517_s5 + $0x1300] sm:$0xff]  ;;  %579 = vst [vmem:[%s2522_s6 + $0x258] sm:$0xff] %v578_v17 }
  0x84   : > { %v582_v19 = vld [vmem:[%s2517_s5 + $0x1340] sm:$0xff]  ;;  %581 = vst [vmem:[%s2522_s6 + $0x260] sm:$0xff] %v580_v18 }
  0x85   : > { %v584_v20 = vld [vmem:[%s2517_s5 + $0x1380] sm:$0xff]  ;;  %583 = vst [vmem:[%s2522_s6 + $0x268] sm:$0xff] %v582_v19 }
  0x86   : > { %v586_v21 = vld [vmem:[%s2517_s5 + $0x13c0] sm:$0xff]  ;;  %585 = vst [vmem:[%s2522_s6 + $0x270] sm:$0xff] %v584_v20 }
  0x87   : > { %v588_v22 = vld [vmem:[%s2517_s5 + $0x1400] sm:$0xff]  ;;  %587 = vst [vmem:[%s2522_s6 + $0x278] sm:$0xff] %v586_v21 }
  0x88   : > { %v590_v23 = vld [vmem:[%s2517_s5 + $0x1440] sm:$0xff]  ;;  %589 = vst [vmem:[%s2522_s6 + $0x280] sm:$0xff] %v588_v22 }
  0x89   : > { %v592_v24 = vld [vmem:[%s2517_s5 + $0x1480] sm:$0xff]  ;;  %591 = vst [vmem:[%s2522_s6 + $0x288] sm:$0xff] %v590_v23 }
  0x8a   : > { %v594_v25 = vld [vmem:[%s2517_s5 + $0x14c0] sm:$0xff]  ;;  %593 = vst [vmem:[%s2522_s6 + $0x290] sm:$0xff] %v592_v24 }
  0x8b   : > { %v596_v26 = vld [vmem:[%s2517_s5 + $0x1500] sm:$0xff]  ;;  %595 = vst [vmem:[%s2522_s6 + $0x298] sm:$0xff] %v594_v25 }
  0x8c   : > { %v598_v27 = vld [vmem:[%s2517_s5 + $0x1540] sm:$0xff]  ;;  %597 = vst [vmem:[%s2522_s6 + $0x2a0] sm:$0xff] %v596_v26 }
  0x8d   : > { %v600_v28 = vld [vmem:[%s2517_s5 + $0x1580] sm:$0xff]  ;;  %599 = vst [vmem:[%s2522_s6 + $0x2a8] sm:$0xff] %v598_v27 }
  0x8e   : > { %v602_v29 = vld [vmem:[%s2517_s5 + $0x15c0] sm:$0xff]  ;;  %601 = vst [vmem:[%s2522_s6 + $0x2b0] sm:$0xff] %v600_v28 }
  0x8f   : > { %v604_v30 = vld [vmem:[%s2517_s5 + $0x1600] sm:$0xff]  ;;  %603 = vst [vmem:[%s2522_s6 + $0x2b8] sm:$0xff] %v602_v29 }
  0x90   : > { %v606_v31 = vld [vmem:[%s2517_s5 + $0x1640] sm:$0xff]  ;;  %605 = vst [vmem:[%s2522_s6 + $0x2c0] sm:$0xff] %v604_v30 }
  0x91   : > { %v608_v32 = vld [vmem:[%s2517_s5 + $0x1680] sm:$0xff]  ;;  %607 = vst [vmem:[%s2522_s6 + $0x2c8] sm:$0xff] %v606_v31 }
  0x92   : > { %v610_v33 = vld [vmem:[%s2517_s5 + $0x16c0] sm:$0xff]  ;;  %609 = vst [vmem:[%s2522_s6 + $0x2d0] sm:$0xff] %v608_v32 }
  0x93   : > { %v612_v34 = vld [vmem:[%s2517_s5 + $0x1700] sm:$0xff]  ;;  %611 = vst [vmem:[%s2522_s6 + $0x2d8] sm:$0xff] %v610_v33 }
  0x94   : > { %v614_v35 = vld [vmem:[%s2517_s5 + $0x1740] sm:$0xff]  ;;  %613 = vst [vmem:[%s2522_s6 + $0x2e0] sm:$0xff] %v612_v34 }
  0x95   : > { %v616_v36 = vld [vmem:[%s2517_s5 + $0x1780] sm:$0xff]  ;;  %615 = vst [vmem:[%s2522_s6 + $0x2e8] sm:$0xff] %v614_v35 }
  0x96   : > { %v618_v37 = vld [vmem:[%s2517_s5 + $0x17c0] sm:$0xff]  ;;  %617 = vst [vmem:[%s2522_s6 + $0x2f0] sm:$0xff] %v616_v36 }
  0x97   : > { %619 = vst [vmem:[%s2522_s6 + $0x2f8] sm:$0xff] %v618_v37 }
  0x98 PF: > { %p1678_p0 = scmp.ge.s32.totalorder %s2380_s22, 1  ;;  %p632_p1 = scmp.lt.s32.totalorder %s2380_s22, 49 }
  0x9a   : > { %p633_p2 = pnand %p1678_p0, %p632_p1 }
  0x9b   : > { %s639_s0 = sand.u32 (!%p633_p2), 1, %s2356_s16   ;;  %s646_s23 = sand.u32 (!%p633_p2), 1, %s2348_s14  }
  0x9c   : > { %636 = sbr.rel (%p633_p2) target bundleno = 442 (0x1ba), region = 85  ;;  %s673_s7 = sand.u32 (!%p633_p2), 1, %s2340_s12  }
  0x9d   : > { %s2203_s28 = smul.u32 (!%p633_p2), 48, %s639_s0  ;;  %s1679_s26 = sshll.u32 (!%p633_p2), %s673_s7, 4 }
  0x9e   : > { %s2204_s11 = smul.u32 (!%p633_p2), 768, %s646_s23  ;;  %s1680_s27 = sshll.u32 (!%p633_p2), %s2368_s19, 1 }
  0x9f   : > { %p681_p3 = scmp.lt.s32.totalorder (!%p633_p2), %s1680_s27, 15  ;;  %s2725_s6 = scalar_lea.vmem (!%p633_p2), [#allocation3], %s2203_s28 }
  0xa0   : > { %s2727_s1 = scalar_lea.vmem (!%p633_p2), [#allocation4], %s2204_s11  ;;  %s2729_s25 = scalar_lea.vmem (!%p633_p2), [#allocation5], %s1679_s26 }
  0xa1   : > { %s3040_s27 = smov (!%p681_p3, %s1680_s27), 15  ;;  %p1681_p4 = scmp.ne.s32.totalorder %s2364_s18, 0 }
  0xa2   : > { %s683_s5 = scalar_lea.vmem %s3011_s2, %s3040_s27 }
  0xa3   : > { %690 = sbr.rel (%p1681_p4) target bundleno = 173 (0xad), region = 97 }
  0xa8   : > { %v2382_v38 = vmov 0.0  }
  0xa9   : > { %691 = vst [vmem:[#allocation2 + $0x10] sm:$0xff] %v2382_v38 }
  0xaa   : > { %692 = vst [vmem:[#allocation2] sm:$0xff] %v2382_v38 }
  0xab   : > { %693 = vst [vmem:[#allocation2 + $0x18] sm:$0xff] %v2382_v38 }
  0xac   : > { %694 = vst [vmem:[#allocation2 + $0x8] sm:$0xff] %v2382_v38 }
  0xad PF: > { %v1764_v39 = vld [vmem:[%s2727_s1 + $0x70] sm:$0xf]  ;;  %v2119_v40 = vld [vmem:[%s2727_s1 + $0x74] sm:$0xf0]  ;;  %v1756_v50 = vld [vmem:[%s2727_s1 + $0x60] sm:$0xf] }
  0xae   : > { %v1828_v41 = vld [vmem:[%s2727_s1 + $0xf0] sm:$0xf]  ;;  %v1765_v42 = vor.u32 %v2119_v40, %v1764_v39  ;;  %v2135_v43 = vld [vmem:[%s2727_s1 + $0xf4] sm:$0xf0]  ;;  %v2117_v52 = vld [vmem:[%s2727_s1 + $0x64] sm:$0xf0] }
  0xaf   : > { %v1892_v44 = vld [vmem:[%s2727_s1 + $0x170] sm:$0xf]  ;;  %v2151_v45 = vld [vmem:[%s2727_s1 + $0x174] sm:$0xf0]  ;;  %v1829_v46 = vor.u32 %v2135_v43, %v1828_v41  ;;  %v1820_v53 = vld [vmem:[%s2727_s1 + $0xe0] sm:$0xf]  ;;  %v1757_v55 = vor.u32 %v2117_v52, %v1756_v50 }
  0xb0   : > { %v1893_v47 = vor.u32 %v2151_v45, %v1892_v44  ;;  %v1956_v48 = vld [vmem:[%s2727_s1 + $0x1f0] sm:$0xf]  ;;  %v2167_v49 = vld [vmem:[%s2727_s1 + $0x1f4] sm:$0xf0]  ;;  %1311 = vmatpush.bf16.msra.mxu0 %v1765_v42  ;;  %v2133_v54 = vld [vmem:[%s2727_s1 + $0xe4] sm:$0xf0] }
  0xb1   : > { %v1957_v51 = vor.u32 %v2167_v49, %v1956_v48  ;;  %1325 = vmatpush.bf16.msra.mxu1 %v1829_v46  ;;  %v1821_v56 = vor.u32 %v2133_v54, %v1820_v53  ;;  %v1884_v57 = vld [vmem:[%s2727_s1 + $0x160] sm:$0xf]  ;;  %v2149_v58 = vld [vmem:[%s2727_s1 + $0x164] sm:$0xf0]  ;;  %v1748_v62 = vld [vmem:[%s2727_s1 + $0x50] sm:$0xf] }
  0xb2   : > { %1339 = vmatpush.bf16.msra.mxu2 %v1893_v47  ;;  %v1948_v59 = vld [vmem:[%s2727_s1 + $0x1e0] sm:$0xf]  ;;  %v1885_v60 = vor.u32 %v2149_v58, %v1884_v57  ;;  %v2165_v61 = vld [vmem:[%s2727_s1 + $0x1e4] sm:$0xf0]  ;;  %v2115_v63 = vld [vmem:[%s2727_s1 + $0x54] sm:$0xf0] }
  0xb3   : > { %1353 = vmatpush.bf16.msra.mxu3 %v1957_v51  ;;  %v1949_v0 = vor.u32 %v2165_v61, %v1948_v59  ;;  %v1812_v1 = vld [vmem:[%s2727_s1 + $0xd0] sm:$0xf]  ;;  %v2131_v2 = vld [vmem:[%s2727_s1 + $0xd4] sm:$0xf0]  ;;  %v1749_v4 = vor.u32 %v2115_v63, %v1748_v62  ;;  %v1740_v10 = vld [vmem:[%s2727_s1 + $0x40] sm:$0xf] }
  0xb4   : > { %v1876_v3 = vld [vmem:[%s2727_s1 + $0x150] sm:$0xf]  ;;  %1312 = vmatpush.bf16.msra.mxu0 %v1757_v55  ;;  %v2147_v5 = vld [vmem:[%s2727_s1 + $0x154] sm:$0xf0]  ;;  %v1813_v8 = vor.u32 %v2131_v2, %v1812_v1  ;;  %v2113_v11 = vld [vmem:[%s2727_s1 + $0x44] sm:$0xf0] }
  0xb5   : > { %v1940_v6 = vld [vmem:[%s2727_s1 + $0x1d0] sm:$0xf]  ;;  %v2163_v7 = vld [vmem:[%s2727_s1 + $0x1d4] sm:$0xf0]  ;;  %1326 = vmatpush.bf16.msra.mxu1 %v1821_v56  ;;  %v1877_v9 = vor.u32 %v2147_v5, %v1876_v3  ;;  %v1804_v12 = vld [vmem:[%s2727_s1 + $0xc0] sm:$0xf]  ;;  %v1741_v19 = vor.u32 %v2113_v11, %v1740_v10 }
  0xb6   : > { %1340 = vmatpush.bf16.msra.mxu2 %v1885_v60  ;;  %v1941_v13 = vor.u32 %v2163_v7, %v1940_v6  ;;  %v2129_v14 = vld [vmem:[%s2727_s1 + $0xc4] sm:$0xf0]  ;;  %v1868_v15 = vld [vmem:[%s2727_s1 + $0x140] sm:$0xf]  ;;  %v1732_v22 = vld [vmem:[%s2727_s1 + $0x30] sm:$0xf] }
  0xb7   : > { %1354 = vmatpush.bf16.msra.mxu3 %v1949_v0  ;;  %v2145_v16 = vld [vmem:[%s2727_s1 + $0x144] sm:$0xf0]  ;;  %v1932_v17 = vld [vmem:[%s2727_s1 + $0x1c0] sm:$0xf]  ;;  %v1805_v20 = vor.u32 %v2129_v14, %v1804_v12  ;;  %v2111_v23 = vld [vmem:[%s2727_s1 + $0x34] sm:$0xf0] }
  0xb8   : > { %v2161_v18 = vld [vmem:[%s2727_s1 + $0x1c4] sm:$0xf0]  ;;  %1313 = vmatpush.bf16.msra.mxu0 %v1749_v4  ;;  %v1869_v21 = vor.u32 %v2145_v16, %v1868_v15  ;;  %v1796_v24 = vld [vmem:[%s2727_s1 + $0xb0] sm:$0xf]  ;;  %v2127_v26 = vld [vmem:[%s2727_s1 + $0xb4] sm:$0xf0]  ;;  %v1733_v31 = vor.u32 %v2111_v23, %v1732_v22 }
  0xb9   : > { %1327 = vmatpush.bf16.msra.mxu1 %v1813_v8  ;;  %v1933_v25 = vor.u32 %v2161_v18, %v1932_v17  ;;  %v1860_v27 = vld [vmem:[%s2727_s1 + $0x130] sm:$0xf]  ;;  %v2143_v28 = vld [vmem:[%s2727_s1 + $0x134] sm:$0xf0]  ;;  %v1797_v32 = vor.u32 %v2127_v26, %v1796_v24  ;;  %v1724_v34 = vld [vmem:[%s2727_s1 + $0x20] sm:$0xf] }
  0xba   : > { %1341 = vmatpush.bf16.msra.mxu2 %v1877_v9  ;;  %v1924_v29 = vld [vmem:[%s2727_s1 + $0x1b0] sm:$0xf]  ;;  %v2159_v30 = vld [vmem:[%s2727_s1 + $0x1b4] sm:$0xf0]  ;;  %v1861_v33 = vor.u32 %v2143_v28, %v1860_v27  ;;  %v2109_v35 = vld [vmem:[%s2727_s1 + $0x24] sm:$0xf0] }
  0xbb   : > { %1355 = vmatpush.bf16.msra.mxu3 %v1941_v13  ;;  %v1788_v36 = vld [vmem:[%s2727_s1 + $0xa0] sm:$0xf]  ;;  %v1925_v37 = vor.u32 %v2159_v30, %v1924_v29  ;;  %v2125_v38 = vld [vmem:[%s2727_s1 + $0xa4] sm:$0xf0]  ;;  %v1725_v43 = vor.u32 %v2109_v35, %v1724_v34  ;;  %v1716_v46 = vld [vmem:[%s2727_s1 + $0x10] sm:$0xf] }
  0xbc   : > { %1314 = vmatpush.bf16.msra.mxu0 %v1741_v19  ;;  %v1852_v39 = vld [vmem:[%s2727_s1 + $0x120] sm:$0xf]  ;;  %v2141_v40 = vld [vmem:[%s2727_s1 + $0x124] sm:$0xf0]  ;;  %v1789_v44 = vor.u32 %v2125_v38, %v1788_v36  ;;  %v2107_v47 = vld [vmem:[%s2727_s1 + $0x14] sm:$0xf0] }
  0xbd   : > { %1328 = vmatpush.bf16.msra.mxu1 %v1805_v20  ;;  %v1916_v41 = vld [vmem:[%s2727_s1 + $0x1a0] sm:$0xf]  ;;  %v2157_v42 = vld [vmem:[%s2727_s1 + $0x1a4] sm:$0xf0]  ;;  %v1853_v45 = vor.u32 %v2141_v40, %v1852_v39  ;;  %v1780_v48 = vld [vmem:[%s2727_s1 + $0x90] sm:$0xf]  ;;  %v1717_v55 = vor.u32 %v2107_v47, %v1716_v46 }
  0xbe   : > { %1342 = vmatpush.bf16.msra.mxu2 %v1869_v21  ;;  %v1917_v49 = vor.u32 %v2157_v42, %v1916_v41  ;;  %v2123_v50 = vld [vmem:[%s2727_s1 + $0x94] sm:$0xf0]  ;;  %v1844_v51 = vld [vmem:[%s2727_s1 + $0x110] sm:$0xf]  ;;  %v1708_v56 = vld [vmem:[%s2727_s1] sm:$0xf] }
  0xbf   : > { %1356 = vmatpush.bf16.msra.mxu3 %v1933_v25  ;;  %v2139_v52 = vld [vmem:[%s2727_s1 + $0x114] sm:$0xf0]  ;;  %v1908_v53 = vld [vmem:[%s2727_s1 + $0x190] sm:$0xf]  ;;  %v2105_v57 = vld [vmem:[%s2727_s1 + $0x4] sm:$0xf0]  ;;  %v1781_v58 = vor.u32 %v2123_v50, %v1780_v48 }
  0xc0   : > { %1315 = vmatpush.bf16.msra.mxu0 %v1733_v31  ;;  %v2155_v54 = vld [vmem:[%s2727_s1 + $0x194] sm:$0xf0]  ;;  %v1845_v59 = vor.u32 %v2139_v52, %v1844_v51  ;;  %v1772_v60 = vld [vmem:[%s2727_s1 + $0x80] sm:$0xf]  ;;  %v2121_v61 = vld [vmem:[%s2727_s1 + $0x84] sm:$0xf0]  ;;  %v1709_v6 = vor.u32 %v2105_v57, %v1708_v56 }
  0xc1   : > { %1329 = vmatpush.bf16.msra.mxu1 %v1797_v32  ;;  %v1836_v62 = vld [vmem:[%s2727_s1 + $0x100] sm:$0xf]  ;;  %v1909_v63 = vor.u32 %v2155_v54, %v1908_v53  ;;  %v2137_v0 = vld [vmem:[%s2727_s1 + $0x104] sm:$0xf0]  ;;  %v2020_v3 = vld [vmem:[%s2727_s1 + $0x270] sm:$0xf]  ;;  %v1773_v10 = vor.u32 %v2121_v61, %v1772_v60 }
  0xc2   : > { %1343 = vmatpush.bf16.msra.mxu2 %v1861_v33  ;;  %v1900_v1 = vld [vmem:[%s2727_s1 + $0x180] sm:$0xf]  ;;  %v2153_v2 = vld [vmem:[%s2727_s1 + $0x184] sm:$0xf0]  ;;  %v2183_v4 = vld [vmem:[%s2727_s1 + $0x274] sm:$0xf0]  ;;  %v1837_v11 = vor.u32 %v2137_v0, %v1836_v62 }
  0xc3   : > { %1357 = vmatpush.bf16.msra.mxu3 %v1925_v37  ;;  %v2084_v5 = vld [vmem:[%s2727_s1 + $0x2f0] sm:$0xf]  ;;  %v2199_v7 = vld [vmem:[%s2727_s1 + $0x2f4] sm:$0xf0]  ;;  %v2118_v8 = vld [vmem:[%s2727_s1 + $0x74] sm:$0xf]  ;;  %v1901_v14 = vor.u32 %v2153_v2, %v1900_v1  ;;  %v2021_v15 = vor.u32 %v2183_v4, %v2020_v3 }
  0xc4   : > { %1316 = vmatpush.bf16.msra.mxu0 %v1725_v43  ;;  %v1766_v9 = vld [vmem:[%s2727_s1 + $0x78] sm:$0xf0]  ;;  %v2134_v12 = vld [vmem:[%s2727_s1 + $0xf4] sm:$0xf]  ;;  %v2012_v16 = vld [vmem:[%s2727_s1 + $0x260] sm:$0xf]  ;;  %v2085_v18 = vor.u32 %v2199_v7, %v2084_v5 }
  0xc5   : > { %1330 = vmatpush.bf16.msra.mxu1 %v1789_v44  ;;  %v1830_v13 = vld [vmem:[%s2727_s1 + $0xf8] sm:$0xf0]  ;;  %v2181_v17 = vld [vmem:[%s2727_s1 + $0x264] sm:$0xf0]  ;;  %v1769_v19 = vor.u32 %v2118_v8, %v1766_v9  ;;  %v2076_v20 = vld [vmem:[%s2727_s1 + $0x2e0] sm:$0xf] }
  0xc6   : > { %1344 = vmatpush.bf16.msra.mxu2 %v1853_v45  ;;  %v2197_v21 = vld [vmem:[%s2727_s1 + $0x2e4] sm:$0xf0]  ;;  %v2116_v22 = vld [vmem:[%s2727_s1 + $0x64] sm:$0xf]  ;;  %v1833_v23 = vor.u32 %v2134_v12, %v1830_v13  ;;  %v1758_v24 = vld [vmem:[%s2727_s1 + $0x68] sm:$0xf0]  ;;  %v2013_v30 = vor.u32 %v2181_v17, %v2012_v16 }
  0xc7   : > { %1358 = vmatpush.bf16.msra.mxu3 %v1917_v49  ;;  %v2132_v25 = vld [vmem:[%s2727_s1 + $0xe4] sm:$0xf]  ;;  %v1822_v26 = vld [vmem:[%s2727_s1 + $0xe8] sm:$0xf0]  ;;  %v2004_v27 = vld [vmem:[%s2727_s1 + $0x250] sm:$0xf]  ;;  %v2077_v35 = vor.u32 %v2197_v21, %v2076_v20  ;;  %v1761_v36 = vor.u32 %v2116_v22, %v1758_v24 }
  0xc8   : > { %1317 = vmatpush.bf16.msra.mxu0 %v1717_v55  ;;  %v1684_v28 = vld [vmem:[%s2725_s6] sm:$0xf]  ;;  %v2101_v29 = vld [vmem:[%s2725_s6 + $0x14] sm:$0xf0]  ;;  %v2114_v37 = vld [vmem:[%s2727_s1 + $0x54] sm:$0xf]  ;;  %v1825_v40 = vor.u32 %v2132_v25, %v1822_v26 }
  0xc9   : > { %1331 = vmatpush.bf16.msra.mxu1 %v1781_v58  ;;  %v2179_v31 = vld [vmem:[%s2727_s1 + $0x254] sm:$0xf0]  ;;  %v2068_v32 = vld [vmem:[%s2727_s1 + $0x2d0] sm:$0xf]  ;;  %v2818_v34 = vor.u32 %v2101_v29, %v1684_v28  ;;  %v1750_v38 = vld [vmem:[%s2727_s1 + $0x58] sm:$0xf0] }
  0xca   : > { %1345 = vmatpush.bf16.msra.mxu2 %v1845_v59  ;;  %v2195_v33 = vld [vmem:[%s2727_s1 + $0x2d4] sm:$0xf0]  ;;  %v2130_v39 = vld [vmem:[%s2727_s1 + $0xd4] sm:$0xf]  ;;  %v1814_v41 = vld [vmem:[%s2727_s1 + $0xd8] sm:$0xf0]  ;;  %v2005_v48 = vor.u32 %v2179_v31, %v2004_v27  ;;  %v1753_v52 = vor.u32 %v2114_v37, %v1750_v38 }
  0xcb   : > { %1359 = vmatpush.bf16.msra.mxu3 %v1909_v63  ;;  %v2098_v42 = vld [vmem:[%s2725_s6 + $0x4] sm:$0xf]  ;;  %v1686_v43 = vld [vmem:[%s2725_s6 + $0x18] sm:$0xf0]  ;;  %v1692_v45 = vld [vmem:[%s2725_s6 + $0x8] sm:$0xf]  ;;  %v2069_v51 = vor.u32 %v2195_v33, %v2068_v32  ;;  %v1817_v57 = vor.u32 %v2130_v39, %v1814_v41 }
  0xcc   : > { %1318 = vmatpush.bf16.msra.mxu0 %v1709_v6  ;;  %v2827_v44 = vor.u32 %v2098_v42, %v1686_v43  ;;  %v2102_v46 = vld [vmem:[%s2725_s6 + $0x1c] sm:$0xf0]  ;;  %v2099_v47 = vld [vmem:[%s2725_s6 + $0xc] sm:$0xf]  ;;  %v1694_v50 = vld [vmem:[%s2725_s6 + $0x20] sm:$0xf0] }
  0xcd   : > { %1332 = vmatpush.bf16.msra.mxu1 %v1773_v10  ;;  %v2832_v49 = vor.u32 %v2102_v46, %v1692_v45  ;;  %v1996_v53 = vld [vmem:[%s2727_s1 + $0x240] sm:$0xf]  ;;  %v2177_v54 = vld [vmem:[%s2727_s1 + $0x244] sm:$0xf0]  ;;  %v2838_v56 = vor.u32 %v2099_v47, %v1694_v50  ;;  %v2112_v59 = vld [vmem:[%s2727_s1 + $0x44] sm:$0xf] }
  0xce   : > { %1346 = vmatpush.bf16.msra.mxu2 %v1837_v11  ;;  %v2060_v55 = vld [vmem:[%s2727_s1 + $0x2c0] sm:$0xf]  ;;  %v2193_v58 = vld [vmem:[%s2727_s1 + $0x2c4] sm:$0xf0]  ;;  %v1742_v60 = vld [vmem:[%s2727_s1 + $0x48] sm:$0xf0]  ;;  %v1997_v63 = vor.u32 %v2177_v54, %v1996_v53 }
  0xcf   : > { %1360 = vmatpush.bf16.msra.mxu3 %v1901_v14  ;;  %1319 = vmatmul.bf16.vlgmr.msra.gmra.mxu0 %v2818_v34  ;;  %v2128_v61 = vld [vmem:[%s2727_s1 + $0xc4] sm:$0xf]  ;;  %v1806_v62 = vld [vmem:[%s2727_s1 + $0xc8] sm:$0xf0]  ;;  %v2061_v0 = vor.u32 %v2193_v58, %v2060_v55  ;;  %v1745_v1 = vor.u32 %v2112_v59, %v1742_v60  ;;  %v1988_v2 = vld [vmem:[%s2727_s1 + $0x230] sm:$0xf] }
  0xd0   : > { %1367 = vmatpush.bf16.msrb.mxu0 %v2021_v15  ;;  %1333 = vmatmul.bf16.vlgmr.msra.gmra.mxu1 %v2827_v44  ;;  %v2175_v3 = vld [vmem:[%s2727_s1 + $0x234] sm:$0xf0]  ;;  %v2052_v4 = vld [vmem:[%s2727_s1 + $0x2b0] sm:$0xf]  ;;  %v1809_v5 = vor.u32 %v2128_v61, %v1806_v62  ;;  %v2110_v7 = vld [vmem:[%s2727_s1 + $0x34] sm:$0xf] }
  0xd1   : > { %1381 = vmatpush.bf16.msrb.mxu1 %v2085_v18  ;;  %1347 = vmatmul.bf16.vlgmr.msra.gmra.mxu2 %v2832_v49  ;;  %v2191_v6 = vld [vmem:[%s2727_s1 + $0x2b4] sm:$0xf0]  ;;  %v1734_v8 = vld [vmem:[%s2727_s1 + $0x38] sm:$0xf0]  ;;  %v2126_v9 = vld [vmem:[%s2727_s1 + $0xb4] sm:$0xf]  ;;  %v1989_v11 = vor.u32 %v2175_v3, %v1988_v2 }
  0xd2   : > { %1395 = vmatpush.bf16.msrb.mxu2 %v1769_v19  ;;  %1361 = vmatmul.bf16.vlgmr.msra.gmra.mxu3 %v2838_v56  ;;  %v1798_v10 = vld [vmem:[%s2727_s1 + $0xb8] sm:$0xf0]  ;;  %v2053_v12 = vor.u32 %v2191_v6, %v2052_v4  ;;  %v1737_v13 = vor.u32 %v2110_v7, %v1734_v8  ;;  %v1980_v14 = vld [vmem:[%s2727_s1 + $0x220] sm:$0xf]  ;;  %v2173_v15 = vld [vmem:[%s2727_s1 + $0x224] sm:$0xf0] }
  0xd3   : > { %1409 = vmatpush.bf16.msrb.mxu3 %v1833_v23  ;;  %v2044_v16 = vld [vmem:[%s2727_s1 + $0x2a0] sm:$0xf]  ;;  %v1801_v17 = vor.u32 %v2126_v9, %v1798_v10  ;;  %v2189_v18 = vld [vmem:[%s2727_s1 + $0x2a4] sm:$0xf0]  ;;  %v2108_v19 = vld [vmem:[%s2727_s1 + $0x24] sm:$0xf]  ;;  %v1981_v23 = vor.u32 %v2173_v15, %v1980_v14 }
  0xd4   : > { %1368 = vmatpush.bf16.msrb.mxu0 %v2013_v30  ;;  %v1726_v20 = vld [vmem:[%s2727_s1 + $0x28] sm:$0xf0]  ;;  %v2124_v21 = vld [vmem:[%s2727_s1 + $0xa4] sm:$0xf]  ;;  %v2045_v24 = vor.u32 %v2189_v18, %v2044_v16  ;;  %v1972_v26 = vld [vmem:[%s2727_s1 + $0x210] sm:$0xf] }
  0xd5   : > { %1382 = vmatpush.bf16.msrb.mxu1 %v2077_v35  ;;  %v1790_v22 = vld [vmem:[%s2727_s1 + $0xa8] sm:$0xf0]  ;;  %v1729_v25 = vor.u32 %v2108_v19, %v1726_v20  ;;  %v2171_v27 = vld [vmem:[%s2727_s1 + $0x214] sm:$0xf0]  ;;  %v2036_v28 = vld [vmem:[%s2727_s1 + $0x290] sm:$0xf] }
  0xd6   : > { %1396 = vmatpush.bf16.msrb.mxu2 %v1761_v36  ;;  %v1793_v29 = vor.u32 %v2124_v21, %v1790_v22  ;;  %v2187_v30 = vld [vmem:[%s2727_s1 + $0x294] sm:$0xf0]  ;;  %v2106_v31 = vld [vmem:[%s2727_s1 + $0x14] sm:$0xf]  ;;  %v1718_v32 = vld [vmem:[%s2727_s1 + $0x18] sm:$0xf0]  ;;  %v1973_v36 = vor.u32 %v2171_v27, %v1972_v26 }
  0xd7   : > { %1410 = vmatpush.bf16.msrb.mxu3 %v1825_v40  ;;  %v2122_v33 = vld [vmem:[%s2727_s1 + $0x94] sm:$0xf]  ;;  %v1782_v35 = vld [vmem:[%s2727_s1 + $0x98] sm:$0xf0]  ;;  %v1964_v37 = vld [vmem:[%s2727_s1 + $0x200] sm:$0xf]  ;;  %v2037_v40 = vor.u32 %v2187_v30, %v2036_v28  ;;  %v1721_v41 = vor.u32 %v2106_v31, %v1718_v32 }
  0xd8   : > { %1369 = vmatpush.bf16.msrb.mxu0 %v2005_v48  ;;  %v2169_v38 = vld [vmem:[%s2727_s1 + $0x204] sm:$0xf0]  ;;  %v2028_v39 = vld [vmem:[%s2727_s1 + $0x280] sm:$0xf]  ;;  %v2104_v43 = vld [vmem:[%s2727_s1 + $0x4] sm:$0xf]  ;;  %v1785_v46 = vor.u32 %v2122_v33, %v1782_v35 }
  0xd9   : > { %1383 = vmatpush.bf16.msrb.mxu1 %v2069_v51  ;;  %v2185_v42 = vld [vmem:[%s2727_s1 + $0x284] sm:$0xf0]  ;;  %v1710_v45 = vld [vmem:[%s2727_s1 + $0x8] sm:$0xf0]  ;;  %v2120_v47 = vld [vmem:[%s2727_s1 + $0x84] sm:$0xf]  ;;  %v1965_v54 = vor.u32 %v2169_v38, %v1964_v37 }
  0xda   : > { %1397 = vmatpush.bf16.msrb.mxu2 %v1753_v52  ;;  %v1774_v48 = vld [vmem:[%s2727_s1 + $0x88] sm:$0xf0]  ;;  %v2150_v50 = vld [vmem:[%s2727_s1 + $0x174] sm:$0xf]  ;;  %v1894_v51 = vld [vmem:[%s2727_s1 + $0x178] sm:$0xf0]  ;;  %v2029_v59 = vor.u32 %v2185_v42, %v2028_v39  ;;  %v1713_v60 = vor.u32 %v2104_v43, %v1710_v45 }
  0xdb   : > { %1411 = vmatpush.bf16.msrb.mxu3 %v1817_v57  ;;  %v2166_v52 = vld [vmem:[%s2727_s1 + $0x1f4] sm:$0xf]  ;;  %v1958_v53 = vld [vmem:[%s2727_s1 + $0x1f8] sm:$0xf0]  ;;  %v1700_v62 = vld [vmem:[%s2725_s6 + $0x10] sm:$0xf] }
  0xdc   : > { %1370 = vmatpush.bf16.msrb.mxu0 %v1997_v63  ;;  %v2182_v55 = vld [vmem:[%s2727_s1 + $0x274] sm:$0xf]  ;;  %v2022_v57 = vld [vmem:[%s2727_s1 + $0x278] sm:$0xf0]  ;;  %v2103_v63 = vld [vmem:[%s2725_s6 + $0x24] sm:$0xf0]  ;;  %v1961_v4 = vor.u32 %v2166_v52, %v1958_v53 }
  0xdd   : > { %1384 = vmatpush.bf16.msrb.mxu1 %v2061_v0  ;;  %v2198_v58 = vld [vmem:[%s2727_s1 + $0x2f4] sm:$0xf]  ;;  %v2086_v61 = vld [vmem:[%s2727_s1 + $0x2f8] sm:$0xf0]  ;;  %v1777_v0 = vor.u32 %v2120_v47, %v1774_v48  ;;  %v2148_v6 = vld [vmem:[%s2727_s1 + $0x164] sm:$0xf]  ;;  %v2895_v10 = vor.u32 %v2103_v63, %v1700_v62 }
  0xde   : > { %1398 = vmatpush.bf16.msrb.mxu2 %v1745_v1  ;;  %v1897_v1 = vor.u32 %v2150_v50, %v1894_v51  ;;  %v2100_v2 = vld [vmem:[%s2725_s6 + $0x14] sm:$0xf]  ;;  %v1702_v3 = vld [vmem:[%s2725_s6 + $0x28] sm:$0xf0]  ;;  %v2089_v9 = vor.u32 %v2198_v58, %v2086_v61  ;;  %p2090_p5 = scmp.ne.s32.totalorder %s2364_s18, 5 }
  0xdf   : > { %1412 = vmatpush.bf16.msrb.mxu3 %v1809_v5  ;;  %v2025_v5 = vor.u32 %v2182_v55, %v2022_v57  ;;  %v1886_v7 = vld [vmem:[%s2727_s1 + $0x168] sm:$0xf0]  ;;  %v2164_v8 = vld [vmem:[%s2727_s1 + $0x1e4] sm:$0xf]  ;;  %v2900_v14 = vor.u32 %v2100_v2, %v1702_v3  ;;  %v2146_v20 = vld [vmem:[%s2727_s1 + $0x154] sm:$0xf] }
  0xe0   : > { %1371 = vmatpush.bf16.msrb.mxu0 %v1989_v11  ;;  %v1950_v11 = vld [vmem:[%s2727_s1 + $0x1e8] sm:$0xf0]  ;;  %v2196_v15 = vld [vmem:[%s2727_s1 + $0x2e4] sm:$0xf]  ;;  %v1878_v21 = vld [vmem:[%s2727_s1 + $0x158] sm:$0xf0] }
  0xe1   : > { %1385 = vmatpush.bf16.msrb.mxu1 %v2053_v12  ;;  %v2180_v12 = vld [vmem:[%s2727_s1 + $0x264] sm:$0xf]  ;;  %v2078_v16 = vld [vmem:[%s2727_s1 + $0x2e8] sm:$0xf0]  ;;  %v1953_v18 = vor.u32 %v2164_v8, %v1950_v11  ;;  %v2162_v22 = vld [vmem:[%s2727_s1 + $0x1d4] sm:$0xf] }
  0xe2   : > { %1399 = vmatpush.bf16.msrb.mxu2 %v1737_v13  ;;  %v2014_v13 = vld [vmem:[%s2727_s1 + $0x268] sm:$0xf0]  ;;  %v2006_v26 = vld [vmem:[%s2727_s1 + $0x258] sm:$0xf0]  ;;  %v2194_v27 = vld [vmem:[%s2727_s1 + $0x2d4] sm:$0xf] }
  0xe3   : > { %1413 = vmatpush.bf16.msrb.mxu3 %v1801_v17  ;;  %v1889_v17 = vor.u32 %v2148_v6, %v1886_v7  ;;  %v2017_v19 = vor.u32 %v2180_v12, %v2014_v13  ;;  %v2070_v28 = vld [vmem:[%s2727_s1 + $0x2d8] sm:$0xf0]  ;;  %v2144_v32 = vld [vmem:[%s2727_s1 + $0x144] sm:$0xf]  ;;  %v1870_v33 = vld [vmem:[%s2727_s1 + $0x148] sm:$0xf0] }
  0xe4   : > { %1372 = vmatpush.bf16.msrb.mxu0 %v1981_v23  ;;  %v2081_v23 = vor.u32 %v2196_v15, %v2078_v16  ;;  %v2160_v35 = vld [vmem:[%s2727_s1 + $0x1c4] sm:$0xf]  ;;  %v1998_v38 = vld [vmem:[%s2727_s1 + $0x248] sm:$0xf0]  ;;  %v2142_v43 = vld [vmem:[%s2727_s1 + $0x134] sm:$0xf] }
  0xe5   : > { %1386 = vmatpush.bf16.msrb.mxu1 %v2045_v24  ;;  %v1942_v24 = vld [vmem:[%s2727_s1 + $0x1d8] sm:$0xf0]  ;;  %v2176_v37 = vld [vmem:[%s2727_s1 + $0x244] sm:$0xf]  ;;  %v2062_v39 = vld [vmem:[%s2727_s1 + $0x2c8] sm:$0xf0] }
  0xe6   : > { %1400 = vmatpush.bf16.msrb.mxu2 %v1729_v25  ;;  %v2178_v25 = vld [vmem:[%s2727_s1 + $0x254] sm:$0xf]  ;;  %v1945_v30 = vor.u32 %v2162_v22, %v1942_v24  ;;  %v2001_v42 = vor.u32 %v2176_v37, %v1998_v38  ;;  %v1862_v45 = vld [vmem:[%s2727_s1 + $0x138] sm:$0xf0]  ;;  %v2140_v58 = vld [vmem:[%s2727_s1 + $0x124] sm:$0xf] }
  0xe7   : > { %1414 = vmatpush.bf16.msrb.mxu3 %v1793_v29  ;;  %v1881_v29 = vor.u32 %v2146_v20, %v1878_v21  ;;  %v2009_v31 = vor.u32 %v2178_v25, %v2006_v26  ;;  %v1926_v48 = vld [vmem:[%s2727_s1 + $0x1b8] sm:$0xf0]  ;;  %v2174_v50 = vld [vmem:[%s2727_s1 + $0x234] sm:$0xf]  ;;  %v1918_v62 = vld [vmem:[%s2727_s1 + $0x1a8] sm:$0xf0] }
  0xe8   : > { %1373 = vmatpush.bf16.msrb.mxu0 %v1973_v36  ;;  %v1934_v36 = vld [vmem:[%s2727_s1 + $0x1c8] sm:$0xf0]  ;;  %v1990_v51 = vld [vmem:[%s2727_s1 + $0x238] sm:$0xf0]  ;;  %v2190_v52 = vld [vmem:[%s2727_s1 + $0x2b4] sm:$0xf] }
  0xe9   : > { %1387 = vmatpush.bf16.msrb.mxu1 %v2037_v40  ;;  %v1873_v40 = vor.u32 %v2144_v32, %v1870_v33  ;;  %v2054_v53 = vld [vmem:[%s2727_s1 + $0x2b8] sm:$0xf0]  ;;  %v1993_v57 = vor.u32 %v2174_v50, %v1990_v51  ;;  %v2172_v63 = vld [vmem:[%s2727_s1 + $0x224] sm:$0xf]  ;;  %v2046_v2 = vld [vmem:[%s2727_s1 + $0x2a8] sm:$0xf0] }
  0xea   : > { %1401 = vmatpush.bf16.msrb.mxu2 %v1721_v41  ;;  %v1937_v41 = vor.u32 %v2160_v35, %v1934_v36  ;;  %v2057_v61 = vor.u32 %v2190_v52, %v2054_v53  ;;  %v2138_v6 = vld [vmem:[%s2727_s1 + $0x114] sm:$0xf]  ;;  %v1846_v7 = vld [vmem:[%s2727_s1 + $0x118] sm:$0xf0]  ;;  %v2136_v20 = vld [vmem:[%s2727_s1 + $0x104] sm:$0xf] }
  0xeb   : > { %1415 = vmatpush.bf16.msrb.mxu3 %v1785_v46  ;;  %v2158_v46 = vld [vmem:[%s2727_s1 + $0x1b4] sm:$0xf]  ;;  %v1910_v11 = vld [vmem:[%s2727_s1 + $0x198] sm:$0xf0]  ;;  %v1838_v21 = vld [vmem:[%s2727_s1 + $0x108] sm:$0xf0] }
  0xec   : > { %1374 = vmatpush.bf16.msrb.mxu0 %v1965_v54  ;;  %v1865_v54 = vor.u32 %v2142_v43, %v1862_v45  ;;  %v1929_v55 = vor.u32 %v2158_v46, %v1926_v48  ;;  %v2154_v8 = vld [vmem:[%s2727_s1 + $0x194] sm:$0xf]  ;;  %v1974_v13 = vld [vmem:[%s2727_s1 + $0x218] sm:$0xf0]  ;;  %v2152_v22 = vld [vmem:[%s2727_s1 + $0x184] sm:$0xf] }
  0xed   : > { %1388 = vmatpush.bf16.msrb.mxu1 %v2029_v59  ;;  %v1854_v59 = vld [vmem:[%s2727_s1 + $0x128] sm:$0xf0]  ;;  %v2170_v12 = vld [vmem:[%s2727_s1 + $0x214] sm:$0xf]  ;;  %v2038_v16 = vld [vmem:[%s2727_s1 + $0x298] sm:$0xf0] }
  0xee   : > { %1402 = vmatpush.bf16.msrb.mxu2 %v1713_v60  ;;  %v2156_v60 = vld [vmem:[%s2727_s1 + $0x1a4] sm:$0xf]  ;;  %v1857_v3 = vor.u32 %v2140_v58, %v1854_v59  ;;  %v2186_v15 = vld [vmem:[%s2727_s1 + $0x294] sm:$0xf]  ;;  %v1902_v24 = vld [vmem:[%s2727_s1 + $0x188] sm:$0xf0] }
  0xef   : > { %1416 = vmatpush.bf16.msrb.mxu3 %v1777_v0  ;;  %1375 = vmatmul.bf16.vlgmr.msrb.gmra.mxu0 %v2895_v10  ;;  %v1982_v0 = vld [vmem:[%s2727_s1 + $0x228] sm:$0xf0]  ;;  %v2168_v25 = vld [vmem:[%s2727_s1 + $0x204] sm:$0xf]  ;;  %v695_v46 = vld [vmem:[#allocation2 + $0x10] sm:$0xff] }
  0xf0   : > { %1423 = vmatpush.bf16.msra.mxu0 %v1897_v1  ;;  %1389 = vmatmul.bf16.vlgmr.msrb.gmra.mxu1 %v2900_v14  ;;  %v2188_v1 = vld [vmem:[%s2727_s1 + $0x2a4] sm:$0xf]  ;;  %v1966_v26 = vld [vmem:[%s2727_s1 + $0x208] sm:$0xf0]  ;;  %v697_v53 = vld [vmem:[#allocation2 + $0x18] sm:$0xff] }
  0xf1   : > { %1437 = vmatpush.bf16.msra.mxu1 %v1961_v4  ;;  %1403 = vmatmul.bf16.vlgmr.msrb.gmra.mxu2 %v2818_v34  ;;  %v2073_v34 = vor.u32 %v2194_v27, %v2070_v28  ;;  %v1921_v4 = vor.u32 %v2156_v60, %v1918_v62  ;;  %v2184_v27 = vld [vmem:[%s2727_s1 + $0x284] sm:$0xf]  ;;  %v2030_v28 = vld [vmem:[%s2727_s1 + $0x288] sm:$0xf0] }
  0xf2   : > { %1451 = vmatpush.bf16.msra.mxu2 %v2025_v5  ;;  %1417 = vmatmul.bf16.vlgmr.msrb.gmra.mxu3 %v2827_v44  ;;  %v2192_v44 = vld [vmem:[%s2727_s1 + $0x2c4] sm:$0xf]  ;;  %v1985_v5 = vor.u32 %v2172_v63, %v1982_v0  ;;  %v2033_v32 = vor.u32 %v2184_v27, %v2030_v28 }
  0xf3   : > { %1465 = vmatpush.bf16.msra.mxu3 %v2089_v9  ;;  %v2065_v47 = vor.u32 %v2192_v44, %v2062_v39  ;;  %v2049_v9 = vor.u32 %v2188_v1, %v2046_v2 }
  0xf4   : > { %1424 = vmatpush.bf16.msra.mxu0 %v1889_v17  ;;  %v1849_v17 = vor.u32 %v2138_v6, %v1846_v7  ;;  %v696_v7 = vld [vmem:[#allocation2] sm:$0xff] }
  0xf5   : > { %1438 = vmatpush.bf16.msra.mxu1 %v1953_v18  ;;  %v1913_v18 = vor.u32 %v2154_v8, %v1910_v11 }
  0xf6   : > { %1452 = vmatpush.bf16.msra.mxu2 %v2017_v19  ;;  %v1977_v19 = vor.u32 %v2170_v12, %v1974_v13 }
  0xf7   : > { %1466 = vmatpush.bf16.msra.mxu3 %v2081_v23  ;;  %v2041_v23 = vor.u32 %v2186_v15, %v2038_v16 }
  0xf8   : > { %1425 = vmatpush.bf16.msra.mxu0 %v1881_v29  ;;  %v1841_v29 = vor.u32 %v2136_v20, %v1838_v21 }
  0xf9   : > { %1439 = vmatpush.bf16.msra.mxu1 %v1945_v30  ;;  %v1905_v30 = vor.u32 %v2152_v22, %v1902_v24 }
  0xfa   : > { %1453 = vmatpush.bf16.msra.mxu2 %v2009_v31  ;;  %v1969_v31 = vor.u32 %v2168_v25, %v1966_v26 }
  0xfb   : > { %1467 = vmatpush.bf16.msra.mxu3 %v2073_v34 }
  0xfc   : > { %1426 = vmatpush.bf16.msra.mxu0 %v1873_v40 }
  0xfd   : > { %1440 = vmatpush.bf16.msra.mxu1 %v1937_v41 }
  0xfe   : > { %1454 = vmatpush.bf16.msra.mxu2 %v2001_v42 }
  0xff   : > { %1468 = vmatpush.bf16.msra.mxu3 %v2065_v47 }
 0x100   : > { %1427 = vmatpush.bf16.msra.mxu0 %v1865_v54 }
 0x101   : > { %1441 = vmatpush.bf16.msra.mxu1 %v1929_v55 }
 0x102   : > { %1455 = vmatpush.bf16.msra.mxu2 %v1993_v57 }
 0x103   : > { %1469 = vmatpush.bf16.msra.mxu3 %v2057_v61 }
 0x104   : > { %1428 = vmatpush.bf16.msra.mxu0 %v1857_v3 }
 0x105   : > { %1442 = vmatpush.bf16.msra.mxu1 %v1921_v4 }
 0x106   : > { %1456 = vmatpush.bf16.msra.mxu2 %v1985_v5 }
 0x107   : > { %1470 = vmatpush.bf16.msra.mxu3 %v2049_v9 }
 0x108   : > { %1429 = vmatpush.bf16.msra.mxu0 %v1849_v17  ;;  %v698_v17 = vld [vmem:[#allocation2 + $0x8] sm:$0xff] }
 0x109   : > { %1443 = vmatpush.bf16.msra.mxu1 %v1913_v18 }
 0x10a   : > { %1457 = vmatpush.bf16.msra.mxu2 %v1977_v19 }
 0x10b   : > { %1471 = vmatpush.bf16.msra.mxu3 %v2041_v23 }
 0x10c   : > { %1430 = vmatpush.bf16.msra.mxu0 %v1841_v29 }
 0x10d   : > { %1444 = vmatpush.bf16.msra.mxu1 %v1905_v30 }
 0x10e   : > { %1458 = vmatpush.bf16.msra.mxu2 %v1969_v31 }
 0x10f   : > { %1472 = vmatpush.bf16.msra.mxu3 %v2033_v32  ;;  %1431 = vmatmul.bf16.vlgmr.msra.gmra.mxu0 %v2832_v49 }
 0x110   : > { %1445 = vmatmul.bf16.vlgmr.msra.gmra.mxu1 %v2838_v56 }
 0x111   : > { %1459 = vmatmul.bf16.vlgmr.msra.gmra.mxu2 %v2895_v10 }
 0x112   : > { %1473 = vmatmul.bf16.vlgmr.msra.gmra.mxu3 %v2900_v14 }
 0x14c   : > { %v1320_v33 = vpop.f32.mrf.mxu0 }
 0x14d   : > { %v1334_v35 = vpop.f32.mrf.mxu1 }
 0x14e   : > { %v1335_v34 = vadd.f32 %v1334_v35, %v1320_v33 }
 0x154   : > { %v1322_v36 = vpop.f32.mrf.mxu0  ;;  %v1348_v37 = vpop.f32.mrf.mxu2 }
 0x155   : > { %v1336_v38 = vpop.f32.mrf.mxu1  ;;  %v1349_v44 = vadd.f32 %v1348_v37, %v1335_v34  ;;  %v1362_v39 = vpop.f32.mrf.mxu3 }
 0x156   : > { %v1337_v41 = vadd.f32 %v1336_v38, %v1322_v36 }
 0x157   : > { %v1363_v40 = vadd.f32 %v1362_v39, %v1349_v44 }
 0x15c   : > { %v1350_v43 = vpop.f32.mrf.mxu2 }
 0x15d   : > { %v1351_v56 = vadd.f32 %v1350_v43, %v1337_v41  ;;  %v1364_v10 = vpop.f32.mrf.mxu3 }
 0x15f   : > { %v1365_v14 = vadd.f32 %v1364_v10, %v1351_v56 }
 0x16c   : > { %v1376_v42 = vpop.f32.mrf.mxu0 }
 0x16d   : > { %v1377_v45 = vadd.f32 %v1376_v42, %v1363_v40  ;;  %v1390_v49 = vpop.f32.mrf.mxu1 }
 0x16f   : > { %v1391_v47 = vadd.f32 %v1390_v49, %v1377_v45 }
 0x171   : > { %v1479_v48 = vadd.f32 %v1391_v47, %v695_v46 }
 0x173   : > { %1483 = vst [vmem:[#allocation2 + $0x10] sm:$0xff] %v1479_v48 }
 0x174   : > { %v1378_v50 = vpop.f32.mrf.mxu0  ;;  %v1404_v57 = vpop.f32.mrf.mxu2 }
 0x175   : > { %v1379_v51 = vadd.f32 %v1378_v50, %v1365_v14  ;;  %v1392_v52 = vpop.f32.mrf.mxu1  ;;  %v1418_v58 = vpop.f32.mrf.mxu3 }
 0x176   : > { %v1419_v60 = vadd.f32 %v1418_v58, %v1404_v57 }
 0x177   : > { %v1393_v54 = vadd.f32 %v1392_v52, %v1379_v51 }
 0x179   : > { %v1481_v55 = vadd.f32 %v1393_v54, %v697_v53 }
 0x17b   : > { %1485 = vst [vmem:[#allocation2 + $0x18] sm:$0xff] %v1481_v55 }
 0x17c   : > { %v1406_v59 = vpop.f32.mrf.mxu2 }
 0x17d   : > { %v1420_v61 = vpop.f32.mrf.mxu3 }
 0x17e   : > { %v1421_v3 = vadd.f32 %v1420_v61, %v1406_v59 }
 0x18c   : > { %v1432_v62 = vpop.f32.mrf.mxu0 }
 0x18d   : > { %v1433_v63 = vadd.f32 %v1432_v62, %v1419_v60  ;;  %v1446_v0 = vpop.f32.mrf.mxu1 }
 0x18f   : > { %v1447_v1 = vadd.f32 %v1446_v0, %v1433_v63 }
 0x194   : > { %v1460_v2 = vpop.f32.mrf.mxu2  ;;  %v1434_v6 = vpop.f32.mrf.mxu0 }
 0x195   : > { %v1461_v4 = vadd.f32 %v1460_v2, %v1447_v1  ;;  %v1474_v5 = vpop.f32.mrf.mxu3  ;;  %v1435_v9 = vadd.f32 %v1434_v6, %v1421_v3  ;;  %v1448_v12 = vpop.f32.mrf.mxu1 }
 0x197   : > { %v1475_v8 = vadd.f32 %v1474_v5, %v1461_v4  ;;  %v1449_v13 = vadd.f32 %v1448_v12, %v1435_v9 }
 0x199   : > { %v1480_v11 = vadd.f32 %v1475_v8, %v696_v7 }
 0x19b   : > { %1484 = vst [vmem:[#allocation2] sm:$0xff] %v1480_v11 }
 0x19c   : > { %v1462_v15 = vpop.f32.mrf.mxu2 }
 0x19d   : > { %v1463_v16 = vadd.f32 %v1462_v15, %v1449_v13  ;;  %v1476_v18 = vpop.f32.mrf.mxu3 }
 0x19f   : > { %v1477_v19 = vadd.f32 %v1476_v18, %v1463_v16  ;;  %1490 = sbr.rel (%p2090_p5) target bundleno = 434 (0x1b2), region = 101 }
 0x1a1   : > { %v1482_v20 = vadd.f32 %v1477_v19, %v698_v17 }
 0x1a3   : > { %1486 = vst [vmem:[#allocation2 + $0x8] sm:$0xff] %v1482_v20 }
 0x1a4   : > { %v1491_v21 = vld [vmem:[#allocation2 + $0x10] sm:$0xff]  ;;  %v1492_v22 = vld [vmem:[#allocation2] sm:$0xff]  ;;  %v1493_v26 = vld [vmem:[#allocation2 + $0x18] sm:$0xff] }
 0x1a5   : > { %v1495_v23 = vld [vmem:[%s683_s5] sm:$0x3] }
 0x1a6   : > { %v1497_v24 = vperm.slane %v1495_v23, 0  ;;  %v1498_v25 = vperm.slane %v1495_v23, 1 }
 0x1a8   : > { %v1501_v28 = vadd.f32 %v1497_v24, %v1491_v21  ;;  %v1502_v29 = vadd.f32 %v1498_v25, %v1492_v22  ;;  %v1503_v30 = vadd.f32 %v1497_v24, %v1493_v26 }
 0x1aa   : > { %v1494_v27 = vld [vmem:[#allocation2 + $0x8] sm:$0xff]  ;;  %v1505_v32 = vmax.f32 %v1501_v28, 0.0  ;;  %v1506_v33 = vmax.f32 %v1502_v29, 0.0  ;;  %v1507_v35 = vmax.f32 %v1503_v30, 0.0 }
 0x1ab   : > { %v1504_v31 = vadd.f32 %v1498_v25, %v1494_v27 }
 0x1ac   : > { %v1509_v36 = vpack.c.bf16 %v1506_v33, %v1505_v32 }
 0x1ad   : > { %v1508_v34 = vmax.f32 %v1504_v31, 0.0 }
 0x1ae   : > { %1511 = vst [vmem:[%s2729_s25] sm:$0xff] %v1509_v36 }
 0x1af   : > { %v1510_v37 = vpack.c.bf16 %v1508_v34, %v1507_v35 }
 0x1b1   : > { %1512 = vst [vmem:[%s2729_s25 + $0x8] sm:$0xff] %v1510_v37 }
 0x1b2 PF: > { %1519 = sbr.rel (!%p2497_p12) target bundleno = 442 (0x1ba), region = 105  ;;  %s2200_s14 = sshll.u32 (%p2497_p12), %s2368_s19, 3 }
 0x1b3   : > { %s1525_s0 = scalar_lea.vmem (%p2497_p12), %s3012_s3, %s2200_s14 }
 0x1b5   : > { %v1556_v38 = vld [vmem:[%s2729_s25] sm:$0xff] (%p2497_p12) }
 0x1b6   : > { %1557 = vst [vmem:[%s1525_s0] sm:$0xff] (%p2497_p12), %v1556_v38 }
 0x1b8   : > { %v1558_v44 = vld [vmem:[%s2729_s25 + $0x8] sm:$0xff] }
 0x1b9   : > { %1559 = vst [vmem:[%s1525_s0 + $0x40] sm:$0xff] %v1558_v44 }
 0x1ba PF: > { %s13_s22 = sadd.s32 1, %s2380_s22   ;;  %s3022_s25 = sld [smem:[#allocation6_spill]] }
 0x1bb   : > { %p10_p6 = scmp.ge.s32.totalorder %s13_s22, 50   ;;  %s3023_s12 = smov %s2344_s13 }
 0x1bc   : > { %s3024_s13 = smov %s2495_s9  ;;  %s3025_s14 = smov %s2352_s15 }
 0x1bd   : > { %s3026_s15 = smov %s2492_s8  ;;  %s3027_s16 = smov %s2360_s17 }
 0x1be   : > { %s3028_s17 = smov %s2478_s30  ;;  %s3029_s18 = smov %s2372_s20 }
 0x1bf   : > { %s3030_s19 = smov %s2376_s21  ;;  %s3031_s20 = smov %s3034_s24 }
 0x1c0   : > { %s3032_s21 = smov %s3022_s25  ;;  %12 = sbr.rel (!%p10_p6) target bundleno = 9 (0x9), region = 185 }

// kernel: deeplab_forward.19
= control target key start
LH: loop header
LB: loop body
LE: loop exit
PB: predicated region body
PF: predicated region fallthrough
CT: control target
= control target key end

     0   :  { %s2316_s12 = smov 0   ;;  %s2318_s13 = smov 0   ;;  %s2700_s0 = inlined_call_operand.vmem [shape: bf16[16,2048], index: 0, kind: input, shape index: {}]   ;;  %s2701_s1 = inlined_call_operand.vmem [shape: bf16[2048,256], index: 1, kind: input, shape index: {}]   ;;  %s2702_s2 = inlined_call_operand.vmem [shape: f32[1,256], index: 2, kind: input, shape index: {}]   ;;  %s2703_s3 = inlined_call_operand.vmem [shape: bf16[16,256], index: 3, kind: output, shape index: {}]  }
   0x1   :  { %s2320_s14 = smov 0   ;;  %s2322_s15 = smov 0  }
   0x2   :  { %s2324_s16 = smov 0  }
   0x3 LB: > { %s25_s17 = sadd.s32 1, %s2289_s15  ;;  %p48_p1 = scmp.ne.s32.totalorder %s2281_s13, %s2277_s12  ;;  %s2293_s16 = sphi %s2324_s16, %s13_s16   ;;  %s2289_s15 = sphi %s2322_s15, %s2707_s15   ;;  %s2285_s14 = sphi %s2320_s14, %s2706_s14   ;;  %s2281_s13 = sphi %s2318_s13, %s2705_s13   ;;  %s2277_s12 = sphi %s2316_s12, %s2704_s12  }
   0x4   : > { %p26_p0 = scmp.ge.s32.totalorder %s25_s17, 2  ;;  %p49_p2 = scmp.eq.s32.totalorder %s2293_s16, 0 }
   0x5   : > { %s41_s19 = sadd.s32 1, %s2281_s13  ;;  %p1517_p5 = scmp.ge.s32.totalorder %s2293_s16, 2 }
   0x6   : > { %s2709_s17 = smov (%p26_p0, %s25_s17), 0  ;;  %p50_p3 = por %p49_p2, %p48_p1 }
   0x7   : > { %s37_s18 = ssub.s32 %s2289_s15, %s2709_s17  ;;  %164 = sbr.rel (%p1517_p5) target bundleno = 24 (0x18), region = 20 }
   0x8   : > { %p39_p4 = scmp.eq.s32.totalorder %s37_s18, 0 }
   0xa   : > { %s2351_s20 = scalar_select %p39_p4, %s2281_s13, %s41_s19  }
   0xc   : > { %167 = sbr.rel (!%p50_p3) target bundleno = 24 (0x18), region = 24  ;;  %s169_s21 = sand.u32 (%p50_p3), 1, %s2281_s13  }
   0xd   : > { %s2076_s22 = sshll.u32 (%p50_p3), %s2289_s15, 5  ;;  %s1518_s23 = sshll.u32 (%p50_p3), %s169_s21, 6 }
   0xe   : > { %s177_s26 = scalar_lea.vmem (%p50_p3), %s2700_s0, %s2076_s22  ;;  %s171_s27 = scalar_lea.vmem (%p50_p3), [#allocation3], %s1518_s23 }
   0xf   : > { %v190_v0 = vld [vmem:[%s177_s26] sm:$0xff] (%p50_p3)  ;;  %v192_v1 = vld [vmem:[%s177_s26 + $0x8] sm:$0xff] (%p50_p3)  ;;  %v194_v2 = vld [vmem:[%s177_s26 + $0x10] sm:$0xff] (%p50_p3) }
  0x10   : > { %191 = vst [vmem:[%s171_s27] sm:$0xff] (%p50_p3), %v190_v0  ;;  %v196_v3 = vld [vmem:[%s177_s26 + $0x18] sm:$0xff] (%p50_p3)  ;;  %v198_v4 = vld [vmem:[%s177_s26 + $0x40] sm:$0xff] (%p50_p3)  ;;  %v200_v5 = vld [vmem:[%s177_s26 + $0x48] sm:$0xff] (%p50_p3) }
  0x11   : > { %193 = vst [vmem:[%s171_s27 + $0x8] sm:$0xff] %v192_v1  ;;  %v202_v6 = vld [vmem:[%s177_s26 + $0x50] sm:$0xff]  ;;  %v204_v7 = vld [vmem:[%s177_s26 + $0x58] sm:$0xff] }
  0x12   : > { %195 = vst [vmem:[%s171_s27 + $0x10] sm:$0xff] %v194_v2 }
  0x13   : > { %197 = vst [vmem:[%s171_s27 + $0x18] sm:$0xff] %v196_v3 }
  0x14   : > { %199 = vst [vmem:[%s171_s27 + $0x20] sm:$0xff] %v198_v4 }
  0x15   : > { %201 = vst [vmem:[%s171_s27 + $0x28] sm:$0xff] %v200_v5 }
  0x16   : > { %203 = vst [vmem:[%s171_s27 + $0x30] sm:$0xff] %v202_v6 }
  0x17   : > { %205 = vst [vmem:[%s171_s27 + $0x38] sm:$0xff] %v204_v7 }
  0x18 PF: > { %p1521_p6 = scmp.ge.s32.totalorder %s2293_s16, 1  ;;  %p225_p7 = scmp.lt.s32.totalorder %s2293_s16, 3 }
  0x1a   : > { %p226_p8 = pnand %p1521_p6, %p225_p7 }
  0x1b   : > { %s232_s28 = sand.u32 (!%p226_p8), 1, %s2277_s12   ;;  %s1523_s29 = sshll.u32 (!%p226_p8), %s2285_s14, 7 }
  0x1c   : > { %229 = sbr.rel (%p226_p8) target bundleno = 336 (0x150), region = 51  ;;  %s1522_s30 = sshll.u32 (!%p226_p8), %s232_s28, 6 }
  0x1d   : > { %p278_p9 = scmp.lt.s32.totalorder (!%p226_p8), %s1523_s29, 255  ;;  %s2368_s8 = scalar_lea.vmem (!%p226_p8), [#allocation3], %s1522_s30 }
  0x1e   : > { %p1526_p10 = scmp.ne.s32.totalorder (!%p226_p8), %s2285_s14, 0 }
  0x21   : > { %s2711_s29 = smov (!%p278_p9, %s1523_s29), 255  ;;  %308 = sbr.rel (%p1526_p10) target bundleno = 43 (0x2b), region = 59 }
  0x22   : > { %s2077_s4 = sshll.u32 %s2711_s29, 3 }
  0x23   : > { %s2366_s7 = scalar_lea.vmem %s2701_s1, %s2077_s4 }
  0x26   : > { %v2295_v8 = vmov 0.0  }
  0x27   : > { %309 = vst [vmem:[#allocation2 + $0x10] sm:$0xff] %v2295_v8 }
  0x28   : > { %310 = vst [vmem:[#allocation2] sm:$0xff] %v2295_v8 }
  0x29   : > { %311 = vst [vmem:[#allocation2 + $0x18] sm:$0xff] %v2295_v8 }
  0x2a   : > { %312 = vst [vmem:[#allocation2 + $0x8] sm:$0xff] %v2295_v8 }
  0x2b PF: > { %v1617_v9 = vld [vmem:[%s2366_s7 + $0x70] sm:$0xf]  ;;  %v2101_v10 = vld [vmem:[%s2366_s7 + $0x74] sm:$0xf0]  ;;  %v1609_v20 = vld [vmem:[%s2366_s7 + $0x60] sm:$0xf] }
  0x2c   : > { %v1681_v11 = vld [vmem:[%s2366_s7 + $0xf0] sm:$0xf]  ;;  %v1618_v12 = vor.u32 %v2101_v10, %v1617_v9  ;;  %v2117_v13 = vld [vmem:[%s2366_s7 + $0xf4] sm:$0xf0]  ;;  %v2099_v22 = vld [vmem:[%s2366_s7 + $0x64] sm:$0xf0] }
  0x2d   : > { %v1745_v14 = vld [vmem:[%s2366_s7 + $0x170] sm:$0xf]  ;;  %v2133_v15 = vld [vmem:[%s2366_s7 + $0x174] sm:$0xf0]  ;;  %v1682_v16 = vor.u32 %v2117_v13, %v1681_v11  ;;  %v1673_v23 = vld [vmem:[%s2366_s7 + $0xe0] sm:$0xf]  ;;  %v1610_v25 = vor.u32 %v2099_v22, %v1609_v20 }
  0x2e   : > { %v1746_v17 = vor.u32 %v2133_v15, %v1745_v14  ;;  %v1809_v18 = vld [vmem:[%s2366_s7 + $0x1f0] sm:$0xf]  ;;  %v2149_v19 = vld [vmem:[%s2366_s7 + $0x1f4] sm:$0xf0]  ;;  %1133 = vmatpush.bf16.msra.mxu0 %v1618_v12  ;;  %v2115_v24 = vld [vmem:[%s2366_s7 + $0xe4] sm:$0xf0] }
  0x2f   : > { %v1810_v21 = vor.u32 %v2149_v19, %v1809_v18  ;;  %1147 = vmatpush.bf16.msra.mxu1 %v1682_v16  ;;  %v1674_v26 = vor.u32 %v2115_v24, %v1673_v23  ;;  %v1737_v27 = vld [vmem:[%s2366_s7 + $0x160] sm:$0xf]  ;;  %v2131_v28 = vld [vmem:[%s2366_s7 + $0x164] sm:$0xf0]  ;;  %v1601_v32 = vld [vmem:[%s2366_s7 + $0x50] sm:$0xf] }
  0x30   : > { %1161 = vmatpush.bf16.msra.mxu2 %v1746_v17  ;;  %v1801_v29 = vld [vmem:[%s2366_s7 + $0x1e0] sm:$0xf]  ;;  %v1738_v30 = vor.u32 %v2131_v28, %v1737_v27  ;;  %v2147_v31 = vld [vmem:[%s2366_s7 + $0x1e4] sm:$0xf0]  ;;  %v2097_v33 = vld [vmem:[%s2366_s7 + $0x54] sm:$0xf0] }
  0x31   : > { %1175 = vmatpush.bf16.msra.mxu3 %v1810_v21  ;;  %v1802_v34 = vor.u32 %v2147_v31, %v1801_v29  ;;  %v1665_v35 = vld [vmem:[%s2366_s7 + $0xd0] sm:$0xf]  ;;  %v2113_v36 = vld [vmem:[%s2366_s7 + $0xd4] sm:$0xf0]  ;;  %v1602_v38 = vor.u32 %v2097_v33, %v1601_v32  ;;  %v1593_v44 = vld [vmem:[%s2366_s7 + $0x40] sm:$0xf] }
  0x32   : > { %v1729_v37 = vld [vmem:[%s2366_s7 + $0x150] sm:$0xf]  ;;  %1134 = vmatpush.bf16.msra.mxu0 %v1610_v25  ;;  %v2129_v39 = vld [vmem:[%s2366_s7 + $0x154] sm:$0xf0]  ;;  %v1666_v42 = vor.u32 %v2113_v36, %v1665_v35  ;;  %v2095_v45 = vld [vmem:[%s2366_s7 + $0x44] sm:$0xf0] }
  0x33   : > { %v1793_v40 = vld [vmem:[%s2366_s7 + $0x1d0] sm:$0xf]  ;;  %v2145_v41 = vld [vmem:[%s2366_s7 + $0x1d4] sm:$0xf0]  ;;  %1148 = vmatpush.bf16.msra.mxu1 %v1674_v26  ;;  %v1730_v43 = vor.u32 %v2129_v39, %v1729_v37  ;;  %v1657_v46 = vld [vmem:[%s2366_s7 + $0xc0] sm:$0xf]  ;;  %v1594_v53 = vor.u32 %v2095_v45, %v1593_v44 }
  0x34   : > { %1162 = vmatpush.bf16.msra.mxu2 %v1738_v30  ;;  %v1794_v47 = vor.u32 %v2145_v41, %v1793_v40  ;;  %v2111_v48 = vld [vmem:[%s2366_s7 + $0xc4] sm:$0xf0]  ;;  %v1721_v49 = vld [vmem:[%s2366_s7 + $0x140] sm:$0xf]  ;;  %v1585_v56 = vld [vmem:[%s2366_s7 + $0x30] sm:$0xf] }
  0x35   : > { %1176 = vmatpush.bf16.msra.mxu3 %v1802_v34  ;;  %v2127_v50 = vld [vmem:[%s2366_s7 + $0x144] sm:$0xf0]  ;;  %v1785_v51 = vld [vmem:[%s2366_s7 + $0x1c0] sm:$0xf]  ;;  %v1658_v54 = vor.u32 %v2111_v48, %v1657_v46  ;;  %v2093_v57 = vld [vmem:[%s2366_s7 + $0x34] sm:$0xf0] }
  0x36   : > { %v2143_v52 = vld [vmem:[%s2366_s7 + $0x1c4] sm:$0xf0]  ;;  %1135 = vmatpush.bf16.msra.mxu0 %v1602_v38  ;;  %v1722_v55 = vor.u32 %v2127_v50, %v1721_v49  ;;  %v1649_v58 = vld [vmem:[%s2366_s7 + $0xb0] sm:$0xf]  ;;  %v2109_v60 = vld [vmem:[%s2366_s7 + $0xb4] sm:$0xf0]  ;;  %v1586_v1 = vor.u32 %v2093_v57, %v1585_v56 }
  0x37   : > { %1149 = vmatpush.bf16.msra.mxu1 %v1666_v42  ;;  %v1786_v59 = vor.u32 %v2143_v52, %v1785_v51  ;;  %v1713_v61 = vld [vmem:[%s2366_s7 + $0x130] sm:$0xf]  ;;  %v2125_v62 = vld [vmem:[%s2366_s7 + $0x134] sm:$0xf0]  ;;  %v1650_v2 = vor.u32 %v2109_v60, %v1649_v58  ;;  %v1577_v4 = vld [vmem:[%s2366_s7 + $0x20] sm:$0xf] }
  0x38   : > { %1163 = vmatpush.bf16.msra.mxu2 %v1730_v43  ;;  %v1777_v63 = vld [vmem:[%s2366_s7 + $0x1b0] sm:$0xf]  ;;  %v2141_v0 = vld [vmem:[%s2366_s7 + $0x1b4] sm:$0xf0]  ;;  %v1714_v3 = vor.u32 %v2125_v62, %v1713_v61  ;;  %v2091_v5 = vld [vmem:[%s2366_s7 + $0x24] sm:$0xf0] }
  0x39   : > { %1177 = vmatpush.bf16.msra.mxu3 %v1794_v47  ;;  %v1641_v6 = vld [vmem:[%s2366_s7 + $0xa0] sm:$0xf]  ;;  %v1778_v7 = vor.u32 %v2141_v0, %v1777_v63  ;;  %v2107_v8 = vld [vmem:[%s2366_s7 + $0xa4] sm:$0xf0]  ;;  %v1578_v13 = vor.u32 %v2091_v5, %v1577_v4  ;;  %v1569_v16 = vld [vmem:[%s2366_s7 + $0x10] sm:$0xf] }
  0x3a   : > { %1136 = vmatpush.bf16.msra.mxu0 %v1594_v53  ;;  %v1705_v9 = vld [vmem:[%s2366_s7 + $0x120] sm:$0xf]  ;;  %v2123_v10 = vld [vmem:[%s2366_s7 + $0x124] sm:$0xf0]  ;;  %v1642_v14 = vor.u32 %v2107_v8, %v1641_v6  ;;  %v2089_v17 = vld [vmem:[%s2366_s7 + $0x14] sm:$0xf0] }
  0x3b   : > { %1150 = vmatpush.bf16.msra.mxu1 %v1658_v54  ;;  %v1769_v11 = vld [vmem:[%s2366_s7 + $0x1a0] sm:$0xf]  ;;  %v2139_v12 = vld [vmem:[%s2366_s7 + $0x1a4] sm:$0xf0]  ;;  %v1706_v15 = vor.u32 %v2123_v10, %v1705_v9  ;;  %v1633_v18 = vld [vmem:[%s2366_s7 + $0x90] sm:$0xf]  ;;  %v1570_v25 = vor.u32 %v2089_v17, %v1569_v16 }
  0x3c   : > { %1164 = vmatpush.bf16.msra.mxu2 %v1722_v55  ;;  %v1770_v19 = vor.u32 %v2139_v12, %v1769_v11  ;;  %v2105_v20 = vld [vmem:[%s2366_s7 + $0x94] sm:$0xf0]  ;;  %v1697_v21 = vld [vmem:[%s2366_s7 + $0x110] sm:$0xf]  ;;  %v1561_v26 = vld [vmem:[%s2366_s7] sm:$0xf] }
  0x3d   : > { %1178 = vmatpush.bf16.msra.mxu3 %v1786_v59  ;;  %v2121_v22 = vld [vmem:[%s2366_s7 + $0x114] sm:$0xf0]  ;;  %v1761_v23 = vld [vmem:[%s2366_s7 + $0x190] sm:$0xf]  ;;  %v2087_v27 = vld [vmem:[%s2366_s7 + $0x4] sm:$0xf0]  ;;  %v1634_v28 = vor.u32 %v2105_v20, %v1633_v18 }
  0x3e   : > { %1137 = vmatpush.bf16.msra.mxu0 %v1586_v1  ;;  %v2137_v24 = vld [vmem:[%s2366_s7 + $0x194] sm:$0xf0]  ;;  %v1698_v29 = vor.u32 %v2121_v22, %v1697_v21  ;;  %v1625_v30 = vld [vmem:[%s2366_s7 + $0x80] sm:$0xf]  ;;  %v2103_v31 = vld [vmem:[%s2366_s7 + $0x84] sm:$0xf0]  ;;  %v1562_v40 = vor.u32 %v2087_v27, %v1561_v26 }
  0x3f   : > { %1151 = vmatpush.bf16.msra.mxu1 %v1650_v2  ;;  %v1689_v32 = vld [vmem:[%s2366_s7 + $0x100] sm:$0xf]  ;;  %v1762_v33 = vor.u32 %v2137_v24, %v1761_v23  ;;  %v2119_v34 = vld [vmem:[%s2366_s7 + $0x104] sm:$0xf0]  ;;  %v1873_v37 = vld [vmem:[%s2366_s7 + $0x270] sm:$0xf]  ;;  %v1626_v44 = vor.u32 %v2103_v31, %v1625_v30 }
  0x40   : > { %1165 = vmatpush.bf16.msra.mxu2 %v1714_v3  ;;  %v1753_v35 = vld [vmem:[%s2366_s7 + $0x180] sm:$0xf]  ;;  %v2135_v36 = vld [vmem:[%s2366_s7 + $0x184] sm:$0xf0]  ;;  %v2165_v38 = vld [vmem:[%s2366_s7 + $0x274] sm:$0xf0]  ;;  %v1690_v45 = vor.u32 %v2119_v34, %v1689_v32 }
  0x41   : > { %1179 = vmatpush.bf16.msra.mxu3 %v1778_v7  ;;  %v1937_v39 = vld [vmem:[%s2366_s7 + $0x2f0] sm:$0xf]  ;;  %v2181_v41 = vld [vmem:[%s2366_s7 + $0x2f4] sm:$0xf0]  ;;  %v1754_v48 = vor.u32 %v2135_v36, %v1753_v35  ;;  %v1874_v49 = vor.u32 %v2165_v38, %v1873_v37  ;;  %v1865_v50 = vld [vmem:[%s2366_s7 + $0x260] sm:$0xf] }
  0x42   : > { %1138 = vmatpush.bf16.msra.mxu0 %v1578_v13  ;;  %v2001_v42 = vld [vmem:[%s2366_s7 + $0x370] sm:$0xf]  ;;  %v2197_v43 = vld [vmem:[%s2366_s7 + $0x374] sm:$0xf0]  ;;  %v2163_v51 = vld [vmem:[%s2366_s7 + $0x264] sm:$0xf0]  ;;  %v1938_v52 = vor.u32 %v2181_v41, %v1937_v39 }
  0x43   : > { %1152 = vmatpush.bf16.msra.mxu1 %v1642_v14  ;;  %v2065_v46 = vld [vmem:[%s2366_s7 + $0x3f0] sm:$0xf]  ;;  %v2213_v47 = vld [vmem:[%s2366_s7 + $0x3f4] sm:$0xf0]  ;;  %v2002_v53 = vor.u32 %v2197_v43, %v2001_v42  ;;  %v1929_v54 = vld [vmem:[%s2366_s7 + $0x2e0] sm:$0xf]  ;;  %v1866_v0 = vor.u32 %v2163_v51, %v1865_v50 }
  0x44   : > { %1166 = vmatpush.bf16.msra.mxu2 %v1706_v15  ;;  %v2179_v55 = vld [vmem:[%s2366_s7 + $0x2e4] sm:$0xf0]  ;;  %v1993_v56 = vld [vmem:[%s2366_s7 + $0x360] sm:$0xf]  ;;  %v2066_v57 = vor.u32 %v2213_v47, %v2065_v46  ;;  %v1857_v1 = vld [vmem:[%s2366_s7 + $0x250] sm:$0xf] }
  0x45   : > { %1180 = vmatpush.bf16.msra.mxu3 %v1770_v19  ;;  %v2195_v58 = vld [vmem:[%s2366_s7 + $0x364] sm:$0xf0]  ;;  %v2057_v59 = vld [vmem:[%s2366_s7 + $0x3e0] sm:$0xf]  ;;  %v2161_v2 = vld [vmem:[%s2366_s7 + $0x254] sm:$0xf0]  ;;  %v1930_v5 = vor.u32 %v2179_v55, %v1929_v54 }
  0x46   : > { %1139 = vmatpush.bf16.msra.mxu0 %v1570_v25  ;;  %v2211_v60 = vld [vmem:[%s2366_s7 + $0x3e4] sm:$0xf0]  ;;  %v1529_v61 = vld [vmem:[%s2368_s8] sm:$0xf]  ;;  %v1994_v6 = vor.u32 %v2195_v58, %v1993_v56  ;;  %v1921_v7 = vld [vmem:[%s2366_s7 + $0x2d0] sm:$0xf]  ;;  %v1858_v18 = vor.u32 %v2161_v2, %v1857_v1 }
  0x47   : > { %1153 = vmatpush.bf16.msra.mxu1 %v1634_v28  ;;  %v2082_v62 = vld [vmem:[%s2368_s8 + $0x1c] sm:$0xf0]  ;;  %v1537_v63 = vld [vmem:[%s2368_s8 + $0x8] sm:$0xf]  ;;  %v2177_v8 = vld [vmem:[%s2366_s7 + $0x2d4] sm:$0xf0]  ;;  %v2058_v11 = vor.u32 %v2211_v60, %v2057_v59 }
  0x48   : > { %1167 = vmatpush.bf16.msra.mxu2 %v1698_v29  ;;  %v2456_v3 = vor.u32 %v2082_v62, %v1529_v61  ;;  %v2083_v4 = vld [vmem:[%s2368_s8 + $0x24] sm:$0xf0]  ;;  %v1985_v9 = vld [vmem:[%s2366_s7 + $0x350] sm:$0xf]  ;;  %v2193_v12 = vld [vmem:[%s2366_s7 + $0x354] sm:$0xf0]  ;;  %v1922_v21 = vor.u32 %v2177_v8, %v1921_v7 }
  0x49   : > { %1181 = vmatpush.bf16.msra.mxu3 %v1762_v33  ;;  %v2462_v10 = vor.u32 %v2083_v4, %v1537_v63  ;;  %v2049_v13 = vld [vmem:[%s2366_s7 + $0x3d0] sm:$0xf]  ;;  %v2209_v14 = vld [vmem:[%s2366_s7 + $0x3d4] sm:$0xf0]  ;;  %v2078_v15 = vld [vmem:[%s2368_s8 + $0x4] sm:$0xf]  ;;  %v1986_v22 = vor.u32 %v2193_v12, %v1985_v9 }
  0x4a   : > { %1140 = vmatpush.bf16.msra.mxu0 %v1562_v40  ;;  %v1531_v16 = vld [vmem:[%s2368_s8 + $0x20] sm:$0xf0]  ;;  %v2079_v17 = vld [vmem:[%s2368_s8 + $0xc] sm:$0xf]  ;;  %v1849_v23 = vld [vmem:[%s2366_s7 + $0x240] sm:$0xf]  ;;  %v2050_v27 = vor.u32 %v2209_v14, %v2049_v13 }
  0x4b   : > { %1154 = vmatpush.bf16.msra.mxu1 %v1626_v44  ;;  %v2472_v19 = vor.u32 %v2078_v15, %v1531_v16  ;;  %v1539_v20 = vld [vmem:[%s2368_s8 + $0x28] sm:$0xf0]  ;;  %v2159_v24 = vld [vmem:[%s2366_s7 + $0x244] sm:$0xf0]  ;;  %v1913_v25 = vld [vmem:[%s2366_s7 + $0x2c0] sm:$0xf] }
  0x4c   : > { %1168 = vmatpush.bf16.msra.mxu2 %v1690_v45  ;;  %v2478_v26 = vor.u32 %v2079_v17, %v1539_v20  ;;  %v2175_v28 = vld [vmem:[%s2366_s7 + $0x2c4] sm:$0xf0]  ;;  %v1977_v29 = vld [vmem:[%s2366_s7 + $0x340] sm:$0xf]  ;;  %v1850_v33 = vor.u32 %v2159_v24, %v1849_v23  ;;  %v1841_v36 = vld [vmem:[%s2366_s7 + $0x230] sm:$0xf] }
  0x4d   : > { %1182 = vmatpush.bf16.msra.mxu3 %v1754_v48  ;;  %1141 = vmatmul.bf16.vlgmr.msra.gmra.mxu0 %v2456_v3  ;;  %v2191_v30 = vld [vmem:[%s2366_s7 + $0x344] sm:$0xf0]  ;;  %v2041_v31 = vld [vmem:[%s2366_s7 + $0x3c0] sm:$0xf]  ;;  %v1914_v34 = vor.u32 %v2175_v28, %v1913_v25  ;;  %v2157_v37 = vld [vmem:[%s2366_s7 + $0x234] sm:$0xf0] }
  0x4e   : > { %1189 = vmatpush.bf16.msrb.mxu0 %v1874_v49  ;;  %1155 = vmatmul.bf16.vlgmr.msra.gmra.mxu1 %v2472_v19  ;;  %v2207_v32 = vld [vmem:[%s2366_s7 + $0x3c4] sm:$0xf0]  ;;  %v1978_v35 = vor.u32 %v2191_v30, %v1977_v29  ;;  %v1905_v38 = vld [vmem:[%s2366_s7 + $0x2b0] sm:$0xf]  ;;  %v2173_v40 = vld [vmem:[%s2366_s7 + $0x2b4] sm:$0xf0]  ;;  %v1842_v45 = vor.u32 %v2157_v37, %v1841_v36 }
  0x4f   : > { %1203 = vmatpush.bf16.msrb.mxu1 %v1938_v52  ;;  %1169 = vmatmul.bf16.vlgmr.msra.gmra.mxu2 %v2462_v10  ;;  %v2042_v39 = vor.u32 %v2207_v32, %v2041_v31  ;;  %v1969_v41 = vld [vmem:[%s2366_s7 + $0x330] sm:$0xf]  ;;  %v2189_v42 = vld [vmem:[%s2366_s7 + $0x334] sm:$0xf0]  ;;  %v1906_v46 = vor.u32 %v2173_v40, %v1905_v38  ;;  %v1833_v48 = vld [vmem:[%s2366_s7 + $0x220] sm:$0xf] }
  0x50   : > { %1217 = vmatpush.bf16.msrb.mxu2 %v2002_v53  ;;  %1183 = vmatmul.bf16.vlgmr.msra.gmra.mxu3 %v2478_v26  ;;  %v2033_v43 = vld [vmem:[%s2366_s7 + $0x3b0] sm:$0xf]  ;;  %v2205_v44 = vld [vmem:[%s2366_s7 + $0x3b4] sm:$0xf0]  ;;  %v1970_v47 = vor.u32 %v2189_v42, %v1969_v41  ;;  %v2155_v49 = vld [vmem:[%s2366_s7 + $0x224] sm:$0xf0] }
  0x51   : > { %1231 = vmatpush.bf16.msrb.mxu3 %v2066_v57  ;;  %v1897_v50 = vld [vmem:[%s2366_s7 + $0x2a0] sm:$0xf]  ;;  %v2034_v51 = vor.u32 %v2205_v44, %v2033_v43  ;;  %v2171_v52 = vld [vmem:[%s2366_s7 + $0x2a4] sm:$0xf0]  ;;  %v1834_v57 = vor.u32 %v2155_v49, %v1833_v48  ;;  %v1825_v58 = vld [vmem:[%s2366_s7 + $0x210] sm:$0xf] }
  0x52   : > { %1190 = vmatpush.bf16.msrb.mxu0 %v1866_v0  ;;  %v1961_v53 = vld [vmem:[%s2366_s7 + $0x320] sm:$0xf]  ;;  %v2187_v54 = vld [vmem:[%s2366_s7 + $0x324] sm:$0xf0]  ;;  %v1898_v59 = vor.u32 %v2171_v52, %v1897_v50  ;;  %v2153_v61 = vld [vmem:[%s2366_s7 + $0x214] sm:$0xf0] }
  0x53   : > { %1204 = vmatpush.bf16.msrb.mxu1 %v1930_v5  ;;  %v2025_v55 = vld [vmem:[%s2366_s7 + $0x3a0] sm:$0xf]  ;;  %v2203_v56 = vld [vmem:[%s2366_s7 + $0x3a4] sm:$0xf0]  ;;  %v1962_v60 = vor.u32 %v2187_v54, %v1961_v53  ;;  %v1889_v62 = vld [vmem:[%s2366_s7 + $0x290] sm:$0xf]  ;;  %v1826_v8 = vor.u32 %v2153_v61, %v1825_v58 }
  0x54   : > { %1218 = vmatpush.bf16.msrb.mxu2 %v1994_v6  ;;  %v2169_v63 = vld [vmem:[%s2366_s7 + $0x294] sm:$0xf0]  ;;  %v2026_v0 = vor.u32 %v2203_v56, %v2025_v55  ;;  %v1953_v1 = vld [vmem:[%s2366_s7 + $0x310] sm:$0xf]  ;;  %v1817_v6 = vld [vmem:[%s2366_s7 + $0x200] sm:$0xf] }
  0x55   : > { %1232 = vmatpush.bf16.msrb.mxu3 %v2058_v11  ;;  %v2185_v2 = vld [vmem:[%s2366_s7 + $0x314] sm:$0xf0]  ;;  %v2017_v4 = vld [vmem:[%s2366_s7 + $0x390] sm:$0xf]  ;;  %v2151_v7 = vld [vmem:[%s2366_s7 + $0x204] sm:$0xf0]  ;;  %v1890_v14 = vor.u32 %v2169_v63, %v1889_v62 }
  0x56   : > { %1191 = vmatpush.bf16.msrb.mxu0 %v1858_v18  ;;  %v2201_v5 = vld [vmem:[%s2366_s7 + $0x394] sm:$0xf0]  ;;  %v1881_v9 = vld [vmem:[%s2366_s7 + $0x280] sm:$0xf]  ;;  %v2167_v11 = vld [vmem:[%s2366_s7 + $0x284] sm:$0xf0]  ;;  %v1954_v15 = vor.u32 %v2185_v2, %v1953_v1  ;;  %v1818_v28 = vor.u32 %v2151_v7, %v1817_v6 }
  0x57   : > { %1205 = vmatpush.bf16.msrb.mxu1 %v1922_v21  ;;  %v1945_v12 = vld [vmem:[%s2366_s7 + $0x300] sm:$0xf]  ;;  %v2183_v13 = vld [vmem:[%s2366_s7 + $0x304] sm:$0xf0]  ;;  %v2100_v18 = vld [vmem:[%s2366_s7 + $0x74] sm:$0xf]  ;;  %v2018_v20 = vor.u32 %v2201_v5, %v2017_v4  ;;  %v1882_v32 = vor.u32 %v2167_v11, %v1881_v9 }
  0x58   : > { %1219 = vmatpush.bf16.msrb.mxu2 %v1986_v22  ;;  %v2009_v16 = vld [vmem:[%s2366_s7 + $0x380] sm:$0xf]  ;;  %v2199_v17 = vld [vmem:[%s2366_s7 + $0x384] sm:$0xf0]  ;;  %v1619_v21 = vld [vmem:[%s2366_s7 + $0x78] sm:$0xf0] }
  0x59   : > { %1233 = vmatpush.bf16.msrb.mxu3 %v2050_v27  ;;  %v2116_v22 = vld [vmem:[%s2366_s7 + $0xf4] sm:$0xf]  ;;  %v1683_v23 = vld [vmem:[%s2366_s7 + $0xf8] sm:$0xf0]  ;;  %v1545_v30 = vld [vmem:[%s2368_s8 + $0x10] sm:$0xf]  ;;  %v2010_v37 = vor.u32 %v2199_v17, %v2009_v16  ;;  %v1622_v38 = vor.u32 %v2100_v18, %v1619_v21 }
  0x5a   : > { %1192 = vmatpush.bf16.msrb.mxu0 %v1850_v33  ;;  %v2132_v24 = vld [vmem:[%s2366_s7 + $0x174] sm:$0xf]  ;;  %v1747_v25 = vld [vmem:[%s2366_s7 + $0x178] sm:$0xf0]  ;;  %v2084_v31 = vld [vmem:[%s2368_s8 + $0x2c] sm:$0xf0]  ;;  %v1946_v33 = vor.u32 %v2183_v13, %v1945_v12  ;;  %v1686_v42 = vor.u32 %v2116_v22, %v1683_v23 }
  0x5b   : > { %1206 = vmatpush.bf16.msrb.mxu1 %v1914_v34  ;;  %v2148_v27 = vld [vmem:[%s2366_s7 + $0x1f4] sm:$0xf]  ;;  %v1811_v29 = vld [vmem:[%s2366_s7 + $0x1f8] sm:$0xf0]  ;;  %v1553_v34 = vld [vmem:[%s2368_s8 + $0x18] sm:$0xf]  ;;  %v1750_v43 = vor.u32 %v2132_v24, %v1747_v25  ;;  %v2538_v48 = vor.u32 %v2084_v31, %v1545_v30 }
  0x5c   : > { %1220 = vmatpush.bf16.msrb.mxu2 %v1978_v35  ;;  %v2085_v35 = vld [vmem:[%s2368_s8 + $0x34] sm:$0xf0]  ;;  %v2080_v36 = vld [vmem:[%s2368_s8 + $0x14] sm:$0xf]  ;;  %v2081_v40 = vld [vmem:[%s2368_s8 + $0x1c] sm:$0xf] }
  0x5d   : > { %1234 = vmatpush.bf16.msrb.mxu3 %v2042_v39  ;;  %v1547_v39 = vld [vmem:[%s2368_s8 + $0x30] sm:$0xf0]  ;;  %v1555_v41 = vld [vmem:[%s2368_s8 + $0x38] sm:$0xf0]  ;;  %v2098_v44 = vld [vmem:[%s2366_s7 + $0x64] sm:$0xf]  ;;  %v2543_v52 = vor.u32 %v2085_v35, %v1553_v34 }
  0x5e   : > { %1193 = vmatpush.bf16.msrb.mxu0 %v1842_v45  ;;  %v1611_v45 = vld [vmem:[%s2366_s7 + $0x68] sm:$0xf0]  ;;  %v2130_v50 = vld [vmem:[%s2366_s7 + $0x164] sm:$0xf]  ;;  %v2545_v53 = vor.u32 %v2080_v36, %v1547_v39  ;;  %v2549_v56 = vor.u32 %v2081_v40, %v1555_v41  ;;  %v1603_v61 = vld [vmem:[%s2366_s7 + $0x58] sm:$0xf0] }
  0x5f   : > { %1207 = vmatpush.bf16.msrb.mxu1 %v1906_v46  ;;  %v2114_v46 = vld [vmem:[%s2366_s7 + $0xe4] sm:$0xf]  ;;  %v1675_v49 = vld [vmem:[%s2366_s7 + $0xe8] sm:$0xf0]  ;;  %v2112_v62 = vld [vmem:[%s2366_s7 + $0xd4] sm:$0xf] }
  0x60   : > { %1221 = vmatpush.bf16.msrb.mxu2 %v1970_v47  ;;  %v1814_v47 = vor.u32 %v2148_v27, %v1811_v29  ;;  %v2146_v54 = vld [vmem:[%s2366_s7 + $0x1e4] sm:$0xf]  ;;  %v1803_v55 = vld [vmem:[%s2366_s7 + $0x1e8] sm:$0xf0]  ;;  %v1678_v58 = vor.u32 %v2114_v46, %v1675_v49  ;;  %v2128_v1 = vld [vmem:[%s2366_s7 + $0x154] sm:$0xf] }
  0x61   : > { %1235 = vmatpush.bf16.msrb.mxu3 %v2034_v51  ;;  %v1739_v51 = vld [vmem:[%s2366_s7 + $0x168] sm:$0xf0]  ;;  %v1806_v63 = vor.u32 %v2146_v54, %v1803_v55  ;;  %v1731_v2 = vld [vmem:[%s2366_s7 + $0x158] sm:$0xf0]  ;;  %v2144_v4 = vld [vmem:[%s2366_s7 + $0x1d4] sm:$0xf] }
  0x62   : > { %1194 = vmatpush.bf16.msrb.mxu0 %v1834_v57  ;;  %v1614_v57 = vor.u32 %v2098_v44, %v1611_v45  ;;  %v1795_v5 = vld [vmem:[%s2366_s7 + $0x1d8] sm:$0xf0]  ;;  %v2094_v9 = vld [vmem:[%s2366_s7 + $0x44] sm:$0xf]  ;;  %v1595_v11 = vld [vmem:[%s2366_s7 + $0x48] sm:$0xf0] }
  0x63   : > { %1208 = vmatpush.bf16.msrb.mxu1 %v1898_v59  ;;  %v1742_v59 = vor.u32 %v2130_v50, %v1739_v51  ;;  %v2110_v12 = vld [vmem:[%s2366_s7 + $0xc4] sm:$0xf]  ;;  %v1798_v13 = vor.u32 %v2144_v4, %v1795_v5  ;;  %v1723_v16 = vld [vmem:[%s2366_s7 + $0x148] sm:$0xf0]  ;;  %v2092_v23 = vld [vmem:[%s2366_s7 + $0x34] sm:$0xf] }
  0x64   : > { %1222 = vmatpush.bf16.msrb.mxu2 %v1962_v60  ;;  %v2096_v60 = vld [vmem:[%s2366_s7 + $0x54] sm:$0xf]  ;;  %v2142_v17 = vld [vmem:[%s2366_s7 + $0x1c4] sm:$0xf]  ;;  %v1787_v18 = vld [vmem:[%s2366_s7 + $0x1c8] sm:$0xf0] }
  0x65   : > { %1236 = vmatpush.bf16.msrb.mxu3 %v2026_v0  ;;  %v1667_v0 = vld [vmem:[%s2366_s7 + $0xd8] sm:$0xf0]  ;;  %v1606_v6 = vor.u32 %v2096_v60, %v1603_v61  ;;  %v2108_v25 = vld [vmem:[%s2366_s7 + $0xb4] sm:$0xf]  ;;  %v1790_v27 = vor.u32 %v2142_v17, %v1787_v18  ;;  %v2090_v36 = vld [vmem:[%s2366_s7 + $0x24] sm:$0xf] }
  0x66   : > { %1195 = vmatpush.bf16.msrb.mxu0 %v1826_v8  ;;  %v1670_v7 = vor.u32 %v2112_v62, %v1667_v0  ;;  %v1734_v8 = vor.u32 %v2128_v1, %v1731_v2  ;;  %v1587_v24 = vld [vmem:[%s2366_s7 + $0x38] sm:$0xf0]  ;;  %v2124_v29 = vld [vmem:[%s2366_s7 + $0x134] sm:$0xf]  ;;  %v1643_v40 = vld [vmem:[%s2366_s7 + $0xa8] sm:$0xf0] }
  0x67   : > { %1209 = vmatpush.bf16.msrb.mxu1 %v1890_v14  ;;  %v1659_v14 = vld [vmem:[%s2366_s7 + $0xc8] sm:$0xf0]  ;;  %v1715_v30 = vld [vmem:[%s2366_s7 + $0x138] sm:$0xf0]  ;;  %v2140_v31 = vld [vmem:[%s2366_s7 + $0x1b4] sm:$0xf] }
  0x68   : > { %1223 = vmatpush.bf16.msrb.mxu2 %v1954_v15  ;;  %v2126_v15 = vld [vmem:[%s2366_s7 + $0x144] sm:$0xf]  ;;  %v1662_v21 = vor.u32 %v2110_v12, %v1659_v14  ;;  %v1718_v35 = vor.u32 %v2124_v29, %v1715_v30  ;;  %v1771_v44 = vld [vmem:[%s2366_s7 + $0x1a8] sm:$0xf0]  ;;  %v2088_v49 = vld [vmem:[%s2366_s7 + $0x14] sm:$0xf] }
  0x69   : > { %1237 = vmatpush.bf16.msrb.mxu3 %v2018_v20  ;;  %v1598_v20 = vor.u32 %v2094_v9, %v1595_v11  ;;  %v1726_v22 = vor.u32 %v2126_v15, %v1723_v16  ;;  %v2122_v41 = vld [vmem:[%s2366_s7 + $0x124] sm:$0xf]  ;;  %v1571_v50 = vld [vmem:[%s2366_s7 + $0x18] sm:$0xf0]  ;;  %v2104_v51 = vld [vmem:[%s2366_s7 + $0x94] sm:$0xf] }
  0x6a   : > { %1196 = vmatpush.bf16.msrb.mxu0 %v1818_v28  ;;  %v1651_v28 = vld [vmem:[%s2366_s7 + $0xb8] sm:$0xf0]  ;;  %v1574_v61 = vor.u32 %v2088_v49, %v1571_v50  ;;  %v2086_v62 = vld [vmem:[%s2366_s7 + $0x4] sm:$0xf]  ;;  %v1627_v4 = vld [vmem:[%s2366_s7 + $0x88] sm:$0xf0] }
  0x6b   : > { %1210 = vmatpush.bf16.msrb.mxu1 %v1882_v32  ;;  %v1779_v32 = vld [vmem:[%s2366_s7 + $0x1b8] sm:$0xf0]  ;;  %v1654_v34 = vor.u32 %v2108_v25, %v1651_v28  ;;  %v2102_v2 = vld [vmem:[%s2366_s7 + $0x84] sm:$0xf]  ;;  %v1755_v9 = vld [vmem:[%s2366_s7 + $0x188] sm:$0xf0] }
  0x6c   : > { %1224 = vmatpush.bf16.msrb.mxu2 %v1946_v33  ;;  %v1590_v33 = vor.u32 %v2092_v23, %v1587_v24  ;;  %v1782_v39 = vor.u32 %v2140_v31, %v1779_v32  ;;  %v1635_v55 = vld [vmem:[%s2366_s7 + $0x98] sm:$0xf0]  ;;  %v2118_v5 = vld [vmem:[%s2366_s7 + $0x104] sm:$0xf]  ;;  %v2164_v11 = vld [vmem:[%s2366_s7 + $0x274] sm:$0xf]  ;;  %v1630_v18 = vor.u32 %v2102_v2, %v1627_v4 }
  0x6d   : > { %1238 = vmatpush.bf16.msrb.mxu3 %v2010_v37  ;;  %1197 = vmatmul.bf16.vlgmr.msrb.gmra.mxu0 %v2538_v48  ;;  %v1579_v37 = vld [vmem:[%s2366_s7 + $0x28] sm:$0xf0]  ;;  %v1763_v60 = vld [vmem:[%s2366_s7 + $0x198] sm:$0xf0]  ;;  %v1638_v0 = vor.u32 %v2104_v51, %v1635_v55  ;;  %v2196_v16 = vld [vmem:[%s2366_s7 + $0x374] sm:$0xf] }
  0x6e   : > { %1245 = vmatpush.bf16.msra.mxu0 %v1622_v38  ;;  %1211 = vmatmul.bf16.vlgmr.msrb.gmra.mxu1 %v2545_v53  ;;  %v2106_v38 = vld [vmem:[%s2366_s7 + $0xa4] sm:$0xf]  ;;  %v1582_v45 = vor.u32 %v2090_v36, %v1579_v37  ;;  %v1875_v12 = vld [vmem:[%s2366_s7 + $0x278] sm:$0xf0]  ;;  %v1867_v29 = vld [vmem:[%s2366_s7 + $0x268] sm:$0xf0] }
  0x6f   : > { %1259 = vmatpush.bf16.msra.mxu1 %v1686_v42  ;;  %1225 = vmatmul.bf16.vlgmr.msrb.gmra.mxu2 %v2543_v52  ;;  %v1707_v42 = vld [vmem:[%s2366_s7 + $0x128] sm:$0xf0]  ;;  %v1646_v46 = vor.u32 %v2106_v38, %v1643_v40  ;;  %v1939_v15 = vld [vmem:[%s2366_s7 + $0x2f8] sm:$0xf0]  ;;  %v1878_v24 = vor.u32 %v2164_v11, %v1875_v12  ;;  %v2162_v28 = vld [vmem:[%s2366_s7 + $0x264] sm:$0xf] }
  0x70   : > { %1273 = vmatpush.bf16.msra.mxu2 %v1750_v43  ;;  %1239 = vmatmul.bf16.vlgmr.msrb.gmra.mxu3 %v2549_v56  ;;  %v2138_v43 = vld [vmem:[%s2366_s7 + $0x1a4] sm:$0xf]  ;;  %v2003_v17 = vld [vmem:[%s2366_s7 + $0x378] sm:$0xf0]  ;;  %v1931_v32 = vld [vmem:[%s2366_s7 + $0x2e8] sm:$0xf0]  ;;  %v1870_v37 = vor.u32 %v2162_v28, %v1867_v29 }
  0x71   : > { %1287 = vmatpush.bf16.msra.mxu3 %v1814_v47  ;;  %v1710_v47 = vor.u32 %v2122_v41, %v1707_v42  ;;  %v1774_v54 = vor.u32 %v2138_v43, %v1771_v44  ;;  %v2178_v30 = vld [vmem:[%s2366_s7 + $0x2e4] sm:$0xf]  ;;  %v2059_v36 = vld [vmem:[%s2366_s7 + $0x3e8] sm:$0xf0]  ;;  %v2160_v40 = vld [vmem:[%s2366_s7 + $0x254] sm:$0xf] }
  0x72   : > { %1246 = vmatpush.bf16.msra.mxu0 %v1614_v57  ;;  %v2120_v57 = vld [vmem:[%s2366_s7 + $0x114] sm:$0xf]  ;;  %v1934_v38 = vor.u32 %v2178_v30, %v1931_v32  ;;  %v1859_v41 = vld [vmem:[%s2366_s7 + $0x258] sm:$0xf0]  ;;  %v2174_v55 = vld [vmem:[%s2366_s7 + $0x2c4] sm:$0xf] }
  0x73   : > { %1260 = vmatpush.bf16.msra.mxu1 %v1678_v58  ;;  %v1699_v58 = vld [vmem:[%s2366_s7 + $0x118] sm:$0xf0]  ;;  %v2176_v42 = vld [vmem:[%s2366_s7 + $0x2d4] sm:$0xf]  ;;  %v1862_v50 = vor.u32 %v2160_v40, %v1859_v41  ;;  %v2150_v40 = vld [vmem:[%s2366_s7 + $0x204] sm:$0xf] }
  0x74   : > { %1274 = vmatpush.bf16.msra.mxu2 %v1742_v59  ;;  %v2136_v59 = vld [vmem:[%s2366_s7 + $0x194] sm:$0xf]  ;;  %v1702_v1 = vor.u32 %v2120_v57, %v1699_v58  ;;  %v1923_v44 = vld [vmem:[%s2366_s7 + $0x2d8] sm:$0xf0]  ;;  %v1915_v58 = vld [vmem:[%s2366_s7 + $0x2c8] sm:$0xf0] }
  0x75   : > { %1288 = vmatpush.bf16.msra.mxu3 %v1806_v63  ;;  %v1563_v63 = vld [vmem:[%s2366_s7 + $0x8] sm:$0xf0]  ;;  %v2051_v49 = vld [vmem:[%s2366_s7 + $0x3d8] sm:$0xf0]  ;;  %v2172_v2 = vld [vmem:[%s2366_s7 + $0x2b4] sm:$0xf] }
  0x76   : > { %1247 = vmatpush.bf16.msra.mxu0 %v1606_v6  ;;  %v1766_v6 = vor.u32 %v2136_v59, %v1763_v60  ;;  %v1566_v14 = vor.u32 %v2086_v62, %v1563_v63  ;;  %v1979_v59 = vld [vmem:[%s2366_s7 + $0x348] sm:$0xf0]  ;;  %v2206_v60 = vld [vmem:[%s2366_s7 + $0x3c4] sm:$0xf]  ;;  %v1918_v62 = vor.u32 %v2174_v55, %v1915_v58  ;;  %v2152_v28 = vld [vmem:[%s2366_s7 + $0x214] sm:$0xf] }
  0x77   : > { %1261 = vmatpush.bf16.msra.mxu1 %v1670_v7  ;;  %v1691_v7 = vld [vmem:[%s2366_s7 + $0x108] sm:$0xf0]  ;;  %v1827_v29 = vld [vmem:[%s2366_s7 + $0x218] sm:$0xf0]  ;;  %v2168_v30 = vld [vmem:[%s2366_s7 + $0x294] sm:$0xf] }
  0x78   : > { %1275 = vmatpush.bf16.msra.mxu2 %v1734_v8  ;;  %v2134_v8 = vld [vmem:[%s2366_s7 + $0x184] sm:$0xf]  ;;  %v1891_v32 = vld [vmem:[%s2366_s7 + $0x298] sm:$0xf0]  ;;  %v1819_v41 = vld [vmem:[%s2366_s7 + $0x208] sm:$0xf0] }
  0x79   : > { %1289 = vmatpush.bf16.msra.mxu3 %v1798_v13  ;;  %v2180_v13 = vld [vmem:[%s2366_s7 + $0x2f4] sm:$0xf]  ;;  %v1758_v23 = vor.u32 %v2134_v8, %v1755_v9  ;;  %v2035_v9 = vld [vmem:[%s2366_s7 + $0x3b8] sm:$0xf0]  ;;  %p2071_p11 = scmp.ne.s32.totalorder %s2285_s14, 1 }
  0x7a   : > { %1248 = vmatpush.bf16.msra.mxu0 %v1598_v20  ;;  %v1694_v20 = vor.u32 %v2118_v5, %v1691_v7  ;;  %v1942_v25 = vor.u32 %v2180_v13, %v1939_v15  ;;  %v1907_v5 = vld [vmem:[%s2366_s7 + $0x2b8] sm:$0xf0]  ;;  %v2204_v8 = vld [vmem:[%s2366_s7 + $0x3b4] sm:$0xf]  ;;  %v1835_v15 = vld [vmem:[%s2366_s7 + $0x228] sm:$0xf0] }
  0x7b   : > { %1262 = vmatpush.bf16.msra.mxu1 %v1662_v21  ;;  %v2212_v21 = vld [vmem:[%s2366_s7 + $0x3f4] sm:$0xf]  ;;  %v1971_v7 = vld [vmem:[%s2366_s7 + $0x338] sm:$0xf0]  ;;  %v1910_v12 = vor.u32 %v2172_v2, %v1907_v5 }
  0x7c   : > { %1276 = vmatpush.bf16.msra.mxu2 %v1726_v22  ;;  %v2067_v22 = vld [vmem:[%s2366_s7 + $0x3f8] sm:$0xf0] }
  0x7d   : > { %1290 = vmatpush.bf16.msra.mxu3 %v1790_v27  ;;  %v2006_v27 = vor.u32 %v2196_v16, %v2003_v17  ;;  %v2070_v31 = vor.u32 %v2212_v21, %v2067_v22  ;;  %v2170_v16 = vld [vmem:[%s2366_s7 + $0x2a4] sm:$0xf]  ;;  %v2038_v17 = vor.u32 %v2204_v8, %v2035_v9  ;;  %v1963_v21 = vld [vmem:[%s2366_s7 + $0x328] sm:$0xf0]  ;;  %v313_v8 = vld [vmem:[#allocation2 + $0x10] sm:$0xff] }
  0x7e   : > { %1249 = vmatpush.bf16.msra.mxu0 %v1590_v33  ;;  %v2194_v33 = vld [vmem:[%s2366_s7 + $0x364] sm:$0xf] }
  0x7f   : > { %1263 = vmatpush.bf16.msra.mxu1 %v1654_v34  ;;  %v1995_v34 = vld [vmem:[%s2366_s7 + $0x368] sm:$0xf0]  ;;  %v2202_v22 = vld [vmem:[%s2366_s7 + $0x3a4] sm:$0xf] }
  0x80   : > { %1277 = vmatpush.bf16.msra.mxu2 %v1718_v35  ;;  %v2210_v35 = vld [vmem:[%s2366_s7 + $0x3e4] sm:$0xf] }
  0x81   : > { %1291 = vmatpush.bf16.msra.mxu3 %v1782_v39  ;;  %v1998_v39 = vor.u32 %v2194_v33, %v1995_v34  ;;  %v2062_v43 = vor.u32 %v2210_v35, %v2059_v36  ;;  %v2184_v33 = vld [vmem:[%s2366_s7 + $0x314] sm:$0xf]  ;;  %v1955_v34 = vld [vmem:[%s2366_s7 + $0x318] sm:$0xf0] }
  0x82   : > { %1250 = vmatpush.bf16.msra.mxu0 %v1582_v45  ;;  %v2192_v45 = vld [vmem:[%s2366_s7 + $0x354] sm:$0xf]  ;;  %v2019_v36 = vld [vmem:[%s2366_s7 + $0x398] sm:$0xf0] }
  0x83   : > { %1264 = vmatpush.bf16.msra.mxu1 %v1646_v46  ;;  %v1987_v46 = vld [vmem:[%s2366_s7 + $0x358] sm:$0xf0]  ;;  %v2200_v35 = vld [vmem:[%s2366_s7 + $0x394] sm:$0xf] }
  0x84   : > { %1278 = vmatpush.bf16.msra.mxu2 %v1710_v47  ;;  %v2208_v47 = vld [vmem:[%s2366_s7 + $0x3d4] sm:$0xf]  ;;  %v1990_v51 = vor.u32 %v2192_v45, %v1987_v46  ;;  %v2182_v45 = vld [vmem:[%s2366_s7 + $0x304] sm:$0xf]  ;;  %v1947_v46 = vld [vmem:[%s2366_s7 + $0x308] sm:$0xf0] }
  0x85   : > { %1292 = vmatpush.bf16.msra.mxu3 %v1774_v54  ;;  %v2158_v54 = vld [vmem:[%s2366_s7 + $0x244] sm:$0xf]  ;;  %v2054_v57 = vor.u32 %v2208_v47, %v2051_v49  ;;  %v2011_v49 = vld [vmem:[%s2366_s7 + $0x388] sm:$0xf0] }
  0x86   : > { %1251 = vmatpush.bf16.msra.mxu0 %v1574_v61  ;;  %v2198_v47 = vld [vmem:[%s2366_s7 + $0x384] sm:$0xf] }
  0x87   : > { %1265 = vmatpush.bf16.msra.mxu1 %v1638_v0  ;;  %v2156_v0 = vld [vmem:[%s2366_s7 + $0x234] sm:$0xf] }
  0x88   : > { %1279 = vmatpush.bf16.msra.mxu2 %v1702_v1  ;;  %v1843_v1 = vld [vmem:[%s2366_s7 + $0x238] sm:$0xf0] }
  0x89   : > { %1293 = vmatpush.bf16.msra.mxu3 %v1766_v6  ;;  %v2188_v6 = vld [vmem:[%s2366_s7 + $0x334] sm:$0xf]  ;;  %v1846_v11 = vor.u32 %v2156_v0, %v1843_v1 }
  0x8a   : > { %1252 = vmatpush.bf16.msra.mxu0 %v1566_v14  ;;  %v1974_v13 = vor.u32 %v2188_v6, %v1971_v7  ;;  %v2154_v14 = vld [vmem:[%s2366_s7 + $0x224] sm:$0xf] }
  0x8b   : > { %1266 = vmatpush.bf16.msra.mxu1 %v1630_v18  ;;  %v1899_v18 = vld [vmem:[%s2366_s7 + $0x2a8] sm:$0xf0] }
  0x8c   : > { %1280 = vmatpush.bf16.msra.mxu2 %v1694_v20  ;;  %v2186_v20 = vld [vmem:[%s2366_s7 + $0x324] sm:$0xf] }
  0x8d   : > { %1294 = vmatpush.bf16.msra.mxu3 %v1758_v23  ;;  %1253 = vmatmul.bf16.vlgmr.msra.gmra.mxu0 %v2456_v3  ;;  %v2190_v3 = vld [vmem:[%s2366_s7 + $0x344] sm:$0xf]  ;;  %v2027_v23 = vld [vmem:[%s2366_s7 + $0x3a8] sm:$0xf0] }
  0x8e   : > { %1301 = vmatpush.bf16.msrb.mxu0 %v1878_v24  ;;  %1267 = vmatmul.bf16.vlgmr.msra.gmra.mxu1 %v2472_v19  ;;  %v2043_v19 = vld [vmem:[%s2366_s7 + $0x3c8] sm:$0xf0]  ;;  %v1982_v63 = vor.u32 %v2190_v3, %v1979_v59  ;;  %v1838_v24 = vor.u32 %v2154_v14, %v1835_v15 }
  0x8f   : > { %1315 = vmatpush.bf16.msrb.mxu1 %v1942_v25  ;;  %1281 = vmatmul.bf16.vlgmr.msra.gmra.mxu2 %v2462_v10  ;;  %v1926_v10 = vor.u32 %v2176_v42, %v1923_v44  ;;  %v2046_v4 = vor.u32 %v2206_v60, %v2043_v19  ;;  %v1902_v25 = vor.u32 %v2170_v16, %v1899_v18  ;;  %v2166_v42 = vld [vmem:[%s2366_s7 + $0x284] sm:$0xf]  ;;  %v1883_v44 = vld [vmem:[%s2366_s7 + $0x288] sm:$0xf0]  ;;  %v315_v18 = vld [vmem:[#allocation2 + $0x18] sm:$0xff] }
  0x90   : > { %1329 = vmatpush.bf16.msrb.mxu2 %v2006_v27  ;;  %1295 = vmatmul.bf16.vlgmr.msra.gmra.mxu3 %v2478_v26  ;;  %v1851_v26 = vld [vmem:[%s2366_s7 + $0x248] sm:$0xf0]  ;;  %v1966_v27 = vor.u32 %v2186_v20, %v1963_v21 }
  0x91   : > { %1343 = vmatpush.bf16.msrb.mxu3 %v2070_v31  ;;  %v1854_v61 = vor.u32 %v2158_v54, %v1851_v26  ;;  %v2030_v31 = vor.u32 %v2202_v22, %v2027_v23  ;;  %v2014_v54 = vor.u32 %v2198_v47, %v2011_v49 }
  0x92   : > { %1302 = vmatpush.bf16.msrb.mxu0 %v1870_v37  ;;  %v1830_v37 = vor.u32 %v2152_v28, %v1827_v29 }
  0x93   : > { %1316 = vmatpush.bf16.msrb.mxu1 %v1934_v38  ;;  %v1894_v38 = vor.u32 %v2168_v30, %v1891_v32 }
  0x94   : > { %1330 = vmatpush.bf16.msrb.mxu2 %v1998_v39  ;;  %v1958_v39 = vor.u32 %v2184_v33, %v1955_v34 }
  0x95   : > { %1344 = vmatpush.bf16.msrb.mxu3 %v2062_v43  ;;  %v2022_v43 = vor.u32 %v2200_v35, %v2019_v36 }
  0x96   : > { %1303 = vmatpush.bf16.msrb.mxu0 %v1862_v50  ;;  %v1822_v50 = vor.u32 %v2150_v40, %v1819_v41 }
  0x97   : > { %1317 = vmatpush.bf16.msrb.mxu1 %v1926_v10  ;;  %v1886_v10 = vor.u32 %v2166_v42, %v1883_v44 }
  0x98   : > { %1331 = vmatpush.bf16.msrb.mxu2 %v1990_v51  ;;  %v1950_v51 = vor.u32 %v2182_v45, %v1947_v46  ;;  %v314_v45 = vld [vmem:[#allocation2] sm:$0xff] }
  0x99   : > { %1345 = vmatpush.bf16.msrb.mxu3 %v2054_v57 }
  0x9a   : > { %1304 = vmatpush.bf16.msrb.mxu0 %v1854_v61 }
  0x9b   : > { %1318 = vmatpush.bf16.msrb.mxu1 %v1918_v62 }
  0x9c   : > { %1332 = vmatpush.bf16.msrb.mxu2 %v1982_v63 }
  0x9d   : > { %1346 = vmatpush.bf16.msrb.mxu3 %v2046_v4 }
  0x9e   : > { %1305 = vmatpush.bf16.msrb.mxu0 %v1846_v11 }
  0x9f   : > { %1319 = vmatpush.bf16.msrb.mxu1 %v1910_v12 }
  0xa0   : > { %1333 = vmatpush.bf16.msrb.mxu2 %v1974_v13 }
  0xa1   : > { %1347 = vmatpush.bf16.msrb.mxu3 %v2038_v17 }
  0xa2   : > { %1306 = vmatpush.bf16.msrb.mxu0 %v1838_v24 }
  0xa3   : > { %1320 = vmatpush.bf16.msrb.mxu1 %v1902_v25 }
  0xa4   : > { %1334 = vmatpush.bf16.msrb.mxu2 %v1966_v27 }
  0xa5   : > { %1348 = vmatpush.bf16.msrb.mxu3 %v2030_v31 }
  0xa6   : > { %1307 = vmatpush.bf16.msrb.mxu0 %v1830_v37 }
  0xa7   : > { %1321 = vmatpush.bf16.msrb.mxu1 %v1894_v38 }
  0xa8   : > { %1335 = vmatpush.bf16.msrb.mxu2 %v1958_v39 }
  0xa9   : > { %1349 = vmatpush.bf16.msrb.mxu3 %v2022_v43 }
  0xaa   : > { %1308 = vmatpush.bf16.msrb.mxu0 %v1822_v50 }
  0xab   : > { %1322 = vmatpush.bf16.msrb.mxu1 %v1886_v10 }
  0xac   : > { %1336 = vmatpush.bf16.msrb.mxu2 %v1950_v51 }
  0xad   : > { %1350 = vmatpush.bf16.msrb.mxu3 %v2014_v54  ;;  %1309 = vmatmul.bf16.vlgmr.msrb.gmra.mxu0 %v2538_v48 }
  0xae   : > { %1323 = vmatmul.bf16.vlgmr.msrb.gmra.mxu1 %v2545_v53 }
  0xaf   : > { %1337 = vmatmul.bf16.vlgmr.msrb.gmra.mxu2 %v2543_v52 }
  0xb0   : > { %1351 = vmatmul.bf16.vlgmr.msrb.gmra.mxu3 %v2549_v56 }
  0xca   : > { %v1142_v26 = vpop.f32.mrf.mxu0 }
  0xcb   : > { %v1156_v55 = vpop.f32.mrf.mxu1 }
  0xcc   : > { %v1157_v3 = vadd.f32 %v1156_v55, %v1142_v26  ;;  %v316_v26 = vld [vmem:[#allocation2 + $0x8] sm:$0xff] }
  0xd2   : > { %v1170_v57 = vpop.f32.mrf.mxu2  ;;  %v1144_v59 = vpop.f32.mrf.mxu0 }
  0xd3   : > { %v1184_v58 = vpop.f32.mrf.mxu3  ;;  %v1158_v60 = vpop.f32.mrf.mxu1  ;;  %v1171_v19 = vadd.f32 %v1170_v57, %v1157_v3 }
  0xd4   : > { %v1159_v0 = vadd.f32 %v1158_v60, %v1144_v59 }
  0xd5   : > { %v1185_v61 = vadd.f32 %v1184_v58, %v1171_v19 }
  0xda   : > { %v1172_v62 = vpop.f32.mrf.mxu2 }
  0xdb   : > { %v1186_v63 = vpop.f32.mrf.mxu3  ;;  %v1173_v53 = vadd.f32 %v1172_v62, %v1159_v0 }
  0xdd   : > { %v1187_v5 = vadd.f32 %v1186_v63, %v1173_v53 }
  0xea   : > { %v1198_v1 = vpop.f32.mrf.mxu0 }
  0xeb   : > { %v1199_v48 = vadd.f32 %v1198_v1, %v1185_v61  ;;  %v1212_v2 = vpop.f32.mrf.mxu1 }
  0xed   : > { %v1213_v4 = vadd.f32 %v1212_v2, %v1199_v48 }
  0xf2   : > { %v1226_v52 = vpop.f32.mrf.mxu2  ;;  %v1200_v6 = vpop.f32.mrf.mxu0 }
  0xf3   : > { %v1227_v56 = vadd.f32 %v1226_v52, %v1213_v4  ;;  %v1240_v7 = vpop.f32.mrf.mxu3  ;;  %v1201_v9 = vadd.f32 %v1200_v6, %v1187_v5  ;;  %v1214_v12 = vpop.f32.mrf.mxu1 }
  0xf5   : > { %v1241_v11 = vadd.f32 %v1240_v7, %v1227_v56  ;;  %v1215_v14 = vadd.f32 %v1214_v12, %v1201_v9 }
  0xf7   : > { %v1357_v13 = vadd.f32 %v1241_v11, %v313_v8 }
  0xf9   : > { %1361 = vst [vmem:[#allocation2 + $0x10] sm:$0xff] %v1357_v13 }
  0xfa   : > { %v1228_v15 = vpop.f32.mrf.mxu2 }
  0xfb   : > { %v1229_v16 = vadd.f32 %v1228_v15, %v1215_v14  ;;  %v1242_v17 = vpop.f32.mrf.mxu3 }
  0xfd   : > { %v1243_v20 = vadd.f32 %v1242_v17, %v1229_v16 }
  0xff   : > { %v1359_v21 = vadd.f32 %v1243_v20, %v315_v18 }
 0x101   : > { %1363 = vst [vmem:[#allocation2 + $0x18] sm:$0xff] %v1359_v21 }
 0x10a   : > { %v1254_v22 = vpop.f32.mrf.mxu0 }
 0x10b   : > { %v1268_v23 = vpop.f32.mrf.mxu1 }
 0x10c   : > { %v1269_v27 = vadd.f32 %v1268_v23, %v1254_v22 }
 0x112   : > { %v1282_v24 = vpop.f32.mrf.mxu2  ;;  %v1256_v28 = vpop.f32.mrf.mxu0 }
 0x113   : > { %v1296_v25 = vpop.f32.mrf.mxu3  ;;  %v1270_v29 = vpop.f32.mrf.mxu1  ;;  %v1283_v30 = vadd.f32 %v1282_v24, %v1269_v27 }
 0x114   : > { %v1271_v33 = vadd.f32 %v1270_v29, %v1256_v28 }
 0x115   : > { %v1297_v32 = vadd.f32 %v1296_v25, %v1283_v30 }
 0x11a   : > { %v1284_v31 = vpop.f32.mrf.mxu2 }
 0x11b   : > { %v1298_v34 = vpop.f32.mrf.mxu3  ;;  %v1285_v38 = vadd.f32 %v1284_v31, %v1271_v33 }
 0x11d   : > { %v1299_v41 = vadd.f32 %v1298_v34, %v1285_v38 }
 0x12a   : > { %v1310_v35 = vpop.f32.mrf.mxu0 }
 0x12b   : > { %v1311_v36 = vadd.f32 %v1310_v35, %v1297_v32  ;;  %v1324_v37 = vpop.f32.mrf.mxu1 }
 0x12d   : > { %v1325_v39 = vadd.f32 %v1324_v37, %v1311_v36 }
 0x132   : > { %v1338_v40 = vpop.f32.mrf.mxu2  ;;  %v1312_v44 = vpop.f32.mrf.mxu0 }
 0x133   : > { %v1339_v42 = vadd.f32 %v1338_v40, %v1325_v39  ;;  %v1352_v43 = vpop.f32.mrf.mxu3  ;;  %v1313_v47 = vadd.f32 %v1312_v44, %v1299_v41  ;;  %v1326_v50 = vpop.f32.mrf.mxu1 }
 0x135   : > { %v1353_v46 = vadd.f32 %v1352_v43, %v1339_v42  ;;  %v1327_v10 = vadd.f32 %v1326_v50, %v1313_v47 }
 0x137   : > { %v1358_v49 = vadd.f32 %v1353_v46, %v314_v45 }
 0x139   : > { %1362 = vst [vmem:[#allocation2] sm:$0xff] %v1358_v49 }
 0x13a   : > { %v1340_v51 = vpop.f32.mrf.mxu2 }
 0x13b   : > { %v1341_v54 = vadd.f32 %v1340_v51, %v1327_v10  ;;  %v1354_v55 = vpop.f32.mrf.mxu3 }
 0x13d   : > { %v1355_v57 = vadd.f32 %v1354_v55, %v1341_v54  ;;  %1368 = sbr.rel (%p2071_p11) target bundleno = 336 (0x150), region = 63 }
 0x13f   : > { %v1360_v58 = vadd.f32 %v1355_v57, %v316_v26 }
 0x141   : > { %1364 = vst [vmem:[#allocation2 + $0x8] sm:$0xff] %v1360_v58 }
 0x142   : > { %v1369_v3 = vld [vmem:[#allocation2 + $0x10] sm:$0xff]  ;;  %v1370_v59 = vld [vmem:[#allocation2] sm:$0xff]  ;;  %v1371_v62 = vld [vmem:[#allocation2 + $0x18] sm:$0xff] }
 0x143   : > { %v1373_v60 = vld [vmem:[%s2702_s2] sm:$0x3] }
 0x144   : > { %v1375_v19 = vperm.slane %v1373_v60, 0  ;;  %v1376_v61 = vperm.slane %v1373_v60, 1 }
 0x146   : > { %v1379_v0 = vadd.f32 %v1375_v19, %v1369_v3  ;;  %v1380_v1 = vadd.f32 %v1376_v61, %v1370_v59  ;;  %v1381_v48 = vadd.f32 %v1375_v19, %v1371_v62 }
 0x148   : > { %v1372_v63 = vld [vmem:[#allocation2 + $0x8] sm:$0xff]  ;;  %v1383_v53 = vmax.f32 %v1379_v0, 0.0  ;;  %v1384_v4 = vmax.f32 %v1380_v1, 0.0  ;;  %v1385_v52 = vmax.f32 %v1381_v48, 0.0 }
 0x149   : > { %v1382_v2 = vadd.f32 %v1376_v61, %v1372_v63 }
 0x14a   : > { %v1387_v56 = vpack.c.bf16 %v1384_v4, %v1383_v53 }
 0x14b   : > { %v1386_v5 = vmax.f32 %v1382_v2, 0.0 }
 0x14c   : > { %1389 = vst [vmem:[%s2703_s3] sm:$0xff] %v1387_v56 }
 0x14d   : > { %v1388_v6 = vpack.c.bf16 %v1386_v5, %v1385_v52 }
 0x14f   : > { %1390 = vst [vmem:[%s2703_s3 + $0x8] sm:$0xff] %v1388_v6 }
 0x150 PF: > { %s13_s16 = sadd.s32 1, %s2293_s16   ;;  %s2704_s12 = smov %s2281_s13 }
 0x151   : > { %p10_p12 = scmp.ge.s32.totalorder %s13_s16, 4   ;;  %s2705_s13 = smov %s2351_s20 }
 0x152   : > { %s2706_s14 = smov %s2289_s15  ;;  %s2707_s15 = smov %s2709_s17 }
 0x153   :  { %12 = sbr.rel (!%p10_p12) target bundleno = 3 (0x3), region = 104 }

// kernel: deeplab_forward.20
= control target key start
LH: loop header
LB: loop body
LE: loop exit
PB: predicated region body
PF: predicated region fallthrough
CT: control target
= control target key end

     0   :  { %s2316_s12 = smov 0   ;;  %s2318_s13 = smov 0   ;;  %s2700_s0 = inlined_call_operand.vmem [shape: bf16[16,18432], index: 0, kind: input, shape index: {}]   ;;  %s2701_s1 = inlined_call_operand.vmem [shape: bf16[18432,256], index: 1, kind: input, shape index: {}]   ;;  %s2702_s2 = inlined_call_operand.vmem [shape: f32[1,256], index: 2, kind: input, shape index: {}]   ;;  %s2703_s3 = inlined_call_operand.vmem [shape: bf16[16,256], index: 3, kind: output, shape index: {}]  }
   0x1   :  { %s2320_s14 = smov 0   ;;  %s2322_s15 = smov 0  }
   0x2   :  { %s2324_s16 = smov 0  }
   0x3 LB: > { %s25_s17 = sadd.s32 1, %s2289_s15  ;;  %p48_p1 = scmp.ne.s32.totalorder %s2281_s13, %s2277_s12  ;;  %s2293_s16 = sphi %s2324_s16, %s13_s16   ;;  %s2289_s15 = sphi %s2322_s15, %s2707_s15   ;;  %s2285_s14 = sphi %s2320_s14, %s2706_s14   ;;  %s2281_s13 = sphi %s2318_s13, %s2705_s13   ;;  %s2277_s12 = sphi %s2316_s12, %s2704_s12  }
   0x4   : > { %p26_p0 = scmp.ge.s32.totalorder %s25_s17, 18  ;;  %p49_p2 = scmp.eq.s32.totalorder %s2293_s16, 0 }
   0x5   : > { %s41_s19 = sadd.s32 1, %s2281_s13  ;;  %p1517_p5 = scmp.ge.s32.totalorder %s2293_s16, 18 }
   0x6   : > { %s2709_s17 = smov (%p26_p0, %s25_s17), 0  ;;  %p50_p3 = por %p49_p2, %p48_p1 }
   0x7   : > { %s37_s18 = ssub.s32 %s2289_s15, %s2709_s17  ;;  %164 = sbr.rel (%p1517_p5) target bundleno = 24 (0x18), region = 20 }
   0x8   : > { %p39_p4 = scmp.eq.s32.totalorder %s37_s18, 0 }
   0xa   : > { %s2351_s20 = scalar_select %p39_p4, %s2281_s13, %s41_s19  }
   0xc   : > { %167 = sbr.rel (!%p50_p3) target bundleno = 24 (0x18), region = 24  ;;  %s169_s21 = sand.u32 (%p50_p3), 1, %s2281_s13  }
   0xd   : > { %s2076_s22 = sshll.u32 (%p50_p3), %s2289_s15, 5  ;;  %s1518_s23 = sshll.u32 (%p50_p3), %s169_s21, 6 }
   0xe   : > { %s177_s26 = scalar_lea.vmem (%p50_p3), %s2700_s0, %s2076_s22  ;;  %s171_s27 = scalar_lea.vmem (%p50_p3), [#allocation3], %s1518_s23 }
   0xf   : > { %v190_v0 = vld [vmem:[%s177_s26] sm:$0xff] (%p50_p3)  ;;  %v192_v1 = vld [vmem:[%s177_s26 + $0x8] sm:$0xff] (%p50_p3)  ;;  %v194_v2 = vld [vmem:[%s177_s26 + $0x10] sm:$0xff] (%p50_p3) }
  0x10   : > { %191 = vst [vmem:[%s171_s27] sm:$0xff] (%p50_p3), %v190_v0  ;;  %v196_v3 = vld [vmem:[%s177_s26 + $0x18] sm:$0xff] (%p50_p3)  ;;  %v198_v4 = vld [vmem:[%s177_s26 + $0x240] sm:$0xff] (%p50_p3)  ;;  %v200_v5 = vld [vmem:[%s177_s26 + $0x248] sm:$0xff] (%p50_p3) }
  0x11   : > { %193 = vst [vmem:[%s171_s27 + $0x8] sm:$0xff] %v192_v1  ;;  %v202_v6 = vld [vmem:[%s177_s26 + $0x250] sm:$0xff]  ;;  %v204_v7 = vld [vmem:[%s177_s26 + $0x258] sm:$0xff] }
  0x12   : > { %195 = vst [vmem:[%s171_s27 + $0x10] sm:$0xff] %v194_v2 }
  0x13   : > { %197 = vst [vmem:[%s171_s27 + $0x18] sm:$0xff] %v196_v3 }
  0x14   : > { %199 = vst [vmem:[%s171_s27 + $0x20] sm:$0xff] %v198_v4 }
  0x15   : > { %201 = vst [vmem:[%s171_s27 + $0x28] sm:$0xff] %v200_v5 }
  0x16   : > { %203 = vst [vmem:[%s171_s27 + $0x30] sm:$0xff] %v202_v6 }
  0x17   : > { %205 = vst [vmem:[%s171_s27 + $0x38] sm:$0xff] %v204_v7 }
  0x18 PF: > { %p1521_p6 = scmp.ge.s32.totalorder %s2293_s16, 1  ;;  %p225_p7 = scmp.lt.s32.totalorder %s2293_s16, 19 }
  0x1a   : > { %p226_p8 = pnand %p1521_p6, %p225_p7 }
  0x1b   : > { %s232_s28 = sand.u32 (!%p226_p8), 1, %s2277_s12   ;;  %s1523_s29 = sshll.u32 (!%p226_p8), %s2285_s14, 7 }
  0x1c   : > { %229 = sbr.rel (%p226_p8) target bundleno = 336 (0x150), region = 51  ;;  %s1522_s30 = sshll.u32 (!%p226_p8), %s232_s28, 6 }
  0x1d   : > { %p278_p9 = scmp.lt.s32.totalorder (!%p226_p8), %s1523_s29, 2303  ;;  %s2368_s8 = scalar_lea.vmem (!%p226_p8), [#allocation3], %s1522_s30 }
  0x1e   : > { %p1526_p10 = scmp.ne.s32.totalorder (!%p226_p8), %s2285_s14, 0 }
  0x21   : > { %s2711_s29 = smov (!%p278_p9, %s1523_s29), 2303  ;;  %308 = sbr.rel (%p1526_p10) target bundleno = 43 (0x2b), region = 59 }
  0x22   : > { %s2077_s4 = sshll.u32 %s2711_s29, 3 }
  0x23   : > { %s2366_s7 = scalar_lea.vmem %s2701_s1, %s2077_s4 }
  0x26   : > { %v2295_v8 = vmov 0.0  }
  0x27   : > { %309 = vst [vmem:[#allocation2 + $0x10] sm:$0xff] %v2295_v8 }
  0x28   : > { %310 = vst [vmem:[#allocation2] sm:$0xff] %v2295_v8 }
  0x29   : > { %311 = vst [vmem:[#allocation2 + $0x18] sm:$0xff] %v2295_v8 }
  0x2a   : > { %312 = vst [vmem:[#allocation2 + $0x8] sm:$0xff] %v2295_v8 }
  0x2b PF: > { %v1617_v9 = vld [vmem:[%s2366_s7 + $0x70] sm:$0xf]  ;;  %v2101_v10 = vld [vmem:[%s2366_s7 + $0x74] sm:$0xf0]  ;;  %v1609_v20 = vld [vmem:[%s2366_s7 + $0x60] sm:$0xf] }
  0x2c   : > { %v1681_v11 = vld [vmem:[%s2366_s7 + $0xf0] sm:$0xf]  ;;  %v1618_v12 = vor.u32 %v2101_v10, %v1617_v9  ;;  %v2117_v13 = vld [vmem:[%s2366_s7 + $0xf4] sm:$0xf0]  ;;  %v2099_v22 = vld [vmem:[%s2366_s7 + $0x64] sm:$0xf0] }
  0x2d   : > { %v1745_v14 = vld [vmem:[%s2366_s7 + $0x170] sm:$0xf]  ;;  %v2133_v15 = vld [vmem:[%s2366_s7 + $0x174] sm:$0xf0]  ;;  %v1682_v16 = vor.u32 %v2117_v13, %v1681_v11  ;;  %v1673_v23 = vld [vmem:[%s2366_s7 + $0xe0] sm:$0xf]  ;;  %v1610_v25 = vor.u32 %v2099_v22, %v1609_v20 }
  0x2e   : > { %v1746_v17 = vor.u32 %v2133_v15, %v1745_v14  ;;  %v1809_v18 = vld [vmem:[%s2366_s7 + $0x1f0] sm:$0xf]  ;;  %v2149_v19 = vld [vmem:[%s2366_s7 + $0x1f4] sm:$0xf0]  ;;  %1133 = vmatpush.bf16.msra.mxu0 %v1618_v12  ;;  %v2115_v24 = vld [vmem:[%s2366_s7 + $0xe4] sm:$0xf0] }
  0x2f   : > { %v1810_v21 = vor.u32 %v2149_v19, %v1809_v18  ;;  %1147 = vmatpush.bf16.msra.mxu1 %v1682_v16  ;;  %v1674_v26 = vor.u32 %v2115_v24, %v1673_v23  ;;  %v1737_v27 = vld [vmem:[%s2366_s7 + $0x160] sm:$0xf]  ;;  %v2131_v28 = vld [vmem:[%s2366_s7 + $0x164] sm:$0xf0]  ;;  %v1601_v32 = vld [vmem:[%s2366_s7 + $0x50] sm:$0xf] }
  0x30   : > { %1161 = vmatpush.bf16.msra.mxu2 %v1746_v17  ;;  %v1801_v29 = vld [vmem:[%s2366_s7 + $0x1e0] sm:$0xf]  ;;  %v1738_v30 = vor.u32 %v2131_v28, %v1737_v27  ;;  %v2147_v31 = vld [vmem:[%s2366_s7 + $0x1e4] sm:$0xf0]  ;;  %v2097_v33 = vld [vmem:[%s2366_s7 + $0x54] sm:$0xf0] }
  0x31   : > { %1175 = vmatpush.bf16.msra.mxu3 %v1810_v21  ;;  %v1802_v34 = vor.u32 %v2147_v31, %v1801_v29  ;;  %v1665_v35 = vld [vmem:[%s2366_s7 + $0xd0] sm:$0xf]  ;;  %v2113_v36 = vld [vmem:[%s2366_s7 + $0xd4] sm:$0xf0]  ;;  %v1602_v38 = vor.u32 %v2097_v33, %v1601_v32  ;;  %v1593_v44 = vld [vmem:[%s2366_s7 + $0x40] sm:$0xf] }
  0x32   : > { %v1729_v37 = vld [vmem:[%s2366_s7 + $0x150] sm:$0xf]  ;;  %1134 = vmatpush.bf16.msra.mxu0 %v1610_v25  ;;  %v2129_v39 = vld [vmem:[%s2366_s7 + $0x154] sm:$0xf0]  ;;  %v1666_v42 = vor.u32 %v2113_v36, %v1665_v35  ;;  %v2095_v45 = vld [vmem:[%s2366_s7 + $0x44] sm:$0xf0] }
  0x33   : > { %v1793_v40 = vld [vmem:[%s2366_s7 + $0x1d0] sm:$0xf]  ;;  %v2145_v41 = vld [vmem:[%s2366_s7 + $0x1d4] sm:$0xf0]  ;;  %1148 = vmatpush.bf16.msra.mxu1 %v1674_v26  ;;  %v1730_v43 = vor.u32 %v2129_v39, %v1729_v37  ;;  %v1657_v46 = vld [vmem:[%s2366_s7 + $0xc0] sm:$0xf]  ;;  %v1594_v53 = vor.u32 %v2095_v45, %v1593_v44 }
  0x34   : > { %1162 = vmatpush.bf16.msra.mxu2 %v1738_v30  ;;  %v1794_v47 = vor.u32 %v2145_v41, %v1793_v40  ;;  %v2111_v48 = vld [vmem:[%s2366_s7 + $0xc4] sm:$0xf0]  ;;  %v1721_v49 = vld [vmem:[%s2366_s7 + $0x140] sm:$0xf]  ;;  %v1585_v56 = vld [vmem:[%s2366_s7 + $0x30] sm:$0xf] }
  0x35   : > { %1176 = vmatpush.bf16.msra.mxu3 %v1802_v34  ;;  %v2127_v50 = vld [vmem:[%s2366_s7 + $0x144] sm:$0xf0]  ;;  %v1785_v51 = vld [vmem:[%s2366_s7 + $0x1c0] sm:$0xf]  ;;  %v1658_v54 = vor.u32 %v2111_v48, %v1657_v46  ;;  %v2093_v57 = vld [vmem:[%s2366_s7 + $0x34] sm:$0xf0] }
  0x36   : > { %v2143_v52 = vld [vmem:[%s2366_s7 + $0x1c4] sm:$0xf0]  ;;  %1135 = vmatpush.bf16.msra.mxu0 %v1602_v38  ;;  %v1722_v55 = vor.u32 %v2127_v50, %v1721_v49  ;;  %v1649_v58 = vld [vmem:[%s2366_s7 + $0xb0] sm:$0xf]  ;;  %v2109_v60 = vld [vmem:[%s2366_s7 + $0xb4] sm:$0xf0]  ;;  %v1586_v1 = vor.u32 %v2093_v57, %v1585_v56 }
  0x37   : > { %1149 = vmatpush.bf16.msra.mxu1 %v1666_v42  ;;  %v1786_v59 = vor.u32 %v2143_v52, %v1785_v51  ;;  %v1713_v61 = vld [vmem:[%s2366_s7 + $0x130] sm:$0xf]  ;;  %v2125_v62 = vld [vmem:[%s2366_s7 + $0x134] sm:$0xf0]  ;;  %v1650_v2 = vor.u32 %v2109_v60, %v1649_v58  ;;  %v1577_v4 = vld [vmem:[%s2366_s7 + $0x20] sm:$0xf] }
  0x38   : > { %1163 = vmatpush.bf16.msra.mxu2 %v1730_v43  ;;  %v1777_v63 = vld [vmem:[%s2366_s7 + $0x1b0] sm:$0xf]  ;;  %v2141_v0 = vld [vmem:[%s2366_s7 + $0x1b4] sm:$0xf0]  ;;  %v1714_v3 = vor.u32 %v2125_v62, %v1713_v61  ;;  %v2091_v5 = vld [vmem:[%s2366_s7 + $0x24] sm:$0xf0] }
  0x39   : > { %1177 = vmatpush.bf16.msra.mxu3 %v1794_v47  ;;  %v1641_v6 = vld [vmem:[%s2366_s7 + $0xa0] sm:$0xf]  ;;  %v1778_v7 = vor.u32 %v2141_v0, %v1777_v63  ;;  %v2107_v8 = vld [vmem:[%s2366_s7 + $0xa4] sm:$0xf0]  ;;  %v1578_v13 = vor.u32 %v2091_v5, %v1577_v4  ;;  %v1569_v16 = vld [vmem:[%s2366_s7 + $0x10] sm:$0xf] }
  0x3a   : > { %1136 = vmatpush.bf16.msra.mxu0 %v1594_v53  ;;  %v1705_v9 = vld [vmem:[%s2366_s7 + $0x120] sm:$0xf]  ;;  %v2123_v10 = vld [vmem:[%s2366_s7 + $0x124] sm:$0xf0]  ;;  %v1642_v14 = vor.u32 %v2107_v8, %v1641_v6  ;;  %v2089_v17 = vld [vmem:[%s2366_s7 + $0x14] sm:$0xf0] }
  0x3b   : > { %1150 = vmatpush.bf16.msra.mxu1 %v1658_v54  ;;  %v1769_v11 = vld [vmem:[%s2366_s7 + $0x1a0] sm:$0xf]  ;;  %v2139_v12 = vld [vmem:[%s2366_s7 + $0x1a4] sm:$0xf0]  ;;  %v1706_v15 = vor.u32 %v2123_v10, %v1705_v9  ;;  %v1633_v18 = vld [vmem:[%s2366_s7 + $0x90] sm:$0xf]  ;;  %v1570_v25 = vor.u32 %v2089_v17, %v1569_v16 }
  0x3c   : > { %1164 = vmatpush.bf16.msra.mxu2 %v1722_v55  ;;  %v1770_v19 = vor.u32 %v2139_v12, %v1769_v11  ;;  %v2105_v20 = vld [vmem:[%s2366_s7 + $0x94] sm:$0xf0]  ;;  %v1697_v21 = vld [vmem:[%s2366_s7 + $0x110] sm:$0xf]  ;;  %v1561_v26 = vld [vmem:[%s2366_s7] sm:$0xf] }
  0x3d   : > { %1178 = vmatpush.bf16.msra.mxu3 %v1786_v59  ;;  %v2121_v22 = vld [vmem:[%s2366_s7 + $0x114] sm:$0xf0]  ;;  %v1761_v23 = vld [vmem:[%s2366_s7 + $0x190] sm:$0xf]  ;;  %v2087_v27 = vld [vmem:[%s2366_s7 + $0x4] sm:$0xf0]  ;;  %v1634_v28 = vor.u32 %v2105_v20, %v1633_v18 }
  0x3e   : > { %1137 = vmatpush.bf16.msra.mxu0 %v1586_v1  ;;  %v2137_v24 = vld [vmem:[%s2366_s7 + $0x194] sm:$0xf0]  ;;  %v1698_v29 = vor.u32 %v2121_v22, %v1697_v21  ;;  %v1625_v30 = vld [vmem:[%s2366_s7 + $0x80] sm:$0xf]  ;;  %v2103_v31 = vld [vmem:[%s2366_s7 + $0x84] sm:$0xf0]  ;;  %v1562_v40 = vor.u32 %v2087_v27, %v1561_v26 }
  0x3f   : > { %1151 = vmatpush.bf16.msra.mxu1 %v1650_v2  ;;  %v1689_v32 = vld [vmem:[%s2366_s7 + $0x100] sm:$0xf]  ;;  %v1762_v33 = vor.u32 %v2137_v24, %v1761_v23  ;;  %v2119_v34 = vld [vmem:[%s2366_s7 + $0x104] sm:$0xf0]  ;;  %v1873_v37 = vld [vmem:[%s2366_s7 + $0x270] sm:$0xf]  ;;  %v1626_v44 = vor.u32 %v2103_v31, %v1625_v30 }
  0x40   : > { %1165 = vmatpush.bf16.msra.mxu2 %v1714_v3  ;;  %v1753_v35 = vld [vmem:[%s2366_s7 + $0x180] sm:$0xf]  ;;  %v2135_v36 = vld [vmem:[%s2366_s7 + $0x184] sm:$0xf0]  ;;  %v2165_v38 = vld [vmem:[%s2366_s7 + $0x274] sm:$0xf0]  ;;  %v1690_v45 = vor.u32 %v2119_v34, %v1689_v32 }
  0x41   : > { %1179 = vmatpush.bf16.msra.mxu3 %v1778_v7  ;;  %v1937_v39 = vld [vmem:[%s2366_s7 + $0x2f0] sm:$0xf]  ;;  %v2181_v41 = vld [vmem:[%s2366_s7 + $0x2f4] sm:$0xf0]  ;;  %v1754_v48 = vor.u32 %v2135_v36, %v1753_v35  ;;  %v1874_v49 = vor.u32 %v2165_v38, %v1873_v37  ;;  %v1865_v50 = vld [vmem:[%s2366_s7 + $0x260] sm:$0xf] }
  0x42   : > { %1138 = vmatpush.bf16.msra.mxu0 %v1578_v13  ;;  %v2001_v42 = vld [vmem:[%s2366_s7 + $0x370] sm:$0xf]  ;;  %v2197_v43 = vld [vmem:[%s2366_s7 + $0x374] sm:$0xf0]  ;;  %v2163_v51 = vld [vmem:[%s2366_s7 + $0x264] sm:$0xf0]  ;;  %v1938_v52 = vor.u32 %v2181_v41, %v1937_v39 }
  0x43   : > { %1152 = vmatpush.bf16.msra.mxu1 %v1642_v14  ;;  %v2065_v46 = vld [vmem:[%s2366_s7 + $0x3f0] sm:$0xf]  ;;  %v2213_v47 = vld [vmem:[%s2366_s7 + $0x3f4] sm:$0xf0]  ;;  %v2002_v53 = vor.u32 %v2197_v43, %v2001_v42  ;;  %v1929_v54 = vld [vmem:[%s2366_s7 + $0x2e0] sm:$0xf]  ;;  %v1866_v0 = vor.u32 %v2163_v51, %v1865_v50 }
  0x44   : > { %1166 = vmatpush.bf16.msra.mxu2 %v1706_v15  ;;  %v2179_v55 = vld [vmem:[%s2366_s7 + $0x2e4] sm:$0xf0]  ;;  %v1993_v56 = vld [vmem:[%s2366_s7 + $0x360] sm:$0xf]  ;;  %v2066_v57 = vor.u32 %v2213_v47, %v2065_v46  ;;  %v1857_v1 = vld [vmem:[%s2366_s7 + $0x250] sm:$0xf] }
  0x45   : > { %1180 = vmatpush.bf16.msra.mxu3 %v1770_v19  ;;  %v2195_v58 = vld [vmem:[%s2366_s7 + $0x364] sm:$0xf0]  ;;  %v2057_v59 = vld [vmem:[%s2366_s7 + $0x3e0] sm:$0xf]  ;;  %v2161_v2 = vld [vmem:[%s2366_s7 + $0x254] sm:$0xf0]  ;;  %v1930_v5 = vor.u32 %v2179_v55, %v1929_v54 }
  0x46   : > { %1139 = vmatpush.bf16.msra.mxu0 %v1570_v25  ;;  %v2211_v60 = vld [vmem:[%s2366_s7 + $0x3e4] sm:$0xf0]  ;;  %v1529_v61 = vld [vmem:[%s2368_s8] sm:$0xf]  ;;  %v1994_v6 = vor.u32 %v2195_v58, %v1993_v56  ;;  %v1921_v7 = vld [vmem:[%s2366_s7 + $0x2d0] sm:$0xf]  ;;  %v1858_v18 = vor.u32 %v2161_v2, %v1857_v1 }
  0x47   : > { %1153 = vmatpush.bf16.msra.mxu1 %v1634_v28  ;;  %v2082_v62 = vld [vmem:[%s2368_s8 + $0x1c] sm:$0xf0]  ;;  %v1537_v63 = vld [vmem:[%s2368_s8 + $0x8] sm:$0xf]  ;;  %v2177_v8 = vld [vmem:[%s2366_s7 + $0x2d4] sm:$0xf0]  ;;  %v2058_v11 = vor.u32 %v2211_v60, %v2057_v59 }
  0x48   : > { %1167 = vmatpush.bf16.msra.mxu2 %v1698_v29  ;;  %v2456_v3 = vor.u32 %v2082_v62, %v1529_v61  ;;  %v2083_v4 = vld [vmem:[%s2368_s8 + $0x24] sm:$0xf0]  ;;  %v1985_v9 = vld [vmem:[%s2366_s7 + $0x350] sm:$0xf]  ;;  %v2193_v12 = vld [vmem:[%s2366_s7 + $0x354] sm:$0xf0]  ;;  %v1922_v21 = vor.u32 %v2177_v8, %v1921_v7 }
  0x49   : > { %1181 = vmatpush.bf16.msra.mxu3 %v1762_v33  ;;  %v2462_v10 = vor.u32 %v2083_v4, %v1537_v63  ;;  %v2049_v13 = vld [vmem:[%s2366_s7 + $0x3d0] sm:$0xf]  ;;  %v2209_v14 = vld [vmem:[%s2366_s7 + $0x3d4] sm:$0xf0]  ;;  %v2078_v15 = vld [vmem:[%s2368_s8 + $0x4] sm:$0xf]  ;;  %v1986_v22 = vor.u32 %v2193_v12, %v1985_v9 }
  0x4a   : > { %1140 = vmatpush.bf16.msra.mxu0 %v1562_v40  ;;  %v1531_v16 = vld [vmem:[%s2368_s8 + $0x20] sm:$0xf0]  ;;  %v2079_v17 = vld [vmem:[%s2368_s8 + $0xc] sm:$0xf]  ;;  %v1849_v23 = vld [vmem:[%s2366_s7 + $0x240] sm:$0xf]  ;;  %v2050_v27 = vor.u32 %v2209_v14, %v2049_v13 }
  0x4b   : > { %1154 = vmatpush.bf16.msra.mxu1 %v1626_v44  ;;  %v2472_v19 = vor.u32 %v2078_v15, %v1531_v16  ;;  %v1539_v20 = vld [vmem:[%s2368_s8 + $0x28] sm:$0xf0]  ;;  %v2159_v24 = vld [vmem:[%s2366_s7 + $0x244] sm:$0xf0]  ;;  %v1913_v25 = vld [vmem:[%s2366_s7 + $0x2c0] sm:$0xf] }
  0x4c   : > { %1168 = vmatpush.bf16.msra.mxu2 %v1690_v45  ;;  %v2478_v26 = vor.u32 %v2079_v17, %v1539_v20  ;;  %v2175_v28 = vld [vmem:[%s2366_s7 + $0x2c4] sm:$0xf0]  ;;  %v1977_v29 = vld [vmem:[%s2366_s7 + $0x340] sm:$0xf]  ;;  %v1850_v33 = vor.u32 %v2159_v24, %v1849_v23  ;;  %v1841_v36 = vld [vmem:[%s2366_s7 + $0x230] sm:$0xf] }
  0x4d   : > { %1182 = vmatpush.bf16.msra.mxu3 %v1754_v48  ;;  %1141 = vmatmul.bf16.vlgmr.msra.gmra.mxu0 %v2456_v3  ;;  %v2191_v30 = vld [vmem:[%s2366_s7 + $0x344] sm:$0xf0]  ;;  %v2041_v31 = vld [vmem:[%s2366_s7 + $0x3c0] sm:$0xf]  ;;  %v1914_v34 = vor.u32 %v2175_v28, %v1913_v25  ;;  %v2157_v37 = vld [vmem:[%s2366_s7 + $0x234] sm:$0xf0] }
  0x4e   : > { %1189 = vmatpush.bf16.msrb.mxu0 %v1874_v49  ;;  %1155 = vmatmul.bf16.vlgmr.msra.gmra.mxu1 %v2472_v19  ;;  %v2207_v32 = vld [vmem:[%s2366_s7 + $0x3c4] sm:$0xf0]  ;;  %v1978_v35 = vor.u32 %v2191_v30, %v1977_v29  ;;  %v1905_v38 = vld [vmem:[%s2366_s7 + $0x2b0] sm:$0xf]  ;;  %v2173_v40 = vld [vmem:[%s2366_s7 + $0x2b4] sm:$0xf0]  ;;  %v1842_v45 = vor.u32 %v2157_v37, %v1841_v36 }
  0x4f   : > { %1203 = vmatpush.bf16.msrb.mxu1 %v1938_v52  ;;  %1169 = vmatmul.bf16.vlgmr.msra.gmra.mxu2 %v2462_v10  ;;  %v2042_v39 = vor.u32 %v2207_v32, %v2041_v31  ;;  %v1969_v41 = vld [vmem:[%s2366_s7 + $0x330] sm:$0xf]  ;;  %v2189_v42 = vld [vmem:[%s2366_s7 + $0x334] sm:$0xf0]  ;;  %v1906_v46 = vor.u32 %v2173_v40, %v1905_v38  ;;  %v1833_v48 = vld [vmem:[%s2366_s7 + $0x220] sm:$0xf] }
  0x50   : > { %1217 = vmatpush.bf16.msrb.mxu2 %v2002_v53  ;;  %1183 = vmatmul.bf16.vlgmr.msra.gmra.mxu3 %v2478_v26  ;;  %v2033_v43 = vld [vmem:[%s2366_s7 + $0x3b0] sm:$0xf]  ;;  %v2205_v44 = vld [vmem:[%s2366_s7 + $0x3b4] sm:$0xf0]  ;;  %v1970_v47 = vor.u32 %v2189_v42, %v1969_v41  ;;  %v2155_v49 = vld [vmem:[%s2366_s7 + $0x224] sm:$0xf0] }
  0x51   : > { %1231 = vmatpush.bf16.msrb.mxu3 %v2066_v57  ;;  %v1897_v50 = vld [vmem:[%s2366_s7 + $0x2a0] sm:$0xf]  ;;  %v2034_v51 = vor.u32 %v2205_v44, %v2033_v43  ;;  %v2171_v52 = vld [vmem:[%s2366_s7 + $0x2a4] sm:$0xf0]  ;;  %v1834_v57 = vor.u32 %v2155_v49, %v1833_v48  ;;  %v1825_v58 = vld [vmem:[%s2366_s7 + $0x210] sm:$0xf] }
  0x52   : > { %1190 = vmatpush.bf16.msrb.mxu0 %v1866_v0  ;;  %v1961_v53 = vld [vmem:[%s2366_s7 + $0x320] sm:$0xf]  ;;  %v2187_v54 = vld [vmem:[%s2366_s7 + $0x324] sm:$0xf0]  ;;  %v1898_v59 = vor.u32 %v2171_v52, %v1897_v50  ;;  %v2153_v61 = vld [vmem:[%s2366_s7 + $0x214] sm:$0xf0] }
  0x53   : > { %1204 = vmatpush.bf16.msrb.mxu1 %v1930_v5  ;;  %v2025_v55 = vld [vmem:[%s2366_s7 + $0x3a0] sm:$0xf]  ;;  %v2203_v56 = vld [vmem:[%s2366_s7 + $0x3a4] sm:$0xf0]  ;;  %v1962_v60 = vor.u32 %v2187_v54, %v1961_v53  ;;  %v1889_v62 = vld [vmem:[%s2366_s7 + $0x290] sm:$0xf]  ;;  %v1826_v8 = vor.u32 %v2153_v61, %v1825_v58 }
  0x54   : > { %1218 = vmatpush.bf16.msrb.mxu2 %v1994_v6  ;;  %v2169_v63 = vld [vmem:[%s2366_s7 + $0x294] sm:$0xf0]  ;;  %v2026_v0 = vor.u32 %v2203_v56, %v2025_v55  ;;  %v1953_v1 = vld [vmem:[%s2366_s7 + $0x310] sm:$0xf]  ;;  %v1817_v6 = vld [vmem:[%s2366_s7 + $0x200] sm:$0xf] }
  0x55   : > { %1232 = vmatpush.bf16.msrb.mxu3 %v2058_v11  ;;  %v2185_v2 = vld [vmem:[%s2366_s7 + $0x314] sm:$0xf0]  ;;  %v2017_v4 = vld [vmem:[%s2366_s7 + $0x390] sm:$0xf]  ;;  %v2151_v7 = vld [vmem:[%s2366_s7 + $0x204] sm:$0xf0]  ;;  %v1890_v14 = vor.u32 %v2169_v63, %v1889_v62 }
  0x56   : > { %1191 = vmatpush.bf16.msrb.mxu0 %v1858_v18  ;;  %v2201_v5 = vld [vmem:[%s2366_s7 + $0x394] sm:$0xf0]  ;;  %v1881_v9 = vld [vmem:[%s2366_s7 + $0x280] sm:$0xf]  ;;  %v2167_v11 = vld [vmem:[%s2366_s7 + $0x284] sm:$0xf0]  ;;  %v1954_v15 = vor.u32 %v2185_v2, %v1953_v1  ;;  %v1818_v28 = vor.u32 %v2151_v7, %v1817_v6 }
  0x57   : > { %1205 = vmatpush.bf16.msrb.mxu1 %v1922_v21  ;;  %v1945_v12 = vld [vmem:[%s2366_s7 + $0x300] sm:$0xf]  ;;  %v2183_v13 = vld [vmem:[%s2366_s7 + $0x304] sm:$0xf0]  ;;  %v2100_v18 = vld [vmem:[%s2366_s7 + $0x74] sm:$0xf]  ;;  %v2018_v20 = vor.u32 %v2201_v5, %v2017_v4  ;;  %v1882_v32 = vor.u32 %v2167_v11, %v1881_v9 }
  0x58   : > { %1219 = vmatpush.bf16.msrb.mxu2 %v1986_v22  ;;  %v2009_v16 = vld [vmem:[%s2366_s7 + $0x380] sm:$0xf]  ;;  %v2199_v17 = vld [vmem:[%s2366_s7 + $0x384] sm:$0xf0]  ;;  %v1619_v21 = vld [vmem:[%s2366_s7 + $0x78] sm:$0xf0] }
  0x59   : > { %1233 = vmatpush.bf16.msrb.mxu3 %v2050_v27  ;;  %v2116_v22 = vld [vmem:[%s2366_s7 + $0xf4] sm:$0xf]  ;;  %v1683_v23 = vld [vmem:[%s2366_s7 + $0xf8] sm:$0xf0]  ;;  %v1545_v30 = vld [vmem:[%s2368_s8 + $0x10] sm:$0xf]  ;;  %v2010_v37 = vor.u32 %v2199_v17, %v2009_v16  ;;  %v1622_v38 = vor.u32 %v2100_v18, %v1619_v21 }
  0x5a   : > { %1192 = vmatpush.bf16.msrb.mxu0 %v1850_v33  ;;  %v2132_v24 = vld [vmem:[%s2366_s7 + $0x174] sm:$0xf]  ;;  %v1747_v25 = vld [vmem:[%s2366_s7 + $0x178] sm:$0xf0]  ;;  %v2084_v31 = vld [vmem:[%s2368_s8 + $0x2c] sm:$0xf0]  ;;  %v1946_v33 = vor.u32 %v2183_v13, %v1945_v12  ;;  %v1686_v42 = vor.u32 %v2116_v22, %v1683_v23 }
  0x5b   : > { %1206 = vmatpush.bf16.msrb.mxu1 %v1914_v34  ;;  %v2148_v27 = vld [vmem:[%s2366_s7 + $0x1f4] sm:$0xf]  ;;  %v1811_v29 = vld [vmem:[%s2366_s7 + $0x1f8] sm:$0xf0]  ;;  %v1553_v34 = vld [vmem:[%s2368_s8 + $0x18] sm:$0xf]  ;;  %v1750_v43 = vor.u32 %v2132_v24, %v1747_v25  ;;  %v2538_v48 = vor.u32 %v2084_v31, %v1545_v30 }
  0x5c   : > { %1220 = vmatpush.bf16.msrb.mxu2 %v1978_v35  ;;  %v2085_v35 = vld [vmem:[%s2368_s8 + $0x34] sm:$0xf0]  ;;  %v2080_v36 = vld [vmem:[%s2368_s8 + $0x14] sm:$0xf]  ;;  %v2081_v40 = vld [vmem:[%s2368_s8 + $0x1c] sm:$0xf] }
  0x5d   : > { %1234 = vmatpush.bf16.msrb.mxu3 %v2042_v39  ;;  %v1547_v39 = vld [vmem:[%s2368_s8 + $0x30] sm:$0xf0]  ;;  %v1555_v41 = vld [vmem:[%s2368_s8 + $0x38] sm:$0xf0]  ;;  %v2098_v44 = vld [vmem:[%s2366_s7 + $0x64] sm:$0xf]  ;;  %v2543_v52 = vor.u32 %v2085_v35, %v1553_v34 }
  0x5e   : > { %1193 = vmatpush.bf16.msrb.mxu0 %v1842_v45  ;;  %v1611_v45 = vld [vmem:[%s2366_s7 + $0x68] sm:$0xf0]  ;;  %v2130_v50 = vld [vmem:[%s2366_s7 + $0x164] sm:$0xf]  ;;  %v2545_v53 = vor.u32 %v2080_v36, %v1547_v39  ;;  %v2549_v56 = vor.u32 %v2081_v40, %v1555_v41  ;;  %v1603_v61 = vld [vmem:[%s2366_s7 + $0x58] sm:$0xf0] }
  0x5f   : > { %1207 = vmatpush.bf16.msrb.mxu1 %v1906_v46  ;;  %v2114_v46 = vld [vmem:[%s2366_s7 + $0xe4] sm:$0xf]  ;;  %v1675_v49 = vld [vmem:[%s2366_s7 + $0xe8] sm:$0xf0]  ;;  %v2112_v62 = vld [vmem:[%s2366_s7 + $0xd4] sm:$0xf] }
  0x60   : > { %1221 = vmatpush.bf16.msrb.mxu2 %v1970_v47  ;;  %v1814_v47 = vor.u32 %v2148_v27, %v1811_v29  ;;  %v2146_v54 = vld [vmem:[%s2366_s7 + $0x1e4] sm:$0xf]  ;;  %v1803_v55 = vld [vmem:[%s2366_s7 + $0x1e8] sm:$0xf0]  ;;  %v1678_v58 = vor.u32 %v2114_v46, %v1675_v49  ;;  %v2128_v1 = vld [vmem:[%s2366_s7 + $0x154] sm:$0xf] }
  0x61   : > { %1235 = vmatpush.bf16.msrb.mxu3 %v2034_v51  ;;  %v1739_v51 = vld [vmem:[%s2366_s7 + $0x168] sm:$0xf0]  ;;  %v1806_v63 = vor.u32 %v2146_v54, %v1803_v55  ;;  %v1731_v2 = vld [vmem:[%s2366_s7 + $0x158] sm:$0xf0]  ;;  %v2144_v4 = vld [vmem:[%s2366_s7 + $0x1d4] sm:$0xf] }
  0x62   : > { %1194 = vmatpush.bf16.msrb.mxu0 %v1834_v57  ;;  %v1614_v57 = vor.u32 %v2098_v44, %v1611_v45  ;;  %v1795_v5 = vld [vmem:[%s2366_s7 + $0x1d8] sm:$0xf0]  ;;  %v2094_v9 = vld [vmem:[%s2366_s7 + $0x44] sm:$0xf]  ;;  %v1595_v11 = vld [vmem:[%s2366_s7 + $0x48] sm:$0xf0] }
  0x63   : > { %1208 = vmatpush.bf16.msrb.mxu1 %v1898_v59  ;;  %v1742_v59 = vor.u32 %v2130_v50, %v1739_v51  ;;  %v2110_v12 = vld [vmem:[%s2366_s7 + $0xc4] sm:$0xf]  ;;  %v1798_v13 = vor.u32 %v2144_v4, %v1795_v5  ;;  %v1723_v16 = vld [vmem:[%s2366_s7 + $0x148] sm:$0xf0]  ;;  %v2092_v23 = vld [vmem:[%s2366_s7 + $0x34] sm:$0xf] }
  0x64   : > { %1222 = vmatpush.bf16.msrb.mxu2 %v1962_v60  ;;  %v2096_v60 = vld [vmem:[%s2366_s7 + $0x54] sm:$0xf]  ;;  %v2142_v17 = vld [vmem:[%s2366_s7 + $0x1c4] sm:$0xf]  ;;  %v1787_v18 = vld [vmem:[%s2366_s7 + $0x1c8] sm:$0xf0] }
  0x65   : > { %1236 = vmatpush.bf16.msrb.mxu3 %v2026_v0  ;;  %v1667_v0 = vld [vmem:[%s2366_s7 + $0xd8] sm:$0xf0]  ;;  %v1606_v6 = vor.u32 %v2096_v60, %v1603_v61  ;;  %v2108_v25 = vld [vmem:[%s2366_s7 + $0xb4] sm:$0xf]  ;;  %v1790_v27 = vor.u32 %v2142_v17, %v1787_v18  ;;  %v2090_v36 = vld [vmem:[%s2366_s7 + $0x24] sm:$0xf] }
  0x66   : > { %1195 = vmatpush.bf16.msrb.mxu0 %v1826_v8  ;;  %v1670_v7 = vor.u32 %v2112_v62, %v1667_v0  ;;  %v1734_v8 = vor.u32 %v2128_v1, %v1731_v2  ;;  %v1587_v24 = vld [vmem:[%s2366_s7 + $0x38] sm:$0xf0]  ;;  %v2124_v29 = vld [vmem:[%s2366_s7 + $0x134] sm:$0xf]  ;;  %v1643_v40 = vld [vmem:[%s2366_s7 + $0xa8] sm:$0xf0] }
  0x67   : > { %1209 = vmatpush.bf16.msrb.mxu1 %v1890_v14  ;;  %v1659_v14 = vld [vmem:[%s2366_s7 + $0xc8] sm:$0xf0]  ;;  %v1715_v30 = vld [vmem:[%s2366_s7 + $0x138] sm:$0xf0]  ;;  %v2140_v31 = vld [vmem:[%s2366_s7 + $0x1b4] sm:$0xf] }
  0x68   : > { %1223 = vmatpush.bf16.msrb.mxu2 %v1954_v15  ;;  %v2126_v15 = vld [vmem:[%s2366_s7 + $0x144] sm:$0xf]  ;;  %v1662_v21 = vor.u32 %v2110_v12, %v1659_v14  ;;  %v1718_v35 = vor.u32 %v2124_v29, %v1715_v30  ;;  %v1771_v44 = vld [vmem:[%s2366_s7 + $0x1a8] sm:$0xf0]  ;;  %v2088_v49 = vld [vmem:[%s2366_s7 + $0x14] sm:$0xf] }
  0x69   : > { %1237 = vmatpush.bf16.msrb.mxu3 %v2018_v20  ;;  %v1598_v20 = vor.u32 %v2094_v9, %v1595_v11  ;;  %v1726_v22 = vor.u32 %v2126_v15, %v1723_v16  ;;  %v2122_v41 = vld [vmem:[%s2366_s7 + $0x124] sm:$0xf]  ;;  %v1571_v50 = vld [vmem:[%s2366_s7 + $0x18] sm:$0xf0]  ;;  %v2104_v51 = vld [vmem:[%s2366_s7 + $0x94] sm:$0xf] }
  0x6a   : > { %1196 = vmatpush.bf16.msrb.mxu0 %v1818_v28  ;;  %v1651_v28 = vld [vmem:[%s2366_s7 + $0xb8] sm:$0xf0]  ;;  %v1574_v61 = vor.u32 %v2088_v49, %v1571_v50  ;;  %v2086_v62 = vld [vmem:[%s2366_s7 + $0x4] sm:$0xf]  ;;  %v1627_v4 = vld [vmem:[%s2366_s7 + $0x88] sm:$0xf0] }
  0x6b   : > { %1210 = vmatpush.bf16.msrb.mxu1 %v1882_v32  ;;  %v1779_v32 = vld [vmem:[%s2366_s7 + $0x1b8] sm:$0xf0]  ;;  %v1654_v34 = vor.u32 %v2108_v25, %v1651_v28  ;;  %v2102_v2 = vld [vmem:[%s2366_s7 + $0x84] sm:$0xf]  ;;  %v1755_v9 = vld [vmem:[%s2366_s7 + $0x188] sm:$0xf0] }
  0x6c   : > { %1224 = vmatpush.bf16.msrb.mxu2 %v1946_v33  ;;  %v1590_v33 = vor.u32 %v2092_v23, %v1587_v24  ;;  %v1782_v39 = vor.u32 %v2140_v31, %v1779_v32  ;;  %v1635_v55 = vld [vmem:[%s2366_s7 + $0x98] sm:$0xf0]  ;;  %v2118_v5 = vld [vmem:[%s2366_s7 + $0x104] sm:$0xf]  ;;  %v2164_v11 = vld [vmem:[%s2366_s7 + $0x274] sm:$0xf]  ;;  %v1630_v18 = vor.u32 %v2102_v2, %v1627_v4 }
  0x6d   : > { %1238 = vmatpush.bf16.msrb.mxu3 %v2010_v37  ;;  %1197 = vmatmul.bf16.vlgmr.msrb.gmra.mxu0 %v2538_v48  ;;  %v1579_v37 = vld [vmem:[%s2366_s7 + $0x28] sm:$0xf0]  ;;  %v1763_v60 = vld [vmem:[%s2366_s7 + $0x198] sm:$0xf0]  ;;  %v1638_v0 = vor.u32 %v2104_v51, %v1635_v55  ;;  %v2196_v16 = vld [vmem:[%s2366_s7 + $0x374] sm:$0xf] }
  0x6e   : > { %1245 = vmatpush.bf16.msra.mxu0 %v1622_v38  ;;  %1211 = vmatmul.bf16.vlgmr.msrb.gmra.mxu1 %v2545_v53  ;;  %v2106_v38 = vld [vmem:[%s2366_s7 + $0xa4] sm:$0xf]  ;;  %v1582_v45 = vor.u32 %v2090_v36, %v1579_v37  ;;  %v1875_v12 = vld [vmem:[%s2366_s7 + $0x278] sm:$0xf0]  ;;  %v1867_v29 = vld [vmem:[%s2366_s7 + $0x268] sm:$0xf0] }
  0x6f   : > { %1259 = vmatpush.bf16.msra.mxu1 %v1686_v42  ;;  %1225 = vmatmul.bf16.vlgmr.msrb.gmra.mxu2 %v2543_v52  ;;  %v1707_v42 = vld [vmem:[%s2366_s7 + $0x128] sm:$0xf0]  ;;  %v1646_v46 = vor.u32 %v2106_v38, %v1643_v40  ;;  %v1939_v15 = vld [vmem:[%s2366_s7 + $0x2f8] sm:$0xf0]  ;;  %v1878_v24 = vor.u32 %v2164_v11, %v1875_v12  ;;  %v2162_v28 = vld [vmem:[%s2366_s7 + $0x264] sm:$0xf] }
  0x70   : > { %1273 = vmatpush.bf16.msra.mxu2 %v1750_v43  ;;  %1239 = vmatmul.bf16.vlgmr.msrb.gmra.mxu3 %v2549_v56  ;;  %v2138_v43 = vld [vmem:[%s2366_s7 + $0x1a4] sm:$0xf]  ;;  %v2003_v17 = vld [vmem:[%s2366_s7 + $0x378] sm:$0xf0]  ;;  %v1931_v32 = vld [vmem:[%s2366_s7 + $0x2e8] sm:$0xf0]  ;;  %v1870_v37 = vor.u32 %v2162_v28, %v1867_v29 }
  0x71   : > { %1287 = vmatpush.bf16.msra.mxu3 %v1814_v47  ;;  %v1710_v47 = vor.u32 %v2122_v41, %v1707_v42  ;;  %v1774_v54 = vor.u32 %v2138_v43, %v1771_v44  ;;  %v2178_v30 = vld [vmem:[%s2366_s7 + $0x2e4] sm:$0xf]  ;;  %v2059_v36 = vld [vmem:[%s2366_s7 + $0x3e8] sm:$0xf0]  ;;  %v2160_v40 = vld [vmem:[%s2366_s7 + $0x254] sm:$0xf] }
  0x72   : > { %1246 = vmatpush.bf16.msra.mxu0 %v1614_v57  ;;  %v2120_v57 = vld [vmem:[%s2366_s7 + $0x114] sm:$0xf]  ;;  %v1934_v38 = vor.u32 %v2178_v30, %v1931_v32  ;;  %v1859_v41 = vld [vmem:[%s2366_s7 + $0x258] sm:$0xf0]  ;;  %v2174_v55 = vld [vmem:[%s2366_s7 + $0x2c4] sm:$0xf] }
  0x73   : > { %1260 = vmatpush.bf16.msra.mxu1 %v1678_v58  ;;  %v1699_v58 = vld [vmem:[%s2366_s7 + $0x118] sm:$0xf0]  ;;  %v2176_v42 = vld [vmem:[%s2366_s7 + $0x2d4] sm:$0xf]  ;;  %v1862_v50 = vor.u32 %v2160_v40, %v1859_v41  ;;  %v2150_v40 = vld [vmem:[%s2366_s7 + $0x204] sm:$0xf] }
  0x74   : > { %1274 = vmatpush.bf16.msra.mxu2 %v1742_v59  ;;  %v2136_v59 = vld [vmem:[%s2366_s7 + $0x194] sm:$0xf]  ;;  %v1702_v1 = vor.u32 %v2120_v57, %v1699_v58  ;;  %v1923_v44 = vld [vmem:[%s2366_s7 + $0x2d8] sm:$0xf0]  ;;  %v1915_v58 = vld [vmem:[%s2366_s7 + $0x2c8] sm:$0xf0] }
  0x75   : > { %1288 = vmatpush.bf16.msra.mxu3 %v1806_v63  ;;  %v1563_v63 = vld [vmem:[%s2366_s7 + $0x8] sm:$0xf0]  ;;  %v2051_v49 = vld [vmem:[%s2366_s7 + $0x3d8] sm:$0xf0]  ;;  %v2172_v2 = vld [vmem:[%s2366_s7 + $0x2b4] sm:$0xf] }
  0x76   : > { %1247 = vmatpush.bf16.msra.mxu0 %v1606_v6  ;;  %v1766_v6 = vor.u32 %v2136_v59, %v1763_v60  ;;  %v1566_v14 = vor.u32 %v2086_v62, %v1563_v63  ;;  %v1979_v59 = vld [vmem:[%s2366_s7 + $0x348] sm:$0xf0]  ;;  %v2206_v60 = vld [vmem:[%s2366_s7 + $0x3c4] sm:$0xf]  ;;  %v1918_v62 = vor.u32 %v2174_v55, %v1915_v58  ;;  %v2152_v28 = vld [vmem:[%s2366_s7 + $0x214] sm:$0xf] }
  0x77   : > { %1261 = vmatpush.bf16.msra.mxu1 %v1670_v7  ;;  %v1691_v7 = vld [vmem:[%s2366_s7 + $0x108] sm:$0xf0]  ;;  %v1827_v29 = vld [vmem:[%s2366_s7 + $0x218] sm:$0xf0]  ;;  %v2168_v30 = vld [vmem:[%s2366_s7 + $0x294] sm:$0xf] }
  0x78   : > { %1275 = vmatpush.bf16.msra.mxu2 %v1734_v8  ;;  %v2134_v8 = vld [vmem:[%s2366_s7 + $0x184] sm:$0xf]  ;;  %v1891_v32 = vld [vmem:[%s2366_s7 + $0x298] sm:$0xf0]  ;;  %v1819_v41 = vld [vmem:[%s2366_s7 + $0x208] sm:$0xf0] }
  0x79   : > { %1289 = vmatpush.bf16.msra.mxu3 %v1798_v13  ;;  %v2180_v13 = vld [vmem:[%s2366_s7 + $0x2f4] sm:$0xf]  ;;  %v1758_v23 = vor.u32 %v2134_v8, %v1755_v9  ;;  %v2035_v9 = vld [vmem:[%s2366_s7 + $0x3b8] sm:$0xf0]  ;;  %p2071_p11 = scmp.ne.s32.totalorder %s2285_s14, 17 }
  0x7a   : > { %1248 = vmatpush.bf16.msra.mxu0 %v1598_v20  ;;  %v1694_v20 = vor.u32 %v2118_v5, %v1691_v7  ;;  %v1942_v25 = vor.u32 %v2180_v13, %v1939_v15  ;;  %v1907_v5 = vld [vmem:[%s2366_s7 + $0x2b8] sm:$0xf0]  ;;  %v2204_v8 = vld [vmem:[%s2366_s7 + $0x3b4] sm:$0xf]  ;;  %v1835_v15 = vld [vmem:[%s2366_s7 + $0x228] sm:$0xf0] }
  0x7b   : > { %1262 = vmatpush.bf16.msra.mxu1 %v1662_v21  ;;  %v2212_v21 = vld [vmem:[%s2366_s7 + $0x3f4] sm:$0xf]  ;;  %v1971_v7 = vld [vmem:[%s2366_s7 + $0x338] sm:$0xf0]  ;;  %v1910_v12 = vor.u32 %v2172_v2, %v1907_v5 }
  0x7c   : > { %1276 = vmatpush.bf16.msra.mxu2 %v1726_v22  ;;  %v2067_v22 = vld [vmem:[%s2366_s7 + $0x3f8] sm:$0xf0] }
  0x7d   : > { %1290 = vmatpush.bf16.msra.mxu3 %v1790_v27  ;;  %v2006_v27 = vor.u32 %v2196_v16, %v2003_v17  ;;  %v2070_v31 = vor.u32 %v2212_v21, %v2067_v22  ;;  %v2170_v16 = vld [vmem:[%s2366_s7 + $0x2a4] sm:$0xf]  ;;  %v2038_v17 = vor.u32 %v2204_v8, %v2035_v9  ;;  %v1963_v21 = vld [vmem:[%s2366_s7 + $0x328] sm:$0xf0]  ;;  %v313_v8 = vld [vmem:[#allocation2 + $0x10] sm:$0xff] }
  0x7e   : > { %1249 = vmatpush.bf16.msra.mxu0 %v1590_v33  ;;  %v2194_v33 = vld [vmem:[%s2366_s7 + $0x364] sm:$0xf] }
  0x7f   : > { %1263 = vmatpush.bf16.msra.mxu1 %v1654_v34  ;;  %v1995_v34 = vld [vmem:[%s2366_s7 + $0x368] sm:$0xf0]  ;;  %v2202_v22 = vld [vmem:[%s2366_s7 + $0x3a4] sm:$0xf] }
  0x80   : > { %1277 = vmatpush.bf16.msra.mxu2 %v1718_v35  ;;  %v2210_v35 = vld [vmem:[%s2366_s7 + $0x3e4] sm:$0xf] }
  0x81   : > { %1291 = vmatpush.bf16.msra.mxu3 %v1782_v39  ;;  %v1998_v39 = vor.u32 %v2194_v33, %v1995_v34  ;;  %v2062_v43 = vor.u32 %v2210_v35, %v2059_v36  ;;  %v2184_v33 = vld [vmem:[%s2366_s7 + $0x314] sm:$0xf]  ;;  %v1955_v34 = vld [vmem:[%s2366_s7 + $0x318] sm:$0xf0] }
  0x82   : > { %1250 = vmatpush.bf16.msra.mxu0 %v1582_v45  ;;  %v2192_v45 = vld [vmem:[%s2366_s7 + $0x354] sm:$0xf]  ;;  %v2019_v36 = vld [vmem:[%s2366_s7 + $0x398] sm:$0xf0] }
  0x83   : > { %1264 = vmatpush.bf16.msra.mxu1 %v1646_v46  ;;  %v1987_v46 = vld [vmem:[%s2366_s7 + $0x358] sm:$0xf0]  ;;  %v2200_v35 = vld [vmem:[%s2366_s7 + $0x394] sm:$0xf] }
  0x84   : > { %1278 = vmatpush.bf16.msra.mxu2 %v1710_v47  ;;  %v2208_v47 = vld [vmem:[%s2366_s7 + $0x3d4] sm:$0xf]  ;;  %v1990_v51 = vor.u32 %v2192_v45, %v1987_v46  ;;  %v2182_v45 = vld [vmem:[%s2366_s7 + $0x304] sm:$0xf]  ;;  %v1947_v46 = vld [vmem:[%s2366_s7 + $0x308] sm:$0xf0] }
  0x85   : > { %1292 = vmatpush.bf16.msra.mxu3 %v1774_v54  ;;  %v2158_v54 = vld [vmem:[%s2366_s7 + $0x244] sm:$0xf]  ;;  %v2054_v57 = vor.u32 %v2208_v47, %v2051_v49  ;;  %v2011_v49 = vld [vmem:[%s2366_s7 + $0x388] sm:$0xf0] }
  0x86   : > { %1251 = vmatpush.bf16.msra.mxu0 %v1574_v61  ;;  %v2198_v47 = vld [vmem:[%s2366_s7 + $0x384] sm:$0xf] }
  0x87   : > { %1265 = vmatpush.bf16.msra.mxu1 %v1638_v0  ;;  %v2156_v0 = vld [vmem:[%s2366_s7 + $0x234] sm:$0xf] }
  0x88   : > { %1279 = vmatpush.bf16.msra.mxu2 %v1702_v1  ;;  %v1843_v1 = vld [vmem:[%s2366_s7 + $0x238] sm:$0xf0] }
  0x89   : > { %1293 = vmatpush.bf16.msra.mxu3 %v1766_v6  ;;  %v2188_v6 = vld [vmem:[%s2366_s7 + $0x334] sm:$0xf]  ;;  %v1846_v11 = vor.u32 %v2156_v0, %v1843_v1 }
  0x8a   : > { %1252 = vmatpush.bf16.msra.mxu0 %v1566_v14  ;;  %v1974_v13 = vor.u32 %v2188_v6, %v1971_v7  ;;  %v2154_v14 = vld [vmem:[%s2366_s7 + $0x224] sm:$0xf] }
  0x8b   : > { %1266 = vmatpush.bf16.msra.mxu1 %v1630_v18  ;;  %v1899_v18 = vld [vmem:[%s2366_s7 + $0x2a8] sm:$0xf0] }
  0x8c   : > { %1280 = vmatpush.bf16.msra.mxu2 %v1694_v20  ;;  %v2186_v20 = vld [vmem:[%s2366_s7 + $0x324] sm:$0xf] }
  0x8d   : > { %1294 = vmatpush.bf16.msra.mxu3 %v1758_v23  ;;  %1253 = vmatmul.bf16.vlgmr.msra.gmra.mxu0 %v2456_v3  ;;  %v2190_v3 = vld [vmem:[%s2366_s7 + $0x344] sm:$0xf]  ;;  %v2027_v23 = vld [vmem:[%s2366_s7 + $0x3a8] sm:$0xf0] }
  0x8e   : > { %1301 = vmatpush.bf16.msrb.mxu0 %v1878_v24  ;;  %1267 = vmatmul.bf16.vlgmr.msra.gmra.mxu1 %v2472_v19  ;;  %v2043_v19 = vld [vmem:[%s2366_s7 + $0x3c8] sm:$0xf0]  ;;  %v1982_v63 = vor.u32 %v2190_v3, %v1979_v59  ;;  %v1838_v24 = vor.u32 %v2154_v14, %v1835_v15 }
  0x8f   : > { %1315 = vmatpush.bf16.msrb.mxu1 %v1942_v25  ;;  %1281 = vmatmul.bf16.vlgmr.msra.gmra.mxu2 %v2462_v10  ;;  %v1926_v10 = vor.u32 %v2176_v42, %v1923_v44  ;;  %v2046_v4 = vor.u32 %v2206_v60, %v2043_v19  ;;  %v1902_v25 = vor.u32 %v2170_v16, %v1899_v18  ;;  %v2166_v42 = vld [vmem:[%s2366_s7 + $0x284] sm:$0xf]  ;;  %v1883_v44 = vld [vmem:[%s2366_s7 + $0x288] sm:$0xf0]  ;;  %v315_v18 = vld [vmem:[#allocation2 + $0x18] sm:$0xff] }
  0x90   : > { %1329 = vmatpush.bf16.msrb.mxu2 %v2006_v27  ;;  %1295 = vmatmul.bf16.vlgmr.msra.gmra.mxu3 %v2478_v26  ;;  %v1851_v26 = vld [vmem:[%s2366_s7 + $0x248] sm:$0xf0]  ;;  %v1966_v27 = vor.u32 %v2186_v20, %v1963_v21 }
  0x91   : > { %1343 = vmatpush.bf16.msrb.mxu3 %v2070_v31  ;;  %v1854_v61 = vor.u32 %v2158_v54, %v1851_v26  ;;  %v2030_v31 = vor.u32 %v2202_v22, %v2027_v23  ;;  %v2014_v54 = vor.u32 %v2198_v47, %v2011_v49 }
  0x92   : > { %1302 = vmatpush.bf16.msrb.mxu0 %v1870_v37  ;;  %v1830_v37 = vor.u32 %v2152_v28, %v1827_v29 }
  0x93   : > { %1316 = vmatpush.bf16.msrb.mxu1 %v1934_v38  ;;  %v1894_v38 = vor.u32 %v2168_v30, %v1891_v32 }
  0x94   : > { %1330 = vmatpush.bf16.msrb.mxu2 %v1998_v39  ;;  %v1958_v39 = vor.u32 %v2184_v33, %v1955_v34 }
  0x95   : > { %1344 = vmatpush.bf16.msrb.mxu3 %v2062_v43  ;;  %v2022_v43 = vor.u32 %v2200_v35, %v2019_v36 }
  0x96   : > { %1303 = vmatpush.bf16.msrb.mxu0 %v1862_v50  ;;  %v1822_v50 = vor.u32 %v2150_v40, %v1819_v41 }
  0x97   : > { %1317 = vmatpush.bf16.msrb.mxu1 %v1926_v10  ;;  %v1886_v10 = vor.u32 %v2166_v42, %v1883_v44 }
  0x98   : > { %1331 = vmatpush.bf16.msrb.mxu2 %v1990_v51  ;;  %v1950_v51 = vor.u32 %v2182_v45, %v1947_v46  ;;  %v314_v45 = vld [vmem:[#allocation2] sm:$0xff] }
  0x99   : > { %1345 = vmatpush.bf16.msrb.mxu3 %v2054_v57 }
  0x9a   : > { %1304 = vmatpush.bf16.msrb.mxu0 %v1854_v61 }
  0x9b   : > { %1318 = vmatpush.bf16.msrb.mxu1 %v1918_v62 }
  0x9c   : > { %1332 = vmatpush.bf16.msrb.mxu2 %v1982_v63 }
  0x9d   : > { %1346 = vmatpush.bf16.msrb.mxu3 %v2046_v4 }
  0x9e   : > { %1305 = vmatpush.bf16.msrb.mxu0 %v1846_v11 }
  0x9f   : > { %1319 = vmatpush.bf16.msrb.mxu1 %v1910_v12 }
  0xa0   : > { %1333 = vmatpush.bf16.msrb.mxu2 %v1974_v13 }
  0xa1   : > { %1347 = vmatpush.bf16.msrb.mxu3 %v2038_v17 }
  0xa2   : > { %1306 = vmatpush.bf16.msrb.mxu0 %v1838_v24 }
  0xa3   : > { %1320 = vmatpush.bf16.msrb.mxu1 %v1902_v25 }
  0xa4   : > { %1334 = vmatpush.bf16.msrb.mxu2 %v1966_v27 }
  0xa5   : > { %1348 = vmatpush.bf16.msrb.mxu3 %v2030_v31 }
  0xa6   : > { %1307 = vmatpush.bf16.msrb.mxu0 %v1830_v37 }
  0xa7   : > { %1321 = vmatpush.bf16.msrb.mxu1 %v1894_v38 }
  0xa8   : > { %1335 = vmatpush.bf16.msrb.mxu2 %v1958_v39 }
  0xa9   : > { %1349 = vmatpush.bf16.msrb.mxu3 %v2022_v43 }
  0xaa   : > { %1308 = vmatpush.bf16.msrb.mxu0 %v1822_v50 }
  0xab   : > { %1322 = vmatpush.bf16.msrb.mxu1 %v1886_v10 }
  0xac   : > { %1336 = vmatpush.bf16.msrb.mxu2 %v1950_v51 }
  0xad   : > { %1350 = vmatpush.bf16.msrb.mxu3 %v2014_v54  ;;  %1309 = vmatmul.bf16.vlgmr.msrb.gmra.mxu0 %v2538_v48 }
  0xae   : > { %1323 = vmatmul.bf16.vlgmr.msrb.gmra.mxu1 %v2545_v53 }
  0xaf   : > { %1337 = vmatmul.bf16.vlgmr.msrb.gmra.mxu2 %v2543_v52 }
  0xb0   : > { %1351 = vmatmul.bf16.vlgmr.msrb.gmra.mxu3 %v2549_v56 }
  0xca   : > { %v1142_v26 = vpop.f32.mrf.mxu0 }
  0xcb   : > { %v1156_v55 = vpop.f32.mrf.mxu1 }
  0xcc   : > { %v1157_v3 = vadd.f32 %v1156_v55, %v1142_v26  ;;  %v316_v26 = vld [vmem:[#allocation2 + $0x8] sm:$0xff] }
  0xd2   : > { %v1170_v57 = vpop.f32.mrf.mxu2  ;;  %v1144_v59 = vpop.f32.mrf.mxu0 }
  0xd3   : > { %v1184_v58 = vpop.f32.mrf.mxu3  ;;  %v1158_v60 = vpop.f32.mrf.mxu1  ;;  %v1171_v19 = vadd.f32 %v1170_v57, %v1157_v3 }
  0xd4   : > { %v1159_v0 = vadd.f32 %v1158_v60, %v1144_v59 }
  0xd5   : > { %v1185_v61 = vadd.f32 %v1184_v58, %v1171_v19 }
  0xda   : > { %v1172_v62 = vpop.f32.mrf.mxu2 }
  0xdb   : > { %v1186_v63 = vpop.f32.mrf.mxu3  ;;  %v1173_v53 = vadd.f32 %v1172_v62, %v1159_v0 }
  0xdd   : > { %v1187_v5 = vadd.f32 %v1186_v63, %v1173_v53 }
  0xea   : > { %v1198_v1 = vpop.f32.mrf.mxu0 }
  0xeb   : > { %v1199_v48 = vadd.f32 %v1198_v1, %v1185_v61  ;;  %v1212_v2 = vpop.f32.mrf.mxu1 }
  0xed   : > { %v1213_v4 = vadd.f32 %v1212_v2, %v1199_v48 }
  0xf2   : > { %v1226_v52 = vpop.f32.mrf.mxu2  ;;  %v1200_v6 = vpop.f32.mrf.mxu0 }
  0xf3   : > { %v1227_v56 = vadd.f32 %v1226_v52, %v1213_v4  ;;  %v1240_v7 = vpop.f32.mrf.mxu3  ;;  %v1201_v9 = vadd.f32 %v1200_v6, %v1187_v5  ;;  %v1214_v12 = vpop.f32.mrf.mxu1 }
  0xf5   : > { %v1241_v11 = vadd.f32 %v1240_v7, %v1227_v56  ;;  %v1215_v14 = vadd.f32 %v1214_v12, %v1201_v9 }
  0xf7   : > { %v1357_v13 = vadd.f32 %v1241_v11, %v313_v8 }
  0xf9   : > { %1361 = vst [vmem:[#allocation2 + $0x10] sm:$0xff] %v1357_v13 }
  0xfa   : > { %v1228_v15 = vpop.f32.mrf.mxu2 }
  0xfb   : > { %v1229_v16 = vadd.f32 %v1228_v15, %v1215_v14  ;;  %v1242_v17 = vpop.f32.mrf.mxu3 }
  0xfd   : > { %v1243_v20 = vadd.f32 %v1242_v17, %v1229_v16 }
  0xff   : > { %v1359_v21 = vadd.f32 %v1243_v20, %v315_v18 }
 0x101   : > { %1363 = vst [vmem:[#allocation2 + $0x18] sm:$0xff] %v1359_v21 }
 0x10a   : > { %v1254_v22 = vpop.f32.mrf.mxu0 }
 0x10b   : > { %v1268_v23 = vpop.f32.mrf.mxu1 }
 0x10c   : > { %v1269_v27 = vadd.f32 %v1268_v23, %v1254_v22 }
 0x112   : > { %v1282_v24 = vpop.f32.mrf.mxu2  ;;  %v1256_v28 = vpop.f32.mrf.mxu0 }
 0x113   : > { %v1296_v25 = vpop.f32.mrf.mxu3  ;;  %v1270_v29 = vpop.f32.mrf.mxu1  ;;  %v1283_v30 = vadd.f32 %v1282_v24, %v1269_v27 }
 0x114   : > { %v1271_v33 = vadd.f32 %v1270_v29, %v1256_v28 }
 0x115   : > { %v1297_v32 = vadd.f32 %v1296_v25, %v1283_v30 }
 0x11a   : > { %v1284_v31 = vpop.f32.mrf.mxu2 }
 0x11b   : > { %v1298_v34 = vpop.f32.mrf.mxu3  ;;  %v1285_v38 = vadd.f32 %v1284_v31, %v1271_v33 }
 0x11d   : > { %v1299_v41 = vadd.f32 %v1298_v34, %v1285_v38 }
 0x12a   : > { %v1310_v35 = vpop.f32.mrf.mxu0 }
 0x12b   : > { %v1311_v36 = vadd.f32 %v1310_v35, %v1297_v32  ;;  %v1324_v37 = vpop.f32.mrf.mxu1 }
 0x12d   : > { %v1325_v39 = vadd.f32 %v1324_v37, %v1311_v36 }
 0x132   : > { %v1338_v40 = vpop.f32.mrf.mxu2  ;;  %v1312_v44 = vpop.f32.mrf.mxu0 }
 0x133   : > { %v1339_v42 = vadd.f32 %v1338_v40, %v1325_v39  ;;  %v1352_v43 = vpop.f32.mrf.mxu3  ;;  %v1313_v47 = vadd.f32 %v1312_v44, %v1299_v41  ;;  %v1326_v50 = vpop.f32.mrf.mxu1 }
 0x135   : > { %v1353_v46 = vadd.f32 %v1352_v43, %v1339_v42  ;;  %v1327_v10 = vadd.f32 %v1326_v50, %v1313_v47 }
 0x137   : > { %v1358_v49 = vadd.f32 %v1353_v46, %v314_v45 }
 0x139   : > { %1362 = vst [vmem:[#allocation2] sm:$0xff] %v1358_v49 }
 0x13a   : > { %v1340_v51 = vpop.f32.mrf.mxu2 }
 0x13b   : > { %v1341_v54 = vadd.f32 %v1340_v51, %v1327_v10  ;;  %v1354_v55 = vpop.f32.mrf.mxu3 }
 0x13d   : > { %v1355_v57 = vadd.f32 %v1354_v55, %v1341_v54  ;;  %1368 = sbr.rel (%p2071_p11) target bundleno = 336 (0x150), region = 63 }
 0x13f   : > { %v1360_v58 = vadd.f32 %v1355_v57, %v316_v26 }
 0x141   : > { %1364 = vst [vmem:[#allocation2 + $0x8] sm:$0xff] %v1360_v58 }
 0x142   : > { %v1369_v3 = vld [vmem:[#allocation2 + $0x10] sm:$0xff]  ;;  %v1370_v59 = vld [vmem:[#allocation2] sm:$0xff]  ;;  %v1371_v62 = vld [vmem:[#allocation2 + $0x18] sm:$0xff] }
 0x143   : > { %v1373_v60 = vld [vmem:[%s2702_s2] sm:$0x3] }
 0x144   : > { %v1375_v19 = vperm.slane %v1373_v60, 0  ;;  %v1376_v61 = vperm.slane %v1373_v60, 1 }
 0x146   : > { %v1379_v0 = vadd.f32 %v1375_v19, %v1369_v3  ;;  %v1380_v1 = vadd.f32 %v1376_v61, %v1370_v59  ;;  %v1381_v48 = vadd.f32 %v1375_v19, %v1371_v62 }
 0x148   : > { %v1372_v63 = vld [vmem:[#allocation2 + $0x8] sm:$0xff]  ;;  %v1383_v53 = vmax.f32 %v1379_v0, 0.0  ;;  %v1384_v4 = vmax.f32 %v1380_v1, 0.0  ;;  %v1385_v52 = vmax.f32 %v1381_v48, 0.0 }
 0x149   : > { %v1382_v2 = vadd.f32 %v1376_v61, %v1372_v63 }
 0x14a   : > { %v1387_v56 = vpack.c.bf16 %v1384_v4, %v1383_v53 }
 0x14b   : > { %v1386_v5 = vmax.f32 %v1382_v2, 0.0 }
 0x14c   : > { %1389 = vst [vmem:[%s2703_s3] sm:$0xff] %v1387_v56 }
 0x14d   : > { %v1388_v6 = vpack.c.bf16 %v1386_v5, %v1385_v52 }
 0x14f   : > { %1390 = vst [vmem:[%s2703_s3 + $0x8] sm:$0xff] %v1388_v6 }
 0x150 PF: > { %s13_s16 = sadd.s32 1, %s2293_s16   ;;  %s2704_s12 = smov %s2281_s13 }
 0x151   : > { %p10_p12 = scmp.ge.s32.totalorder %s13_s16, 20   ;;  %s2705_s13 = smov %s2351_s20 }
 0x152   : > { %s2706_s14 = smov %s2289_s15  ;;  %s2707_s15 = smov %s2709_s17 }
 0x153   :  { %12 = sbr.rel (!%p10_p12) target bundleno = 3 (0x3), region = 104 }

// kernel: deeplab_forward.24
= control target key start
LH: loop header
LB: loop body
LE: loop exit
PB: predicated region body
PF: predicated region fallthrough
CT: control target
= control target key end

     0   :  { %s1685_s12 = smov 0   ;;  %s1687_s13 = smov 0   ;;  %s1955_s0 = inlined_call_operand.vmem [shape: bf16[16,1280], index: 0, kind: input, shape index: {}]   ;;  %s1956_s1 = inlined_call_operand.vmem [shape: bf16[1280,256], index: 1, kind: input, shape index: {}]   ;;  %s1957_s2 = inlined_call_operand.vmem [shape: f32[1,256], index: 2, kind: input, shape index: {}]   ;;  %s1958_s3 = inlined_call_operand.vmem [shape: bf16[16,256], index: 3, kind: output, shape index: {}]  }
   0x1   :  { %s1689_s14 = smov 0   ;;  %s1691_s15 = smov 0  }
   0x2   :  { %s1693_s16 = smov 0  }
   0x3 LB: > { %s25_s17 = sadd.s32 1, %s1658_s15  ;;  %p48_p1 = scmp.ne.s32.totalorder %s1650_s13, %s1646_s12  ;;  %s1662_s16 = sphi %s1693_s16, %s13_s16   ;;  %s1658_s15 = sphi %s1691_s15, %s1962_s15   ;;  %s1654_s14 = sphi %s1689_s14, %s1961_s14   ;;  %s1650_s13 = sphi %s1687_s13, %s1960_s13   ;;  %s1646_s12 = sphi %s1685_s12, %s1959_s12  }
   0x4   : > { %p26_p0 = scmp.ge.s32.totalorder %s25_s17, 2  ;;  %p49_p2 = scmp.eq.s32.totalorder %s1662_s16, 0 }
   0x5   : > { %s41_s19 = sadd.s32 1, %s1650_s13  ;;  %p1139_p5 = scmp.ge.s32.totalorder %s1662_s16, 2 }
   0x6   : > { %s1964_s17 = smov (%p26_p0, %s25_s17), 0  ;;  %p50_p3 = por %p49_p2, %p48_p1 }
   0x7   : > { %s37_s18 = ssub.s32 %s1658_s15, %s1964_s17  ;;  %164 = sbr.rel (%p1139_p5) target bundleno = 23 (0x17), region = 20 }
   0x8   : > { %p39_p4 = scmp.eq.s32.totalorder %s37_s18, 0 }
   0xa   : > { %s1720_s20 = scalar_select %p39_p4, %s1650_s13, %s41_s19  }
   0xc   : > { %167 = sbr.rel (!%p50_p3) target bundleno = 23 (0x17), region = 24  ;;  %s169_s21 = sand.u32 (%p50_p3), 1, %s1650_s13  }
   0xd   : > { %s1494_s22 = smul.u32 (%p50_p3), 20, %s1658_s15 }
   0xe   : > { %s1581_s23 = smul.u32 (%p50_p3), 40, %s169_s21 }
   0xf   : > { %s177_s26 = scalar_lea.vmem (%p50_p3), %s1955_s0, %s1494_s22 }
  0x10   : > { %v192_v0 = vld [vmem:[%s177_s26] sm:$0xff] (%p50_p3)  ;;  %v194_v1 = vld [vmem:[%s177_s26 + $0x8] sm:$0xff] (%p50_p3)  ;;  %s171_s27 = scalar_lea.vmem (%p50_p3), [#allocation3], %s1581_s23  ;;  %v198_v3 = vld [vmem:[%s177_s26 + $0x30] sm:$0xff] (%p50_p3) }
  0x11   : > { %v196_v2 = vld [vmem:[%s177_s26 + $0x28] sm:$0xff]  ;;  %193 = vst [vmem:[%s171_s27] sm:$0xff] %v192_v0  ;;  %v1141_v4 = vld [vmem:[%s177_s26 + $0x10] sm:$0xf]  ;;  %v1143_v5 = vld [vmem:[%s177_s26 + $0x38] sm:$0xf] }
  0x12   : > { %195 = vst [vmem:[%s171_s27 + $0x8] sm:$0xff] %v194_v1 }
  0x13   : > { %197 = vst [vmem:[%s171_s27 + $0x14] sm:$0xff] %v196_v2 }
  0x14   : > { %199 = vst [vmem:[%s171_s27 + $0x1c] sm:$0xff] %v198_v3 }
  0x15   : > { %1142 = vst [vmem:[%s171_s27 + $0x10] sm:$0xf] %v1141_v4 }
  0x16   : > { %1144 = vst [vmem:[%s171_s27 + $0x24] sm:$0xf] %v1143_v5 }
  0x17 PF: > { %p1145_p6 = scmp.ge.s32.totalorder %s1662_s16, 1  ;;  %p231_p7 = scmp.lt.s32.totalorder %s1662_s16, 3 }
  0x19   : > { %p232_p8 = pnand %p1145_p6, %p231_p7 }
  0x1a   : > { %s238_s28 = sand.u32 (!%p232_p8), 1, %s1646_s12   ;;  %s282_s29 = smul.u32 (!%p232_p8), 80, %s1654_s14 }
  0x1b   : > { %235 = sbr.rel (%p232_p8) target bundleno = 295 (0x127), region = 54  ;;  %p1148_p10 = scmp.ne.s32.totalorder (!%p232_p8), %s1654_s14, 0 }
  0x1c   : > { %s1582_s30 = smul.u32 (!%p232_p8), 40, %s238_s28  ;;  %p284_p9 = scmp.lt.s32.totalorder (!%p232_p8), %s282_s29, 159 }
  0x1e   : > { %s1737_s8 = scalar_lea.vmem (!%p232_p8), [#allocation3], %s1582_s30 }
  0x20   : > { %s1966_s29 = smov (!%p284_p9, %s282_s29), 159  ;;  %314 = sbr.rel (%p1148_p10) target bundleno = 42 (0x2a), region = 62 }
  0x21   : > { %s1495_s4 = sshll.u32 %s1966_s29, 3 }
  0x22   : > { %s1735_s7 = scalar_lea.vmem %s1956_s1, %s1495_s4 }
  0x25   : > { %v1664_v6 = vmov 0.0  }
  0x26   : > { %315 = vst [vmem:[#allocation2 + $0x10] sm:$0xff] %v1664_v6 }
  0x27   : > { %316 = vst [vmem:[#allocation2] sm:$0xff] %v1664_v6 }
  0x28   : > { %317 = vst [vmem:[#allocation2 + $0x18] sm:$0xff] %v1664_v6 }
  0x29   : > { %318 = vst [vmem:[#allocation2 + $0x8] sm:$0xff] %v1664_v6 }
  0x2a PF: > { %v1227_v7 = vld [vmem:[%s1735_s7 + $0x70] sm:$0xf]  ;;  %v1516_v8 = vld [vmem:[%s1735_s7 + $0x74] sm:$0xf0]  ;;  %v1219_v18 = vld [vmem:[%s1735_s7 + $0x60] sm:$0xf] }
  0x2b   : > { %v1291_v9 = vld [vmem:[%s1735_s7 + $0xf0] sm:$0xf]  ;;  %v1228_v10 = vor.u32 %v1516_v8, %v1227_v7  ;;  %v1532_v11 = vld [vmem:[%s1735_s7 + $0xf4] sm:$0xf0]  ;;  %v1514_v20 = vld [vmem:[%s1735_s7 + $0x64] sm:$0xf0] }
  0x2c   : > { %v1355_v12 = vld [vmem:[%s1735_s7 + $0x170] sm:$0xf]  ;;  %v1548_v13 = vld [vmem:[%s1735_s7 + $0x174] sm:$0xf0]  ;;  %v1292_v14 = vor.u32 %v1532_v11, %v1291_v9  ;;  %v1283_v21 = vld [vmem:[%s1735_s7 + $0xe0] sm:$0xf]  ;;  %v1220_v23 = vor.u32 %v1514_v20, %v1219_v18 }
  0x2d   : > { %v1356_v15 = vor.u32 %v1548_v13, %v1355_v12  ;;  %v1419_v16 = vld [vmem:[%s1735_s7 + $0x1f0] sm:$0xf]  ;;  %v1564_v17 = vld [vmem:[%s1735_s7 + $0x1f4] sm:$0xf0]  ;;  %835 = vmatpush.bf16.msra.mxu0 %v1228_v10  ;;  %v1530_v22 = vld [vmem:[%s1735_s7 + $0xe4] sm:$0xf0] }
  0x2e   : > { %v1420_v19 = vor.u32 %v1564_v17, %v1419_v16  ;;  %849 = vmatpush.bf16.msra.mxu1 %v1292_v14  ;;  %v1284_v24 = vor.u32 %v1530_v22, %v1283_v21  ;;  %v1347_v25 = vld [vmem:[%s1735_s7 + $0x160] sm:$0xf]  ;;  %v1546_v26 = vld [vmem:[%s1735_s7 + $0x164] sm:$0xf0]  ;;  %v1211_v30 = vld [vmem:[%s1735_s7 + $0x50] sm:$0xf] }
  0x2f   : > { %863 = vmatpush.bf16.msra.mxu2 %v1356_v15  ;;  %v1411_v27 = vld [vmem:[%s1735_s7 + $0x1e0] sm:$0xf]  ;;  %v1348_v28 = vor.u32 %v1546_v26, %v1347_v25  ;;  %v1562_v29 = vld [vmem:[%s1735_s7 + $0x1e4] sm:$0xf0]  ;;  %v1512_v31 = vld [vmem:[%s1735_s7 + $0x54] sm:$0xf0] }
  0x30   : > { %877 = vmatpush.bf16.msra.mxu3 %v1420_v19  ;;  %v1412_v32 = vor.u32 %v1562_v29, %v1411_v27  ;;  %v1275_v33 = vld [vmem:[%s1735_s7 + $0xd0] sm:$0xf]  ;;  %v1528_v34 = vld [vmem:[%s1735_s7 + $0xd4] sm:$0xf0]  ;;  %v1212_v36 = vor.u32 %v1512_v31, %v1211_v30  ;;  %v1203_v42 = vld [vmem:[%s1735_s7 + $0x40] sm:$0xf] }
  0x31   : > { %v1339_v35 = vld [vmem:[%s1735_s7 + $0x150] sm:$0xf]  ;;  %836 = vmatpush.bf16.msra.mxu0 %v1220_v23  ;;  %v1544_v37 = vld [vmem:[%s1735_s7 + $0x154] sm:$0xf0]  ;;  %v1276_v40 = vor.u32 %v1528_v34, %v1275_v33  ;;  %v1510_v43 = vld [vmem:[%s1735_s7 + $0x44] sm:$0xf0] }
  0x32   : > { %v1403_v38 = vld [vmem:[%s1735_s7 + $0x1d0] sm:$0xf]  ;;  %v1560_v39 = vld [vmem:[%s1735_s7 + $0x1d4] sm:$0xf0]  ;;  %850 = vmatpush.bf16.msra.mxu1 %v1284_v24  ;;  %v1340_v41 = vor.u32 %v1544_v37, %v1339_v35  ;;  %v1267_v44 = vld [vmem:[%s1735_s7 + $0xc0] sm:$0xf]  ;;  %v1204_v51 = vor.u32 %v1510_v43, %v1203_v42 }
  0x33   : > { %864 = vmatpush.bf16.msra.mxu2 %v1348_v28  ;;  %v1404_v45 = vor.u32 %v1560_v39, %v1403_v38  ;;  %v1526_v46 = vld [vmem:[%s1735_s7 + $0xc4] sm:$0xf0]  ;;  %v1331_v47 = vld [vmem:[%s1735_s7 + $0x140] sm:$0xf]  ;;  %v1195_v54 = vld [vmem:[%s1735_s7 + $0x30] sm:$0xf] }
  0x34   : > { %878 = vmatpush.bf16.msra.mxu3 %v1412_v32  ;;  %v1542_v48 = vld [vmem:[%s1735_s7 + $0x144] sm:$0xf0]  ;;  %v1395_v49 = vld [vmem:[%s1735_s7 + $0x1c0] sm:$0xf]  ;;  %v1268_v52 = vor.u32 %v1526_v46, %v1267_v44  ;;  %v1508_v55 = vld [vmem:[%s1735_s7 + $0x34] sm:$0xf0] }
  0x35   : > { %v1558_v50 = vld [vmem:[%s1735_s7 + $0x1c4] sm:$0xf0]  ;;  %837 = vmatpush.bf16.msra.mxu0 %v1212_v36  ;;  %v1332_v53 = vor.u32 %v1542_v48, %v1331_v47  ;;  %v1259_v56 = vld [vmem:[%s1735_s7 + $0xb0] sm:$0xf]  ;;  %v1524_v58 = vld [vmem:[%s1735_s7 + $0xb4] sm:$0xf0]  ;;  %v1196_v63 = vor.u32 %v1508_v55, %v1195_v54 }
  0x36   : > { %851 = vmatpush.bf16.msra.mxu1 %v1276_v40  ;;  %v1396_v57 = vor.u32 %v1558_v50, %v1395_v49  ;;  %v1323_v59 = vld [vmem:[%s1735_s7 + $0x130] sm:$0xf]  ;;  %v1540_v60 = vld [vmem:[%s1735_s7 + $0x134] sm:$0xf0]  ;;  %v1260_v0 = vor.u32 %v1524_v58, %v1259_v56  ;;  %v1187_v2 = vld [vmem:[%s1735_s7 + $0x20] sm:$0xf] }
  0x37   : > { %865 = vmatpush.bf16.msra.mxu2 %v1340_v41  ;;  %v1387_v61 = vld [vmem:[%s1735_s7 + $0x1b0] sm:$0xf]  ;;  %v1556_v62 = vld [vmem:[%s1735_s7 + $0x1b4] sm:$0xf0]  ;;  %v1324_v1 = vor.u32 %v1540_v60, %v1323_v59  ;;  %v1506_v3 = vld [vmem:[%s1735_s7 + $0x24] sm:$0xf0] }
  0x38   : > { %879 = vmatpush.bf16.msra.mxu3 %v1404_v45  ;;  %v1251_v4 = vld [vmem:[%s1735_s7 + $0xa0] sm:$0xf]  ;;  %v1388_v5 = vor.u32 %v1556_v62, %v1387_v61  ;;  %v1522_v6 = vld [vmem:[%s1735_s7 + $0xa4] sm:$0xf0]  ;;  %v1188_v11 = vor.u32 %v1506_v3, %v1187_v2  ;;  %v1179_v14 = vld [vmem:[%s1735_s7 + $0x10] sm:$0xf] }
  0x39   : > { %838 = vmatpush.bf16.msra.mxu0 %v1204_v51  ;;  %v1315_v7 = vld [vmem:[%s1735_s7 + $0x120] sm:$0xf]  ;;  %v1538_v8 = vld [vmem:[%s1735_s7 + $0x124] sm:$0xf0]  ;;  %v1252_v12 = vor.u32 %v1522_v6, %v1251_v4  ;;  %v1504_v15 = vld [vmem:[%s1735_s7 + $0x14] sm:$0xf0] }
  0x3a   : > { %852 = vmatpush.bf16.msra.mxu1 %v1268_v52  ;;  %v1379_v9 = vld [vmem:[%s1735_s7 + $0x1a0] sm:$0xf]  ;;  %v1554_v10 = vld [vmem:[%s1735_s7 + $0x1a4] sm:$0xf0]  ;;  %v1316_v13 = vor.u32 %v1538_v8, %v1315_v7  ;;  %v1243_v16 = vld [vmem:[%s1735_s7 + $0x90] sm:$0xf]  ;;  %v1180_v23 = vor.u32 %v1504_v15, %v1179_v14 }
  0x3b   : > { %866 = vmatpush.bf16.msra.mxu2 %v1332_v53  ;;  %v1380_v17 = vor.u32 %v1554_v10, %v1379_v9  ;;  %v1520_v18 = vld [vmem:[%s1735_s7 + $0x94] sm:$0xf0]  ;;  %v1307_v19 = vld [vmem:[%s1735_s7 + $0x110] sm:$0xf]  ;;  %v1171_v24 = vld [vmem:[%s1735_s7] sm:$0xf] }
  0x3c   : > { %880 = vmatpush.bf16.msra.mxu3 %v1396_v57  ;;  %v1536_v20 = vld [vmem:[%s1735_s7 + $0x114] sm:$0xf0]  ;;  %v1371_v21 = vld [vmem:[%s1735_s7 + $0x190] sm:$0xf]  ;;  %v1502_v25 = vld [vmem:[%s1735_s7 + $0x4] sm:$0xf0]  ;;  %v1244_v26 = vor.u32 %v1520_v18, %v1243_v16 }
  0x3d   : > { %839 = vmatpush.bf16.msra.mxu0 %v1196_v63  ;;  %v1552_v22 = vld [vmem:[%s1735_s7 + $0x194] sm:$0xf0]  ;;  %v1308_v27 = vor.u32 %v1536_v20, %v1307_v19  ;;  %v1235_v28 = vld [vmem:[%s1735_s7 + $0x80] sm:$0xf]  ;;  %v1518_v29 = vld [vmem:[%s1735_s7 + $0x84] sm:$0xf0]  ;;  %v1172_v38 = vor.u32 %v1502_v25, %v1171_v24 }
  0x3e   : > { %853 = vmatpush.bf16.msra.mxu1 %v1260_v0  ;;  %v1299_v30 = vld [vmem:[%s1735_s7 + $0x100] sm:$0xf]  ;;  %v1372_v31 = vor.u32 %v1552_v22, %v1371_v21  ;;  %v1534_v32 = vld [vmem:[%s1735_s7 + $0x104] sm:$0xf0]  ;;  %v1483_v33 = vld [vmem:[%s1735_s7 + $0x270] sm:$0xf]  ;;  %v1236_v42 = vor.u32 %v1518_v29, %v1235_v28 }
  0x3f   : > { %867 = vmatpush.bf16.msra.mxu2 %v1324_v1  ;;  %v1580_v34 = vld [vmem:[%s1735_s7 + $0x274] sm:$0xf0]  ;;  %v1515_v35 = vld [vmem:[%s1735_s7 + $0x74] sm:$0xf]  ;;  %v1229_v36 = vld [vmem:[%s1735_s7 + $0x78] sm:$0xf0]  ;;  %v1300_v43 = vor.u32 %v1534_v32, %v1299_v30 }
  0x40   : > { %881 = vmatpush.bf16.msra.mxu3 %v1388_v5  ;;  %v1531_v37 = vld [vmem:[%s1735_s7 + $0xf4] sm:$0xf]  ;;  %v1293_v39 = vld [vmem:[%s1735_s7 + $0xf8] sm:$0xf0]  ;;  %v1363_v40 = vld [vmem:[%s1735_s7 + $0x180] sm:$0xf]  ;;  %v1484_v46 = vor.u32 %v1580_v34, %v1483_v33  ;;  %v1232_v47 = vor.u32 %v1515_v35, %v1229_v36 }
  0x41   : > { %840 = vmatpush.bf16.msra.mxu0 %v1188_v11  ;;  %v1550_v41 = vld [vmem:[%s1735_s7 + $0x184] sm:$0xf0]  ;;  %v1547_v44 = vld [vmem:[%s1735_s7 + $0x174] sm:$0xf]  ;;  %v1357_v45 = vld [vmem:[%s1735_s7 + $0x178] sm:$0xf0]  ;;  %v1296_v50 = vor.u32 %v1531_v37, %v1293_v39 }
  0x42   : > { %854 = vmatpush.bf16.msra.mxu1 %v1252_v12  ;;  %v1475_v48 = vld [vmem:[%s1735_s7 + $0x260] sm:$0xf]  ;;  %v1578_v49 = vld [vmem:[%s1735_s7 + $0x264] sm:$0xf0]  ;;  %v1364_v51 = vor.u32 %v1550_v41, %v1363_v40  ;;  %v1513_v52 = vld [vmem:[%s1735_s7 + $0x64] sm:$0xf]  ;;  %v1360_v55 = vor.u32 %v1547_v44, %v1357_v45 }
  0x43   : > { %868 = vmatpush.bf16.msra.mxu2 %v1316_v13  ;;  %v1221_v53 = vld [vmem:[%s1735_s7 + $0x68] sm:$0xf0]  ;;  %v1529_v54 = vld [vmem:[%s1735_s7 + $0xe4] sm:$0xf]  ;;  %v1151_v57 = vld [vmem:[%s1737_s8] sm:$0xf]  ;;  %v1476_v63 = vor.u32 %v1578_v49, %v1475_v48 }
  0x44   : > { %882 = vmatpush.bf16.msra.mxu3 %v1380_v17  ;;  %v1285_v56 = vld [vmem:[%s1735_s7 + $0xe8] sm:$0xf0]  ;;  %v1498_v58 = vld [vmem:[%s1737_s8 + $0x10] sm:$0xf0]  ;;  %v1545_v59 = vld [vmem:[%s1735_s7 + $0x164] sm:$0xf]  ;;  %v1224_v0 = vor.u32 %v1513_v52, %v1221_v53 }
  0x45   : > { %841 = vmatpush.bf16.msra.mxu0 %v1180_v23  ;;  %v1349_v60 = vld [vmem:[%s1735_s7 + $0x168] sm:$0xf0]  ;;  %v1822_v61 = vor.u32 %v1498_v58, %v1151_v57  ;;  %v1159_v62 = vld [vmem:[%s1737_s8 + $0x8] sm:$0xf]  ;;  %v1576_v2 = vld [vmem:[%s1735_s7 + $0x254] sm:$0xf0]  ;;  %v1288_v4 = vor.u32 %v1529_v54, %v1285_v56 }
  0x46   : > { %855 = vmatpush.bf16.msra.mxu1 %v1244_v26  ;;  %v1467_v1 = vld [vmem:[%s1735_s7 + $0x250] sm:$0xf]  ;;  %v1499_v3 = vld [vmem:[%s1737_s8 + $0x18] sm:$0xf0]  ;;  %v1511_v5 = vld [vmem:[%s1735_s7 + $0x54] sm:$0xf]  ;;  %v1352_v9 = vor.u32 %v1545_v59, %v1349_v60 }
  0x47   : > { %869 = vmatpush.bf16.msra.mxu2 %v1308_v27  ;;  %v1213_v6 = vld [vmem:[%s1735_s7 + $0x58] sm:$0xf0]  ;;  %v1527_v7 = vld [vmem:[%s1735_s7 + $0xd4] sm:$0xf]  ;;  %v1831_v8 = vor.u32 %v1499_v3, %v1159_v62  ;;  %v1161_v12 = vld [vmem:[%s1737_s8 + $0x1c] sm:$0xf0]  ;;  %v1468_v17 = vor.u32 %v1576_v2, %v1467_v1 }
  0x48   : > { %883 = vmatpush.bf16.msra.mxu3 %v1372_v31  ;;  %v1277_v10 = vld [vmem:[%s1735_s7 + $0xd8] sm:$0xf0]  ;;  %v1497_v11 = vld [vmem:[%s1737_s8 + $0xc] sm:$0xf]  ;;  %v1496_v16 = vld [vmem:[%s1737_s8 + $0x4] sm:$0xf]  ;;  %v1216_v18 = vor.u32 %v1511_v5, %v1213_v6 }
  0x49   : > { %842 = vmatpush.bf16.msra.mxu0 %v1172_v38  ;;  %v1543_v13 = vld [vmem:[%s1735_s7 + $0x154] sm:$0xf]  ;;  %v1341_v14 = vld [vmem:[%s1735_s7 + $0x158] sm:$0xf0]  ;;  %v1840_v15 = vor.u32 %v1497_v11, %v1161_v12  ;;  %v1459_v19 = vld [vmem:[%s1735_s7 + $0x240] sm:$0xf]  ;;  %v1280_v21 = vor.u32 %v1527_v7, %v1277_v10 }
  0x4a   : > { %856 = vmatpush.bf16.msra.mxu1 %v1236_v42  ;;  %v1153_v20 = vld [vmem:[%s1737_s8 + $0x14] sm:$0xf0]  ;;  %v1574_v22 = vld [vmem:[%s1735_s7 + $0x244] sm:$0xf0]  ;;  %v1509_v23 = vld [vmem:[%s1735_s7 + $0x44] sm:$0xf]  ;;  %v1344_v26 = vor.u32 %v1543_v13, %v1341_v14 }
  0x4b   : > { %870 = vmatpush.bf16.msra.mxu2 %v1300_v43  ;;  %v1205_v24 = vld [vmem:[%s1735_s7 + $0x48] sm:$0xf0]  ;;  %v1849_v25 = vor.u32 %v1496_v16, %v1153_v20  ;;  %v1525_v27 = vld [vmem:[%s1735_s7 + $0xc4] sm:$0xf]  ;;  %v1460_v31 = vor.u32 %v1574_v22, %v1459_v19  ;;  %v1451_v33 = vld [vmem:[%s1735_s7 + $0x230] sm:$0xf] }
  0x4c   : > { %884 = vmatpush.bf16.msra.mxu3 %v1364_v51  ;;  %843 = vmatmul.bf16.vlgmr.msra.gmra.mxu0 %v1822_v61  ;;  %v1269_v28 = vld [vmem:[%s1735_s7 + $0xc8] sm:$0xf0]  ;;  %v1541_v29 = vld [vmem:[%s1735_s7 + $0x144] sm:$0xf]  ;;  %v1208_v32 = vor.u32 %v1509_v23, %v1205_v24  ;;  %v1572_v35 = vld [vmem:[%s1735_s7 + $0x234] sm:$0xf0] }
  0x4d   : > { %891 = vmatpush.bf16.msrb.mxu0 %v1484_v46  ;;  %v1333_v30 = vld [vmem:[%s1735_s7 + $0x148] sm:$0xf0]  ;;  %857 = vmatmul.bf16.vlgmr.msra.gmra.mxu1 %v1849_v25  ;;  %v1272_v34 = vor.u32 %v1525_v27, %v1269_v28  ;;  %v1507_v36 = vld [vmem:[%s1735_s7 + $0x34] sm:$0xf]  ;;  %v1197_v37 = vld [vmem:[%s1735_s7 + $0x38] sm:$0xf0]  ;;  %v1452_v43 = vor.u32 %v1572_v35, %v1451_v33 }
  0x4e   : > { %905 = vmatpush.bf16.msrb.mxu1 %v1232_v47  ;;  %871 = vmatmul.bf16.vlgmr.msra.gmra.mxu2 %v1831_v8  ;;  %v1336_v38 = vor.u32 %v1541_v29, %v1333_v30  ;;  %v1523_v39 = vld [vmem:[%s1735_s7 + $0xb4] sm:$0xf]  ;;  %v1261_v40 = vld [vmem:[%s1735_s7 + $0xb8] sm:$0xf0]  ;;  %v1200_v44 = vor.u32 %v1507_v36, %v1197_v37  ;;  %v1443_v45 = vld [vmem:[%s1735_s7 + $0x220] sm:$0xf] }
  0x4f   : > { %919 = vmatpush.bf16.msrb.mxu2 %v1296_v50  ;;  %885 = vmatmul.bf16.vlgmr.msra.gmra.mxu3 %v1840_v15  ;;  %v1539_v41 = vld [vmem:[%s1735_s7 + $0x134] sm:$0xf]  ;;  %v1325_v42 = vld [vmem:[%s1735_s7 + $0x138] sm:$0xf0]  ;;  %v1264_v46 = vor.u32 %v1523_v39, %v1261_v40  ;;  %v1570_v47 = vld [vmem:[%s1735_s7 + $0x224] sm:$0xf0] }
  0x50   : > { %933 = vmatpush.bf16.msrb.mxu3 %v1360_v55  ;;  %v1505_v48 = vld [vmem:[%s1735_s7 + $0x24] sm:$0xf]  ;;  %v1189_v49 = vld [vmem:[%s1735_s7 + $0x28] sm:$0xf0]  ;;  %v1328_v50 = vor.u32 %v1539_v41, %v1325_v42  ;;  %v1444_v55 = vor.u32 %v1570_v47, %v1443_v45  ;;  %v1435_v57 = vld [vmem:[%s1735_s7 + $0x210] sm:$0xf] }
  0x51   : > { %892 = vmatpush.bf16.msrb.mxu0 %v1476_v63  ;;  %v1521_v51 = vld [vmem:[%s1735_s7 + $0xa4] sm:$0xf]  ;;  %v1253_v52 = vld [vmem:[%s1735_s7 + $0xa8] sm:$0xf0]  ;;  %v1192_v56 = vor.u32 %v1505_v48, %v1189_v49  ;;  %v1568_v59 = vld [vmem:[%s1735_s7 + $0x214] sm:$0xf0] }
  0x52   : > { %906 = vmatpush.bf16.msrb.mxu1 %v1224_v0  ;;  %v1537_v53 = vld [vmem:[%s1735_s7 + $0x124] sm:$0xf]  ;;  %v1317_v54 = vld [vmem:[%s1735_s7 + $0x128] sm:$0xf0]  ;;  %v1256_v58 = vor.u32 %v1521_v51, %v1253_v52  ;;  %v1503_v60 = vld [vmem:[%s1735_s7 + $0x14] sm:$0xf] }
  0x53   : > { %920 = vmatpush.bf16.msrb.mxu2 %v1288_v4  ;;  %v1181_v62 = vld [vmem:[%s1735_s7 + $0x18] sm:$0xf0]  ;;  %v1320_v63 = vor.u32 %v1537_v53, %v1317_v54  ;;  %v1519_v0 = vld [vmem:[%s1735_s7 + $0x94] sm:$0xf]  ;;  %v1436_v4 = vor.u32 %v1568_v59, %v1435_v57  ;;  %v1427_v6 = vld [vmem:[%s1735_s7 + $0x200] sm:$0xf] }
  0x54   : > { %934 = vmatpush.bf16.msrb.mxu3 %v1352_v9  ;;  %v1245_v1 = vld [vmem:[%s1735_s7 + $0x98] sm:$0xf0]  ;;  %v1535_v2 = vld [vmem:[%s1735_s7 + $0x114] sm:$0xf]  ;;  %v1184_v5 = vor.u32 %v1503_v60, %v1181_v62  ;;  %v1566_v7 = vld [vmem:[%s1735_s7 + $0x204] sm:$0xf0] }
  0x55   : > { %893 = vmatpush.bf16.msrb.mxu0 %v1468_v17  ;;  %v1309_v3 = vld [vmem:[%s1735_s7 + $0x118] sm:$0xf0]  ;;  %v1501_v9 = vld [vmem:[%s1735_s7 + $0x4] sm:$0xf]  ;;  %v1248_v10 = vor.u32 %v1519_v0, %v1245_v1  ;;  %v1173_v11 = vld [vmem:[%s1735_s7 + $0x8] sm:$0xf0]  ;;  %v1428_v22 = vor.u32 %v1566_v7, %v1427_v6 }
  0x56   : > { %907 = vmatpush.bf16.msrb.mxu1 %v1216_v18  ;;  %v1517_v12 = vld [vmem:[%s1735_s7 + $0x84] sm:$0xf]  ;;  %v1237_v13 = vld [vmem:[%s1735_s7 + $0x88] sm:$0xf0]  ;;  %v1312_v14 = vor.u32 %v1535_v2, %v1309_v3  ;;  %v1563_v16 = vld [vmem:[%s1735_s7 + $0x1f4] sm:$0xf]  ;;  %v1176_v23 = vor.u32 %v1501_v9, %v1173_v11 }
  0x57   : > { %921 = vmatpush.bf16.msrb.mxu2 %v1280_v21  ;;  %v1421_v17 = vld [vmem:[%s1735_s7 + $0x1f8] sm:$0xf0]  ;;  %v1579_v18 = vld [vmem:[%s1735_s7 + $0x274] sm:$0xf]  ;;  %v1533_v20 = vld [vmem:[%s1735_s7 + $0x104] sm:$0xf]  ;;  %v1240_v27 = vor.u32 %v1517_v12, %v1237_v13 }
  0x58   : > { %935 = vmatpush.bf16.msrb.mxu3 %v1344_v26  ;;  %v1485_v19 = vld [vmem:[%s1735_s7 + $0x278] sm:$0xf0]  ;;  %v1301_v21 = vld [vmem:[%s1735_s7 + $0x108] sm:$0xf0]  ;;  %v1167_v24 = vld [vmem:[%s1737_s8 + $0x10] sm:$0xf]  ;;  %v1424_v28 = vor.u32 %v1563_v16, %v1421_v17 }
  0x59   : > { %894 = vmatpush.bf16.msrb.mxu0 %v1460_v31  ;;  %v1500_v26 = vld [vmem:[%s1737_s8 + $0x20] sm:$0xf0]  ;;  %v1488_v29 = vor.u32 %v1579_v18, %v1485_v19  ;;  %v1304_v30 = vor.u32 %v1533_v20, %v1301_v21  ;;  %v1405_v39 = vld [vmem:[%s1735_s7 + $0x1d8] sm:$0xf0]  ;;  %v1575_v40 = vld [vmem:[%s1735_s7 + $0x254] sm:$0xf] }
  0x5a   : > { %908 = vmatpush.bf16.msrb.mxu1 %v1208_v32  ;;  %v1561_v31 = vld [vmem:[%s1735_s7 + $0x1e4] sm:$0xf]  ;;  %v1413_v32 = vld [vmem:[%s1735_s7 + $0x1e8] sm:$0xf0]  ;;  %v1896_v33 = vor.u32 %v1500_v26, %v1167_v24  ;;  %v1469_v41 = vld [vmem:[%s1735_s7 + $0x258] sm:$0xf0] }
  0x5b   : > { %922 = vmatpush.bf16.msrb.mxu2 %v1272_v34  ;;  %v1577_v34 = vld [vmem:[%s1735_s7 + $0x264] sm:$0xf]  ;;  %v1477_v35 = vld [vmem:[%s1735_s7 + $0x268] sm:$0xf0]  ;;  %v1416_v36 = vor.u32 %v1561_v31, %v1413_v32  ;;  %v1555_v48 = vld [vmem:[%s1735_s7 + $0x1b4] sm:$0xf] }
  0x5c   : > { %936 = vmatpush.bf16.msrb.mxu3 %v1336_v38  ;;  %v1480_v37 = vor.u32 %v1577_v34, %v1477_v35  ;;  %v1559_v38 = vld [vmem:[%s1735_s7 + $0x1d4] sm:$0xf]  ;;  %v1397_v45 = vld [vmem:[%s1735_s7 + $0x1c8] sm:$0xf0]  ;;  %v1389_v49 = vld [vmem:[%s1735_s7 + $0x1b8] sm:$0xf0] }
  0x5d   : > { %895 = vmatpush.bf16.msrb.mxu0 %v1452_v43  ;;  %v1408_v42 = vor.u32 %v1559_v38, %v1405_v39  ;;  %v1472_v43 = vor.u32 %v1575_v40, %v1469_v41  ;;  %v1461_v47 = vld [vmem:[%s1735_s7 + $0x248] sm:$0xf0]  ;;  %v1392_v51 = vor.u32 %v1555_v48, %v1389_v49  ;;  %v1553_v53 = vld [vmem:[%s1735_s7 + $0x1a4] sm:$0xf]  ;;  %v1551_v59 = vld [vmem:[%s1735_s7 + $0x194] sm:$0xf] }
  0x5e   : > { %909 = vmatpush.bf16.msrb.mxu1 %v1200_v44  ;;  %v1557_v44 = vld [vmem:[%s1735_s7 + $0x1c4] sm:$0xf]  ;;  %v1381_v54 = vld [vmem:[%s1735_s7 + $0x1a8] sm:$0xf0]  ;;  %v1373_v60 = vld [vmem:[%s1735_s7 + $0x198] sm:$0xf0] }
  0x5f   : > { %923 = vmatpush.bf16.msrb.mxu2 %v1264_v46  ;;  %v1573_v46 = vld [vmem:[%s1735_s7 + $0x244] sm:$0xf]  ;;  %v1384_v57 = vor.u32 %v1553_v53, %v1381_v54  ;;  %v1567_v62 = vld [vmem:[%s1735_s7 + $0x214] sm:$0xf]  ;;  %v1376_v0 = vor.u32 %v1551_v59, %v1373_v60  ;;  %v1365_v3 = vld [vmem:[%s1735_s7 + $0x188] sm:$0xf0] }
  0x60   : > { %937 = vmatpush.bf16.msrb.mxu3 %v1328_v50  ;;  %v1453_v50 = vld [vmem:[%s1735_s7 + $0x238] sm:$0xf0]  ;;  %v1549_v2 = vld [vmem:[%s1735_s7 + $0x184] sm:$0xf]  ;;  %v319_v21 = vld [vmem:[#allocation2 + $0x10] sm:$0xff]  ;;  %p1489_p11 = scmp.ne.s32.totalorder %s1654_s14, 1 }
  0x61   : > { %896 = vmatpush.bf16.msrb.mxu0 %v1444_v55  ;;  %v1569_v55 = vld [vmem:[%s1735_s7 + $0x224] sm:$0xf]  ;;  %v1368_v6 = vor.u32 %v1549_v2, %v1365_v3  ;;  %v322_v48 = vld [vmem:[#allocation2 + $0x8] sm:$0xff] }
  0x62   : > { %910 = vmatpush.bf16.msrb.mxu1 %v1192_v56  ;;  %v1445_v56 = vld [vmem:[%s1735_s7 + $0x228] sm:$0xf0] }
  0x63   : > { %924 = vmatpush.bf16.msrb.mxu2 %v1256_v58  ;;  %v1448_v58 = vor.u32 %v1569_v55, %v1445_v56 }
  0x64   : > { %938 = vmatpush.bf16.msrb.mxu3 %v1320_v63  ;;  %v1437_v63 = vld [vmem:[%s1735_s7 + $0x218] sm:$0xf0] }
  0x65   : > { %897 = vmatpush.bf16.msrb.mxu0 %v1436_v4  ;;  %v1440_v1 = vor.u32 %v1567_v62, %v1437_v63  ;;  %v1565_v4 = vld [vmem:[%s1735_s7 + $0x204] sm:$0xf] }
  0x66   : > { %911 = vmatpush.bf16.msrb.mxu1 %v1184_v5  ;;  %v1429_v5 = vld [vmem:[%s1735_s7 + $0x208] sm:$0xf0] }
  0x67   : > { %925 = vmatpush.bf16.msrb.mxu2 %v1248_v10  ;;  %v1432_v7 = vor.u32 %v1565_v4, %v1429_v5 }
  0x68   : > { %939 = vmatpush.bf16.msrb.mxu3 %v1312_v14 }
  0x69   : > { %898 = vmatpush.bf16.msrb.mxu0 %v1428_v22 }
  0x6a   : > { %912 = vmatpush.bf16.msrb.mxu1 %v1176_v23 }
  0x6b   : > { %926 = vmatpush.bf16.msrb.mxu2 %v1240_v27 }
  0x6c   : > { %940 = vmatpush.bf16.msrb.mxu3 %v1304_v30  ;;  %899 = vmatmul.bf16.vlgmr.msrb.gmra.mxu0 %v1896_v33 }
  0x6d   : > { %947 = vmatpush.bf16.msra.mxu0 %v1424_v28  ;;  %913 = vmatmul.bf16.vlgmr.msrb.gmra.mxu1 %v1822_v61  ;;  %v1400_v61 = vor.u32 %v1557_v44, %v1397_v45  ;;  %v321_v28 = vld [vmem:[#allocation2 + $0x18] sm:$0xff] }
  0x6e   : > { %961 = vmatpush.bf16.msra.mxu1 %v1488_v29  ;;  %927 = vmatmul.bf16.vlgmr.msrb.gmra.mxu2 %v1849_v25  ;;  %v1464_v25 = vor.u32 %v1573_v46, %v1461_v47 }
  0x6f   : > { %941 = vmatmul.bf16.vlgmr.msrb.gmra.mxu3 %v1831_v8  ;;  %v1571_v8 = vld [vmem:[%s1735_s7 + $0x234] sm:$0xf] }
  0x70   : > { %v1456_v52 = vor.u32 %v1571_v8, %v1453_v50 }
  0x71   : > { %948 = vmatpush.bf16.msra.mxu0 %v1416_v36 }
  0x72   : > { %962 = vmatpush.bf16.msra.mxu1 %v1480_v37 }
  0x75   : > { %949 = vmatpush.bf16.msra.mxu0 %v1408_v42  ;;  %v320_v42 = vld [vmem:[#allocation2] sm:$0xff] }
  0x76   : > { %963 = vmatpush.bf16.msra.mxu1 %v1472_v43 }
  0x79   : > { %950 = vmatpush.bf16.msra.mxu0 %v1400_v61 }
  0x7a   : > { %964 = vmatpush.bf16.msra.mxu1 %v1464_v25 }
  0x7d   : > { %951 = vmatpush.bf16.msra.mxu0 %v1392_v51 }
  0x7e   : > { %965 = vmatpush.bf16.msra.mxu1 %v1456_v52 }
  0x81   : > { %952 = vmatpush.bf16.msra.mxu0 %v1384_v57 }
  0x82   : > { %966 = vmatpush.bf16.msra.mxu1 %v1448_v58 }
  0x85   : > { %953 = vmatpush.bf16.msra.mxu0 %v1376_v0 }
  0x86   : > { %967 = vmatpush.bf16.msra.mxu1 %v1440_v1 }
  0x89   : > { %954 = vmatpush.bf16.msra.mxu0 %v1368_v6 }
  0x8a   : > { %968 = vmatpush.bf16.msra.mxu1 %v1432_v7 }
  0x8c   : > { %955 = vmatmul.bf16.vlgmr.msra.gmra.mxu0 %v1840_v15 }
  0x8d   : > { %969 = vmatmul.bf16.vlgmr.msra.gmra.mxu1 %v1896_v33 }
  0xc9   : > { %v844_v9 = vpop.f32.mrf.mxu0 }
  0xca   : > { %v858_v10 = vpop.f32.mrf.mxu1 }
  0xcb   : > { %v859_v11 = vadd.f32 %v858_v10, %v844_v9 }
  0xd1   : > { %v872_v12 = vpop.f32.mrf.mxu2  ;;  %v846_v13 = vpop.f32.mrf.mxu0 }
  0xd2   : > { %v873_v14 = vadd.f32 %v872_v12, %v859_v11  ;;  %v886_v16 = vpop.f32.mrf.mxu3  ;;  %v860_v17 = vpop.f32.mrf.mxu1 }
  0xd3   : > { %v861_v19 = vadd.f32 %v860_v17, %v846_v13 }
  0xd4   : > { %v887_v18 = vadd.f32 %v886_v16, %v873_v14 }
  0xd9   : > { %v874_v20 = vpop.f32.mrf.mxu2 }
  0xda   : > { %v875_v24 = vadd.f32 %v874_v20, %v861_v19  ;;  %v888_v27 = vpop.f32.mrf.mxu3 }
  0xdc   : > { %v889_v15 = vadd.f32 %v888_v27, %v875_v24 }
  0xe9   : > { %v900_v22 = vpop.f32.mrf.mxu0 }
  0xea   : > { %v901_v23 = vadd.f32 %v900_v22, %v887_v18  ;;  %v914_v32 = vpop.f32.mrf.mxu1 }
  0xec   : > { %v975_v26 = vadd.f32 %v901_v23, %v319_v21 }
  0xee   : > { %979 = vst [vmem:[#allocation2 + $0x10] sm:$0xff] %v975_v26 }
  0xf1   : > { %v902_v29 = vpop.f32.mrf.mxu0  ;;  %v928_v33 = vpop.f32.mrf.mxu2 }
  0xf2   : > { %v903_v30 = vadd.f32 %v902_v29, %v889_v15  ;;  %v916_v34 = vpop.f32.mrf.mxu1  ;;  %v942_v35 = vpop.f32.mrf.mxu3  ;;  %v929_v36 = vadd.f32 %v928_v33, %v914_v32 }
  0xf4   : > { %v977_v31 = vadd.f32 %v903_v30, %v321_v28  ;;  %v943_v37 = vadd.f32 %v942_v35, %v929_v36 }
  0xf6   : > { %981 = vst [vmem:[#allocation2 + $0x18] sm:$0xff] %v977_v31 }
  0xf9   : > { %v930_v38 = vpop.f32.mrf.mxu2 }
  0xfa   : > { %v931_v43 = vadd.f32 %v930_v38, %v916_v34  ;;  %v944_v45 = vpop.f32.mrf.mxu3 }
  0xfc   : > { %v945_v47 = vadd.f32 %v944_v45, %v931_v43 }
 0x109   : > { %v956_v39 = vpop.f32.mrf.mxu0 }
 0x10a   : > { %v957_v40 = vadd.f32 %v956_v39, %v943_v37  ;;  %v970_v41 = vpop.f32.mrf.mxu1 }
 0x10c   : > { %v971_v44 = vadd.f32 %v970_v41, %v957_v40 }
 0x10e   : > { %v976_v46 = vadd.f32 %v971_v44, %v320_v42 }
 0x110   : > { %980 = vst [vmem:[#allocation2] sm:$0xff] %v976_v46 }
 0x111   : > { %v958_v61 = vpop.f32.mrf.mxu0 }
 0x112   : > { %v959_v25 = vadd.f32 %v958_v61, %v945_v47  ;;  %v972_v49 = vpop.f32.mrf.mxu1 }
 0x114   : > { %v973_v8 = vadd.f32 %v972_v49, %v959_v25  ;;  %986 = sbr.rel (%p1489_p11) target bundleno = 295 (0x127), region = 66 }
 0x116   : > { %v978_v50 = vadd.f32 %v973_v8, %v322_v48 }
 0x118   : > { %982 = vst [vmem:[#allocation2 + $0x8] sm:$0xff] %v978_v50 }
 0x119   : > { %v987_v51 = vld [vmem:[#allocation2 + $0x10] sm:$0xff]  ;;  %v988_v52 = vld [vmem:[#allocation2] sm:$0xff]  ;;  %v989_v56 = vld [vmem:[#allocation2 + $0x18] sm:$0xff] }
 0x11a   : > { %v991_v53 = vld [vmem:[%s1957_s2] sm:$0x3] }
 0x11b   : > { %v993_v54 = vperm.slane %v991_v53, 0  ;;  %v994_v55 = vperm.slane %v991_v53, 1 }
 0x11d   : > { %v997_v58 = vadd.f32 %v993_v54, %v987_v51  ;;  %v998_v59 = vadd.f32 %v994_v55, %v988_v52  ;;  %v999_v60 = vadd.f32 %v993_v54, %v989_v56 }
 0x11f   : > { %v990_v57 = vld [vmem:[#allocation2 + $0x8] sm:$0xff]  ;;  %v1001_v63 = vmax.f32 %v997_v58, 0.0  ;;  %v1002_v0 = vmax.f32 %v998_v59, 0.0  ;;  %v1003_v1 = vmax.f32 %v999_v60, 0.0 }
 0x120   : > { %v1000_v62 = vadd.f32 %v994_v55, %v990_v57 }
 0x121   : > { %v1005_v3 = vpack.c.bf16 %v1002_v0, %v1001_v63 }
 0x122   : > { %v1004_v2 = vmax.f32 %v1000_v62, 0.0 }
 0x123   : > { %1007 = vst [vmem:[%s1958_s3] sm:$0xff] %v1005_v3 }
 0x124   : > { %v1006_v4 = vpack.c.bf16 %v1004_v2, %v1003_v1 }
 0x126   : > { %1008 = vst [vmem:[%s1958_s3 + $0x8] sm:$0xff] %v1006_v4 }
 0x127 PF: > { %s13_s16 = sadd.s32 1, %s1662_s16   ;;  %s1959_s12 = smov %s1650_s13 }
 0x128   : > { %p10_p12 = scmp.ge.s32.totalorder %s13_s16, 4   ;;  %s1960_s13 = smov %s1720_s20 }
 0x129   : > { %s1961_s14 = smov %s1658_s15  ;;  %s1962_s15 = smov %s1964_s17 }
 0x12a   :  { %12 = sbr.rel (!%p10_p12) target bundleno = 3 (0x3), region = 113 }

// kernel: deeplab_forward.26
= control target key start
LH: loop header
LB: loop body
LE: loop exit
PB: predicated region body
PF: predicated region fallthrough
CT: control target
= control target key end

     0   :  { %s1606_s12 = smov 0   ;;  %s1608_s13 = smov 0   ;;  %s1878_s0 = inlined_call_operand.vmem [shape: bf16[128,2816], index: 0, kind: input, shape index: {}]   ;;  %s1879_s1 = inlined_call_operand.vmem [shape: bf16[2816,256], index: 1, kind: input, shape index: {}]   ;;  %s1880_s2 = inlined_call_operand.vmem [shape: f32[1,256], index: 2, kind: input, shape index: {}]   ;;  %s1881_s3 = inlined_call_operand.vmem [shape: bf16[128,256], index: 3, kind: output, shape index: {}]  }
   0x1   :  { %s1610_s14 = smov 0   ;;  %s1612_s15 = smov 0  }
   0x2   :  { %s1614_s16 = smov 0  }
   0x3 LB: > { %s25_s17 = sadd.s32 1, %s1579_s15  ;;  %p48_p1 = scmp.ne.s32.totalorder %s1571_s13, %s1567_s12  ;;  %s1583_s16 = sphi %s1614_s16, %s13_s16   ;;  %s1579_s15 = sphi %s1612_s15, %s1885_s15   ;;  %s1575_s14 = sphi %s1610_s14, %s1884_s14   ;;  %s1571_s13 = sphi %s1608_s13, %s1883_s13   ;;  %s1567_s12 = sphi %s1606_s12, %s1882_s12  }
   0x4   : > { %p26_p0 = scmp.ge.s32.totalorder %s25_s17, 11  ;;  %p49_p2 = scmp.eq.s32.totalorder %s1583_s16, 0 }
   0x5   : > { %s41_s19 = sadd.s32 1, %s1571_s13  ;;  %p1247_p5 = scmp.ge.s32.totalorder %s1583_s16, 11 }
   0x6   : > { %s1887_s17 = smov (%p26_p0, %s25_s17), 0  ;;  %p50_p3 = por %p49_p2, %p48_p1 }
   0x7   : > { %s37_s18 = ssub.s32 %s1579_s15, %s1887_s17  ;;  %164 = sbr.rel (%p1247_p5) target bundleno = 32 (0x20), region = 20 }
   0x8   : > { %p39_p4 = scmp.eq.s32.totalorder %s37_s18, 0 }
   0xa   : > { %s1641_s20 = scalar_select %p39_p4, %s1571_s13, %s41_s19  }
   0xc   : > { %167 = sbr.rel (!%p50_p3) target bundleno = 32 (0x20), region = 24  ;;  %s169_s21 = sand.u32 (%p50_p3), 1, %s1571_s13  }
   0xd   : > { %s1454_s22 = sshll.u32 (%p50_p3), %s1579_s15, 3  ;;  %s1248_s23 = sshll.u32 (%p50_p3), %s169_s21, 7 }
   0xe   : > { %s1649_s26 = scalar_lea.vmem (%p50_p3), %s1878_s0, %s1454_s22  ;;  %s171_s27 = scalar_lea.vmem (%p50_p3), [#allocation3], %s1248_s23 }
   0xf   : > { %v236_v0 = vld [vmem:[%s1649_s26] sm:$0xff] (%p50_p3)  ;;  %v238_v1 = vld [vmem:[%s1649_s26 + $0x58] sm:$0xff] (%p50_p3)  ;;  %v240_v2 = vld [vmem:[%s1649_s26 + $0xb0] sm:$0xff] (%p50_p3) }
  0x10   : > { %237 = vst [vmem:[%s171_s27] sm:$0xff] (%p50_p3), %v236_v0  ;;  %v242_v3 = vld [vmem:[%s1649_s26 + $0x108] sm:$0xff] (%p50_p3)  ;;  %v244_v4 = vld [vmem:[%s1649_s26 + $0x160] sm:$0xff] (%p50_p3)  ;;  %v246_v5 = vld [vmem:[%s1649_s26 + $0x1b8] sm:$0xff] (%p50_p3) }
  0x11   : > { %239 = vst [vmem:[%s171_s27 + $0x8] sm:$0xff] %v238_v1  ;;  %v248_v6 = vld [vmem:[%s1649_s26 + $0x210] sm:$0xff]  ;;  %v250_v7 = vld [vmem:[%s1649_s26 + $0x268] sm:$0xff]  ;;  %v252_v8 = vld [vmem:[%s1649_s26 + $0x2c0] sm:$0xff] }
  0x12   : > { %241 = vst [vmem:[%s171_s27 + $0x10] sm:$0xff] %v240_v2  ;;  %v254_v9 = vld [vmem:[%s1649_s26 + $0x318] sm:$0xff]  ;;  %v256_v10 = vld [vmem:[%s1649_s26 + $0x370] sm:$0xff]  ;;  %v258_v11 = vld [vmem:[%s1649_s26 + $0x3c8] sm:$0xff] }
  0x13   : > { %243 = vst [vmem:[%s171_s27 + $0x18] sm:$0xff] %v242_v3  ;;  %v260_v12 = vld [vmem:[%s1649_s26 + $0x420] sm:$0xff]  ;;  %v262_v13 = vld [vmem:[%s1649_s26 + $0x478] sm:$0xff]  ;;  %v264_v14 = vld [vmem:[%s1649_s26 + $0x4d0] sm:$0xff] }
  0x14   : > { %245 = vst [vmem:[%s171_s27 + $0x20] sm:$0xff] %v244_v4  ;;  %v266_v15 = vld [vmem:[%s1649_s26 + $0x528] sm:$0xff] }
  0x15   : > { %247 = vst [vmem:[%s171_s27 + $0x28] sm:$0xff] %v246_v5 }
  0x16   : > { %249 = vst [vmem:[%s171_s27 + $0x30] sm:$0xff] %v248_v6 }
  0x17   : > { %251 = vst [vmem:[%s171_s27 + $0x38] sm:$0xff] %v250_v7 }
  0x18   : > { %253 = vst [vmem:[%s171_s27 + $0x40] sm:$0xff] %v252_v8 }
  0x19   : > { %255 = vst [vmem:[%s171_s27 + $0x48] sm:$0xff] %v254_v9 }
  0x1a   : > { %257 = vst [vmem:[%s171_s27 + $0x50] sm:$0xff] %v256_v10 }
  0x1b   : > { %259 = vst [vmem:[%s171_s27 + $0x58] sm:$0xff] %v258_v11 }
  0x1c   : > { %261 = vst [vmem:[%s171_s27 + $0x60] sm:$0xff] %v260_v12 }
  0x1d   : > { %263 = vst [vmem:[%s171_s27 + $0x68] sm:$0xff] %v262_v13 }
  0x1e   : > { %265 = vst [vmem:[%s171_s27 + $0x70] sm:$0xff] %v264_v14 }
  0x1f   : > { %267 = vst [vmem:[%s171_s27 + $0x78] sm:$0xff] %v266_v15 }
  0x20 PF: > { %p1251_p6 = scmp.ge.s32.totalorder %s1583_s16, 1  ;;  %p287_p7 = scmp.lt.s32.totalorder %s1583_s16, 12 }
  0x22   : > { %p288_p8 = pnand %p1251_p6, %p287_p7 }
  0x23   : > { %s294_s28 = sand.u32 (!%p288_p8), 1, %s1567_s12   ;;  %s1253_s29 = sshll.u32 (!%p288_p8), %s1575_s14, 5 }
  0x24   : > { %291 = sbr.rel (%p288_p8) target bundleno = 400 (0x190), region = 66  ;;  %s1252_s30 = sshll.u32 (!%p288_p8), %s294_s28, 7 }
  0x25   : > { %p340_p9 = scmp.lt.s32.totalorder (!%p288_p8), %s1253_s29, 351  ;;  %s1676_s8 = scalar_lea.vmem (!%p288_p8), [#allocation3], %s1252_s30 }
  0x26   : > { %p1256_p10 = scmp.ne.s32.totalorder (!%p288_p8), %s1575_s14, 0 }
  0x29   : > { %s1889_s29 = smov (!%p340_p9, %s1253_s29), 351  ;;  %370 = sbr.rel (%p1256_p10) target bundleno = 79 (0x4f), region = 74 }
  0x2a   : > { %s1455_s4 = sshll.u32 %s1889_s29, 3 }
  0x2b   : > { %s1674_s7 = scalar_lea.vmem %s1879_s1, %s1455_s4 }
  0x2e   : > { %v1585_v16 = vmov 0.0  }
  0x2f   : > { %371 = vst [vmem:[#allocation2 + $0xb0] sm:$0xff] %v1585_v16 }
  0x30   : > { %372 = vst [vmem:[#allocation2] sm:$0xff] %v1585_v16 }
  0x31   : > { %373 = vst [vmem:[#allocation2 + $0xd8] sm:$0xff] %v1585_v16 }
  0x32   : > { %374 = vst [vmem:[#allocation2 + $0x18] sm:$0xff] %v1585_v16 }
  0x33   : > { %375 = vst [vmem:[#allocation2 + $0x50] sm:$0xff] %v1585_v16 }
  0x34   : > { %376 = vst [vmem:[#allocation2 + $0x68] sm:$0xff] %v1585_v16 }
  0x35   : > { %377 = vst [vmem:[#allocation2 + $0x30] sm:$0xff] %v1585_v16 }
  0x36   : > { %378 = vst [vmem:[#allocation2 + $0x48] sm:$0xff] %v1585_v16 }
  0x37   : > { %379 = vst [vmem:[#allocation2 + $0x80] sm:$0xff] %v1585_v16 }
  0x38   : > { %380 = vst [vmem:[#allocation2 + $0x88] sm:$0xff] %v1585_v16 }
  0x39   : > { %381 = vst [vmem:[#allocation2 + $0xe8] sm:$0xff] %v1585_v16 }
  0x3a   : > { %382 = vst [vmem:[#allocation2 + $0xb8] sm:$0xff] %v1585_v16 }
  0x3b   : > { %383 = vst [vmem:[#allocation2 + $0x60] sm:$0xff] %v1585_v16 }
  0x3c   : > { %384 = vst [vmem:[#allocation2 + $0xf0] sm:$0xff] %v1585_v16 }
  0x3d   : > { %385 = vst [vmem:[#allocation2 + $0x8] sm:$0xff] %v1585_v16 }
  0x3e   : > { %386 = vst [vmem:[#allocation2 + $0x78] sm:$0xff] %v1585_v16 }
  0x3f   : > { %387 = vst [vmem:[#allocation2 + $0x38] sm:$0xff] %v1585_v16 }
  0x40   : > { %388 = vst [vmem:[#allocation2 + $0x58] sm:$0xff] %v1585_v16 }
  0x41   : > { %389 = vst [vmem:[#allocation2 + $0x40] sm:$0xff] %v1585_v16 }
  0x42   : > { %390 = vst [vmem:[#allocation2 + $0xc8] sm:$0xff] %v1585_v16 }
  0x43   : > { %391 = vst [vmem:[#allocation2 + $0xe0] sm:$0xff] %v1585_v16 }
  0x44   : > { %392 = vst [vmem:[#allocation2 + $0x90] sm:$0xff] %v1585_v16 }
  0x45   : > { %393 = vst [vmem:[#allocation2 + $0x70] sm:$0xff] %v1585_v16 }
  0x46   : > { %394 = vst [vmem:[#allocation2 + $0xc0] sm:$0xff] %v1585_v16 }
  0x47   : > { %395 = vst [vmem:[#allocation2 + $0xa8] sm:$0xff] %v1585_v16 }
  0x48   : > { %396 = vst [vmem:[#allocation2 + $0xd0] sm:$0xff] %v1585_v16 }
  0x49   : > { %397 = vst [vmem:[#allocation2 + $0x10] sm:$0xff] %v1585_v16 }
  0x4a   : > { %398 = vst [vmem:[#allocation2 + $0x28] sm:$0xff] %v1585_v16 }
  0x4b   : > { %399 = vst [vmem:[#allocation2 + $0xa0] sm:$0xff] %v1585_v16 }
  0x4c   : > { %400 = vst [vmem:[#allocation2 + $0xf8] sm:$0xff] %v1585_v16 }
  0x4d   : > { %401 = vst [vmem:[#allocation2 + $0x20] sm:$0xff] %v1585_v16 }
  0x4e   : > { %402 = vst [vmem:[#allocation2 + $0x98] sm:$0xff] %v1585_v16 }
  0x4f PF: > { %v1379_v17 = vld [vmem:[%s1674_s7 + $0x70] sm:$0xf]  ;;  %v1487_v18 = vld [vmem:[%s1674_s7 + $0x74] sm:$0xf0]  ;;  %v1486_v22 = vld [vmem:[%s1674_s7 + $0x74] sm:$0xf] }
  0x50   : > { %v1443_v19 = vld [vmem:[%s1674_s7 + $0xf0] sm:$0xf]  ;;  %v1380_v20 = vor.u32 %v1487_v18, %v1379_v17  ;;  %v1503_v21 = vld [vmem:[%s1674_s7 + $0xf4] sm:$0xf0]  ;;  %v1381_v23 = vld [vmem:[%s1674_s7 + $0x78] sm:$0xf0] }
  0x51   : > { %v1444_v24 = vor.u32 %v1503_v21, %v1443_v19  ;;  %v1384_v25 = vor.u32 %v1486_v22, %v1381_v23  ;;  %v1502_v26 = vld [vmem:[%s1674_s7 + $0xf4] sm:$0xf]  ;;  %v1445_v27 = vld [vmem:[%s1674_s7 + $0xf8] sm:$0xf0]  ;;  %v1371_v28 = vld [vmem:[%s1674_s7 + $0x60] sm:$0xf] }
  0x52   : > { %723 = vmatpush.bf16.msra.mxu0 %v1380_v20  ;;  %v1448_v29 = vor.u32 %v1502_v26, %v1445_v27  ;;  %v1485_v30 = vld [vmem:[%s1674_s7 + $0x64] sm:$0xf0]  ;;  %v1435_v31 = vld [vmem:[%s1674_s7 + $0xe0] sm:$0xf]  ;;  %v1484_v35 = vld [vmem:[%s1674_s7 + $0x64] sm:$0xf] }
  0x53   : > { %v1501_v32 = vld [vmem:[%s1674_s7 + $0xe4] sm:$0xf0]  ;;  %772 = vmatpush.bf16.msra.mxu1 %v1444_v24  ;;  %821 = vmatpush.bf16.msra.mxu2 %v1384_v25  ;;  %v1372_v33 = vor.u32 %v1485_v30, %v1371_v28  ;;  %v1373_v36 = vld [vmem:[%s1674_s7 + $0x68] sm:$0xf0]  ;;  %v1500_v37 = vld [vmem:[%s1674_s7 + $0xe4] sm:$0xf] }
  0x54   : > { %v1436_v34 = vor.u32 %v1501_v32, %v1435_v31  ;;  %870 = vmatpush.bf16.msra.mxu3 %v1448_v29  ;;  %v1376_v38 = vor.u32 %v1484_v35, %v1373_v36  ;;  %v1437_v39 = vld [vmem:[%s1674_s7 + $0xe8] sm:$0xf0]  ;;  %v1363_v40 = vld [vmem:[%s1674_s7 + $0x50] sm:$0xf]  ;;  %v1483_v41 = vld [vmem:[%s1674_s7 + $0x54] sm:$0xf0] }
  0x55   : > { %v1440_v42 = vor.u32 %v1500_v37, %v1437_v39  ;;  %v1427_v43 = vld [vmem:[%s1674_s7 + $0xd0] sm:$0xf]  ;;  %v1499_v44 = vld [vmem:[%s1674_s7 + $0xd4] sm:$0xf0]  ;;  %v1482_v45 = vld [vmem:[%s1674_s7 + $0x54] sm:$0xf]  ;;  %v1364_v46 = vor.u32 %v1483_v41, %v1363_v40 }
  0x56   : > { %724 = vmatpush.bf16.msra.mxu0 %v1372_v33  ;;  %v1365_v47 = vld [vmem:[%s1674_s7 + $0x58] sm:$0xf0]  ;;  %v1498_v48 = vld [vmem:[%s1674_s7 + $0xd4] sm:$0xf]  ;;  %v1428_v50 = vor.u32 %v1499_v44, %v1427_v43  ;;  %v1355_v52 = vld [vmem:[%s1674_s7 + $0x40] sm:$0xf] }
  0x57   : > { %v1429_v49 = vld [vmem:[%s1674_s7 + $0xd8] sm:$0xf0]  ;;  %773 = vmatpush.bf16.msra.mxu1 %v1436_v34  ;;  %822 = vmatpush.bf16.msra.mxu2 %v1376_v38  ;;  %v1368_v51 = vor.u32 %v1482_v45, %v1365_v47  ;;  %v1481_v53 = vld [vmem:[%s1674_s7 + $0x44] sm:$0xf0]  ;;  %v1419_v54 = vld [vmem:[%s1674_s7 + $0xc0] sm:$0xf] }
  0x58   : > { %871 = vmatpush.bf16.msra.mxu3 %v1440_v42  ;;  %v1432_v55 = vor.u32 %v1498_v48, %v1429_v49  ;;  %v1497_v56 = vld [vmem:[%s1674_s7 + $0xc4] sm:$0xf0]  ;;  %v1480_v57 = vld [vmem:[%s1674_s7 + $0x44] sm:$0xf]  ;;  %v1357_v58 = vld [vmem:[%s1674_s7 + $0x48] sm:$0xf0]  ;;  %v1356_v61 = vor.u32 %v1481_v53, %v1355_v52 }
  0x59   : > { %v1496_v59 = vld [vmem:[%s1674_s7 + $0xc4] sm:$0xf]  ;;  %v1421_v60 = vld [vmem:[%s1674_s7 + $0xc8] sm:$0xf0]  ;;  %v1420_v62 = vor.u32 %v1497_v56, %v1419_v54  ;;  %v1360_v63 = vor.u32 %v1480_v57, %v1357_v58  ;;  %v1347_v0 = vld [vmem:[%s1674_s7 + $0x30] sm:$0xf] }
  0x5a   : > { %725 = vmatpush.bf16.msra.mxu0 %v1364_v46  ;;  %v1479_v1 = vld [vmem:[%s1674_s7 + $0x34] sm:$0xf0]  ;;  %v1411_v2 = vld [vmem:[%s1674_s7 + $0xb0] sm:$0xf]  ;;  %v1424_v3 = vor.u32 %v1496_v59, %v1421_v60  ;;  %v1478_v5 = vld [vmem:[%s1674_s7 + $0x34] sm:$0xf] }
  0x5b   : > { %774 = vmatpush.bf16.msra.mxu1 %v1428_v50  ;;  %823 = vmatpush.bf16.msra.mxu2 %v1368_v51  ;;  %v1495_v4 = vld [vmem:[%s1674_s7 + $0xb4] sm:$0xf0]  ;;  %v1349_v6 = vld [vmem:[%s1674_s7 + $0x38] sm:$0xf0]  ;;  %v1494_v7 = vld [vmem:[%s1674_s7 + $0xb4] sm:$0xf]  ;;  %v1348_v9 = vor.u32 %v1479_v1, %v1347_v0 }
  0x5c   : > { %872 = vmatpush.bf16.msra.mxu3 %v1432_v55  ;;  %v1413_v8 = vld [vmem:[%s1674_s7 + $0xb8] sm:$0xf0]  ;;  %v1412_v10 = vor.u32 %v1495_v4, %v1411_v2  ;;  %v1352_v11 = vor.u32 %v1478_v5, %v1349_v6  ;;  %v1339_v12 = vld [vmem:[%s1674_s7 + $0x20] sm:$0xf]  ;;  %v1477_v13 = vld [vmem:[%s1674_s7 + $0x24] sm:$0xf0] }
  0x5d   : > { %v1403_v14 = vld [vmem:[%s1674_s7 + $0xa0] sm:$0xf]  ;;  %v1416_v15 = vor.u32 %v1494_v7, %v1413_v8  ;;  %v1493_v16 = vld [vmem:[%s1674_s7 + $0xa4] sm:$0xf0]  ;;  %v1476_v17 = vld [vmem:[%s1674_s7 + $0x24] sm:$0xf]  ;;  %v1340_v21 = vor.u32 %v1477_v13, %v1339_v12 }
  0x5e   : > { %726 = vmatpush.bf16.msra.mxu0 %v1356_v61  ;;  %v1341_v18 = vld [vmem:[%s1674_s7 + $0x28] sm:$0xf0]  ;;  %v1492_v19 = vld [vmem:[%s1674_s7 + $0xa4] sm:$0xf]  ;;  %v1404_v22 = vor.u32 %v1493_v16, %v1403_v14  ;;  %v1331_v24 = vld [vmem:[%s1674_s7 + $0x10] sm:$0xf] }
  0x5f   : > { %775 = vmatpush.bf16.msra.mxu1 %v1420_v62  ;;  %824 = vmatpush.bf16.msra.mxu2 %v1360_v63  ;;  %v1405_v20 = vld [vmem:[%s1674_s7 + $0xa8] sm:$0xf0]  ;;  %v1344_v23 = vor.u32 %v1476_v17, %v1341_v18  ;;  %v1475_v25 = vld [vmem:[%s1674_s7 + $0x14] sm:$0xf0]  ;;  %v1395_v26 = vld [vmem:[%s1674_s7 + $0x90] sm:$0xf] }
  0x60   : > { %873 = vmatpush.bf16.msra.mxu3 %v1424_v3  ;;  %v1408_v27 = vor.u32 %v1492_v19, %v1405_v20  ;;  %v1491_v28 = vld [vmem:[%s1674_s7 + $0x94] sm:$0xf0]  ;;  %v1474_v29 = vld [vmem:[%s1674_s7 + $0x14] sm:$0xf]  ;;  %v1333_v30 = vld [vmem:[%s1674_s7 + $0x18] sm:$0xf0]  ;;  %v1332_v33 = vor.u32 %v1475_v25, %v1331_v24 }
  0x61   : > { %v1490_v31 = vld [vmem:[%s1674_s7 + $0x94] sm:$0xf]  ;;  %v1397_v32 = vld [vmem:[%s1674_s7 + $0x98] sm:$0xf0]  ;;  %v1396_v34 = vor.u32 %v1491_v28, %v1395_v26  ;;  %v1336_v35 = vor.u32 %v1474_v29, %v1333_v30  ;;  %v1323_v36 = vld [vmem:[%s1674_s7] sm:$0xf] }
  0x62   : > { %727 = vmatpush.bf16.msra.mxu0 %v1348_v9  ;;  %v1473_v37 = vld [vmem:[%s1674_s7 + $0x4] sm:$0xf0]  ;;  %v1387_v38 = vld [vmem:[%s1674_s7 + $0x80] sm:$0xf]  ;;  %v1400_v39 = vor.u32 %v1490_v31, %v1397_v32  ;;  %v1472_v41 = vld [vmem:[%s1674_s7 + $0x4] sm:$0xf] }
  0x63   : > { %776 = vmatpush.bf16.msra.mxu1 %v1412_v10  ;;  %825 = vmatpush.bf16.msra.mxu2 %v1352_v11  ;;  %v1489_v40 = vld [vmem:[%s1674_s7 + $0x84] sm:$0xf0]  ;;  %v1325_v42 = vld [vmem:[%s1674_s7 + $0x8] sm:$0xf0]  ;;  %v1488_v43 = vld [vmem:[%s1674_s7 + $0x84] sm:$0xf]  ;;  %v1324_v45 = vor.u32 %v1473_v37, %v1323_v36 }
  0x64   : > { %874 = vmatpush.bf16.msra.mxu3 %v1416_v15  ;;  %v1389_v44 = vld [vmem:[%s1674_s7 + $0x88] sm:$0xf0]  ;;  %v1259_v46 = vld [vmem:[%s1676_s8] sm:$0xf]  ;;  %v1457_v47 = vld [vmem:[%s1676_s8 + $0x4] sm:$0xf0]  ;;  %v1388_v48 = vor.u32 %v1489_v40, %v1387_v38  ;;  %v1328_v49 = vor.u32 %v1472_v41, %v1325_v42 }
  0x65   : > { %v1456_v50 = vld [vmem:[%s1676_s8 + $0x4] sm:$0xf]  ;;  %v1261_v51 = vld [vmem:[%s1676_s8 + $0x8] sm:$0xf0]  ;;  %v1392_v52 = vor.u32 %v1488_v43, %v1389_v44  ;;  %v1260_v53 = vor.u32 %v1457_v47, %v1259_v46  ;;  %v1267_v55 = vld [vmem:[%s1676_s8 + $0x10] sm:$0xf] }
  0x66   : > { %728 = vmatpush.bf16.msra.mxu0 %v1340_v21  ;;  %v1264_v54 = vor.u32 %v1456_v50, %v1261_v51  ;;  %v1459_v56 = vld [vmem:[%s1676_s8 + $0x14] sm:$0xf0]  ;;  %v1458_v57 = vld [vmem:[%s1676_s8 + $0x14] sm:$0xf]  ;;  %v1269_v58 = vld [vmem:[%s1676_s8 + $0x18] sm:$0xf0] }
  0x67   : > { %777 = vmatpush.bf16.msra.mxu1 %v1404_v22  ;;  %826 = vmatpush.bf16.msra.mxu2 %v1344_v23  ;;  %v1268_v59 = vor.u32 %v1459_v56, %v1267_v55  ;;  %v1272_v60 = vor.u32 %v1458_v57, %v1269_v58  ;;  %v1275_v61 = vld [vmem:[%s1676_s8 + $0x20] sm:$0xf]  ;;  %v1461_v62 = vld [vmem:[%s1676_s8 + $0x24] sm:$0xf0]  ;;  %v1460_v63 = vld [vmem:[%s1676_s8 + $0x24] sm:$0xf] }
  0x68   : > { %875 = vmatpush.bf16.msra.mxu3 %v1408_v27  ;;  %v1277_v0 = vld [vmem:[%s1676_s8 + $0x28] sm:$0xf0]  ;;  %v1276_v1 = vor.u32 %v1461_v62, %v1275_v61  ;;  %v1283_v3 = vld [vmem:[%s1676_s8 + $0x30] sm:$0xf]  ;;  %v1463_v4 = vld [vmem:[%s1676_s8 + $0x34] sm:$0xf0] }
  0x69   : > { %v1280_v2 = vor.u32 %v1460_v63, %v1277_v0  ;;  %v1462_v5 = vld [vmem:[%s1676_s8 + $0x34] sm:$0xf]  ;;  %v1285_v6 = vld [vmem:[%s1676_s8 + $0x38] sm:$0xf0]  ;;  %v1284_v7 = vor.u32 %v1463_v4, %v1283_v3  ;;  %v1291_v9 = vld [vmem:[%s1676_s8 + $0x40] sm:$0xf] }
  0x6a   : > { %729 = vmatpush.bf16.msra.mxu0 %v1332_v33  ;;  %v1288_v8 = vor.u32 %v1462_v5, %v1285_v6  ;;  %v1465_v10 = vld [vmem:[%s1676_s8 + $0x44] sm:$0xf0]  ;;  %v1464_v11 = vld [vmem:[%s1676_s8 + $0x44] sm:$0xf]  ;;  %v1293_v12 = vld [vmem:[%s1676_s8 + $0x48] sm:$0xf0] }
  0x6b   : > { %778 = vmatpush.bf16.msra.mxu1 %v1396_v34  ;;  %827 = vmatpush.bf16.msra.mxu2 %v1336_v35  ;;  %v1292_v13 = vor.u32 %v1465_v10, %v1291_v9  ;;  %v1296_v14 = vor.u32 %v1464_v11, %v1293_v12  ;;  %v1299_v15 = vld [vmem:[%s1676_s8 + $0x50] sm:$0xf]  ;;  %v1467_v16 = vld [vmem:[%s1676_s8 + $0x54] sm:$0xf0]  ;;  %v1466_v17 = vld [vmem:[%s1676_s8 + $0x54] sm:$0xf] }
  0x6c   : > { %876 = vmatpush.bf16.msra.mxu3 %v1400_v39  ;;  %v1301_v18 = vld [vmem:[%s1676_s8 + $0x58] sm:$0xf0]  ;;  %v1300_v19 = vor.u32 %v1467_v16, %v1299_v15  ;;  %v1307_v21 = vld [vmem:[%s1676_s8 + $0x60] sm:$0xf]  ;;  %v1469_v22 = vld [vmem:[%s1676_s8 + $0x64] sm:$0xf0] }
  0x6d   : > { %v1304_v20 = vor.u32 %v1466_v17, %v1301_v18  ;;  %v1468_v23 = vld [vmem:[%s1676_s8 + $0x64] sm:$0xf]  ;;  %v1309_v24 = vld [vmem:[%s1676_s8 + $0x68] sm:$0xf0]  ;;  %v1308_v25 = vor.u32 %v1469_v22, %v1307_v21  ;;  %v1315_v27 = vld [vmem:[%s1676_s8 + $0x70] sm:$0xf] }
  0x6e   : > { %730 = vmatpush.bf16.msra.mxu0 %v1324_v45  ;;  %v1312_v26 = vor.u32 %v1468_v23, %v1309_v24  ;;  %v1471_v28 = vld [vmem:[%s1676_s8 + $0x74] sm:$0xf0]  ;;  %v1470_v29 = vld [vmem:[%s1676_s8 + $0x74] sm:$0xf]  ;;  %v1317_v30 = vld [vmem:[%s1676_s8 + $0x78] sm:$0xf0] }
  0x6f   : > { %779 = vmatpush.bf16.msra.mxu1 %v1388_v48  ;;  %828 = vmatpush.bf16.msra.mxu2 %v1328_v49  ;;  %v1316_v31 = vor.u32 %v1471_v28, %v1315_v27  ;;  %v1320_v32 = vor.u32 %v1470_v29, %v1317_v30  ;;  %v403_v34 = vld [vmem:[#allocation2 + $0xb0] sm:$0xff]  ;;  %v404_v39 = vld [vmem:[#allocation2] sm:$0xff]  ;;  %v405_v43 = vld [vmem:[#allocation2 + $0xd8] sm:$0xff]  ;;  %p1449_p11 = scmp.ne.s32.totalorder %s1575_s14, 10 }
  0x70   : > { %877 = vmatpush.bf16.msra.mxu3 %v1392_v52  ;;  %v406_v49 = vld [vmem:[#allocation2 + $0x18] sm:$0xff]  ;;  %v409_v63 = vld [vmem:[#allocation2 + $0x30] sm:$0xff]  ;;  %v410_v5 = vld [vmem:[#allocation2 + $0x48] sm:$0xff] }
  0x71   : > { %731 = vmatmul.bf16.vlgmr.msra.gmra.mxu0 %v1260_v53  ;;  %v411_v9 = vld [vmem:[#allocation2 + $0x80] sm:$0xff]  ;;  %v412_v15 = vld [vmem:[#allocation2 + $0x88] sm:$0xff] }
  0x72   : > { %780 = vmatmul.bf16.vlgmr.msra.gmra.mxu1 %v1264_v54  ;;  %829 = vmatmul.bf16.vlgmr.msra.gmra.mxu2 %v1260_v53  ;;  %v407_v53 = vld [vmem:[#allocation2 + $0x50] sm:$0xff]  ;;  %v415_v29 = vld [vmem:[#allocation2 + $0x60] sm:$0xff] }
  0x73   : > { %878 = vmatmul.bf16.vlgmr.msra.gmra.mxu3 %v1264_v54 }
  0x81   : > { %736 = vmatmul.bf16.gmra.mxu0 %v1268_v59 }
  0x82   : > { %785 = vmatmul.bf16.gmra.mxu1 %v1272_v60  ;;  %834 = vmatmul.bf16.gmra.mxu2 %v1268_v59  ;;  %v408_v59 = vld [vmem:[#allocation2 + $0x68] sm:$0xff] }
  0x83   : > { %883 = vmatmul.bf16.gmra.mxu3 %v1272_v60 }
  0x91   : > { %741 = vmatmul.bf16.gmra.mxu0 %v1276_v1 }
  0x92   : > { %790 = vmatmul.bf16.gmra.mxu1 %v1280_v2  ;;  %839 = vmatmul.bf16.gmra.mxu2 %v1276_v1 }
  0x93   : > { %888 = vmatmul.bf16.gmra.mxu3 %v1280_v2 }
  0xa1   : > { %746 = vmatmul.bf16.gmra.mxu0 %v1284_v7 }
  0xa2   : > { %795 = vmatmul.bf16.gmra.mxu1 %v1288_v8  ;;  %844 = vmatmul.bf16.gmra.mxu2 %v1284_v7 }
  0xa3   : > { %893 = vmatmul.bf16.gmra.mxu3 %v1288_v8 }
  0xb1   : > { %751 = vmatmul.bf16.gmra.mxu0 %v1292_v13 }
  0xb2   : > { %800 = vmatmul.bf16.gmra.mxu1 %v1296_v14  ;;  %849 = vmatmul.bf16.gmra.mxu2 %v1292_v13 }
  0xb3   : > { %898 = vmatmul.bf16.gmra.mxu3 %v1296_v14 }
  0xc1   : > { %756 = vmatmul.bf16.gmra.mxu0 %v1300_v19 }
  0xc2   : > { %805 = vmatmul.bf16.gmra.mxu1 %v1304_v20  ;;  %854 = vmatmul.bf16.gmra.mxu2 %v1300_v19  ;;  %v413_v19 = vld [vmem:[#allocation2 + $0xe8] sm:$0xff] }
  0xc3   : > { %903 = vmatmul.bf16.gmra.mxu3 %v1304_v20 }
  0xd1   : > { %761 = vmatmul.bf16.gmra.mxu0 %v1308_v25 }
  0xd2   : > { %810 = vmatmul.bf16.gmra.mxu1 %v1312_v26  ;;  %859 = vmatmul.bf16.gmra.mxu2 %v1308_v25  ;;  %v414_v25 = vld [vmem:[#allocation2 + $0xb8] sm:$0xff] }
  0xd3   : > { %908 = vmatmul.bf16.gmra.mxu3 %v1312_v26 }
  0xe1   : > { %766 = vmatmul.bf16.gmra.mxu0 %v1316_v31 }
  0xe2   : > { %815 = vmatmul.bf16.gmra.mxu1 %v1320_v32  ;;  %864 = vmatmul.bf16.gmra.mxu2 %v1316_v31 }
  0xe3   : > { %913 = vmatmul.bf16.gmra.mxu3 %v1320_v32 }
  0xee   : > { %v732_v33 = vpop.f32.mrf.mxu0 }
  0xef   : > { %v781_v35 = vpop.f32.mrf.mxu1 }
  0xf0   : > { %v782_v36 = vadd.f32 %v781_v35, %v732_v33  ;;  %v416_v35 = vld [vmem:[#allocation2 + $0xf0] sm:$0xff] }
  0xf2   : > { %v919_v37 = vadd.f32 %v782_v36, %v403_v34 }
  0xf4   : > { %951 = vst [vmem:[#allocation2 + $0xb0] sm:$0xff] %v919_v37 }
  0xf5   : > { %v830_v38 = vpop.f32.mrf.mxu2 }
  0xf6   : > { %v879_v40 = vpop.f32.mrf.mxu3  ;;  %v734_v41 = vpop.f32.mrf.mxu0 }
  0xf7   : > { %v880_v42 = vadd.f32 %v879_v40, %v830_v38  ;;  %v783_v44 = vpop.f32.mrf.mxu1 }
  0xf8   : > { %v784_v45 = vadd.f32 %v783_v44, %v734_v41 }
  0xf9   : > { %v920_v46 = vadd.f32 %v880_v42, %v404_v39  ;;  %v417_v39 = vld [vmem:[#allocation2 + $0x8] sm:$0xff] }
  0xfa   : > { %v921_v47 = vadd.f32 %v784_v45, %v405_v43  ;;  %v418_v45 = vld [vmem:[#allocation2 + $0x78] sm:$0xff] }
  0xfb   : > { %952 = vst [vmem:[#allocation2] sm:$0xff] %v920_v46 }
  0xfc   : > { %953 = vst [vmem:[#allocation2 + $0xd8] sm:$0xff] %v921_v47 }
  0xfd   : > { %v832_v48 = vpop.f32.mrf.mxu2 }
  0xfe   : > { %v881_v50 = vpop.f32.mrf.mxu3  ;;  %v737_v51 = vpop.f32.mrf.mxu0 }
  0xff   : > { %v882_v52 = vadd.f32 %v881_v50, %v832_v48  ;;  %v786_v54 = vpop.f32.mrf.mxu1 }
 0x100   : > { %v787_v55 = vadd.f32 %v786_v54, %v737_v51 }
 0x101   : > { %v922_v56 = vadd.f32 %v882_v52, %v406_v49  ;;  %v419_v49 = vld [vmem:[#allocation2 + $0x38] sm:$0xff] }
 0x102   : > { %v923_v57 = vadd.f32 %v787_v55, %v407_v53  ;;  %v420_v55 = vld [vmem:[#allocation2 + $0x58] sm:$0xff] }
 0x103   : > { %954 = vst [vmem:[#allocation2 + $0x18] sm:$0xff] %v922_v56 }
 0x104   : > { %955 = vst [vmem:[#allocation2 + $0x50] sm:$0xff] %v923_v57 }
 0x105   : > { %v835_v58 = vpop.f32.mrf.mxu2 }
 0x106   : > { %v884_v60 = vpop.f32.mrf.mxu3  ;;  %v739_v61 = vpop.f32.mrf.mxu0 }
 0x107   : > { %v885_v62 = vadd.f32 %v884_v60, %v835_v58  ;;  %v788_v0 = vpop.f32.mrf.mxu1 }
 0x108   : > { %v789_v1 = vadd.f32 %v788_v0, %v739_v61 }
 0x109   : > { %v924_v2 = vadd.f32 %v885_v62, %v408_v59  ;;  %v421_v59 = vld [vmem:[#allocation2 + $0x40] sm:$0xff] }
 0x10a   : > { %v925_v3 = vadd.f32 %v789_v1, %v409_v63  ;;  %v422_v1 = vld [vmem:[#allocation2 + $0xc8] sm:$0xff] }
 0x10b   : > { %956 = vst [vmem:[#allocation2 + $0x68] sm:$0xff] %v924_v2 }
 0x10c   : > { %957 = vst [vmem:[#allocation2 + $0x30] sm:$0xff] %v925_v3 }
 0x10d   : > { %v837_v4 = vpop.f32.mrf.mxu2 }
 0x10e   : > { %v886_v6 = vpop.f32.mrf.mxu3  ;;  %v742_v7 = vpop.f32.mrf.mxu0 }
 0x10f   : > { %v887_v8 = vadd.f32 %v886_v6, %v837_v4  ;;  %v791_v10 = vpop.f32.mrf.mxu1 }
 0x110   : > { %v792_v11 = vadd.f32 %v791_v10, %v742_v7 }
 0x111   : > { %v926_v12 = vadd.f32 %v887_v8, %v410_v5  ;;  %v423_v5 = vld [vmem:[#allocation2 + $0xe0] sm:$0xff] }
 0x112   : > { %v927_v13 = vadd.f32 %v792_v11, %v411_v9  ;;  %v424_v11 = vld [vmem:[#allocation2 + $0x90] sm:$0xff] }
 0x113   : > { %958 = vst [vmem:[#allocation2 + $0x48] sm:$0xff] %v926_v12 }
 0x114   : > { %959 = vst [vmem:[#allocation2 + $0x80] sm:$0xff] %v927_v13 }
 0x115   : > { %v840_v14 = vpop.f32.mrf.mxu2 }
 0x116   : > { %v889_v16 = vpop.f32.mrf.mxu3  ;;  %v744_v17 = vpop.f32.mrf.mxu0 }
 0x117   : > { %v890_v18 = vadd.f32 %v889_v16, %v840_v14  ;;  %v793_v20 = vpop.f32.mrf.mxu1 }
 0x118   : > { %v794_v21 = vadd.f32 %v793_v20, %v744_v17 }
 0x119   : > { %v928_v22 = vadd.f32 %v890_v18, %v412_v15  ;;  %v425_v15 = vld [vmem:[#allocation2 + $0x70] sm:$0xff] }
 0x11a   : > { %v929_v23 = vadd.f32 %v794_v21, %v413_v19  ;;  %v426_v21 = vld [vmem:[#allocation2 + $0xc0] sm:$0xff] }
 0x11b   : > { %960 = vst [vmem:[#allocation2 + $0x88] sm:$0xff] %v928_v22 }
 0x11c   : > { %961 = vst [vmem:[#allocation2 + $0xe8] sm:$0xff] %v929_v23 }
 0x11d   : > { %v842_v24 = vpop.f32.mrf.mxu2 }
 0x11e   : > { %v891_v26 = vpop.f32.mrf.mxu3  ;;  %v747_v27 = vpop.f32.mrf.mxu0 }
 0x11f   : > { %v892_v28 = vadd.f32 %v891_v26, %v842_v24  ;;  %v796_v30 = vpop.f32.mrf.mxu1 }
 0x120   : > { %v797_v31 = vadd.f32 %v796_v30, %v747_v27 }
 0x121   : > { %v930_v32 = vadd.f32 %v892_v28, %v414_v25  ;;  %v427_v25 = vld [vmem:[#allocation2 + $0xa8] sm:$0xff] }
 0x122   : > { %v931_v33 = vadd.f32 %v797_v31, %v415_v29  ;;  %v428_v31 = vld [vmem:[#allocation2 + $0xd0] sm:$0xff] }
 0x123   : > { %962 = vst [vmem:[#allocation2 + $0xb8] sm:$0xff] %v930_v32 }
 0x124   : > { %963 = vst [vmem:[#allocation2 + $0x60] sm:$0xff] %v931_v33 }
 0x125   : > { %v845_v34 = vpop.f32.mrf.mxu2 }
 0x126   : > { %v894_v36 = vpop.f32.mrf.mxu3  ;;  %v749_v37 = vpop.f32.mrf.mxu0 }
 0x127   : > { %v895_v38 = vadd.f32 %v894_v36, %v845_v34  ;;  %v798_v40 = vpop.f32.mrf.mxu1 }
 0x128   : > { %v799_v41 = vadd.f32 %v798_v40, %v749_v37 }
 0x129   : > { %v932_v42 = vadd.f32 %v895_v38, %v416_v35  ;;  %v429_v35 = vld [vmem:[#allocation2 + $0x10] sm:$0xff] }
 0x12a   : > { %v933_v43 = vadd.f32 %v799_v41, %v417_v39  ;;  %v430_v41 = vld [vmem:[#allocation2 + $0x28] sm:$0xff] }
 0x12b   : > { %964 = vst [vmem:[#allocation2 + $0xf0] sm:$0xff] %v932_v42 }
 0x12c   : > { %965 = vst [vmem:[#allocation2 + $0x8] sm:$0xff] %v933_v43 }
 0x12d   : > { %v847_v44 = vpop.f32.mrf.mxu2 }
 0x12e   : > { %v896_v46 = vpop.f32.mrf.mxu3  ;;  %v752_v47 = vpop.f32.mrf.mxu0 }
 0x12f   : > { %v897_v48 = vadd.f32 %v896_v46, %v847_v44  ;;  %v801_v50 = vpop.f32.mrf.mxu1 }
 0x130   : > { %v802_v51 = vadd.f32 %v801_v50, %v752_v47 }
 0x131   : > { %v934_v52 = vadd.f32 %v897_v48, %v418_v45  ;;  %v431_v45 = vld [vmem:[#allocation2 + $0xa0] sm:$0xff] }
 0x132   : > { %v935_v53 = vadd.f32 %v802_v51, %v419_v49  ;;  %v432_v51 = vld [vmem:[#allocation2 + $0xf8] sm:$0xff] }
 0x133   : > { %966 = vst [vmem:[#allocation2 + $0x78] sm:$0xff] %v934_v52 }
 0x134   : > { %967 = vst [vmem:[#allocation2 + $0x38] sm:$0xff] %v935_v53 }
 0x135   : > { %v850_v54 = vpop.f32.mrf.mxu2 }
 0x136   : > { %v899_v56 = vpop.f32.mrf.mxu3  ;;  %v754_v57 = vpop.f32.mrf.mxu0 }
 0x137   : > { %v900_v58 = vadd.f32 %v899_v56, %v850_v54  ;;  %v803_v60 = vpop.f32.mrf.mxu1 }
 0x138   : > { %v804_v61 = vadd.f32 %v803_v60, %v754_v57 }
 0x139   : > { %v936_v62 = vadd.f32 %v900_v58, %v420_v55  ;;  %v433_v55 = vld [vmem:[#allocation2 + $0x20] sm:$0xff] }
 0x13a   : > { %v937_v63 = vadd.f32 %v804_v61, %v421_v59  ;;  %v434_v61 = vld [vmem:[#allocation2 + $0x98] sm:$0xff] }
 0x13b   : > { %968 = vst [vmem:[#allocation2 + $0x58] sm:$0xff] %v936_v62 }
 0x13c   : > { %969 = vst [vmem:[#allocation2 + $0x40] sm:$0xff] %v937_v63 }
 0x13d   : > { %v852_v0 = vpop.f32.mrf.mxu2 }
 0x13e   : > { %v901_v2 = vpop.f32.mrf.mxu3  ;;  %v757_v3 = vpop.f32.mrf.mxu0 }
 0x13f   : > { %v902_v4 = vadd.f32 %v901_v2, %v852_v0  ;;  %v806_v6 = vpop.f32.mrf.mxu1 }
 0x140   : > { %v807_v7 = vadd.f32 %v806_v6, %v757_v3 }
 0x141   : > { %v938_v8 = vadd.f32 %v902_v4, %v422_v1 }
 0x142   : > { %v939_v9 = vadd.f32 %v807_v7, %v423_v5 }
 0x143   : > { %970 = vst [vmem:[#allocation2 + $0xc8] sm:$0xff] %v938_v8 }
 0x144   : > { %971 = vst [vmem:[#allocation2 + $0xe0] sm:$0xff] %v939_v9 }
 0x145   : > { %v855_v10 = vpop.f32.mrf.mxu2 }
 0x146   : > { %v904_v12 = vpop.f32.mrf.mxu3  ;;  %v759_v13 = vpop.f32.mrf.mxu0 }
 0x147   : > { %v905_v14 = vadd.f32 %v904_v12, %v855_v10  ;;  %v808_v16 = vpop.f32.mrf.mxu1 }
 0x148   : > { %v809_v17 = vadd.f32 %v808_v16, %v759_v13 }
 0x149   : > { %v940_v18 = vadd.f32 %v905_v14, %v424_v11 }
 0x14a   : > { %v941_v19 = vadd.f32 %v809_v17, %v425_v15 }
 0x14b   : > { %972 = vst [vmem:[#allocation2 + $0x90] sm:$0xff] %v940_v18 }
 0x14c   : > { %973 = vst [vmem:[#allocation2 + $0x70] sm:$0xff] %v941_v19 }
 0x14d   : > { %v857_v20 = vpop.f32.mrf.mxu2 }
 0x14e   : > { %v906_v22 = vpop.f32.mrf.mxu3  ;;  %v762_v23 = vpop.f32.mrf.mxu0 }
 0x14f   : > { %v907_v24 = vadd.f32 %v906_v22, %v857_v20  ;;  %v811_v26 = vpop.f32.mrf.mxu1 }
 0x150   : > { %v812_v27 = vadd.f32 %v811_v26, %v762_v23 }
 0x151   : > { %v942_v28 = vadd.f32 %v907_v24, %v426_v21 }
 0x152   : > { %v943_v29 = vadd.f32 %v812_v27, %v427_v25 }
 0x153   : > { %974 = vst [vmem:[#allocation2 + $0xc0] sm:$0xff] %v942_v28 }
 0x154   : > { %975 = vst [vmem:[#allocation2 + $0xa8] sm:$0xff] %v943_v29 }
 0x155   : > { %v860_v30 = vpop.f32.mrf.mxu2 }
 0x156   : > { %v909_v32 = vpop.f32.mrf.mxu3  ;;  %v764_v33 = vpop.f32.mrf.mxu0 }
 0x157   : > { %v910_v34 = vadd.f32 %v909_v32, %v860_v30  ;;  %v813_v36 = vpop.f32.mrf.mxu1 }
 0x158   : > { %v814_v37 = vadd.f32 %v813_v36, %v764_v33 }
 0x159   : > { %v944_v38 = vadd.f32 %v910_v34, %v428_v31 }
 0x15a   : > { %v945_v39 = vadd.f32 %v814_v37, %v429_v35 }
 0x15b   : > { %976 = vst [vmem:[#allocation2 + $0xd0] sm:$0xff] %v944_v38 }
 0x15c   : > { %977 = vst [vmem:[#allocation2 + $0x10] sm:$0xff] %v945_v39 }
 0x15d   : > { %v862_v40 = vpop.f32.mrf.mxu2 }
 0x15e   : > { %v911_v42 = vpop.f32.mrf.mxu3  ;;  %v767_v43 = vpop.f32.mrf.mxu0 }
 0x15f   : > { %v912_v44 = vadd.f32 %v911_v42, %v862_v40  ;;  %v816_v46 = vpop.f32.mrf.mxu1 }
 0x160   : > { %v817_v47 = vadd.f32 %v816_v46, %v767_v43 }
 0x161   : > { %v946_v48 = vadd.f32 %v912_v44, %v430_v41 }
 0x162   : > { %v947_v49 = vadd.f32 %v817_v47, %v431_v45 }
 0x163   : > { %978 = vst [vmem:[#allocation2 + $0x28] sm:$0xff] %v946_v48 }
 0x164   : > { %979 = vst [vmem:[#allocation2 + $0xa0] sm:$0xff] %v947_v49 }
 0x165   : > { %v865_v50 = vpop.f32.mrf.mxu2 }
 0x166   : > { %v914_v52 = vpop.f32.mrf.mxu3  ;;  %v769_v53 = vpop.f32.mrf.mxu0 }
 0x167   : > { %v915_v54 = vadd.f32 %v914_v52, %v865_v50  ;;  %v818_v56 = vpop.f32.mrf.mxu1 }
 0x168   : > { %v819_v57 = vadd.f32 %v818_v56, %v769_v53 }
 0x169   : > { %v948_v58 = vadd.f32 %v915_v54, %v432_v51 }
 0x16a   : > { %v949_v59 = vadd.f32 %v819_v57, %v433_v55 }
 0x16b   : > { %980 = vst [vmem:[#allocation2 + $0xf8] sm:$0xff] %v948_v58 }
 0x16c   : > { %981 = vst [vmem:[#allocation2 + $0x20] sm:$0xff] %v949_v59 }
 0x16d   : > { %v867_v60 = vpop.f32.mrf.mxu2 }
 0x16e   : > { %v916_v62 = vpop.f32.mrf.mxu3 }
 0x16f   : > { %v917_v63 = vadd.f32 %v916_v62, %v867_v60  ;;  %986 = sbr.rel (%p1449_p11) target bundleno = 400 (0x190), region = 78 }
 0x171   : > { %v950_v0 = vadd.f32 %v917_v63, %v434_v61 }
 0x173   : > { %982 = vst [vmem:[#allocation2 + $0x98] sm:$0xff] %v950_v0 }
 0x174   : > { %v987_v1 = vld [vmem:[#allocation2 + $0xb0] sm:$0xff]  ;;  %v988_v2 = vld [vmem:[#allocation2] sm:$0xff]  ;;  %v989_v6 = vld [vmem:[#allocation2 + $0xd8] sm:$0xff] }
 0x175   : > { %v1019_v3 = vld [vmem:[%s1880_s2] sm:$0x3]  ;;  %v990_v7 = vld [vmem:[#allocation2 + $0x18] sm:$0xff]  ;;  %v991_v8 = vld [vmem:[#allocation2 + $0x50] sm:$0xff] }
 0x176   : > { %v1779_v4 = vperm.slane %v1019_v3, 0  ;;  %v1781_v5 = vperm.slane %v1019_v3, 1  ;;  %v992_v9 = vld [vmem:[#allocation2 + $0x68] sm:$0xff]  ;;  %v993_v10 = vld [vmem:[#allocation2 + $0x30] sm:$0xff]  ;;  %v995_v20 = vld [vmem:[#allocation2 + $0x80] sm:$0xff] }
 0x177   : > { %v994_v11 = vld [vmem:[#allocation2 + $0x48] sm:$0xff]  ;;  %v998_v27 = vld [vmem:[#allocation2 + $0xb8] sm:$0xff]  ;;  %v999_v32 = vld [vmem:[#allocation2 + $0x60] sm:$0xff] }
 0x178   : > { %v1025_v12 = vadd.f32 %v1779_v4, %v987_v1  ;;  %v1026_v13 = vadd.f32 %v1781_v5, %v988_v2  ;;  %v1027_v14 = vadd.f32 %v1779_v4, %v989_v6  ;;  %v1028_v15 = vadd.f32 %v1781_v5, %v990_v7  ;;  %v996_v21 = vld [vmem:[#allocation2 + $0x88] sm:$0xff]  ;;  %v1000_v33 = vld [vmem:[#allocation2 + $0xf0] sm:$0xff]  ;;  %v1002_v39 = vld [vmem:[#allocation2 + $0x78] sm:$0xff] }
 0x179   : > { %v1029_v16 = vadd.f32 %v1779_v4, %v991_v8  ;;  %v1030_v17 = vadd.f32 %v1781_v5, %v992_v9  ;;  %v1031_v18 = vadd.f32 %v1779_v4, %v993_v10  ;;  %v1032_v19 = vadd.f32 %v1781_v5, %v994_v11  ;;  %v997_v26 = vld [vmem:[#allocation2 + $0xe8] sm:$0xff]  ;;  %v1003_v44 = vld [vmem:[#allocation2 + $0x38] sm:$0xff]  ;;  %v1005_v54 = vld [vmem:[#allocation2 + $0x40] sm:$0xff] }
 0x17a   : > { %v1057_v22 = vmax.f32 %v1025_v12, 0.0  ;;  %v1058_v23 = vmax.f32 %v1026_v13, 0.0  ;;  %v1059_v24 = vmax.f32 %v1027_v14, 0.0  ;;  %v1060_v25 = vmax.f32 %v1028_v15, 0.0  ;;  %v1001_v38 = vld [vmem:[#allocation2 + $0x8] sm:$0xff]  ;;  %v1004_v49 = vld [vmem:[#allocation2 + $0x58] sm:$0xff] }
 0x17b   : > { %v1061_v28 = vmax.f32 %v1029_v16, 0.0  ;;  %v1062_v29 = vmax.f32 %v1030_v17, 0.0  ;;  %v1063_v30 = vmax.f32 %v1031_v18, 0.0  ;;  %v1064_v31 = vmax.f32 %v1032_v19, 0.0  ;;  %v1006_v55 = vld [vmem:[#allocation2 + $0xc8] sm:$0xff]  ;;  %v1007_v60 = vld [vmem:[#allocation2 + $0xe0] sm:$0xff] }
 0x17c   : > { %v1089_v34 = vpack.c.bf16 %v1058_v23, %v1057_v22  ;;  %v1090_v35 = vpack.c.bf16 %v1060_v25, %v1059_v24  ;;  %v1033_v36 = vadd.f32 %v1779_v4, %v995_v20  ;;  %v1034_v37 = vadd.f32 %v1781_v5, %v996_v21  ;;  %v1008_v61 = vld [vmem:[#allocation2 + $0x90] sm:$0xff]  ;;  %v1010_v3 = vld [vmem:[#allocation2 + $0xc0] sm:$0xff]  ;;  %v1011_v10 = vld [vmem:[#allocation2 + $0xa8] sm:$0xff] }
 0x17d   : > { %v1091_v40 = vpack.c.bf16 %v1062_v29, %v1061_v28  ;;  %v1092_v41 = vpack.c.bf16 %v1064_v31, %v1063_v30  ;;  %v1035_v42 = vadd.f32 %v1779_v4, %v997_v26  ;;  %v1036_v43 = vadd.f32 %v1781_v5, %v998_v27  ;;  %v1009_v2 = vld [vmem:[#allocation2 + $0x70] sm:$0xff]  ;;  %v1014_v21 = vld [vmem:[#allocation2 + $0x28] sm:$0xff]  ;;  %v1015_v26 = vld [vmem:[#allocation2 + $0xa0] sm:$0xff] }
 0x17e   : > { %1105 = vst [vmem:[%s1881_s3] sm:$0xff] %v1089_v34  ;;  %v1065_v45 = vmax.f32 %v1033_v36, 0.0  ;;  %v1066_v46 = vmax.f32 %v1034_v37, 0.0  ;;  %v1037_v47 = vadd.f32 %v1779_v4, %v999_v32  ;;  %v1038_v48 = vadd.f32 %v1781_v5, %v1000_v33  ;;  %v1012_v15 = vld [vmem:[#allocation2 + $0xd0] sm:$0xff]  ;;  %v1016_v27 = vld [vmem:[#allocation2 + $0xf8] sm:$0xff]  ;;  %v1017_v32 = vld [vmem:[#allocation2 + $0x20] sm:$0xff] }
 0x17f   : > { %1106 = vst [vmem:[%s1881_s3 + $0x8] sm:$0xff] %v1090_v35  ;;  %v1067_v50 = vmax.f32 %v1035_v42, 0.0  ;;  %v1068_v51 = vmax.f32 %v1036_v43, 0.0  ;;  %v1039_v52 = vadd.f32 %v1779_v4, %v1001_v38  ;;  %v1040_v53 = vadd.f32 %v1781_v5, %v1002_v39  ;;  %v1013_v20 = vld [vmem:[#allocation2 + $0x10] sm:$0xff]  ;;  %v1018_v33 = vld [vmem:[#allocation2 + $0x98] sm:$0xff] }
 0x180   : > { %1107 = vst [vmem:[%s1881_s3 + $0x10] sm:$0xff] %v1091_v40  ;;  %v1093_v56 = vpack.c.bf16 %v1066_v46, %v1065_v45  ;;  %v1069_v57 = vmax.f32 %v1037_v47, 0.0  ;;  %v1070_v58 = vmax.f32 %v1038_v48, 0.0  ;;  %v1041_v59 = vadd.f32 %v1779_v4, %v1003_v44 }
 0x181   : > { %1108 = vst [vmem:[%s1881_s3 + $0x18] sm:$0xff] %v1092_v41  ;;  %v1094_v62 = vpack.c.bf16 %v1068_v51, %v1067_v50  ;;  %v1071_v63 = vmax.f32 %v1039_v52, 0.0  ;;  %v1072_v0 = vmax.f32 %v1040_v53, 0.0  ;;  %v1042_v1 = vadd.f32 %v1781_v5, %v1004_v49 }
 0x182   : > { %1109 = vst [vmem:[%s1881_s3 + $0x20] sm:$0xff] %v1093_v56  ;;  %v1095_v6 = vpack.c.bf16 %v1070_v58, %v1069_v57  ;;  %v1073_v7 = vmax.f32 %v1041_v59, 0.0  ;;  %v1043_v8 = vadd.f32 %v1779_v4, %v1005_v54  ;;  %v1044_v9 = vadd.f32 %v1781_v5, %v1006_v55 }
 0x183   : > { %1110 = vst [vmem:[%s1881_s3 + $0x28] sm:$0xff] %v1094_v62  ;;  %v1096_v11 = vpack.c.bf16 %v1072_v0, %v1071_v63  ;;  %v1074_v12 = vmax.f32 %v1042_v1, 0.0  ;;  %v1045_v13 = vadd.f32 %v1779_v4, %v1007_v60  ;;  %v1046_v14 = vadd.f32 %v1781_v5, %v1008_v61 }
 0x184   : > { %1111 = vst [vmem:[%s1881_s3 + $0x30] sm:$0xff] %v1095_v6  ;;  %v1075_v16 = vmax.f32 %v1043_v8, 0.0  ;;  %v1076_v17 = vmax.f32 %v1044_v9, 0.0  ;;  %v1047_v18 = vadd.f32 %v1779_v4, %v1009_v2  ;;  %v1048_v19 = vadd.f32 %v1781_v5, %v1010_v3 }
 0x185   : > { %1112 = vst [vmem:[%s1881_s3 + $0x38] sm:$0xff] %v1096_v11  ;;  %v1097_v22 = vpack.c.bf16 %v1074_v12, %v1073_v7  ;;  %v1077_v23 = vmax.f32 %v1045_v13, 0.0  ;;  %v1078_v24 = vmax.f32 %v1046_v14, 0.0  ;;  %v1049_v25 = vadd.f32 %v1779_v4, %v1011_v10 }
 0x186   : > { %v1098_v28 = vpack.c.bf16 %v1076_v17, %v1075_v16  ;;  %v1079_v29 = vmax.f32 %v1047_v18, 0.0  ;;  %v1080_v30 = vmax.f32 %v1048_v19, 0.0  ;;  %v1050_v31 = vadd.f32 %v1781_v5, %v1012_v15 }
 0x187   : > { %1113 = vst [vmem:[%s1881_s3 + $0x40] sm:$0xff] %v1097_v22  ;;  %v1099_v34 = vpack.c.bf16 %v1078_v24, %v1077_v23  ;;  %v1081_v35 = vmax.f32 %v1049_v25, 0.0  ;;  %v1051_v36 = vadd.f32 %v1779_v4, %v1013_v20  ;;  %v1052_v37 = vadd.f32 %v1781_v5, %v1014_v21 }
 0x188   : > { %1114 = vst [vmem:[%s1881_s3 + $0x48] sm:$0xff] %v1098_v28  ;;  %v1100_v38 = vpack.c.bf16 %v1080_v30, %v1079_v29  ;;  %v1082_v39 = vmax.f32 %v1050_v31, 0.0  ;;  %v1053_v40 = vadd.f32 %v1779_v4, %v1015_v26  ;;  %v1054_v41 = vadd.f32 %v1781_v5, %v1016_v27 }
 0x189   : > { %1115 = vst [vmem:[%s1881_s3 + $0x50] sm:$0xff] %v1099_v34  ;;  %v1083_v42 = vmax.f32 %v1051_v36, 0.0  ;;  %v1084_v43 = vmax.f32 %v1052_v37, 0.0  ;;  %v1055_v44 = vadd.f32 %v1779_v4, %v1017_v32  ;;  %v1056_v45 = vadd.f32 %v1781_v5, %v1018_v33 }
 0x18a   : > { %1116 = vst [vmem:[%s1881_s3 + $0x58] sm:$0xff] %v1100_v38  ;;  %v1101_v46 = vpack.c.bf16 %v1082_v39, %v1081_v35  ;;  %v1085_v47 = vmax.f32 %v1053_v40, 0.0  ;;  %v1086_v48 = vmax.f32 %v1054_v41, 0.0 }
 0x18b   : > { %v1102_v49 = vpack.c.bf16 %v1084_v43, %v1083_v42  ;;  %v1087_v50 = vmax.f32 %v1055_v44, 0.0  ;;  %v1088_v51 = vmax.f32 %v1056_v45, 0.0 }
 0x18c   : > { %1117 = vst [vmem:[%s1881_s3 + $0x60] sm:$0xff] %v1101_v46  ;;  %v1103_v52 = vpack.c.bf16 %v1086_v48, %v1085_v47 }
 0x18d   : > { %1118 = vst [vmem:[%s1881_s3 + $0x68] sm:$0xff] %v1102_v49  ;;  %v1104_v4 = vpack.c.bf16 %v1088_v51, %v1087_v50 }
 0x18e   : > { %1119 = vst [vmem:[%s1881_s3 + $0x70] sm:$0xff] %v1103_v52 }
 0x18f   : > { %1120 = vst [vmem:[%s1881_s3 + $0x78] sm:$0xff] %v1104_v4 }
 0x190 PF: > { %s13_s16 = sadd.s32 1, %s1583_s16   ;;  %s1882_s12 = smov %s1571_s13 }
 0x191   : > { %p10_p12 = scmp.ge.s32.totalorder %s13_s16, 13   ;;  %s1883_s13 = smov %s1641_s20 }
 0x192   : > { %s1884_s14 = smov %s1579_s15  ;;  %s1885_s15 = smov %s1887_s17 }
 0x193   :  { %12 = sbr.rel (!%p10_p12) target bundleno = 3 (0x3), region = 119 }

// kernel: deeplab_forward.27
= control target key start
LH: loop header
LB: loop body
LE: loop exit
PB: predicated region body
PF: predicated region fallthrough
CT: control target
= control target key end

     0   :  { %s3070_s12 = smov 0   ;;  %s3072_s13 = smov 0   ;;  %s3904_s0 = inlined_call_operand.vmem [shape: bf16[128,2304], index: 0, kind: input, shape index: {}]   ;;  %s3905_s1 = inlined_call_operand.vmem [shape: bf16[2304,256], index: 1, kind: input, shape index: {}]   ;;  %s3906_s2 = inlined_call_operand.vmem [shape: f32[1,256], index: 2, kind: input, shape index: {}]   ;;  %s3907_s3 = inlined_call_operand.vmem [shape: bf16[128,256], index: 3, kind: output, shape index: {}]  }
   0x1   :  { %s3074_s14 = smov 0   ;;  %s3076_s15 = smov 0  }
   0x2   :  { %s3078_s16 = smov 0  }
   0x3 LB: > { %s25_s17 = sadd.s32 1, %s3043_s15  ;;  %p48_p1 = scmp.ne.s32.totalorder %s3035_s13, %s3031_s12  ;;  %s3047_s16 = sphi %s3078_s16, %s13_s16   ;;  %s3043_s15 = sphi %s3076_s15, %s3911_s15   ;;  %s3039_s14 = sphi %s3074_s14, %s3910_s14   ;;  %s3035_s13 = sphi %s3072_s13, %s3909_s13   ;;  %s3031_s12 = sphi %s3070_s12, %s3908_s12  }
   0x4   : > { %p26_p0 = scmp.ge.s32.totalorder %s25_s17, 3  ;;  %p49_p2 = scmp.eq.s32.totalorder %s3047_s16, 0 }
   0x5   : > { %s41_s19 = sadd.s32 1, %s3035_s13  ;;  %p2233_p5 = scmp.ge.s32.totalorder %s3047_s16, 3 }
   0x6   : > { %s3913_s17 = smov (%p26_p0, %s25_s17), 0  ;;  %p50_p3 = por %p49_p2, %p48_p1 }
   0x7   : > { %s37_s18 = ssub.s32 %s3043_s15, %s3913_s17  ;;  %164 = sbr.rel (%p2233_p5) target bundleno = 65 (0x41), region = 20 }
   0x8   : > { %p39_p4 = scmp.eq.s32.totalorder %s37_s18, 0 }
   0xa   : > { %s3105_s20 = scalar_select %p39_p4, %s3035_s13, %s41_s19  }
   0xc   : > { %167 = sbr.rel (!%p50_p3) target bundleno = 65 (0x41), region = 24  ;;  %s169_s21 = sand.u32 (%p50_p3), 1, %s3035_s13  }
   0xd   : > { %s2820_s22 = smul.u32 (%p50_p3), 24, %s3043_s15 }
   0xe   : > { %s2966_s23 = smul.u32 (%p50_p3), 384, %s169_s21 }
   0xf   : > { %s3113_s26 = scalar_lea.vmem (%p50_p3), %s3904_s0, %s2820_s22 }
  0x10   : > { %v190_v0 = vld [vmem:[%s3113_s26] sm:$0xff] (%p50_p3)  ;;  %v192_v1 = vld [vmem:[%s3113_s26 + $0x8] sm:$0xff] (%p50_p3)  ;;  %v194_v2 = vld [vmem:[%s3113_s26 + $0x10] sm:$0xff] (%p50_p3)  ;;  %s3118_s27 = scalar_lea.vmem (%p50_p3), [#allocation3], %s2966_s23 }
  0x11   : > { %191 = vst [vmem:[%s3118_s27] sm:$0xff] %v190_v0  ;;  %v196_v3 = vld [vmem:[%s3113_s26 + $0x48] sm:$0xff]  ;;  %v198_v4 = vld [vmem:[%s3113_s26 + $0x50] sm:$0xff]  ;;  %v200_v5 = vld [vmem:[%s3113_s26 + $0x58] sm:$0xff] }
  0x12   : > { %193 = vst [vmem:[%s3118_s27 + $0x8] sm:$0xff] %v192_v1  ;;  %v202_v6 = vld [vmem:[%s3113_s26 + $0x90] sm:$0xff]  ;;  %v204_v7 = vld [vmem:[%s3113_s26 + $0x98] sm:$0xff]  ;;  %v206_v8 = vld [vmem:[%s3113_s26 + $0xa0] sm:$0xff] }
  0x13   : > { %195 = vst [vmem:[%s3118_s27 + $0x10] sm:$0xff] %v194_v2  ;;  %v208_v9 = vld [vmem:[%s3113_s26 + $0xd8] sm:$0xff]  ;;  %v210_v10 = vld [vmem:[%s3113_s26 + $0xe0] sm:$0xff]  ;;  %v212_v11 = vld [vmem:[%s3113_s26 + $0xe8] sm:$0xff] }
  0x14   : > { %197 = vst [vmem:[%s3118_s27 + $0x18] sm:$0xff] %v196_v3  ;;  %v214_v12 = vld [vmem:[%s3113_s26 + $0x120] sm:$0xff]  ;;  %v216_v13 = vld [vmem:[%s3113_s26 + $0x128] sm:$0xff]  ;;  %v218_v14 = vld [vmem:[%s3113_s26 + $0x130] sm:$0xff] }
  0x15   : > { %199 = vst [vmem:[%s3118_s27 + $0x20] sm:$0xff] %v198_v4  ;;  %v220_v15 = vld [vmem:[%s3113_s26 + $0x168] sm:$0xff]  ;;  %v222_v16 = vld [vmem:[%s3113_s26 + $0x170] sm:$0xff]  ;;  %v224_v17 = vld [vmem:[%s3113_s26 + $0x178] sm:$0xff] }
  0x16   : > { %201 = vst [vmem:[%s3118_s27 + $0x28] sm:$0xff] %v200_v5  ;;  %v226_v18 = vld [vmem:[%s3113_s26 + $0x1b0] sm:$0xff]  ;;  %v228_v19 = vld [vmem:[%s3113_s26 + $0x1b8] sm:$0xff]  ;;  %v230_v20 = vld [vmem:[%s3113_s26 + $0x1c0] sm:$0xff] }
  0x17   : > { %203 = vst [vmem:[%s3118_s27 + $0x30] sm:$0xff] %v202_v6  ;;  %v232_v21 = vld [vmem:[%s3113_s26 + $0x1f8] sm:$0xff]  ;;  %v234_v22 = vld [vmem:[%s3113_s26 + $0x200] sm:$0xff]  ;;  %v236_v23 = vld [vmem:[%s3113_s26 + $0x208] sm:$0xff] }
  0x18   : > { %205 = vst [vmem:[%s3118_s27 + $0x38] sm:$0xff] %v204_v7  ;;  %v238_v24 = vld [vmem:[%s3113_s26 + $0x240] sm:$0xff]  ;;  %v240_v25 = vld [vmem:[%s3113_s26 + $0x248] sm:$0xff]  ;;  %v242_v26 = vld [vmem:[%s3113_s26 + $0x250] sm:$0xff] }
  0x19   : > { %207 = vst [vmem:[%s3118_s27 + $0x40] sm:$0xff] %v206_v8  ;;  %v244_v27 = vld [vmem:[%s3113_s26 + $0x288] sm:$0xff]  ;;  %v246_v28 = vld [vmem:[%s3113_s26 + $0x290] sm:$0xff]  ;;  %v248_v29 = vld [vmem:[%s3113_s26 + $0x298] sm:$0xff] }
  0x1a   : > { %209 = vst [vmem:[%s3118_s27 + $0x48] sm:$0xff] %v208_v9  ;;  %v250_v30 = vld [vmem:[%s3113_s26 + $0x2d0] sm:$0xff]  ;;  %v252_v31 = vld [vmem:[%s3113_s26 + $0x2d8] sm:$0xff]  ;;  %v254_v32 = vld [vmem:[%s3113_s26 + $0x2e0] sm:$0xff] }
  0x1b   : > { %211 = vst [vmem:[%s3118_s27 + $0x50] sm:$0xff] %v210_v10  ;;  %v256_v33 = vld [vmem:[%s3113_s26 + $0x318] sm:$0xff]  ;;  %v258_v34 = vld [vmem:[%s3113_s26 + $0x320] sm:$0xff]  ;;  %v260_v35 = vld [vmem:[%s3113_s26 + $0x328] sm:$0xff] }
  0x1c   : > { %213 = vst [vmem:[%s3118_s27 + $0x58] sm:$0xff] %v212_v11  ;;  %v262_v36 = vld [vmem:[%s3113_s26 + $0x360] sm:$0xff]  ;;  %v264_v37 = vld [vmem:[%s3113_s26 + $0x368] sm:$0xff]  ;;  %v266_v38 = vld [vmem:[%s3113_s26 + $0x370] sm:$0xff] }
  0x1d   : > { %215 = vst [vmem:[%s3118_s27 + $0x60] sm:$0xff] %v214_v12  ;;  %v268_v39 = vld [vmem:[%s3113_s26 + $0x3a8] sm:$0xff]  ;;  %v270_v40 = vld [vmem:[%s3113_s26 + $0x3b0] sm:$0xff]  ;;  %v272_v41 = vld [vmem:[%s3113_s26 + $0x3b8] sm:$0xff] }
  0x1e   : > { %217 = vst [vmem:[%s3118_s27 + $0x68] sm:$0xff] %v216_v13  ;;  %v274_v42 = vld [vmem:[%s3113_s26 + $0x3f0] sm:$0xff]  ;;  %v276_v43 = vld [vmem:[%s3113_s26 + $0x3f8] sm:$0xff]  ;;  %v278_v44 = vld [vmem:[%s3113_s26 + $0x400] sm:$0xff] }
  0x1f   : > { %219 = vst [vmem:[%s3118_s27 + $0x70] sm:$0xff] %v218_v14  ;;  %v280_v45 = vld [vmem:[%s3113_s26 + $0x438] sm:$0xff]  ;;  %v282_v46 = vld [vmem:[%s3113_s26 + $0x440] sm:$0xff]  ;;  %v284_v47 = vld [vmem:[%s3113_s26 + $0x448] sm:$0xff] }
  0x20   : > { %221 = vst [vmem:[%s3118_s27 + $0x78] sm:$0xff] %v220_v15 }
  0x21   : > { %223 = vst [vmem:[%s3118_s27 + $0x80] sm:$0xff] %v222_v16 }
  0x22   : > { %225 = vst [vmem:[%s3118_s27 + $0x88] sm:$0xff] %v224_v17 }
  0x23   : > { %227 = vst [vmem:[%s3118_s27 + $0x90] sm:$0xff] %v226_v18 }
  0x24   : > { %229 = vst [vmem:[%s3118_s27 + $0x98] sm:$0xff] %v228_v19 }
  0x25   : > { %231 = vst [vmem:[%s3118_s27 + $0xa0] sm:$0xff] %v230_v20 }
  0x26   : > { %233 = vst [vmem:[%s3118_s27 + $0xa8] sm:$0xff] %v232_v21 }
  0x27   : > { %235 = vst [vmem:[%s3118_s27 + $0xb0] sm:$0xff] %v234_v22 }
  0x28   : > { %237 = vst [vmem:[%s3118_s27 + $0xb8] sm:$0xff] %v236_v23 }
  0x29   : > { %239 = vst [vmem:[%s3118_s27 + $0xc0] sm:$0xff] %v238_v24 }
  0x2a   : > { %241 = vst [vmem:[%s3118_s27 + $0xc8] sm:$0xff] %v240_v25 }
  0x2b   : > { %243 = vst [vmem:[%s3118_s27 + $0xd0] sm:$0xff] %v242_v26 }
  0x2c   : > { %245 = vst [vmem:[%s3118_s27 + $0xd8] sm:$0xff] %v244_v27 }
  0x2d   : > { %247 = vst [vmem:[%s3118_s27 + $0xe0] sm:$0xff] %v246_v28 }
  0x2e   : > { %249 = vst [vmem:[%s3118_s27 + $0xe8] sm:$0xff] %v248_v29 }
  0x2f   : > { %251 = vst [vmem:[%s3118_s27 + $0xf0] sm:$0xff] %v250_v30 }
  0x30   : > { %253 = vst [vmem:[%s3118_s27 + $0xf8] sm:$0xff] %v252_v31 }
  0x31   : > { %255 = vst [vmem:[%s3118_s27 + $0x100] sm:$0xff] %v254_v32 }
  0x32   : > { %257 = vst [vmem:[%s3118_s27 + $0x108] sm:$0xff] %v256_v33 }
  0x33   : > { %259 = vst [vmem:[%s3118_s27 + $0x110] sm:$0xff] %v258_v34 }
  0x34   : > { %261 = vst [vmem:[%s3118_s27 + $0x118] sm:$0xff] %v260_v35 }
  0x35   : > { %263 = vst [vmem:[%s3118_s27 + $0x120] sm:$0xff] %v262_v36 }
  0x36   : > { %265 = vst [vmem:[%s3118_s27 + $0x128] sm:$0xff] %v264_v37 }
  0x37   : > { %267 = vst [vmem:[%s3118_s27 + $0x130] sm:$0xff] %v266_v38 }
  0x38   : > { %269 = vst [vmem:[%s3118_s27 + $0x138] sm:$0xff] %v268_v39 }
  0x39   : > { %271 = vst [vmem:[%s3118_s27 + $0x140] sm:$0xff] %v270_v40 }
  0x3a   : > { %273 = vst [vmem:[%s3118_s27 + $0x148] sm:$0xff] %v272_v41 }
  0x3b   : > { %275 = vst [vmem:[%s3118_s27 + $0x150] sm:$0xff] %v274_v42 }
  0x3c   : > { %277 = vst [vmem:[%s3118_s27 + $0x158] sm:$0xff] %v276_v43 }
  0x3d   : > { %279 = vst [vmem:[%s3118_s27 + $0x160] sm:$0xff] %v278_v44 }
  0x3e   : > { %281 = vst [vmem:[%s3118_s27 + $0x168] sm:$0xff] %v280_v45 }
  0x3f   : > { %283 = vst [vmem:[%s3118_s27 + $0x170] sm:$0xff] %v282_v46 }
  0x40   : > { %285 = vst [vmem:[%s3118_s27 + $0x178] sm:$0xff] %v284_v47 }
  0x41 PF: > { %p2235_p6 = scmp.ge.s32.totalorder %s3047_s16, 1  ;;  %p305_p7 = scmp.lt.s32.totalorder %s3047_s16, 4 }
  0x43   : > { %p306_p8 = pnand %p2235_p6, %p305_p7 }
  0x44   : > { %s312_s28 = sand.u32 (!%p306_p8), 1, %s3031_s12   ;;  %s356_s29 = smul.u32 (!%p306_p8), 96, %s3039_s14 }
  0x45   : > { %309 = sbr.rel (%p306_p8) target bundleno = 691 (0x2b3), region = 51  ;;  %p2238_p10 = scmp.ne.s32.totalorder (!%p306_p8), %s3039_s14, 0 }
  0x46   : > { %s2967_s30 = smul.u32 (!%p306_p8), 384, %s312_s28  ;;  %p358_p9 = scmp.lt.s32.totalorder (!%p306_p8), %s356_s29, 287 }
  0x48   : > { %s3222_s8 = scalar_lea.vmem (!%p306_p8), [#allocation3], %s2967_s30 }
  0x4a   : > { %s3915_s29 = smov (!%p358_p9, %s356_s29), 287  ;;  %388 = sbr.rel (%p2238_p10) target bundleno = 112 (0x70), region = 59 }
  0x4b   : > { %s2821_s4 = sshll.u32 %s3915_s29, 3 }
  0x4c   : > { %s3220_s7 = scalar_lea.vmem %s3905_s1, %s2821_s4 }
  0x4f   : > { %v3049_v48 = vmov 0.0  }
  0x50   : > { %389 = vst [vmem:[#allocation2 + $0xb0] sm:$0xff] %v3049_v48 }
  0x51   : > { %390 = vst [vmem:[#allocation2] sm:$0xff] %v3049_v48 }
  0x52   : > { %391 = vst [vmem:[#allocation2 + $0xd8] sm:$0xff] %v3049_v48 }
  0x53   : > { %392 = vst [vmem:[#allocation2 + $0x18] sm:$0xff] %v3049_v48 }
  0x54   : > { %393 = vst [vmem:[#allocation2 + $0x50] sm:$0xff] %v3049_v48 }
  0x55   : > { %394 = vst [vmem:[#allocation2 + $0x68] sm:$0xff] %v3049_v48 }
  0x56   : > { %395 = vst [vmem:[#allocation2 + $0x30] sm:$0xff] %v3049_v48 }
  0x57   : > { %396 = vst [vmem:[#allocation2 + $0x48] sm:$0xff] %v3049_v48 }
  0x58   : > { %397 = vst [vmem:[#allocation2 + $0x80] sm:$0xff] %v3049_v48 }
  0x59   : > { %398 = vst [vmem:[#allocation2 + $0x88] sm:$0xff] %v3049_v48 }
  0x5a   : > { %399 = vst [vmem:[#allocation2 + $0xe8] sm:$0xff] %v3049_v48 }
  0x5b   : > { %400 = vst [vmem:[#allocation2 + $0xb8] sm:$0xff] %v3049_v48 }
  0x5c   : > { %401 = vst [vmem:[#allocation2 + $0x60] sm:$0xff] %v3049_v48 }
  0x5d   : > { %402 = vst [vmem:[#allocation2 + $0xf0] sm:$0xff] %v3049_v48 }
  0x5e   : > { %403 = vst [vmem:[#allocation2 + $0x8] sm:$0xff] %v3049_v48 }
  0x5f   : > { %404 = vst [vmem:[#allocation2 + $0x78] sm:$0xff] %v3049_v48 }
  0x60   : > { %405 = vst [vmem:[#allocation2 + $0x38] sm:$0xff] %v3049_v48 }
  0x61   : > { %406 = vst [vmem:[#allocation2 + $0x58] sm:$0xff] %v3049_v48 }
  0x62   : > { %407 = vst [vmem:[#allocation2 + $0x40] sm:$0xff] %v3049_v48 }
  0x63   : > { %408 = vst [vmem:[#allocation2 + $0xc8] sm:$0xff] %v3049_v48 }
  0x64   : > { %409 = vst [vmem:[#allocation2 + $0xe0] sm:$0xff] %v3049_v48 }
  0x65   : > { %410 = vst [vmem:[#allocation2 + $0x90] sm:$0xff] %v3049_v48 }
  0x66   : > { %411 = vst [vmem:[#allocation2 + $0x70] sm:$0xff] %v3049_v48 }
  0x67   : > { %412 = vst [vmem:[#allocation2 + $0xc0] sm:$0xff] %v3049_v48 }
  0x68   : > { %413 = vst [vmem:[#allocation2 + $0xa8] sm:$0xff] %v3049_v48 }
  0x69   : > { %414 = vst [vmem:[#allocation2 + $0xd0] sm:$0xff] %v3049_v48 }
  0x6a   : > { %415 = vst [vmem:[#allocation2 + $0x10] sm:$0xff] %v3049_v48 }
  0x6b   : > { %416 = vst [vmem:[#allocation2 + $0x28] sm:$0xff] %v3049_v48 }
  0x6c   : > { %417 = vst [vmem:[#allocation2 + $0xa0] sm:$0xff] %v3049_v48 }
  0x6d   : > { %418 = vst [vmem:[#allocation2 + $0xf8] sm:$0xff] %v3049_v48 }
  0x6e   : > { %419 = vst [vmem:[#allocation2 + $0x20] sm:$0xff] %v3049_v48 }
  0x6f   : > { %420 = vst [vmem:[#allocation2 + $0x98] sm:$0xff] %v3049_v48 }
  0x70 PF: > { %v2489_v49 = vld [vmem:[%s3220_s7 + $0x70] sm:$0xf]  ;;  %v2885_v50 = vld [vmem:[%s3220_s7 + $0x74] sm:$0xf0]  ;;  %v2481_v60 = vld [vmem:[%s3220_s7 + $0x60] sm:$0xf] }
  0x71   : > { %v2553_v51 = vld [vmem:[%s3220_s7 + $0xf0] sm:$0xf]  ;;  %v2490_v52 = vor.u32 %v2885_v50, %v2489_v49  ;;  %v2901_v53 = vld [vmem:[%s3220_s7 + $0xf4] sm:$0xf0]  ;;  %v2883_v62 = vld [vmem:[%s3220_s7 + $0x64] sm:$0xf0] }
  0x72   : > { %v2617_v54 = vld [vmem:[%s3220_s7 + $0x170] sm:$0xf]  ;;  %v2917_v55 = vld [vmem:[%s3220_s7 + $0x174] sm:$0xf0]  ;;  %v2554_v56 = vor.u32 %v2901_v53, %v2553_v51  ;;  %v2545_v63 = vld [vmem:[%s3220_s7 + $0xe0] sm:$0xf]  ;;  %v2482_v1 = vor.u32 %v2883_v62, %v2481_v60 }
  0x73   : > { %v2618_v57 = vor.u32 %v2917_v55, %v2617_v54  ;;  %v2681_v58 = vld [vmem:[%s3220_s7 + $0x1f0] sm:$0xf]  ;;  %v2933_v59 = vld [vmem:[%s3220_s7 + $0x1f4] sm:$0xf0]  ;;  %1317 = vmatpush.bf16.msra.mxu0 %v2490_v52  ;;  %v2899_v0 = vld [vmem:[%s3220_s7 + $0xe4] sm:$0xf0] }
  0x74   : > { %v2682_v61 = vor.u32 %v2933_v59, %v2681_v58  ;;  %1366 = vmatpush.bf16.msra.mxu1 %v2554_v56  ;;  %v2546_v2 = vor.u32 %v2899_v0, %v2545_v63  ;;  %v2609_v3 = vld [vmem:[%s3220_s7 + $0x160] sm:$0xf]  ;;  %v2915_v4 = vld [vmem:[%s3220_s7 + $0x164] sm:$0xf0]  ;;  %v2473_v8 = vld [vmem:[%s3220_s7 + $0x50] sm:$0xf] }
  0x75   : > { %1415 = vmatpush.bf16.msra.mxu2 %v2618_v57  ;;  %v2673_v5 = vld [vmem:[%s3220_s7 + $0x1e0] sm:$0xf]  ;;  %v2610_v6 = vor.u32 %v2915_v4, %v2609_v3  ;;  %v2931_v7 = vld [vmem:[%s3220_s7 + $0x1e4] sm:$0xf0]  ;;  %v2881_v9 = vld [vmem:[%s3220_s7 + $0x54] sm:$0xf0] }
  0x76   : > { %1464 = vmatpush.bf16.msra.mxu3 %v2682_v61  ;;  %v2674_v10 = vor.u32 %v2931_v7, %v2673_v5  ;;  %v2537_v11 = vld [vmem:[%s3220_s7 + $0xd0] sm:$0xf]  ;;  %v2897_v12 = vld [vmem:[%s3220_s7 + $0xd4] sm:$0xf0]  ;;  %v2474_v14 = vor.u32 %v2881_v9, %v2473_v8  ;;  %v2465_v20 = vld [vmem:[%s3220_s7 + $0x40] sm:$0xf] }
  0x77   : > { %v2601_v13 = vld [vmem:[%s3220_s7 + $0x150] sm:$0xf]  ;;  %1318 = vmatpush.bf16.msra.mxu0 %v2482_v1  ;;  %v2913_v15 = vld [vmem:[%s3220_s7 + $0x154] sm:$0xf0]  ;;  %v2538_v18 = vor.u32 %v2897_v12, %v2537_v11  ;;  %v2879_v21 = vld [vmem:[%s3220_s7 + $0x44] sm:$0xf0] }
  0x78   : > { %v2665_v16 = vld [vmem:[%s3220_s7 + $0x1d0] sm:$0xf]  ;;  %v2929_v17 = vld [vmem:[%s3220_s7 + $0x1d4] sm:$0xf0]  ;;  %1367 = vmatpush.bf16.msra.mxu1 %v2546_v2  ;;  %v2602_v19 = vor.u32 %v2913_v15, %v2601_v13  ;;  %v2529_v22 = vld [vmem:[%s3220_s7 + $0xc0] sm:$0xf]  ;;  %v2466_v29 = vor.u32 %v2879_v21, %v2465_v20 }
  0x79   : > { %1416 = vmatpush.bf16.msra.mxu2 %v2610_v6  ;;  %v2666_v23 = vor.u32 %v2929_v17, %v2665_v16  ;;  %v2895_v24 = vld [vmem:[%s3220_s7 + $0xc4] sm:$0xf0]  ;;  %v2593_v25 = vld [vmem:[%s3220_s7 + $0x140] sm:$0xf]  ;;  %v2457_v32 = vld [vmem:[%s3220_s7 + $0x30] sm:$0xf] }
  0x7a   : > { %1465 = vmatpush.bf16.msra.mxu3 %v2674_v10  ;;  %v2911_v26 = vld [vmem:[%s3220_s7 + $0x144] sm:$0xf0]  ;;  %v2657_v27 = vld [vmem:[%s3220_s7 + $0x1c0] sm:$0xf]  ;;  %v2530_v30 = vor.u32 %v2895_v24, %v2529_v22  ;;  %v2877_v33 = vld [vmem:[%s3220_s7 + $0x34] sm:$0xf0] }
  0x7b   : > { %v2927_v28 = vld [vmem:[%s3220_s7 + $0x1c4] sm:$0xf0]  ;;  %1319 = vmatpush.bf16.msra.mxu0 %v2474_v14  ;;  %v2594_v31 = vor.u32 %v2911_v26, %v2593_v25  ;;  %v2521_v34 = vld [vmem:[%s3220_s7 + $0xb0] sm:$0xf]  ;;  %v2893_v36 = vld [vmem:[%s3220_s7 + $0xb4] sm:$0xf0]  ;;  %v2458_v41 = vor.u32 %v2877_v33, %v2457_v32 }
  0x7c   : > { %1368 = vmatpush.bf16.msra.mxu1 %v2538_v18  ;;  %v2658_v35 = vor.u32 %v2927_v28, %v2657_v27  ;;  %v2585_v37 = vld [vmem:[%s3220_s7 + $0x130] sm:$0xf]  ;;  %v2909_v38 = vld [vmem:[%s3220_s7 + $0x134] sm:$0xf0]  ;;  %v2522_v42 = vor.u32 %v2893_v36, %v2521_v34  ;;  %v2449_v44 = vld [vmem:[%s3220_s7 + $0x20] sm:$0xf] }
  0x7d   : > { %1417 = vmatpush.bf16.msra.mxu2 %v2602_v19  ;;  %v2649_v39 = vld [vmem:[%s3220_s7 + $0x1b0] sm:$0xf]  ;;  %v2925_v40 = vld [vmem:[%s3220_s7 + $0x1b4] sm:$0xf0]  ;;  %v2586_v43 = vor.u32 %v2909_v38, %v2585_v37  ;;  %v2875_v45 = vld [vmem:[%s3220_s7 + $0x24] sm:$0xf0] }
  0x7e   : > { %1466 = vmatpush.bf16.msra.mxu3 %v2666_v23  ;;  %v2513_v46 = vld [vmem:[%s3220_s7 + $0xa0] sm:$0xf]  ;;  %v2650_v47 = vor.u32 %v2925_v40, %v2649_v39  ;;  %v2891_v48 = vld [vmem:[%s3220_s7 + $0xa4] sm:$0xf0]  ;;  %v2450_v53 = vor.u32 %v2875_v45, %v2449_v44  ;;  %v2441_v56 = vld [vmem:[%s3220_s7 + $0x10] sm:$0xf] }
  0x7f   : > { %1320 = vmatpush.bf16.msra.mxu0 %v2466_v29  ;;  %v2577_v49 = vld [vmem:[%s3220_s7 + $0x120] sm:$0xf]  ;;  %v2907_v50 = vld [vmem:[%s3220_s7 + $0x124] sm:$0xf0]  ;;  %v2514_v54 = vor.u32 %v2891_v48, %v2513_v46  ;;  %v2873_v57 = vld [vmem:[%s3220_s7 + $0x14] sm:$0xf0] }
  0x80   : > { %1369 = vmatpush.bf16.msra.mxu1 %v2530_v30  ;;  %v2641_v51 = vld [vmem:[%s3220_s7 + $0x1a0] sm:$0xf]  ;;  %v2923_v52 = vld [vmem:[%s3220_s7 + $0x1a4] sm:$0xf0]  ;;  %v2578_v55 = vor.u32 %v2907_v50, %v2577_v49  ;;  %v2505_v58 = vld [vmem:[%s3220_s7 + $0x90] sm:$0xf]  ;;  %v2442_v2 = vor.u32 %v2873_v57, %v2441_v56 }
  0x81   : > { %1418 = vmatpush.bf16.msra.mxu2 %v2594_v31  ;;  %v2642_v59 = vor.u32 %v2923_v52, %v2641_v51  ;;  %v2889_v60 = vld [vmem:[%s3220_s7 + $0x94] sm:$0xf0]  ;;  %v2569_v61 = vld [vmem:[%s3220_s7 + $0x110] sm:$0xf]  ;;  %v2433_v1 = vld [vmem:[%s3220_s7] sm:$0xf] }
  0x82   : > { %1467 = vmatpush.bf16.msra.mxu3 %v2658_v35  ;;  %v2905_v62 = vld [vmem:[%s3220_s7 + $0x114] sm:$0xf0]  ;;  %v2633_v63 = vld [vmem:[%s3220_s7 + $0x190] sm:$0xf]  ;;  %v2871_v3 = vld [vmem:[%s3220_s7 + $0x4] sm:$0xf0]  ;;  %v2506_v6 = vor.u32 %v2889_v60, %v2505_v58 }
  0x83   : > { %1321 = vmatpush.bf16.msra.mxu0 %v2458_v41  ;;  %v2921_v0 = vld [vmem:[%s3220_s7 + $0x194] sm:$0xf0]  ;;  %v2497_v4 = vld [vmem:[%s3220_s7 + $0x80] sm:$0xf]  ;;  %v2887_v5 = vld [vmem:[%s3220_s7 + $0x84] sm:$0xf0]  ;;  %v2570_v7 = vor.u32 %v2905_v62, %v2569_v61  ;;  %v2434_v19 = vor.u32 %v2871_v3, %v2433_v1 }
  0x84   : > { %1370 = vmatpush.bf16.msra.mxu1 %v2522_v42  ;;  %v2561_v8 = vld [vmem:[%s3220_s7 + $0x100] sm:$0xf]  ;;  %v2903_v9 = vld [vmem:[%s3220_s7 + $0x104] sm:$0xf0]  ;;  %v2634_v11 = vor.u32 %v2921_v0, %v2633_v63  ;;  %v2825_v14 = vld [vmem:[%s3222_s8 + $0x14] sm:$0xf0]  ;;  %v2498_v23 = vor.u32 %v2887_v5, %v2497_v4 }
  0x85   : > { %1419 = vmatpush.bf16.msra.mxu2 %v2586_v43  ;;  %v2625_v10 = vld [vmem:[%s3220_s7 + $0x180] sm:$0xf]  ;;  %v2919_v12 = vld [vmem:[%s3220_s7 + $0x184] sm:$0xf0]  ;;  %v2822_v15 = vld [vmem:[%s3222_s8 + $0x4] sm:$0xf]  ;;  %v2562_v24 = vor.u32 %v2903_v9, %v2561_v8 }
  0x86   : > { %1468 = vmatpush.bf16.msra.mxu3 %v2650_v47  ;;  %v2241_v13 = vld [vmem:[%s3222_s8] sm:$0xf]  ;;  %v2243_v16 = vld [vmem:[%s3222_s8 + $0x18] sm:$0xf0]  ;;  %v2884_v17 = vld [vmem:[%s3220_s7 + $0x74] sm:$0xf]  ;;  %v2626_v28 = vor.u32 %v2919_v12, %v2625_v10 }
  0x87   : > { %1322 = vmatpush.bf16.msra.mxu0 %v2450_v53  ;;  %v2491_v18 = vld [vmem:[%s3220_s7 + $0x78] sm:$0xf0]  ;;  %v2249_v20 = vld [vmem:[%s3222_s8 + $0x8] sm:$0xf]  ;;  %v2900_v21 = vld [vmem:[%s3220_s7 + $0xf4] sm:$0xf]  ;;  %v3304_v33 = vor.u32 %v2825_v14, %v2241_v13  ;;  %v3309_v38 = vor.u32 %v2822_v15, %v2243_v16 }
  0x88   : > { %1371 = vmatpush.bf16.msra.mxu1 %v2514_v54  ;;  %v2555_v22 = vld [vmem:[%s3220_s7 + $0xf8] sm:$0xf0]  ;;  %v2826_v25 = vld [vmem:[%s3222_s8 + $0x1c] sm:$0xf0]  ;;  %v2823_v26 = vld [vmem:[%s3222_s8 + $0xc] sm:$0xf]  ;;  %v2494_v29 = vor.u32 %v2884_v17, %v2491_v18 }
  0x89   : > { %1420 = vmatpush.bf16.msra.mxu2 %v2578_v55  ;;  %v2251_v27 = vld [vmem:[%s3222_s8 + $0x20] sm:$0xf0]  ;;  %v2745_v30 = vld [vmem:[%s3220_s7 + $0x270] sm:$0xf]  ;;  %v2949_v31 = vld [vmem:[%s3220_s7 + $0x274] sm:$0xf0]  ;;  %v2558_v34 = vor.u32 %v2900_v21, %v2555_v22  ;;  %v3311_v39 = vor.u32 %v2826_v25, %v2249_v20 }
  0x8a   : > { %1469 = vmatpush.bf16.msra.mxu3 %v2642_v59  ;;  %v2809_v32 = vld [vmem:[%s3220_s7 + $0x2f0] sm:$0xf]  ;;  %v2965_v35 = vld [vmem:[%s3220_s7 + $0x2f4] sm:$0xf0]  ;;  %v2882_v36 = vld [vmem:[%s3220_s7 + $0x64] sm:$0xf]  ;;  %v3315_v42 = vor.u32 %v2823_v26, %v2251_v27  ;;  %v2746_v43 = vor.u32 %v2949_v31, %v2745_v30 }
  0x8b   : > { %1323 = vmatpush.bf16.msra.mxu0 %v2442_v2  ;;  %v2483_v37 = vld [vmem:[%s3220_s7 + $0x68] sm:$0xf0]  ;;  %v2898_v40 = vld [vmem:[%s3220_s7 + $0xe4] sm:$0xf]  ;;  %v2810_v44 = vor.u32 %v2965_v35, %v2809_v32  ;;  %v2737_v46 = vld [vmem:[%s3220_s7 + $0x260] sm:$0xf] }
  0x8c   : > { %1372 = vmatpush.bf16.msra.mxu1 %v2506_v6  ;;  %v2547_v41 = vld [vmem:[%s3220_s7 + $0xe8] sm:$0xf0]  ;;  %v2486_v45 = vor.u32 %v2882_v36, %v2483_v37  ;;  %v2947_v47 = vld [vmem:[%s3220_s7 + $0x264] sm:$0xf0]  ;;  %v2801_v49 = vld [vmem:[%s3220_s7 + $0x2e0] sm:$0xf] }
  0x8d   : > { %1421 = vmatpush.bf16.msra.mxu2 %v2570_v7  ;;  %v2550_v48 = vor.u32 %v2898_v40, %v2547_v41  ;;  %v2963_v50 = vld [vmem:[%s3220_s7 + $0x2e4] sm:$0xf0]  ;;  %v2738_v51 = vor.u32 %v2947_v47, %v2737_v46  ;;  %v2880_v52 = vld [vmem:[%s3220_s7 + $0x54] sm:$0xf]  ;;  %v2475_v53 = vld [vmem:[%s3220_s7 + $0x58] sm:$0xf0] }
  0x8e   : > { %1470 = vmatpush.bf16.msra.mxu3 %v2634_v11  ;;  %v2729_v54 = vld [vmem:[%s3220_s7 + $0x250] sm:$0xf]  ;;  %v2802_v55 = vor.u32 %v2963_v50, %v2801_v49  ;;  %v2478_v56 = vor.u32 %v2880_v52, %v2475_v53  ;;  %v2945_v57 = vld [vmem:[%s3220_s7 + $0x254] sm:$0xf0]  ;;  %v2896_v58 = vld [vmem:[%s3220_s7 + $0xd4] sm:$0xf] }
  0x8f   : > { %1324 = vmatpush.bf16.msra.mxu0 %v2434_v19  ;;  %v2539_v59 = vld [vmem:[%s3220_s7 + $0xd8] sm:$0xf0]  ;;  %v2793_v61 = vld [vmem:[%s3220_s7 + $0x2d0] sm:$0xf]  ;;  %v2961_v62 = vld [vmem:[%s3220_s7 + $0x2d4] sm:$0xf0]  ;;  %v2730_v63 = vor.u32 %v2945_v57, %v2729_v54 }
  0x90   : > { %1373 = vmatpush.bf16.msra.mxu1 %v2498_v23  ;;  %v2542_v60 = vor.u32 %v2896_v58, %v2539_v59  ;;  %v2794_v0 = vor.u32 %v2961_v62, %v2793_v61  ;;  %v2265_v1 = vld [vmem:[%s3222_s8 + $0x30] sm:$0xf]  ;;  %v2831_v2 = vld [vmem:[%s3222_s8 + $0x44] sm:$0xf0]  ;;  %v2828_v3 = vld [vmem:[%s3222_s8 + $0x34] sm:$0xf] }
  0x91   : > { %1422 = vmatpush.bf16.msra.mxu2 %v2562_v24  ;;  %v2267_v4 = vld [vmem:[%s3222_s8 + $0x48] sm:$0xf0]  ;;  %v2273_v5 = vld [vmem:[%s3222_s8 + $0x38] sm:$0xf]  ;;  %v2832_v6 = vld [vmem:[%s3222_s8 + $0x4c] sm:$0xf0]  ;;  %v3341_v9 = vor.u32 %v2831_v2, %v2265_v1 }
  0x92   : > { %1471 = vmatpush.bf16.msra.mxu3 %v2626_v28  ;;  %1325 = vmatmul.bf16.vlgmr.msra.gmra.mxu0 %v3304_v33  ;;  %v2829_v7 = vld [vmem:[%s3222_s8 + $0x3c] sm:$0xf]  ;;  %v2275_v8 = vld [vmem:[%s3222_s8 + $0x50] sm:$0xf0]  ;;  %v3343_v10 = vor.u32 %v2828_v3, %v2267_v4  ;;  %v3345_v11 = vor.u32 %v2832_v6, %v2273_v5  ;;  %v2878_v13 = vld [vmem:[%s3220_s7 + $0x44] sm:$0xf] }
  0x93   : > { %1374 = vmatmul.bf16.vlgmr.msra.gmra.mxu1 %v3309_v38  ;;  %1513 = vmatpush.bf16.msrb.mxu0 %v2746_v43  ;;  %v3347_v12 = vor.u32 %v2829_v7, %v2275_v8  ;;  %v2467_v14 = vld [vmem:[%s3220_s7 + $0x48] sm:$0xf0]  ;;  %v2721_v15 = vld [vmem:[%s3220_s7 + $0x240] sm:$0xf]  ;;  %v2943_v17 = vld [vmem:[%s3220_s7 + $0x244] sm:$0xf0] }
  0x94   : > { %1423 = vmatmul.bf16.vlgmr.msra.gmra.mxu2 %v3311_v39  ;;  %1562 = vmatpush.bf16.msrb.mxu1 %v2810_v44  ;;  %v2470_v16 = vor.u32 %v2878_v13, %v2467_v14  ;;  %v2894_v18 = vld [vmem:[%s3220_s7 + $0xc4] sm:$0xf]  ;;  %v2531_v19 = vld [vmem:[%s3220_s7 + $0xc8] sm:$0xf0]  ;;  %v2722_v20 = vor.u32 %v2943_v17, %v2721_v15  ;;  %v2785_v22 = vld [vmem:[%s3220_s7 + $0x2c0] sm:$0xf] }
  0x95   : > { %1611 = vmatpush.bf16.msrb.mxu2 %v2494_v29  ;;  %1472 = vmatmul.bf16.vlgmr.msra.gmra.mxu3 %v3315_v42  ;;  %v2534_v21 = vor.u32 %v2894_v18, %v2531_v19  ;;  %v2959_v23 = vld [vmem:[%s3220_s7 + $0x2c4] sm:$0xf0]  ;;  %v2289_v25 = vld [vmem:[%s3222_s8 + $0x60] sm:$0xf]  ;;  %v2837_v26 = vld [vmem:[%s3222_s8 + $0x74] sm:$0xf0] }
  0x96   : > { %1660 = vmatpush.bf16.msrb.mxu3 %v2558_v34  ;;  %v2786_v24 = vor.u32 %v2959_v23, %v2785_v22  ;;  %v2834_v27 = vld [vmem:[%s3222_s8 + $0x64] sm:$0xf]  ;;  %v2291_v28 = vld [vmem:[%s3222_s8 + $0x78] sm:$0xf0]  ;;  %v2297_v29 = vld [vmem:[%s3222_s8 + $0x68] sm:$0xf]  ;;  %v3369_v34 = vor.u32 %v2837_v26, %v2289_v25 }
  0x97   : > { %1514 = vmatpush.bf16.msrb.mxu0 %v2738_v51  ;;  %v2838_v30 = vld [vmem:[%s3222_s8 + $0x7c] sm:$0xf0]  ;;  %v2835_v31 = vld [vmem:[%s3222_s8 + $0x6c] sm:$0xf]  ;;  %v2299_v32 = vld [vmem:[%s3222_s8 + $0x80] sm:$0xf0]  ;;  %v3371_v35 = vor.u32 %v2834_v27, %v2291_v28 }
  0x98   : > { %1563 = vmatpush.bf16.msrb.mxu1 %v2802_v55  ;;  %v3373_v36 = vor.u32 %v2838_v30, %v2297_v29  ;;  %v3375_v37 = vor.u32 %v2835_v31, %v2299_v32  ;;  %v2876_v40 = vld [vmem:[%s3220_s7 + $0x34] sm:$0xf]  ;;  %v2459_v41 = vld [vmem:[%s3220_s7 + $0x38] sm:$0xf0]  ;;  %v2713_v43 = vld [vmem:[%s3220_s7 + $0x230] sm:$0xf] }
  0x99   : > { %1612 = vmatpush.bf16.msrb.mxu2 %v2486_v45  ;;  %v2462_v44 = vor.u32 %v2876_v40, %v2459_v41  ;;  %v2941_v45 = vld [vmem:[%s3220_s7 + $0x234] sm:$0xf0]  ;;  %v2892_v46 = vld [vmem:[%s3220_s7 + $0xb4] sm:$0xf]  ;;  %v2523_v47 = vld [vmem:[%s3220_s7 + $0xb8] sm:$0xf0] }
  0x9a   : > { %1661 = vmatpush.bf16.msrb.mxu3 %v2550_v48  ;;  %v2714_v48 = vor.u32 %v2941_v45, %v2713_v43  ;;  %v2526_v49 = vor.u32 %v2892_v46, %v2523_v47  ;;  %v2777_v50 = vld [vmem:[%s3220_s7 + $0x2b0] sm:$0xf]  ;;  %v2957_v51 = vld [vmem:[%s3220_s7 + $0x2b4] sm:$0xf0]  ;;  %v2843_v54 = vld [vmem:[%s3222_s8 + $0xa4] sm:$0xf0] }
  0x9b   : > { %1515 = vmatpush.bf16.msrb.mxu0 %v2730_v63  ;;  %v2778_v52 = vor.u32 %v2957_v51, %v2777_v50  ;;  %v2313_v53 = vld [vmem:[%s3222_s8 + $0x90] sm:$0xf]  ;;  %v2840_v55 = vld [vmem:[%s3222_s8 + $0x94] sm:$0xf]  ;;  %v2321_v57 = vld [vmem:[%s3222_s8 + $0x98] sm:$0xf] }
  0x9c   : > { %1564 = vmatpush.bf16.msrb.mxu1 %v2794_v0  ;;  %v2844_v58 = vld [vmem:[%s3222_s8 + $0xac] sm:$0xf0]  ;;  %v2841_v59 = vld [vmem:[%s3222_s8 + $0x9c] sm:$0xf]  ;;  %v3397_v61 = vor.u32 %v2843_v54, %v2313_v53  ;;  %v2874_v1 = vld [vmem:[%s3220_s7 + $0x24] sm:$0xf] }
  0x9d   : > { %1613 = vmatpush.bf16.msrb.mxu2 %v2478_v56  ;;  %v2315_v56 = vld [vmem:[%s3222_s8 + $0xa8] sm:$0xf0]  ;;  %v3401_v63 = vor.u32 %v2844_v58, %v2321_v57  ;;  %v2705_v3 = vld [vmem:[%s3220_s7 + $0x220] sm:$0xf]  ;;  %v2939_v5 = vld [vmem:[%s3220_s7 + $0x224] sm:$0xf0] }
  0x9e   : > { %1662 = vmatpush.bf16.msrb.mxu3 %v2542_v60  ;;  %v2323_v60 = vld [vmem:[%s3222_s8 + $0xb0] sm:$0xf0]  ;;  %v3399_v62 = vor.u32 %v2840_v55, %v2315_v56  ;;  %v2451_v2 = vld [vmem:[%s3220_s7 + $0x28] sm:$0xf0]  ;;  %v2890_v6 = vld [vmem:[%s3220_s7 + $0xa4] sm:$0xf]  ;;  %v2706_v8 = vor.u32 %v2939_v5, %v2705_v3 }
  0x9f   : > { %1516 = vmatpush.bf16.msrb.mxu0 %v2722_v20  ;;  %v3403_v0 = vor.u32 %v2841_v59, %v2323_v60  ;;  %v2454_v4 = vor.u32 %v2874_v1, %v2451_v2  ;;  %v2515_v7 = vld [vmem:[%s3220_s7 + $0xa8] sm:$0xf0]  ;;  %v2769_v14 = vld [vmem:[%s3220_s7 + $0x2a0] sm:$0xf]  ;;  %v2955_v15 = vld [vmem:[%s3220_s7 + $0x2a4] sm:$0xf0] }
  0xa0   : > { %1565 = vmatpush.bf16.msrb.mxu1 %v2786_v24  ;;  %v2518_v13 = vor.u32 %v2890_v6, %v2515_v7  ;;  %v2337_v17 = vld [vmem:[%s3222_s8 + $0xc0] sm:$0xf]  ;;  %v2849_v18 = vld [vmem:[%s3222_s8 + $0xd4] sm:$0xf0]  ;;  %v2846_v19 = vld [vmem:[%s3222_s8 + $0xc4] sm:$0xf] }
  0xa1   : > { %1614 = vmatpush.bf16.msrb.mxu2 %v2470_v16  ;;  %v2770_v16 = vor.u32 %v2955_v15, %v2769_v14  ;;  %v2339_v20 = vld [vmem:[%s3222_s8 + $0xd8] sm:$0xf0]  ;;  %v2850_v22 = vld [vmem:[%s3222_s8 + $0xdc] sm:$0xf0]  ;;  %v2847_v23 = vld [vmem:[%s3222_s8 + $0xcc] sm:$0xf]  ;;  %v3425_v25 = vor.u32 %v2849_v18, %v2337_v17 }
  0xa2   : > { %1330 = vmatmul.bf16.gmra.mxu0 %v3341_v9  ;;  %1663 = vmatpush.bf16.msrb.mxu3 %v2534_v21  ;;  %v2345_v21 = vld [vmem:[%s3222_s8 + $0xc8] sm:$0xf]  ;;  %v2347_v24 = vld [vmem:[%s3222_s8 + $0xe0] sm:$0xf0]  ;;  %v3427_v26 = vor.u32 %v2846_v19, %v2339_v20  ;;  %v2872_v29 = vld [vmem:[%s3220_s7 + $0x14] sm:$0xf] }
  0xa3   : > { %1379 = vmatmul.bf16.gmra.mxu1 %v3343_v10  ;;  %1517 = vmatpush.bf16.msrb.mxu0 %v2714_v48  ;;  %v3429_v27 = vor.u32 %v2850_v22, %v2345_v21  ;;  %v3431_v28 = vor.u32 %v2847_v23, %v2347_v24  ;;  %v2443_v30 = vld [vmem:[%s3220_s7 + $0x18] sm:$0xf0]  ;;  %v2697_v31 = vld [vmem:[%s3220_s7 + $0x210] sm:$0xf]  ;;  %v2937_v40 = vld [vmem:[%s3220_s7 + $0x214] sm:$0xf0] }
  0xa4   : > { %1428 = vmatmul.bf16.gmra.mxu2 %v3345_v11  ;;  %1566 = vmatpush.bf16.msrb.mxu1 %v2778_v52  ;;  %v2446_v32 = vor.u32 %v2872_v29, %v2443_v30  ;;  %v2888_v41 = vld [vmem:[%s3220_s7 + $0x94] sm:$0xf]  ;;  %v2507_v43 = vld [vmem:[%s3220_s7 + $0x98] sm:$0xf0]  ;;  %v2761_v46 = vld [vmem:[%s3220_s7 + $0x290] sm:$0xf] }
  0xa5   : > { %1477 = vmatmul.bf16.gmra.mxu3 %v3347_v12  ;;  %1615 = vmatpush.bf16.msrb.mxu2 %v2462_v44  ;;  %v2698_v44 = vor.u32 %v2937_v40, %v2697_v31  ;;  %v2510_v45 = vor.u32 %v2888_v41, %v2507_v43  ;;  %v2953_v47 = vld [vmem:[%s3220_s7 + $0x294] sm:$0xf0]  ;;  %v2855_v50 = vld [vmem:[%s3222_s8 + $0x104] sm:$0xf0]  ;;  %v2852_v51 = vld [vmem:[%s3222_s8 + $0xf4] sm:$0xf] }
  0xa6   : > { %1664 = vmatpush.bf16.msrb.mxu3 %v2526_v49  ;;  %v2762_v48 = vor.u32 %v2953_v47, %v2761_v46  ;;  %v2361_v49 = vld [vmem:[%s3222_s8 + $0xf0] sm:$0xf]  ;;  %v2363_v52 = vld [vmem:[%s3222_s8 + $0x108] sm:$0xf0]  ;;  %v2369_v53 = vld [vmem:[%s3222_s8 + $0xf8] sm:$0xf] }
  0xa7   : > { %1518 = vmatpush.bf16.msrb.mxu0 %v2706_v8  ;;  %v2856_v54 = vld [vmem:[%s3222_s8 + $0x10c] sm:$0xf0]  ;;  %v2853_v55 = vld [vmem:[%s3222_s8 + $0xfc] sm:$0xf]  ;;  %v2371_v56 = vld [vmem:[%s3222_s8 + $0x110] sm:$0xf0]  ;;  %v3453_v57 = vor.u32 %v2855_v50, %v2361_v49  ;;  %v3455_v58 = vor.u32 %v2852_v51, %v2363_v52 }
  0xa8   : > { %1567 = vmatpush.bf16.msrb.mxu1 %v2770_v16  ;;  %v3457_v59 = vor.u32 %v2856_v54, %v2369_v53  ;;  %v3459_v60 = vor.u32 %v2853_v55, %v2371_v56  ;;  %v2870_v1 = vld [vmem:[%s3220_s7 + $0x4] sm:$0xf]  ;;  %v2435_v2 = vld [vmem:[%s3220_s7 + $0x8] sm:$0xf0]  ;;  %v2689_v3 = vld [vmem:[%s3220_s7 + $0x200] sm:$0xf] }
  0xa9   : > { %1616 = vmatpush.bf16.msrb.mxu2 %v2454_v4  ;;  %v2438_v4 = vor.u32 %v2870_v1, %v2435_v2  ;;  %v2935_v5 = vld [vmem:[%s3220_s7 + $0x204] sm:$0xf0]  ;;  %v2886_v6 = vld [vmem:[%s3220_s7 + $0x84] sm:$0xf]  ;;  %v2499_v7 = vld [vmem:[%s3220_s7 + $0x88] sm:$0xf0] }
  0xaa   : > { %1665 = vmatpush.bf16.msrb.mxu3 %v2518_v13  ;;  %v2690_v8 = vor.u32 %v2935_v5, %v2689_v3  ;;  %v2502_v13 = vor.u32 %v2886_v6, %v2499_v7  ;;  %v2753_v14 = vld [vmem:[%s3220_s7 + $0x280] sm:$0xf]  ;;  %v2951_v15 = vld [vmem:[%s3220_s7 + $0x284] sm:$0xf0]  ;;  %v2861_v18 = vld [vmem:[%s3222_s8 + $0x134] sm:$0xf0] }
  0xab   : > { %1519 = vmatpush.bf16.msrb.mxu0 %v2698_v44  ;;  %v2754_v16 = vor.u32 %v2951_v15, %v2753_v14  ;;  %v2385_v17 = vld [vmem:[%s3222_s8 + $0x120] sm:$0xf]  ;;  %v2858_v19 = vld [vmem:[%s3222_s8 + $0x124] sm:$0xf]  ;;  %v2387_v20 = vld [vmem:[%s3222_s8 + $0x138] sm:$0xf0] }
  0xac   : > { %1568 = vmatpush.bf16.msrb.mxu1 %v2762_v48  ;;  %v2393_v21 = vld [vmem:[%s3222_s8 + $0x128] sm:$0xf]  ;;  %v2862_v22 = vld [vmem:[%s3222_s8 + $0x13c] sm:$0xf0]  ;;  %v2859_v23 = vld [vmem:[%s3222_s8 + $0x12c] sm:$0xf]  ;;  %v3481_v29 = vor.u32 %v2861_v18, %v2385_v17  ;;  %v3483_v30 = vor.u32 %v2858_v19, %v2387_v20 }
  0xad   : > { %1617 = vmatpush.bf16.msrb.mxu2 %v2446_v32  ;;  %v2395_v24 = vld [vmem:[%s3222_s8 + $0x140] sm:$0xf0]  ;;  %v3485_v31 = vor.u32 %v2862_v22, %v2393_v21  ;;  %v2948_v40 = vld [vmem:[%s3220_s7 + $0x274] sm:$0xf]  ;;  %v2747_v41 = vld [vmem:[%s3220_s7 + $0x278] sm:$0xf0] }
  0xae   : > { %1666 = vmatpush.bf16.msrb.mxu3 %v2510_v45  ;;  %v3487_v32 = vor.u32 %v2859_v23, %v2395_v24  ;;  %v2916_v43 = vld [vmem:[%s3220_s7 + $0x174] sm:$0xf]  ;;  %v2750_v44 = vor.u32 %v2948_v40, %v2747_v41  ;;  %v2619_v45 = vld [vmem:[%s3220_s7 + $0x178] sm:$0xf0]  ;;  %v2409_v53 = vld [vmem:[%s3222_s8 + $0x150] sm:$0xf] }
  0xaf   : > { %1520 = vmatpush.bf16.msrb.mxu0 %v2690_v8  ;;  %v2964_v46 = vld [vmem:[%s3220_s7 + $0x2f4] sm:$0xf]  ;;  %v2811_v47 = vld [vmem:[%s3220_s7 + $0x2f8] sm:$0xf0]  ;;  %v2622_v48 = vor.u32 %v2916_v43, %v2619_v45  ;;  %v2867_v54 = vld [vmem:[%s3222_s8 + $0x164] sm:$0xf0] }
  0xb0   : > { %1569 = vmatpush.bf16.msrb.mxu1 %v2754_v16  ;;  %v2814_v49 = vor.u32 %v2964_v46, %v2811_v47  ;;  %v2932_v50 = vld [vmem:[%s3220_s7 + $0x1f4] sm:$0xf]  ;;  %v2683_v51 = vld [vmem:[%s3220_s7 + $0x1f8] sm:$0xf0]  ;;  %v2411_v56 = vld [vmem:[%s3222_s8 + $0x168] sm:$0xf0]  ;;  %v3509_v5 = vor.u32 %v2867_v54, %v2409_v53 }
  0xb1   : > { %1618 = vmatpush.bf16.msrb.mxu2 %v2438_v4  ;;  %v2686_v52 = vor.u32 %v2932_v50, %v2683_v51  ;;  %v2864_v55 = vld [vmem:[%s3222_s8 + $0x154] sm:$0xf]  ;;  %v2417_v1 = vld [vmem:[%s3222_s8 + $0x158] sm:$0xf]  ;;  %v2868_v2 = vld [vmem:[%s3222_s8 + $0x16c] sm:$0xf0] }
  0xb2   : > { %1335 = vmatmul.bf16.gmra.mxu0 %v3369_v34  ;;  %1667 = vmatpush.bf16.msrb.mxu3 %v2502_v13  ;;  %v2865_v3 = vld [vmem:[%s3222_s8 + $0x15c] sm:$0xf]  ;;  %v2419_v4 = vld [vmem:[%s3222_s8 + $0x170] sm:$0xf0]  ;;  %v3511_v6 = vor.u32 %v2864_v55, %v2411_v56  ;;  %v3513_v7 = vor.u32 %v2868_v2, %v2417_v1  ;;  %v2946_v13 = vld [vmem:[%s3220_s7 + $0x264] sm:$0xf] }
  0xb3   : > { %1384 = vmatmul.bf16.gmra.mxu1 %v3371_v35  ;;  %1709 = vmatpush.bf16.msra.mxu0 %v2622_v48  ;;  %v3515_v8 = vor.u32 %v2865_v3, %v2419_v4  ;;  %v2739_v14 = vld [vmem:[%s3220_s7 + $0x268] sm:$0xf0]  ;;  %v2914_v15 = vld [vmem:[%s3220_s7 + $0x164] sm:$0xf]  ;;  %v2257_v40 = vld [vmem:[%s3222_s8 + $0x10] sm:$0xf] }
  0xb4   : > { %1433 = vmatmul.bf16.gmra.mxu2 %v3373_v36  ;;  %1758 = vmatpush.bf16.msra.mxu1 %v2686_v52  ;;  %v2742_v16 = vor.u32 %v2946_v13, %v2739_v14  ;;  %v2611_v17 = vld [vmem:[%s3220_s7 + $0x168] sm:$0xf0]  ;;  %v2962_v18 = vld [vmem:[%s3220_s7 + $0x2e4] sm:$0xf]  ;;  %v2827_v41 = vld [vmem:[%s3222_s8 + $0x24] sm:$0xf0] }
  0xb5   : > { %1482 = vmatmul.bf16.gmra.mxu3 %v3375_v37  ;;  %1807 = vmatpush.bf16.msra.mxu2 %v2750_v44  ;;  %v2803_v19 = vld [vmem:[%s3220_s7 + $0x2e8] sm:$0xf0]  ;;  %v2614_v20 = vor.u32 %v2914_v15, %v2611_v17  ;;  %v2930_v22 = vld [vmem:[%s3220_s7 + $0x1e4] sm:$0xf]  ;;  %v2824_v43 = vld [vmem:[%s3222_s8 + $0x14] sm:$0xf]  ;;  %v3533_v45 = vor.u32 %v2827_v41, %v2257_v40 }
  0xb6   : > { %1856 = vmatpush.bf16.msra.mxu3 %v2814_v49  ;;  %v2806_v21 = vor.u32 %v2962_v18, %v2803_v19  ;;  %v2675_v23 = vld [vmem:[%s3220_s7 + $0x1e8] sm:$0xf0]  ;;  %v2944_v50 = vld [vmem:[%s3220_s7 + $0x254] sm:$0xf]  ;;  %v2731_v51 = vld [vmem:[%s3220_s7 + $0x258] sm:$0xf0] }
  0xb7   : > { %1710 = vmatpush.bf16.msra.mxu0 %v2614_v20  ;;  %v2678_v24 = vor.u32 %v2930_v22, %v2675_v23  ;;  %v2259_v44 = vld [vmem:[%s3222_s8 + $0x28] sm:$0xf0]  ;;  %v2912_v52 = vld [vmem:[%s3220_s7 + $0x154] sm:$0xf]  ;;  %v2734_v53 = vor.u32 %v2944_v50, %v2731_v51  ;;  %v2603_v54 = vld [vmem:[%s3220_s7 + $0x158] sm:$0xf0] }
  0xb8   : > { %v3535_v47 = vor.u32 %v2824_v43, %v2259_v44  ;;  %v2960_v55 = vld [vmem:[%s3220_s7 + $0x2d4] sm:$0xf]  ;;  %v2795_v56 = vld [vmem:[%s3220_s7 + $0x2d8] sm:$0xf0]  ;;  %v2606_v2 = vor.u32 %v2912_v52, %v2603_v54  ;;  %v2281_v19 = vld [vmem:[%s3222_s8 + $0x40] sm:$0xf] }
  0xb9   : > { %1808 = vmatpush.bf16.msra.mxu2 %v2742_v16  ;;  %1759 = vmatpush.bf16.msra.mxu1 %v2678_v24  ;;  %v2798_v3 = vor.u32 %v2960_v55, %v2795_v56  ;;  %v2928_v16 = vld [vmem:[%s3220_s7 + $0x1d4] sm:$0xf]  ;;  %v2667_v17 = vld [vmem:[%s3220_s7 + $0x1d8] sm:$0xf0]  ;;  %v2833_v20 = vld [vmem:[%s3222_s8 + $0x54] sm:$0xf0] }
  0xba   : > { %1857 = vmatpush.bf16.msra.mxu3 %v2806_v21  ;;  %v2670_v18 = vor.u32 %v2928_v16, %v2667_v17  ;;  %v2830_v21 = vld [vmem:[%s3222_s8 + $0x44] sm:$0xf]  ;;  %v2283_v22 = vld [vmem:[%s3222_s8 + $0x58] sm:$0xf0]  ;;  %v3555_v24 = vor.u32 %v2833_v20, %v2281_v19  ;;  %v2723_v51 = vld [vmem:[%s3220_s7 + $0x248] sm:$0xf0] }
  0xbb   : > { %1711 = vmatpush.bf16.msra.mxu0 %v2606_v2  ;;  %v3557_v44 = vor.u32 %v2830_v21, %v2283_v22  ;;  %v2942_v50 = vld [vmem:[%s3220_s7 + $0x244] sm:$0xf]  ;;  %v2595_v54 = vld [vmem:[%s3220_s7 + $0x148] sm:$0xf0]  ;;  %v2839_v19 = vld [vmem:[%s3222_s8 + $0x84] sm:$0xf0] }
  0xbc   : > { %v2910_v52 = vld [vmem:[%s3220_s7 + $0x144] sm:$0xf]  ;;  %v2787_v56 = vld [vmem:[%s3220_s7 + $0x2c8] sm:$0xf0]  ;;  %v2836_v20 = vld [vmem:[%s3222_s8 + $0x74] sm:$0xf] }
  0xbd   : > { %1809 = vmatpush.bf16.msra.mxu2 %v2734_v53  ;;  %1760 = vmatpush.bf16.msra.mxu1 %v2670_v18  ;;  %v2726_v53 = vor.u32 %v2942_v50, %v2723_v51  ;;  %v2958_v55 = vld [vmem:[%s3220_s7 + $0x2c4] sm:$0xf]  ;;  %v2598_v2 = vor.u32 %v2910_v52, %v2595_v54  ;;  %v2659_v16 = vld [vmem:[%s3220_s7 + $0x1c8] sm:$0xf0]  ;;  %v2305_v18 = vld [vmem:[%s3222_s8 + $0x70] sm:$0xf] }
  0xbe   : > { %1858 = vmatpush.bf16.msra.mxu3 %v2798_v3  ;;  %v2790_v3 = vor.u32 %v2958_v55, %v2787_v56  ;;  %v2307_v21 = vld [vmem:[%s3222_s8 + $0x88] sm:$0xf0]  ;;  %v2940_v52 = vld [vmem:[%s3220_s7 + $0x234] sm:$0xf]  ;;  %v2587_v56 = vld [vmem:[%s3220_s7 + $0x138] sm:$0xf0] }
  0xbf   : > { %1712 = vmatpush.bf16.msra.mxu0 %v2598_v2  ;;  %v2908_v54 = vld [vmem:[%s3220_s7 + $0x134] sm:$0xf]  ;;  %v2779_v2 = vld [vmem:[%s3220_s7 + $0x2b8] sm:$0xf0]  ;;  %p2815_p11 = scmp.ne.s32.totalorder %s3039_s14, 2 }
  0xc1   : > { %1810 = vmatpush.bf16.msra.mxu2 %v2726_v53  ;;  %v2715_v53 = vld [vmem:[%s3220_s7 + $0x238] sm:$0xf0] }
  0xc2   : > { %1340 = vmatmul.bf16.gmra.mxu0 %v3397_v61  ;;  %1859 = vmatpush.bf16.msra.mxu3 %v2790_v3  ;;  %v2718_v55 = vor.u32 %v2940_v52, %v2715_v53 }
  0xc3   : > { %1389 = vmatmul.bf16.gmra.mxu1 %v3399_v62 }
  0xc4   : > { %1438 = vmatmul.bf16.gmra.mxu2 %v3401_v63 }
  0xc5   : > { %1487 = vmatmul.bf16.gmra.mxu3 %v3403_v0  ;;  %1811 = vmatpush.bf16.msra.mxu2 %v2718_v55 }
  0xd2   : > { %1345 = vmatmul.bf16.gmra.mxu0 %v3425_v25 }
  0xd3   : > { %1394 = vmatmul.bf16.gmra.mxu1 %v3427_v26 }
  0xd4   : > { %1443 = vmatmul.bf16.gmra.mxu2 %v3429_v27 }
  0xd5   : > { %1492 = vmatmul.bf16.gmra.mxu3 %v3431_v28 }
  0xe2   : > { %1350 = vmatmul.bf16.gmra.mxu0 %v3453_v57 }
  0xe3   : > { %1399 = vmatmul.bf16.gmra.mxu1 %v3455_v58 }
  0xe4   : > { %1448 = vmatmul.bf16.gmra.mxu2 %v3457_v59 }
  0xe5   : > { %1497 = vmatmul.bf16.gmra.mxu3 %v3459_v60 }
  0xf2   : > { %1355 = vmatmul.bf16.gmra.mxu0 %v3481_v29 }
  0xf3   : > { %1404 = vmatmul.bf16.gmra.mxu1 %v3483_v30 }
  0xf4   : > { %1453 = vmatmul.bf16.gmra.mxu2 %v3485_v31 }
  0xf5   : > { %1502 = vmatmul.bf16.gmra.mxu3 %v3487_v32 }
 0x102   : > { %1360 = vmatmul.bf16.gmra.mxu0 %v3509_v5 }
 0x103   : > { %1409 = vmatmul.bf16.gmra.mxu1 %v3511_v6 }
 0x104   : > { %1458 = vmatmul.bf16.gmra.mxu2 %v3513_v7 }
 0x105   : > { %1507 = vmatmul.bf16.gmra.mxu3 %v3515_v8 }
 0x10f   : > { %v1326_v46 = vpop.f32.mrf.mxu0 }
 0x110   : > { %v1375_v48 = vpop.f32.mrf.mxu1 }
 0x111   : > { %v1376_v49 = vadd.f32 %v1375_v48, %v1326_v46 }
 0x112   : > { %1521 = vmatmul.bf16.vlgmr.msrb.gmra.mxu0 %v3533_v45 }
 0x113   : > { %1570 = vmatmul.bf16.vlgmr.msrb.gmra.mxu1 %v3535_v47 }
 0x114   : > { %1619 = vmatmul.bf16.vlgmr.msrb.gmra.mxu2 %v3304_v33 }
 0x115   : > { %1668 = vmatmul.bf16.vlgmr.msrb.gmra.mxu3 %v3309_v38 }
 0x117   : > { %v1424_v1 = vpop.f32.mrf.mxu2  ;;  %v1328_v13 = vpop.f32.mrf.mxu0 }
 0x118   : > { %v1425_v4 = vadd.f32 %v1424_v1, %v1376_v49  ;;  %v1473_v33 = vpop.f32.mrf.mxu3  ;;  %v1377_v38 = vpop.f32.mrf.mxu1 }
 0x119   : > { %v1378_v15 = vadd.f32 %v1377_v38, %v1328_v13 }
 0x11a   : > { %v3547_v14 = vadd.f32 %v1473_v33, %v1425_v4 }
 0x11f   : > { %v1426_v23 = vpop.f32.mrf.mxu2  ;;  %v1331_v43 = vpop.f32.mrf.mxu0 }
 0x120   : > { %v1427_v40 = vadd.f32 %v1426_v23, %v1378_v15  ;;  %v1475_v41 = vpop.f32.mrf.mxu3  ;;  %v1380_v46 = vpop.f32.mrf.mxu1  ;;  %v2926_v15 = vld [vmem:[%s3220_s7 + $0x1c4] sm:$0xf]  ;;  %v3579_v23 = vor.u32 %v2839_v19, %v2305_v18  ;;  %v2329_v19 = vld [vmem:[%s3222_s8 + $0xa0] sm:$0xf] }
 0x121   : > { %v1381_v49 = vadd.f32 %v1380_v46, %v1331_v43  ;;  %v2662_v17 = vor.u32 %v2926_v15, %v2659_v16  ;;  %v3581_v46 = vor.u32 %v2836_v20, %v2307_v21  ;;  %v2924_v16 = vld [vmem:[%s3220_s7 + $0x1b4] sm:$0xf]  ;;  %v2845_v20 = vld [vmem:[%s3222_s8 + $0xb4] sm:$0xf0]  ;;  %v2842_v21 = vld [vmem:[%s3222_s8 + $0xa4] sm:$0xf] }
 0x122   : > { %v3559_v48 = vadd.f32 %v1475_v41, %v1427_v40  ;;  %1526 = vmatmul.bf16.gmra.mxu0 %v3555_v24 }
 0x123   : > { %1575 = vmatmul.bf16.gmra.mxu1 %v3557_v44 }
 0x124   : > { %1624 = vmatmul.bf16.gmra.mxu2 %v3341_v9  ;;  %1761 = vmatpush.bf16.msra.mxu1 %v2662_v17  ;;  %v2651_v17 = vld [vmem:[%s3220_s7 + $0x1b8] sm:$0xf0] }
 0x125   : > { %1673 = vmatmul.bf16.gmra.mxu3 %v3343_v10  ;;  %v2654_v18 = vor.u32 %v2924_v16, %v2651_v17 }
 0x127   : > { %v1429_v1 = vpop.f32.mrf.mxu2  ;;  %v1333_v33 = vpop.f32.mrf.mxu0 }
 0x128   : > { %v1430_v4 = vadd.f32 %v1429_v1, %v1381_v49  ;;  %v1478_v9 = vpop.f32.mrf.mxu3  ;;  %v1382_v10 = vpop.f32.mrf.mxu1  ;;  %v2956_v1 = vld [vmem:[%s3220_s7 + $0x2b4] sm:$0xf]  ;;  %1762 = vmatpush.bf16.msra.mxu1 %v2654_v18 }
 0x129   : > { %v1383_v38 = vadd.f32 %v1382_v10, %v1333_v33 }
 0x12a   : > { %v3571_v13 = vadd.f32 %v1478_v9, %v1430_v4  ;;  %v2590_v4 = vor.u32 %v2908_v54, %v2587_v56  ;;  %v2782_v9 = vor.u32 %v2956_v1, %v2779_v2  ;;  %v2938_v56 = vld [vmem:[%s3220_s7 + $0x224] sm:$0xf]  ;;  %v2707_v1 = vld [vmem:[%s3220_s7 + $0x228] sm:$0xf0] }
 0x12b   : > { %v2906_v2 = vld [vmem:[%s3220_s7 + $0x124] sm:$0xf] }
 0x12c   : > { %1713 = vmatpush.bf16.msra.mxu0 %v2590_v4  ;;  %1860 = vmatpush.bf16.msra.mxu3 %v2782_v9  ;;  %v2579_v4 = vld [vmem:[%s3220_s7 + $0x128] sm:$0xf0]  ;;  %v2954_v9 = vld [vmem:[%s3220_s7 + $0x2a4] sm:$0xf] }
 0x12f   : > { %v1431_v22 = vpop.f32.mrf.mxu2  ;;  %v1336_v43 = vpop.f32.mrf.mxu0 }
 0x130   : > { %v1432_v40 = vadd.f32 %v1431_v22, %v1383_v38  ;;  %v1480_v41 = vpop.f32.mrf.mxu3  ;;  %v1385_v49 = vpop.f32.mrf.mxu1  ;;  %v2331_v22 = vld [vmem:[%s3222_s8 + $0xb8] sm:$0xf0] }
 0x131   : > { %v1386_v51 = vadd.f32 %v1385_v49, %v1336_v43  ;;  %v3605_v52 = vor.u32 %v2842_v21, %v2331_v22  ;;  %v2353_v22 = vld [vmem:[%s3222_s8 + $0xd0] sm:$0xf] }
 0x132   : > { %v3583_v50 = vadd.f32 %v1480_v41, %v1432_v40  ;;  %1531 = vmatmul.bf16.gmra.mxu0 %v3579_v23  ;;  %v3603_v41 = vor.u32 %v2845_v20, %v2329_v19  ;;  %v2922_v19 = vld [vmem:[%s3220_s7 + $0x1a4] sm:$0xf]  ;;  %v2643_v20 = vld [vmem:[%s3220_s7 + $0x1a8] sm:$0xf0] }
 0x133   : > { %1580 = vmatmul.bf16.gmra.mxu1 %v3581_v46  ;;  %v2646_v21 = vor.u32 %v2922_v19, %v2643_v20 }
 0x134   : > { %1629 = vmatmul.bf16.gmra.mxu2 %v3369_v34 }
 0x135   : > { %1678 = vmatmul.bf16.gmra.mxu3 %v3371_v35  ;;  %1763 = vmatpush.bf16.msra.mxu1 %v2646_v21 }
 0x137   : > { %v1434_v3 = vpop.f32.mrf.mxu2  ;;  %v1338_v10 = vpop.f32.mrf.mxu0 }
 0x138   : > { %v1435_v33 = vadd.f32 %v1434_v3, %v1386_v51  ;;  %v1483_v34 = vpop.f32.mrf.mxu3  ;;  %v1387_v35 = vpop.f32.mrf.mxu1  ;;  %v2710_v3 = vor.u32 %v2938_v56, %v2707_v1 }
 0x139   : > { %v1388_v15 = vadd.f32 %v1387_v35, %v1338_v10  ;;  %v2582_v10 = vor.u32 %v2906_v2, %v2579_v4 }
 0x13a   : > { %v3595_v38 = vadd.f32 %v1483_v34, %v1435_v33  ;;  %v2771_v33 = vld [vmem:[%s3220_s7 + $0x2a8] sm:$0xf0]  ;;  %1812 = vmatpush.bf16.msra.mxu2 %v2710_v3 }
 0x13b   : > { %v2774_v35 = vor.u32 %v2954_v9, %v2771_v33  ;;  %1714 = vmatpush.bf16.msra.mxu0 %v2582_v10  ;;  %v2936_v33 = vld [vmem:[%s3220_s7 + $0x214] sm:$0xf] }
 0x13c   : > { %v2904_v10 = vld [vmem:[%s3220_s7 + $0x114] sm:$0xf] }
 0x13d   : > { %1861 = vmatpush.bf16.msra.mxu3 %v2774_v35 }
 0x13f   : > { %v1436_v40 = vpop.f32.mrf.mxu2  ;;  %v1341_v51 = vpop.f32.mrf.mxu0 }
 0x140   : > { %v1437_v43 = vadd.f32 %v1436_v40, %v1388_v15  ;;  %v1485_v49 = vpop.f32.mrf.mxu3  ;;  %v1390_v53 = vpop.f32.mrf.mxu1  ;;  %v2851_v40 = vld [vmem:[%s3222_s8 + $0xe4] sm:$0xf0] }
 0x141   : > { %v1391_v55 = vadd.f32 %v1390_v53, %v1341_v51  ;;  %v3627_v53 = vor.u32 %v2851_v40, %v2353_v22 }
 0x142   : > { %v3607_v54 = vadd.f32 %v1485_v49, %v1437_v43  ;;  %1536 = vmatmul.bf16.gmra.mxu0 %v3603_v41  ;;  %v2848_v43 = vld [vmem:[%s3222_s8 + $0xd4] sm:$0xf]  ;;  %v2355_v49 = vld [vmem:[%s3222_s8 + $0xe8] sm:$0xf0] }
 0x143   : > { %1585 = vmatmul.bf16.gmra.mxu1 %v3605_v52  ;;  %v3629_v2 = vor.u32 %v2848_v43, %v2355_v49  ;;  %v2920_v43 = vld [vmem:[%s3220_s7 + $0x194] sm:$0xf]  ;;  %v2635_v49 = vld [vmem:[%s3220_s7 + $0x198] sm:$0xf0] }
 0x144   : > { %1634 = vmatmul.bf16.gmra.mxu2 %v3397_v61 }
 0x145   : > { %1683 = vmatmul.bf16.gmra.mxu3 %v3399_v62 }
 0x147   : > { %v1439_v34 = vpop.f32.mrf.mxu2  ;;  %v1343_v16 = vpop.f32.mrf.mxu0 }
 0x148   : > { %v1440_v15 = vadd.f32 %v1439_v34, %v1391_v55  ;;  %v1488_v61 = vpop.f32.mrf.mxu3  ;;  %v1392_v62 = vpop.f32.mrf.mxu1  ;;  %v2699_v34 = vld [vmem:[%s3220_s7 + $0x218] sm:$0xf0] }
 0x149   : > { %v1393_v18 = vadd.f32 %v1392_v62, %v1343_v16  ;;  %v2702_v35 = vor.u32 %v2936_v33, %v2699_v34  ;;  %v2763_v16 = vld [vmem:[%s3220_s7 + $0x298] sm:$0xf0] }
 0x14a   : > { %v3619_v17 = vadd.f32 %v1488_v61, %v1440_v15  ;;  %v2571_v15 = vld [vmem:[%s3220_s7 + $0x118] sm:$0xf0]  ;;  %v2952_v61 = vld [vmem:[%s3220_s7 + $0x294] sm:$0xf] }
 0x14b   : > { %v2766_v19 = vor.u32 %v2952_v61, %v2763_v16  ;;  %1813 = vmatpush.bf16.msra.mxu2 %v2702_v35 }
 0x14d   : > { %1862 = vmatpush.bf16.msra.mxu3 %v2766_v19  ;;  %v2691_v19 = vld [vmem:[%s3220_s7 + $0x208] sm:$0xf0] }
 0x14f   : > { %v1441_v51 = vpop.f32.mrf.mxu2  ;;  %v1346_v1 = vpop.f32.mrf.mxu0 }
 0x150   : > { %v1442_v55 = vadd.f32 %v1441_v51, %v1393_v18  ;;  %v1490_v56 = vpop.f32.mrf.mxu3  ;;  %v1395_v3 = vpop.f32.mrf.mxu1  ;;  %v2574_v18 = vor.u32 %v2904_v10, %v2571_v15  ;;  %v2638_v51 = vor.u32 %v2920_v43, %v2635_v49 }
 0x151   : > { %v1396_v9 = vadd.f32 %v1395_v3, %v1346_v1  ;;  %v2854_v1 = vld [vmem:[%s3222_s8 + $0x104] sm:$0xf]  ;;  %v2379_v3 = vld [vmem:[%s3222_s8 + $0x118] sm:$0xf0] }
 0x152   : > { %v3631_v4 = vadd.f32 %v1490_v56, %v1442_v55  ;;  %1541 = vmatmul.bf16.gmra.mxu0 %v3627_v53  ;;  %v2377_v55 = vld [vmem:[%s3222_s8 + $0x100] sm:$0xf]  ;;  %v2857_v56 = vld [vmem:[%s3222_s8 + $0x114] sm:$0xf0]  ;;  %1764 = vmatpush.bf16.msra.mxu1 %v2638_v51  ;;  %v3653_v15 = vor.u32 %v2854_v1, %v2379_v3 }
 0x153   : > { %1590 = vmatmul.bf16.gmra.mxu1 %v3629_v2  ;;  %1715 = vmatpush.bf16.msra.mxu0 %v2574_v18  ;;  %v3651_v33 = vor.u32 %v2857_v56, %v2377_v55  ;;  %v2934_v18 = vld [vmem:[%s3220_s7 + $0x204] sm:$0xf] }
 0x154   : > { %1639 = vmatmul.bf16.gmra.mxu2 %v3425_v25 }
 0x155   : > { %1688 = vmatmul.bf16.gmra.mxu3 %v3427_v26 }
 0x157   : > { %v1444_v62 = vpop.f32.mrf.mxu2  ;;  %v1348_v21 = vpop.f32.mrf.mxu0 }
 0x158   : > { %v1445_v20 = vadd.f32 %v1444_v62, %v1396_v9  ;;  %v1493_v25 = vpop.f32.mrf.mxu3  ;;  %v1397_v26 = vpop.f32.mrf.mxu1 }
 0x159   : > { %v1398_v40 = vadd.f32 %v1397_v26, %v1348_v21  ;;  %v2563_v21 = vld [vmem:[%s3220_s7 + $0x108] sm:$0xf0]  ;;  %v2950_v26 = vld [vmem:[%s3220_s7 + $0x284] sm:$0xf] }
 0x15a   : > { %v3643_v22 = vadd.f32 %v1493_v25, %v1445_v20  ;;  %v2902_v20 = vld [vmem:[%s3220_s7 + $0x104] sm:$0xf]  ;;  %v2694_v25 = vor.u32 %v2934_v18, %v2691_v19  ;;  %v2860_v18 = vld [vmem:[%s3222_s8 + $0x134] sm:$0xf]  ;;  %v2403_v19 = vld [vmem:[%s3222_s8 + $0x148] sm:$0xf0] }
 0x15b   : > { %v2566_v49 = vor.u32 %v2902_v20, %v2563_v21 }
 0x15c   : > { %1814 = vmatpush.bf16.msra.mxu2 %v2694_v25 }
 0x15d   : > { %1716 = vmatpush.bf16.msra.mxu0 %v2566_v49 }
 0x15f   : > { %v1446_v9 = vpop.f32.mrf.mxu2  ;;  %v1351_v35 = vpop.f32.mrf.mxu0 }
 0x160   : > { %v1447_v34 = vadd.f32 %v1446_v9, %v1398_v40  ;;  %v1495_v10 = vpop.f32.mrf.mxu3  ;;  %v1400_v61 = vpop.f32.mrf.mxu1  ;;  %v2755_v40 = vld [vmem:[%s3220_s7 + $0x288] sm:$0xf0]  ;;  %v2918_v9 = vld [vmem:[%s3220_s7 + $0x184] sm:$0xf] }
 0x161   : > { %v1401_v62 = vadd.f32 %v1400_v61, %v1351_v35  ;;  %v2758_v51 = vor.u32 %v2950_v26, %v2755_v40  ;;  %v2401_v35 = vld [vmem:[%s3222_s8 + $0x130] sm:$0xf]  ;;  %v2863_v61 = vld [vmem:[%s3222_s8 + $0x144] sm:$0xf0]  ;;  %v3677_v40 = vor.u32 %v2860_v18, %v2403_v19  ;;  %v2427_v18 = vld [vmem:[%s3222_s8 + $0x178] sm:$0xf0] }
 0x162   : > { %v3655_v16 = vadd.f32 %v1495_v10, %v1447_v34  ;;  %1546 = vmatmul.bf16.gmra.mxu0 %v3651_v33  ;;  %v2627_v34 = vld [vmem:[%s3220_s7 + $0x188] sm:$0xf0]  ;;  %v3675_v21 = vor.u32 %v2863_v61, %v2401_v35  ;;  %v2869_v35 = vld [vmem:[%s3222_s8 + $0x174] sm:$0xf0]  ;;  %v2866_v61 = vld [vmem:[%s3222_s8 + $0x164] sm:$0xf] }
 0x163   : > { %1595 = vmatmul.bf16.gmra.mxu1 %v3653_v15  ;;  %1863 = vmatpush.bf16.msra.mxu3 %v2758_v51  ;;  %v2630_v10 = vor.u32 %v2918_v9, %v2627_v34 }
 0x164   : > { %1644 = vmatmul.bf16.gmra.mxu2 %v3453_v57 }
 0x165   : > { %1693 = vmatmul.bf16.gmra.mxu3 %v3455_v58  ;;  %1765 = vmatpush.bf16.msra.mxu1 %v2630_v10  ;;  %v2425_v10 = vld [vmem:[%s3222_s8 + $0x160] sm:$0xf] }
 0x167   : > { %v1449_v43 = vpop.f32.mrf.mxu2  ;;  %v1353_v56 = vpop.f32.mrf.mxu0 }
 0x168   : > { %v1450_v55 = vadd.f32 %v1449_v43, %v1401_v62  ;;  %v1498_v57 = vpop.f32.mrf.mxu3  ;;  %v1402_v58 = vpop.f32.mrf.mxu1 }
 0x169   : > { %v1403_v3 = vadd.f32 %v1402_v58, %v1353_v56 }
 0x16a   : > { %v3667_v1 = vadd.f32 %v1498_v57, %v1450_v55 }
 0x16f   : > { %v1451_v20 = vpop.f32.mrf.mxu2  ;;  %v1356_v25 = vpop.f32.mrf.mxu0 }
 0x170   : > { %v1452_v62 = vadd.f32 %v1451_v20, %v1403_v3  ;;  %v1500_v26 = vpop.f32.mrf.mxu3  ;;  %v1405_v43 = vpop.f32.mrf.mxu1  ;;  %v3691_v20 = vor.u32 %v2869_v35, %v2425_v10 }
 0x171   : > { %v1406_v51 = vadd.f32 %v1405_v43, %v1356_v25  ;;  %v3693_v25 = vor.u32 %v2866_v61, %v2427_v18 }
 0x172   : > { %v3679_v49 = vadd.f32 %v1500_v26, %v1452_v62  ;;  %1551 = vmatmul.bf16.gmra.mxu0 %v3675_v21 }
 0x173   : > { %1600 = vmatmul.bf16.gmra.mxu1 %v3677_v40 }
 0x174   : > { %1649 = vmatmul.bf16.gmra.mxu2 %v3481_v29 }
 0x175   : > { %1698 = vmatmul.bf16.gmra.mxu3 %v3483_v30 }
 0x177   : > { %v1454_v55 = vpop.f32.mrf.mxu2  ;;  %v1358_v58 = vpop.f32.mrf.mxu0 }
 0x178   : > { %v1455_v57 = vadd.f32 %v1454_v55, %v1406_v51  ;;  %v1503_v56 = vpop.f32.mrf.mxu3  ;;  %v1407_v3 = vpop.f32.mrf.mxu1 }
 0x179   : > { %v1408_v34 = vadd.f32 %v1407_v3, %v1358_v58 }
 0x17a   : > { %v3685_v9 = vadd.f32 %v1503_v56, %v1455_v57 }
 0x17f   : > { %v1456_v19 = vpop.f32.mrf.mxu2  ;;  %v1361_v29 = vpop.f32.mrf.mxu0 }
 0x180   : > { %v1457_v62 = vadd.f32 %v1456_v19, %v1408_v34  ;;  %v1505_v26 = vpop.f32.mrf.mxu3  ;;  %v1410_v30 = vpop.f32.mrf.mxu1 }
 0x181   : > { %v1411_v51 = vadd.f32 %v1410_v30, %v1361_v29 }
 0x182   : > { %v3695_v43 = vadd.f32 %v1505_v26, %v1457_v62  ;;  %1556 = vmatmul.bf16.gmra.mxu0 %v3691_v20 }
 0x183   : > { %1605 = vmatmul.bf16.gmra.mxu1 %v3693_v25 }
 0x184   : > { %1654 = vmatmul.bf16.gmra.mxu2 %v3509_v5  ;;  %v421_v5 = vld [vmem:[#allocation2 + $0xb0] sm:$0xff] }
 0x185   : > { %1703 = vmatmul.bf16.gmra.mxu3 %v3511_v6 }
 0x187   : > { %v1459_v55 = vpop.f32.mrf.mxu2  ;;  %v1363_v58 = vpop.f32.mrf.mxu0 }
 0x188   : > { %v1460_v57 = vadd.f32 %v1459_v55, %v1411_v51  ;;  %v1508_v56 = vpop.f32.mrf.mxu3  ;;  %v1412_v3 = vpop.f32.mrf.mxu1 }
 0x189   : > { %v1413_v10 = vadd.f32 %v1412_v3, %v1363_v58  ;;  %v423_v3 = vld [vmem:[#allocation2 + $0xd8] sm:$0xff] }
 0x18a   : > { %v3701_v34 = vadd.f32 %v1508_v56, %v1460_v57 }
 0x18f   : > { %v1461_v35 = vpop.f32.mrf.mxu2  ;;  %v1522_v19 = vpop.f32.mrf.mxu0 }
 0x190   : > { %v1462_v61 = vadd.f32 %v1461_v35, %v1413_v10  ;;  %v1510_v18 = vpop.f32.mrf.mxu3  ;;  %v1523_v62 = vadd.f32 %v1522_v19, %v3547_v14  ;;  %v1571_v26 = vpop.f32.mrf.mxu1  ;;  %v425_v19 = vld [vmem:[#allocation2 + $0x50] sm:$0xff] }
 0x192   : > { %v3704_v29 = vadd.f32 %v1510_v18, %v1462_v61  ;;  %v1572_v30 = vadd.f32 %v1571_v26, %v1523_v62  ;;  %1717 = vmatmul.bf16.vlgmr.msra.gmra.mxu0 %v3311_v39 }
 0x193   : > { %1766 = vmatmul.bf16.vlgmr.msra.gmra.mxu1 %v3315_v42 }
 0x194   : > { %1815 = vmatmul.bf16.vlgmr.msra.gmra.mxu2 %v3533_v45  ;;  %v1905_v6 = vadd.f32 %v1572_v30, %v421_v5 }
 0x195   : > { %1864 = vmatmul.bf16.vlgmr.msra.gmra.mxu3 %v3535_v47 }
 0x196   : > { %1937 = vst [vmem:[#allocation2 + $0xb0] sm:$0xff] %v1905_v6 }
 0x197   : > { %v1620_v51 = vpop.f32.mrf.mxu2  ;;  %v1524_v57 = vpop.f32.mrf.mxu0 }
 0x198   : > { %v1669_v55 = vpop.f32.mrf.mxu3  ;;  %v1525_v14 = vadd.f32 %v1524_v57, %v3559_v48  ;;  %v1573_v58 = vpop.f32.mrf.mxu1 }
 0x199   : > { %v3710_v56 = vadd.f32 %v1669_v55, %v1620_v51  ;;  %v427_v55 = vld [vmem:[#allocation2 + $0x30] sm:$0xff] }
 0x19a   : > { %v1574_v10 = vadd.f32 %v1573_v58, %v1525_v14 }
 0x19c   : > { %v1907_v35 = vadd.f32 %v1574_v10, %v423_v3  ;;  %v429_v10 = vld [vmem:[#allocation2 + $0x80] sm:$0xff] }
 0x19e   : > { %1939 = vst [vmem:[#allocation2 + $0xd8] sm:$0xff] %v1907_v35 }
 0x19f   : > { %v1622_v39 = vpop.f32.mrf.mxu2  ;;  %v1527_v61 = vpop.f32.mrf.mxu0 }
 0x1a0   : > { %v1671_v42 = vpop.f32.mrf.mxu3  ;;  %v1528_v47 = vadd.f32 %v1527_v61, %v3571_v13  ;;  %v1576_v18 = vpop.f32.mrf.mxu1 }
 0x1a1   : > { %v3713_v45 = vadd.f32 %v1671_v42, %v1622_v39 }
 0x1a2   : > { %v1577_v62 = vadd.f32 %v1576_v18, %v1528_v47  ;;  %1722 = vmatmul.bf16.gmra.mxu0 %v3345_v11 }
 0x1a3   : > { %1771 = vmatmul.bf16.gmra.mxu1 %v3347_v12 }
 0x1a4   : > { %1820 = vmatmul.bf16.gmra.mxu2 %v3555_v24  ;;  %v1909_v48 = vadd.f32 %v1577_v62, %v425_v19  ;;  %v431_v19 = vld [vmem:[#allocation2 + $0xe8] sm:$0xff] }
 0x1a5   : > { %1869 = vmatmul.bf16.gmra.mxu3 %v3557_v44 }
 0x1a6   : > { %1941 = vst [vmem:[#allocation2 + $0x50] sm:$0xff] %v1909_v48 }
 0x1a7   : > { %v1625_v26 = vpop.f32.mrf.mxu2  ;;  %v1529_v30 = vpop.f32.mrf.mxu0 }
 0x1a8   : > { %v1674_v5 = vpop.f32.mrf.mxu3  ;;  %v1530_v13 = vadd.f32 %v1529_v30, %v3583_v50  ;;  %v1578_v51 = vpop.f32.mrf.mxu1  ;;  %v433_v30 = vld [vmem:[#allocation2 + $0x60] sm:$0xff] }
 0x1a9   : > { %v3720_v6 = vadd.f32 %v1674_v5, %v1625_v26 }
 0x1aa   : > { %v1579_v57 = vadd.f32 %v1578_v51, %v1530_v13 }
 0x1ac   : > { %v1911_v14 = vadd.f32 %v1579_v57, %v427_v55 }
 0x1ae   : > { %1943 = vst [vmem:[#allocation2 + $0x30] sm:$0xff] %v1911_v14 }
 0x1af   : > { %v1627_v11 = vpop.f32.mrf.mxu2  ;;  %v1532_v58 = vpop.f32.mrf.mxu0 }
 0x1b0   : > { %v1676_v12 = vpop.f32.mrf.mxu3  ;;  %v1533_v44 = vadd.f32 %v1532_v58, %v3595_v38  ;;  %v1581_v3 = vpop.f32.mrf.mxu1 }
 0x1b1   : > { %v3723_v24 = vadd.f32 %v1676_v12, %v1627_v11  ;;  %v435_v12 = vld [vmem:[#allocation2 + $0x8] sm:$0xff] }
 0x1b2   : > { %v1582_v35 = vadd.f32 %v1581_v3, %v1533_v44  ;;  %1727 = vmatmul.bf16.gmra.mxu0 %v3373_v36 }
 0x1b3   : > { %1776 = vmatmul.bf16.gmra.mxu1 %v3375_v37 }
 0x1b4   : > { %1825 = vmatmul.bf16.gmra.mxu2 %v3579_v23  ;;  %v1913_v50 = vadd.f32 %v1582_v35, %v429_v10  ;;  %v437_v35 = vld [vmem:[#allocation2 + $0x38] sm:$0xff] }
 0x1b5   : > { %1874 = vmatmul.bf16.gmra.mxu3 %v3581_v46 }
 0x1b6   : > { %1945 = vst [vmem:[#allocation2 + $0x80] sm:$0xff] %v1913_v50 }
 0x1b7   : > { %v1630_v39 = vpop.f32.mrf.mxu2  ;;  %v1534_v61 = vpop.f32.mrf.mxu0 }
 0x1b8   : > { %v1679_v42 = vpop.f32.mrf.mxu3  ;;  %v1535_v38 = vadd.f32 %v1534_v61, %v3607_v54  ;;  %v1583_v18 = vpop.f32.mrf.mxu1 }
 0x1b9   : > { %v3730_v47 = vadd.f32 %v1679_v42, %v1630_v39 }
 0x1ba   : > { %v1584_v62 = vadd.f32 %v1583_v18, %v1535_v38 }
 0x1bc   : > { %v1915_v48 = vadd.f32 %v1584_v62, %v431_v19  ;;  %v439_v19 = vld [vmem:[#allocation2 + $0x40] sm:$0xff] }
 0x1be   : > { %1947 = vst [vmem:[#allocation2 + $0xe8] sm:$0xff] %v1915_v48 }
 0x1bf   : > { %v1632_v36 = vpop.f32.mrf.mxu2  ;;  %v1537_v26 = vpop.f32.mrf.mxu0 }
 0x1c0   : > { %v1681_v37 = vpop.f32.mrf.mxu3  ;;  %v1538_v46 = vadd.f32 %v1537_v26, %v3619_v17  ;;  %v1586_v5 = vpop.f32.mrf.mxu1  ;;  %v441_v26 = vld [vmem:[#allocation2 + $0xe0] sm:$0xff] }
 0x1c1   : > { %v3733_v23 = vadd.f32 %v1681_v37, %v1632_v36 }
 0x1c2   : > { %v1587_v13 = vadd.f32 %v1586_v5, %v1538_v46  ;;  %1732 = vmatmul.bf16.gmra.mxu0 %v3401_v63 }
 0x1c3   : > { %1781 = vmatmul.bf16.gmra.mxu1 %v3403_v0 }
 0x1c4   : > { %1830 = vmatmul.bf16.gmra.mxu2 %v3603_v41  ;;  %v1917_v54 = vadd.f32 %v1587_v13, %v433_v30 }
 0x1c5   : > { %1879 = vmatmul.bf16.gmra.mxu3 %v3605_v52 }
 0x1c6   : > { %1949 = vst [vmem:[#allocation2 + $0x60] sm:$0xff] %v1917_v54 }
 0x1c7   : > { %v1635_v51 = vpop.f32.mrf.mxu2  ;;  %v1539_v57 = vpop.f32.mrf.mxu0 }
 0x1c8   : > { %v1684_v55 = vpop.f32.mrf.mxu3  ;;  %v1540_v17 = vadd.f32 %v1539_v57, %v3631_v4  ;;  %v1588_v11 = vpop.f32.mrf.mxu1 }
 0x1c9   : > { %v3740_v14 = vadd.f32 %v1684_v55, %v1635_v51  ;;  %v443_v55 = vld [vmem:[#allocation2 + $0x70] sm:$0xff] }
 0x1ca   : > { %v1589_v58 = vadd.f32 %v1588_v11, %v1540_v17 }
 0x1cc   : > { %v1919_v44 = vadd.f32 %v1589_v58, %v435_v12  ;;  %v445_v58 = vld [vmem:[#allocation2 + $0xa8] sm:$0xff] }
 0x1ce   : > { %1951 = vst [vmem:[#allocation2 + $0x8] sm:$0xff] %v1919_v44 }
 0x1cf   : > { %v1637_v63 = vpop.f32.mrf.mxu2  ;;  %v1542_v3 = vpop.f32.mrf.mxu0 }
 0x1d0   : > { %v1686_v0 = vpop.f32.mrf.mxu3  ;;  %v1543_v52 = vadd.f32 %v1542_v3, %v3643_v22  ;;  %v1591_v10 = vpop.f32.mrf.mxu1 }
 0x1d1   : > { %v3743_v41 = vadd.f32 %v1686_v0, %v1637_v63 }
 0x1d2   : > { %v1592_v50 = vadd.f32 %v1591_v10, %v1543_v52  ;;  %1737 = vmatmul.bf16.gmra.mxu0 %v3429_v27 }
 0x1d3   : > { %1786 = vmatmul.bf16.gmra.mxu1 %v3431_v28 }
 0x1d4   : > { %1835 = vmatmul.bf16.gmra.mxu2 %v3627_v53  ;;  %v1921_v4 = vadd.f32 %v1592_v50, %v437_v35  ;;  %v447_v35 = vld [vmem:[#allocation2 + $0x10] sm:$0xff] }
 0x1d5   : > { %1884 = vmatmul.bf16.gmra.mxu3 %v3629_v2 }
 0x1d6   : > { %1953 = vst [vmem:[#allocation2 + $0x38] sm:$0xff] %v1921_v4 }
 0x1d7   : > { %v1640_v39 = vpop.f32.mrf.mxu2  ;;  %v1544_v61 = vpop.f32.mrf.mxu0 }
 0x1d8   : > { %v1689_v42 = vpop.f32.mrf.mxu3  ;;  %v1545_v22 = vadd.f32 %v1544_v61, %v3655_v16  ;;  %v1593_v18 = vpop.f32.mrf.mxu1  ;;  %v449_v61 = vld [vmem:[#allocation2 + $0xa0] sm:$0xff] }
 0x1d9   : > { %v3750_v38 = vadd.f32 %v1689_v42, %v1640_v39 }
 0x1da   : > { %v1594_v62 = vadd.f32 %v1593_v18, %v1545_v22 }
 0x1dc   : > { %v1923_v48 = vadd.f32 %v1594_v62, %v439_v19 }
 0x1de   : > { %1955 = vst [vmem:[#allocation2 + $0x40] sm:$0xff] %v1923_v48 }
 0x1df   : > { %v1642_v27 = vpop.f32.mrf.mxu2  ;;  %v1547_v36 = vpop.f32.mrf.mxu0 }
 0x1e0   : > { %v1691_v28 = vpop.f32.mrf.mxu3  ;;  %v1548_v2 = vadd.f32 %v1547_v36, %v3667_v1  ;;  %v1596_v37 = vpop.f32.mrf.mxu1 }
 0x1e1   : > { %v3753_v53 = vadd.f32 %v1691_v28, %v1642_v27  ;;  %v451_v28 = vld [vmem:[#allocation2 + $0x20] sm:$0xff] }
 0x1e2   : > { %v1597_v46 = vadd.f32 %v1596_v37, %v1548_v2  ;;  %1742 = vmatmul.bf16.gmra.mxu0 %v3457_v59 }
 0x1e3   : > { %1791 = vmatmul.bf16.gmra.mxu1 %v3459_v60 }
 0x1e4   : > { %1840 = vmatmul.bf16.gmra.mxu2 %v3651_v33  ;;  %v1925_v16 = vadd.f32 %v1597_v46, %v441_v26 }
 0x1e5   : > { %1889 = vmatmul.bf16.gmra.mxu3 %v3653_v15 }
 0x1e6   : > { %1957 = vst [vmem:[#allocation2 + $0xe0] sm:$0xff] %v1925_v16 }
 0x1e7   : > { %v1645_v5 = vpop.f32.mrf.mxu2  ;;  %v1549_v13 = vpop.f32.mrf.mxu0 }
 0x1e8   : > { %v1694_v30 = vpop.f32.mrf.mxu3  ;;  %v1550_v1 = vadd.f32 %v1549_v13, %v3679_v49  ;;  %v1598_v51 = vpop.f32.mrf.mxu1 }
 0x1e9   : > { %v3760_v54 = vadd.f32 %v1694_v30, %v1645_v5 }
 0x1ea   : > { %v1599_v57 = vadd.f32 %v1598_v51, %v1550_v1  ;;  %v422_v1 = vld [vmem:[#allocation2] sm:$0xff] }
 0x1ec   : > { %v1927_v17 = vadd.f32 %v1599_v57, %v443_v55 }
 0x1ee   : > { %1959 = vst [vmem:[#allocation2 + $0x70] sm:$0xff] %v1927_v17 }
 0x1ef   : > { %v1647_v59 = vpop.f32.mrf.mxu2  ;;  %v1552_v11 = vpop.f32.mrf.mxu0 }
 0x1f0   : > { %v1696_v60 = vpop.f32.mrf.mxu3  ;;  %v1553_v15 = vadd.f32 %v1552_v11, %v3685_v9  ;;  %v1601_v12 = vpop.f32.mrf.mxu1 }
 0x1f1   : > { %v3763_v33 = vadd.f32 %v1696_v60, %v1647_v59 }
 0x1f2   : > { %v1602_v44 = vadd.f32 %v1601_v12, %v1553_v15  ;;  %1747 = vmatmul.bf16.gmra.mxu0 %v3485_v31  ;;  %v424_v12 = vld [vmem:[#allocation2 + $0x18] sm:$0xff] }
 0x1f3   : > { %1796 = vmatmul.bf16.gmra.mxu1 %v3487_v32 }
 0x1f4   : > { %1845 = vmatmul.bf16.gmra.mxu2 %v3675_v21  ;;  %v1929_v49 = vadd.f32 %v1602_v44, %v445_v58 }
 0x1f5   : > { %1894 = vmatmul.bf16.gmra.mxu3 %v3677_v40 }
 0x1f6   : > { %1961 = vst [vmem:[#allocation2 + $0xa8] sm:$0xff] %v1929_v49 }
 0x1f7   : > { %v1650_v63 = vpop.f32.mrf.mxu2  ;;  %v1554_v3 = vpop.f32.mrf.mxu0 }
 0x1f8   : > { %v1699_v0 = vpop.f32.mrf.mxu3  ;;  %v1555_v9 = vadd.f32 %v1554_v3, %v3695_v43  ;;  %v1603_v10 = vpop.f32.mrf.mxu1 }
 0x1f9   : > { %v3770_v52 = vadd.f32 %v1699_v0, %v1650_v63 }
 0x1fa   : > { %v1604_v50 = vadd.f32 %v1603_v10, %v1555_v9 }
 0x1fc   : > { %v1931_v4 = vadd.f32 %v1604_v50, %v447_v35 }
 0x1fe   : > { %1963 = vst [vmem:[#allocation2 + $0x10] sm:$0xff] %v1931_v4 }
 0x1ff   : > { %v1652_v31 = vpop.f32.mrf.mxu2  ;;  %v1557_v39 = vpop.f32.mrf.mxu0 }
 0x200   : > { %v1701_v32 = vpop.f32.mrf.mxu3  ;;  %v1558_v40 = vadd.f32 %v1557_v39, %v3701_v34  ;;  %v1606_v42 = vpop.f32.mrf.mxu1 }
 0x201   : > { %v3773_v21 = vadd.f32 %v1701_v32, %v1652_v31 }
 0x202   : > { %v1607_v22 = vadd.f32 %v1606_v42, %v1558_v40  ;;  %1752 = vmatmul.bf16.gmra.mxu0 %v3513_v7 }
 0x203   : > { %1801 = vmatmul.bf16.gmra.mxu1 %v3515_v8 }
 0x204   : > { %1850 = vmatmul.bf16.gmra.mxu2 %v3691_v20  ;;  %v1933_v43 = vadd.f32 %v1607_v22, %v449_v61 }
 0x205   : > { %1899 = vmatmul.bf16.gmra.mxu3 %v3693_v25 }
 0x206   : > { %1965 = vst [vmem:[#allocation2 + $0xa0] sm:$0xff] %v1933_v43 }
 0x207   : > { %v1655_v18 = vpop.f32.mrf.mxu2  ;;  %v1559_v62 = vpop.f32.mrf.mxu0 }
 0x208   : > { %v1704_v19 = vpop.f32.mrf.mxu3  ;;  %v1560_v34 = vadd.f32 %v1559_v62, %v3704_v29  ;;  %v1608_v27 = vpop.f32.mrf.mxu1 }
 0x209   : > { %v3780_v48 = vadd.f32 %v1704_v19, %v1655_v18 }
 0x20a   : > { %v1609_v36 = vadd.f32 %v1608_v27, %v1560_v34 }
 0x20c   : > { %v1935_v2 = vadd.f32 %v1609_v36, %v451_v28 }
 0x20e   : > { %1967 = vst [vmem:[#allocation2 + $0x20] sm:$0xff] %v1935_v2 }
 0x20f   : > { %v1657_v7 = vpop.f32.mrf.mxu2  ;;  %v1718_v37 = vpop.f32.mrf.mxu0 }
 0x210   : > { %v1706_v8 = vpop.f32.mrf.mxu3  ;;  %v1767_v26 = vpop.f32.mrf.mxu1  ;;  %v1719_v25 = vadd.f32 %v1718_v37, %v3710_v56 }
 0x211   : > { %v3783_v20 = vadd.f32 %v1706_v8, %v1657_v7 }
 0x212   : > { %v1768_v46 = vadd.f32 %v1767_v26, %v1719_v25 }
 0x217   : > { %v1816_v16 = vpop.f32.mrf.mxu2  ;;  %v1720_v13 = vpop.f32.mrf.mxu0 }
 0x218   : > { %v1817_v5 = vadd.f32 %v1816_v16, %v1768_v46  ;;  %v1865_v30 = vpop.f32.mrf.mxu3  ;;  %v1769_v29 = vpop.f32.mrf.mxu1  ;;  %v1721_v55 = vadd.f32 %v1720_v13, %v3713_v45  ;;  %v426_v45 = vld [vmem:[#allocation2 + $0x68] sm:$0xff] }
 0x21a   : > { %v1866_v51 = vadd.f32 %v1865_v30, %v1817_v5  ;;  %v1770_v17 = vadd.f32 %v1769_v29, %v1721_v55 }
 0x21c   : > { %v1906_v57 = vadd.f32 %v1866_v51, %v422_v1 }
 0x21e   : > { %1938 = vst [vmem:[#allocation2] sm:$0xff] %v1906_v57 }
 0x21f   : > { %v1818_v59 = vpop.f32.mrf.mxu2  ;;  %v1723_v15 = vpop.f32.mrf.mxu0 }
 0x220   : > { %v1819_v60 = vadd.f32 %v1818_v59, %v1770_v17  ;;  %v1867_v11 = vpop.f32.mrf.mxu3  ;;  %v1772_v58 = vpop.f32.mrf.mxu1  ;;  %v1724_v44 = vadd.f32 %v1723_v15, %v3720_v6  ;;  %v428_v6 = vld [vmem:[#allocation2 + $0x48] sm:$0xff] }
 0x222   : > { %v1868_v56 = vadd.f32 %v1867_v11, %v1819_v60  ;;  %v1773_v63 = vadd.f32 %v1772_v58, %v1724_v44 }
 0x224   : > { %v1908_v49 = vadd.f32 %v1868_v56, %v424_v12 }
 0x226   : > { %1940 = vst [vmem:[#allocation2 + $0x18] sm:$0xff] %v1908_v49 }
 0x227   : > { %v1821_v0 = vpop.f32.mrf.mxu2  ;;  %v1725_v10 = vpop.f32.mrf.mxu0 }
 0x228   : > { %v1822_v3 = vadd.f32 %v1821_v0, %v1773_v63  ;;  %v1870_v9 = vpop.f32.mrf.mxu3  ;;  %v1774_v35 = vpop.f32.mrf.mxu1  ;;  %v1726_v4 = vadd.f32 %v1725_v10, %v3723_v24  ;;  %v430_v24 = vld [vmem:[#allocation2 + $0x88] sm:$0xff] }
 0x22a   : > { %v1871_v50 = vadd.f32 %v1870_v9, %v1822_v3  ;;  %v1775_v32 = vadd.f32 %v1774_v35, %v1726_v4 }
 0x22c   : > { %v1910_v31 = vadd.f32 %v1871_v50, %v426_v45 }
 0x22e   : > { %1942 = vst [vmem:[#allocation2 + $0x68] sm:$0xff] %v1910_v31 }
 0x22f   : > { %v1823_v39 = vpop.f32.mrf.mxu2  ;;  %v1728_v61 = vpop.f32.mrf.mxu0 }
 0x230   : > { %v1824_v40 = vadd.f32 %v1823_v39, %v1775_v32  ;;  %v1872_v42 = vpop.f32.mrf.mxu3  ;;  %v1777_v22 = vpop.f32.mrf.mxu1  ;;  %v1729_v18 = vadd.f32 %v1728_v61, %v3730_v47  ;;  %v432_v47 = vld [vmem:[#allocation2 + $0xb8] sm:$0xff] }
 0x232   : > { %v1873_v43 = vadd.f32 %v1872_v42, %v1824_v40  ;;  %v1778_v62 = vadd.f32 %v1777_v22, %v1729_v18 }
 0x234   : > { %v1912_v19 = vadd.f32 %v1873_v43, %v428_v6 }
 0x236   : > { %1944 = vst [vmem:[#allocation2 + $0x48] sm:$0xff] %v1912_v19 }
 0x237   : > { %v1826_v34 = vpop.f32.mrf.mxu2  ;;  %v1730_v36 = vpop.f32.mrf.mxu0 }
 0x238   : > { %v1827_v27 = vadd.f32 %v1826_v34, %v1778_v62  ;;  %v1875_v28 = vpop.f32.mrf.mxu3  ;;  %v1779_v2 = vpop.f32.mrf.mxu1  ;;  %v1731_v8 = vadd.f32 %v1730_v36, %v3733_v23  ;;  %v434_v23 = vld [vmem:[#allocation2 + $0xf0] sm:$0xff] }
 0x23a   : > { %v1876_v7 = vadd.f32 %v1875_v28, %v1827_v27  ;;  %v1780_v26 = vadd.f32 %v1779_v2, %v1731_v8 }
 0x23c   : > { %v1914_v37 = vadd.f32 %v1876_v7, %v430_v24 }
 0x23e   : > { %1946 = vst [vmem:[#allocation2 + $0x88] sm:$0xff] %v1914_v37 }
 0x23f   : > { %v1828_v25 = vpop.f32.mrf.mxu2  ;;  %v1733_v5 = vpop.f32.mrf.mxu0 }
 0x240   : > { %v1829_v46 = vadd.f32 %v1828_v25, %v1780_v26  ;;  %v1877_v16 = vpop.f32.mrf.mxu3  ;;  %v1782_v30 = vpop.f32.mrf.mxu1  ;;  %v1734_v1 = vadd.f32 %v1733_v5, %v3740_v14  ;;  %v436_v14 = vld [vmem:[#allocation2 + $0x78] sm:$0xff] }
 0x242   : > { %v1878_v13 = vadd.f32 %v1877_v16, %v1829_v46  ;;  %v1783_v51 = vadd.f32 %v1782_v30, %v1734_v1 }
 0x244   : > { %v1916_v29 = vadd.f32 %v1878_v13, %v432_v47 }
 0x246   : > { %1948 = vst [vmem:[#allocation2 + $0xb8] sm:$0xff] %v1916_v29 }
 0x247   : > { %v1831_v55 = vpop.f32.mrf.mxu2  ;;  %v1735_v59 = vpop.f32.mrf.mxu0 }
 0x248   : > { %v1832_v57 = vadd.f32 %v1831_v55, %v1783_v51  ;;  %v1880_v17 = vpop.f32.mrf.mxu3  ;;  %v1784_v60 = vpop.f32.mrf.mxu1  ;;  %v1736_v15 = vadd.f32 %v1735_v59, %v3743_v41  ;;  %v438_v41 = vld [vmem:[#allocation2 + $0x58] sm:$0xff] }
 0x24a   : > { %v1881_v11 = vadd.f32 %v1880_v17, %v1832_v57  ;;  %v1785_v58 = vadd.f32 %v1784_v60, %v1736_v15 }
 0x24c   : > { %v1918_v12 = vadd.f32 %v1881_v11, %v434_v23 }
 0x24e   : > { %1950 = vst [vmem:[#allocation2 + $0xf0] sm:$0xff] %v1918_v12 }
 0x24f   : > { %v1833_v56 = vpop.f32.mrf.mxu2  ;;  %v1738_v63 = vpop.f32.mrf.mxu0 }
 0x250   : > { %v1834_v44 = vadd.f32 %v1833_v56, %v1785_v58  ;;  %v1882_v49 = vpop.f32.mrf.mxu3  ;;  %v1787_v0 = vpop.f32.mrf.mxu1  ;;  %v1739_v9 = vadd.f32 %v1738_v63, %v3750_v38  ;;  %v440_v38 = vld [vmem:[#allocation2 + $0xc8] sm:$0xff] }
 0x252   : > { %v1883_v3 = vadd.f32 %v1882_v49, %v1834_v44  ;;  %v1788_v45 = vadd.f32 %v1787_v0, %v1739_v9 }
 0x254   : > { %v1920_v10 = vadd.f32 %v1883_v3, %v436_v14 }
 0x256   : > { %1952 = vst [vmem:[#allocation2 + $0x78] sm:$0xff] %v1920_v10 }
 0x257   : > { %v1836_v35 = vpop.f32.mrf.mxu2  ;;  %v1740_v31 = vpop.f32.mrf.mxu0 }
 0x258   : > { %v1837_v50 = vadd.f32 %v1836_v35, %v1788_v45  ;;  %v1885_v4 = vpop.f32.mrf.mxu3  ;;  %v1789_v32 = vpop.f32.mrf.mxu1  ;;  %v1741_v40 = vadd.f32 %v1740_v31, %v3753_v53  ;;  %v442_v53 = vld [vmem:[#allocation2 + $0x90] sm:$0xff] }
 0x25a   : > { %v1886_v39 = vadd.f32 %v1885_v4, %v1837_v50  ;;  %v1790_v61 = vadd.f32 %v1789_v32, %v1741_v40 }
 0x25c   : > { %v1922_v42 = vadd.f32 %v1886_v39, %v438_v41 }
 0x25e   : > { %1954 = vst [vmem:[#allocation2 + $0x58] sm:$0xff] %v1922_v42 }
 0x25f   : > { %v1838_v6 = vpop.f32.mrf.mxu2  ;;  %v1743_v18 = vpop.f32.mrf.mxu0 }
 0x260   : > { %v1839_v22 = vadd.f32 %v1838_v6, %v1790_v61  ;;  %v1887_v43 = vpop.f32.mrf.mxu3  ;;  %v1792_v19 = vpop.f32.mrf.mxu1  ;;  %v1744_v34 = vadd.f32 %v1743_v18, %v3760_v54  ;;  %v444_v54 = vld [vmem:[#allocation2 + $0xc0] sm:$0xff]  ;;  %v452_v6 = vld [vmem:[#allocation2 + $0x98] sm:$0xff] }
 0x262   : > { %v1888_v62 = vadd.f32 %v1887_v43, %v1839_v22  ;;  %v1793_v28 = vadd.f32 %v1792_v19, %v1744_v34 }
 0x264   : > { %v1924_v27 = vadd.f32 %v1888_v62, %v440_v38 }
 0x266   : > { %1956 = vst [vmem:[#allocation2 + $0xc8] sm:$0xff] %v1924_v27 }
 0x267   : > { %v1841_v36 = vpop.f32.mrf.mxu2  ;;  %v1745_v7 = vpop.f32.mrf.mxu0 }
 0x268   : > { %v1842_v24 = vadd.f32 %v1841_v36, %v1793_v28  ;;  %v1890_v2 = vpop.f32.mrf.mxu3  ;;  %v1794_v8 = vpop.f32.mrf.mxu1  ;;  %v1746_v26 = vadd.f32 %v1745_v7, %v3763_v33  ;;  %v446_v33 = vld [vmem:[#allocation2 + $0xd0] sm:$0xff] }
 0x26a   : > { %v1891_v37 = vadd.f32 %v1890_v2, %v1842_v24  ;;  %v1795_v46 = vadd.f32 %v1794_v8, %v1746_v26 }
 0x26c   : > { %v1926_v25 = vadd.f32 %v1891_v37, %v442_v53 }
 0x26e   : > { %1958 = vst [vmem:[#allocation2 + $0x90] sm:$0xff] %v1926_v25 }
 0x26f   : > { %v1843_v16 = vpop.f32.mrf.mxu2  ;;  %v1748_v30 = vpop.f32.mrf.mxu0 }
 0x270   : > { %v1844_v5 = vadd.f32 %v1843_v16, %v1795_v46  ;;  %v1892_v47 = vpop.f32.mrf.mxu3  ;;  %v1797_v13 = vpop.f32.mrf.mxu1  ;;  %v1749_v29 = vadd.f32 %v1748_v30, %v3770_v52  ;;  %v448_v52 = vld [vmem:[#allocation2 + $0x28] sm:$0xff] }
 0x272   : > { %v1893_v1 = vadd.f32 %v1892_v47, %v1844_v5  ;;  %v1798_v55 = vadd.f32 %v1797_v13, %v1749_v29 }
 0x274   : > { %v1928_v51 = vadd.f32 %v1893_v1, %v444_v54 }
 0x276   : > { %1960 = vst [vmem:[#allocation2 + $0xc0] sm:$0xff] %v1928_v51 }
 0x277   : > { %v1846_v57 = vpop.f32.mrf.mxu2  ;;  %v1750_v23 = vpop.f32.mrf.mxu0 }
 0x278   : > { %v1847_v17 = vadd.f32 %v1846_v57, %v1798_v55  ;;  %v1895_v59 = vpop.f32.mrf.mxu3  ;;  %v1799_v60 = vpop.f32.mrf.mxu1  ;;  %v1751_v15 = vadd.f32 %v1750_v23, %v3773_v21  ;;  %v450_v21 = vld [vmem:[#allocation2 + $0xf8] sm:$0xff] }
 0x27a   : > { %v1896_v11 = vadd.f32 %v1895_v59, %v1847_v17  ;;  %v1800_v58 = vadd.f32 %v1799_v60, %v1751_v15 }
 0x27c   : > { %v1930_v12 = vadd.f32 %v1896_v11, %v446_v33 }
 0x27e   : > { %1962 = vst [vmem:[#allocation2 + $0xd0] sm:$0xff] %v1930_v12 }
 0x27f   : > { %v1848_v56 = vpop.f32.mrf.mxu2  ;;  %v1753_v63 = vpop.f32.mrf.mxu0 }
 0x280   : > { %v1849_v44 = vadd.f32 %v1848_v56, %v1800_v58  ;;  %v1897_v49 = vpop.f32.mrf.mxu3  ;;  %v1754_v0 = vadd.f32 %v1753_v63, %v3780_v48  ;;  %v1802_v3 = vpop.f32.mrf.mxu1 }
 0x282   : > { %v1898_v14 = vadd.f32 %v1897_v49, %v1849_v44  ;;  %v1803_v10 = vadd.f32 %v1802_v3, %v1754_v0 }
 0x284   : > { %v1932_v9 = vadd.f32 %v1898_v14, %v448_v52 }
 0x286   : > { %1964 = vst [vmem:[#allocation2 + $0x28] sm:$0xff] %v1932_v9 }
 0x287   : > { %v1851_v45 = vpop.f32.mrf.mxu2  ;;  %v1755_v4 = vpop.f32.mrf.mxu0 }
 0x288   : > { %v1852_v35 = vadd.f32 %v1851_v45, %v1803_v10  ;;  %v1900_v50 = vpop.f32.mrf.mxu3  ;;  %v1756_v41 = vadd.f32 %v1755_v4, %v3783_v20  ;;  %v1804_v39 = vpop.f32.mrf.mxu1 }
 0x28a   : > { %v1901_v31 = vadd.f32 %v1900_v50, %v1852_v35  ;;  %v1805_v40 = vadd.f32 %v1804_v39, %v1756_v41 }
 0x28c   : > { %v1934_v32 = vadd.f32 %v1901_v31, %v450_v21 }
 0x28e   : > { %1966 = vst [vmem:[#allocation2 + $0xf8] sm:$0xff] %v1934_v32 }
 0x28f   : > { %v1853_v42 = vpop.f32.mrf.mxu2 }
 0x290   : > { %v1854_v61 = vadd.f32 %v1853_v42, %v1805_v40  ;;  %v1902_v48 = vpop.f32.mrf.mxu3 }
 0x292   : > { %v1903_v22 = vadd.f32 %v1902_v48, %v1854_v61  ;;  %1972 = sbr.rel (%p2815_p11) target bundleno = 691 (0x2b3), region = 63 }
 0x294   : > { %v1936_v43 = vadd.f32 %v1903_v22, %v452_v6 }
 0x296   : > { %1968 = vst [vmem:[#allocation2 + $0x98] sm:$0xff] %v1936_v43 }
 0x297   : > { %v1973_v18 = vld [vmem:[#allocation2 + $0xb0] sm:$0xff]  ;;  %v1974_v38 = vld [vmem:[#allocation2] sm:$0xff]  ;;  %v1975_v34 = vld [vmem:[#allocation2 + $0xd8] sm:$0xff] }
 0x298   : > { %v2005_v20 = vld [vmem:[%s3906_s2] sm:$0x3]  ;;  %v1976_v27 = vld [vmem:[#allocation2 + $0x18] sm:$0xff]  ;;  %v1977_v28 = vld [vmem:[#allocation2 + $0x50] sm:$0xff] }
 0x299   : > { %v3805_v19 = vperm.slane %v2005_v20, 0  ;;  %v3807_v62 = vperm.slane %v2005_v20, 1  ;;  %v1978_v36 = vld [vmem:[#allocation2 + $0x68] sm:$0xff]  ;;  %v1979_v24 = vld [vmem:[#allocation2 + $0x30] sm:$0xff]  ;;  %v1981_v5 = vld [vmem:[#allocation2 + $0x80] sm:$0xff] }
 0x29a   : > { %v1980_v2 = vld [vmem:[#allocation2 + $0x48] sm:$0xff]  ;;  %v1984_v51 = vld [vmem:[#allocation2 + $0xb8] sm:$0xff]  ;;  %v1985_v23 = vld [vmem:[#allocation2 + $0x60] sm:$0xff] }
 0x29b   : > { %v2011_v7 = vadd.f32 %v3805_v19, %v1973_v18  ;;  %v2012_v53 = vadd.f32 %v3807_v62, %v1974_v38  ;;  %v2013_v8 = vadd.f32 %v3805_v19, %v1975_v34  ;;  %v2014_v37 = vadd.f32 %v3807_v62, %v1976_v27  ;;  %v1982_v47 = vld [vmem:[#allocation2 + $0x88] sm:$0xff]  ;;  %v1986_v33 = vld [vmem:[#allocation2 + $0xf0] sm:$0xff]  ;;  %v1988_v56 = vld [vmem:[#allocation2 + $0x78] sm:$0xff] }
 0x29c   : > { %v2015_v26 = vadd.f32 %v3805_v19, %v1977_v28  ;;  %v2016_v25 = vadd.f32 %v3807_v62, %v1978_v36  ;;  %v2017_v46 = vadd.f32 %v3805_v19, %v1979_v24  ;;  %v2018_v16 = vadd.f32 %v3807_v62, %v1980_v2  ;;  %v1983_v29 = vld [vmem:[#allocation2 + $0xe8] sm:$0xff]  ;;  %v1989_v14 = vld [vmem:[#allocation2 + $0x38] sm:$0xff]  ;;  %v1991_v31 = vld [vmem:[#allocation2 + $0x40] sm:$0xff] }
 0x29d   : > { %v2043_v30 = vmax.f32 %v2011_v7, 0.0  ;;  %v2044_v54 = vmax.f32 %v2012_v53, 0.0  ;;  %v2045_v13 = vmax.f32 %v2013_v8, 0.0  ;;  %v2046_v1 = vmax.f32 %v2014_v37, 0.0  ;;  %v1987_v58 = vld [vmem:[#allocation2 + $0x8] sm:$0xff]  ;;  %v1990_v45 = vld [vmem:[#allocation2 + $0x58] sm:$0xff] }
 0x29e   : > { %v2047_v55 = vmax.f32 %v2015_v26, 0.0  ;;  %v2048_v57 = vmax.f32 %v2016_v25, 0.0  ;;  %v2049_v17 = vmax.f32 %v2017_v46, 0.0  ;;  %v2050_v59 = vmax.f32 %v2018_v16, 0.0  ;;  %v1992_v41 = vld [vmem:[#allocation2 + $0xc8] sm:$0xff]  ;;  %v1993_v61 = vld [vmem:[#allocation2 + $0xe0] sm:$0xff] }
 0x29f   : > { %v2075_v60 = vpack.c.bf16 %v2044_v54, %v2043_v30  ;;  %v2076_v11 = vpack.c.bf16 %v2046_v1, %v2045_v13  ;;  %v2019_v15 = vadd.f32 %v3805_v19, %v1981_v5  ;;  %v2020_v12 = vadd.f32 %v3807_v62, %v1982_v47  ;;  %v1994_v6 = vld [vmem:[#allocation2 + $0x90] sm:$0xff]  ;;  %v1996_v20 = vld [vmem:[#allocation2 + $0xc0] sm:$0xff]  ;;  %v1997_v24 = vld [vmem:[#allocation2 + $0xa8] sm:$0xff] }
 0x2a0   : > { %v2077_v44 = vpack.c.bf16 %v2048_v57, %v2047_v55  ;;  %v2078_v49 = vpack.c.bf16 %v2050_v59, %v2049_v17  ;;  %v2021_v63 = vadd.f32 %v3805_v19, %v1983_v29  ;;  %v2022_v52 = vadd.f32 %v3807_v62, %v1984_v51  ;;  %v1995_v38 = vld [vmem:[#allocation2 + $0x70] sm:$0xff]  ;;  %v2000_v47 = vld [vmem:[#allocation2 + $0x28] sm:$0xff]  ;;  %v2001_v29 = vld [vmem:[#allocation2 + $0xa0] sm:$0xff] }
 0x2a1   : > { %2091 = vst [vmem:[%s3907_s3] sm:$0xff] %v2075_v60  ;;  %v2051_v0 = vmax.f32 %v2019_v15, 0.0  ;;  %v2052_v3 = vmax.f32 %v2020_v12, 0.0  ;;  %v2023_v9 = vadd.f32 %v3805_v19, %v1985_v23  ;;  %v2024_v10 = vadd.f32 %v3807_v62, %v1986_v33  ;;  %v1998_v37 = vld [vmem:[#allocation2 + $0xd0] sm:$0xff]  ;;  %v2002_v51 = vld [vmem:[#allocation2 + $0xf8] sm:$0xff]  ;;  %v2003_v23 = vld [vmem:[#allocation2 + $0x20] sm:$0xff] }
 0x2a2   : > { %2092 = vst [vmem:[%s3907_s3 + $0x8] sm:$0xff] %v2076_v11  ;;  %v2053_v35 = vmax.f32 %v2021_v63, 0.0  ;;  %v2054_v50 = vmax.f32 %v2022_v52, 0.0  ;;  %v2025_v4 = vadd.f32 %v3805_v19, %v1987_v58  ;;  %v2026_v21 = vadd.f32 %v3807_v62, %v1988_v56  ;;  %v1999_v5 = vld [vmem:[#allocation2 + $0x10] sm:$0xff]  ;;  %v2004_v33 = vld [vmem:[#allocation2 + $0x98] sm:$0xff] }
 0x2a3   : > { %2093 = vst [vmem:[%s3907_s3 + $0x10] sm:$0xff] %v2077_v44  ;;  %v2079_v32 = vpack.c.bf16 %v2052_v3, %v2051_v0  ;;  %v2055_v39 = vmax.f32 %v2023_v9, 0.0  ;;  %v2056_v40 = vmax.f32 %v2024_v10, 0.0  ;;  %v2027_v42 = vadd.f32 %v3805_v19, %v1989_v14 }
 0x2a4   : > { %2094 = vst [vmem:[%s3907_s3 + $0x18] sm:$0xff] %v2078_v49  ;;  %v2080_v48 = vpack.c.bf16 %v2054_v50, %v2053_v35  ;;  %v2057_v22 = vmax.f32 %v2025_v4, 0.0  ;;  %v2058_v43 = vmax.f32 %v2026_v21, 0.0  ;;  %v2028_v18 = vadd.f32 %v3807_v62, %v1990_v45 }
 0x2a5   : > { %2095 = vst [vmem:[%s3907_s3 + $0x20] sm:$0xff] %v2079_v32  ;;  %v2081_v34 = vpack.c.bf16 %v2056_v40, %v2055_v39  ;;  %v2059_v27 = vmax.f32 %v2027_v42, 0.0  ;;  %v2029_v28 = vadd.f32 %v3805_v19, %v1991_v31  ;;  %v2030_v36 = vadd.f32 %v3807_v62, %v1992_v41 }
 0x2a6   : > { %2096 = vst [vmem:[%s3907_s3 + $0x28] sm:$0xff] %v2080_v48  ;;  %v2082_v2 = vpack.c.bf16 %v2058_v43, %v2057_v22  ;;  %v2060_v7 = vmax.f32 %v2028_v18, 0.0  ;;  %v2031_v53 = vadd.f32 %v3805_v19, %v1993_v61  ;;  %v2032_v8 = vadd.f32 %v3807_v62, %v1994_v6 }
 0x2a7   : > { %2097 = vst [vmem:[%s3907_s3 + $0x30] sm:$0xff] %v2081_v34  ;;  %v2061_v26 = vmax.f32 %v2029_v28, 0.0  ;;  %v2062_v25 = vmax.f32 %v2030_v36, 0.0  ;;  %v2033_v46 = vadd.f32 %v3805_v19, %v1995_v38  ;;  %v2034_v16 = vadd.f32 %v3807_v62, %v1996_v20 }
 0x2a8   : > { %2098 = vst [vmem:[%s3907_s3 + $0x38] sm:$0xff] %v2082_v2  ;;  %v2083_v30 = vpack.c.bf16 %v2060_v7, %v2059_v27  ;;  %v2063_v54 = vmax.f32 %v2031_v53, 0.0  ;;  %v2064_v13 = vmax.f32 %v2032_v8, 0.0  ;;  %v2035_v1 = vadd.f32 %v3805_v19, %v1997_v24 }
 0x2a9   : > { %v2084_v55 = vpack.c.bf16 %v2062_v25, %v2061_v26  ;;  %v2065_v57 = vmax.f32 %v2033_v46, 0.0  ;;  %v2066_v17 = vmax.f32 %v2034_v16, 0.0  ;;  %v2036_v59 = vadd.f32 %v3807_v62, %v1998_v37 }
 0x2aa   : > { %2099 = vst [vmem:[%s3907_s3 + $0x40] sm:$0xff] %v2083_v30  ;;  %v2085_v60 = vpack.c.bf16 %v2064_v13, %v2063_v54  ;;  %v2067_v11 = vmax.f32 %v2035_v1, 0.0  ;;  %v2037_v15 = vadd.f32 %v3805_v19, %v1999_v5  ;;  %v2038_v12 = vadd.f32 %v3807_v62, %v2000_v47 }
 0x2ab   : > { %2100 = vst [vmem:[%s3907_s3 + $0x48] sm:$0xff] %v2084_v55  ;;  %v2086_v58 = vpack.c.bf16 %v2066_v17, %v2065_v57  ;;  %v2068_v56 = vmax.f32 %v2036_v59, 0.0  ;;  %v2039_v44 = vadd.f32 %v3805_v19, %v2001_v29  ;;  %v2040_v49 = vadd.f32 %v3807_v62, %v2002_v51 }
 0x2ac   : > { %2101 = vst [vmem:[%s3907_s3 + $0x50] sm:$0xff] %v2085_v60  ;;  %v2069_v63 = vmax.f32 %v2037_v15, 0.0  ;;  %v2070_v52 = vmax.f32 %v2038_v12, 0.0  ;;  %v2041_v14 = vadd.f32 %v3805_v19, %v2003_v23  ;;  %v2042_v0 = vadd.f32 %v3807_v62, %v2004_v33 }
 0x2ad   : > { %2102 = vst [vmem:[%s3907_s3 + $0x58] sm:$0xff] %v2086_v58  ;;  %v2087_v3 = vpack.c.bf16 %v2068_v56, %v2067_v11  ;;  %v2071_v9 = vmax.f32 %v2039_v44, 0.0  ;;  %v2072_v10 = vmax.f32 %v2040_v49, 0.0 }
 0x2ae   : > { %v2088_v45 = vpack.c.bf16 %v2070_v52, %v2069_v63  ;;  %v2073_v35 = vmax.f32 %v2041_v14, 0.0  ;;  %v2074_v50 = vmax.f32 %v2042_v0, 0.0 }
 0x2af   : > { %2103 = vst [vmem:[%s3907_s3 + $0x60] sm:$0xff] %v2087_v3  ;;  %v2089_v4 = vpack.c.bf16 %v2072_v10, %v2071_v9 }
 0x2b0   : > { %2104 = vst [vmem:[%s3907_s3 + $0x68] sm:$0xff] %v2088_v45  ;;  %v2090_v19 = vpack.c.bf16 %v2074_v50, %v2073_v35 }
 0x2b1   : > { %2105 = vst [vmem:[%s3907_s3 + $0x70] sm:$0xff] %v2089_v4 }
 0x2b2   : > { %2106 = vst [vmem:[%s3907_s3 + $0x78] sm:$0xff] %v2090_v19 }
 0x2b3 PF: > { %s13_s16 = sadd.s32 1, %s3047_s16   ;;  %s3908_s12 = smov %s3035_s13 }
 0x2b4   : > { %p10_p12 = scmp.ge.s32.totalorder %s13_s16, 5   ;;  %s3909_s13 = smov %s3105_s20 }
 0x2b5   : > { %s3910_s14 = smov %s3043_s15  ;;  %s3911_s15 = smov %s3913_s17 }
 0x2b6   :  { %12 = sbr.rel (!%p10_p12) target bundleno = 3 (0x3), region = 104 }

// kernel: deeplab_forward.28
= control target key start
LH: loop header
LB: loop body
LE: loop exit
PB: predicated region body
PF: predicated region fallthrough
CT: control target
= control target key end

     0   :  { %s873_s1 = inlined_call_operand.vmem [shape: bf16[256,128], index: 1, kind: input, shape index: {}]   ;;  %s874_s0 = inlined_call_operand.vmem [shape: bf16[128,256], index: 0, kind: input, shape index: {}]   ;;  %s875_s2 = inlined_call_operand.vmem [shape: f32[1,128], index: 2, kind: input, shape index: {}]   ;;  %s876_s3 = inlined_call_operand.vmem [shape: f32[128,128], index: 3, kind: output, shape index: {}]  }
   0x1   :  { %v614_v0 = vld [vmem:[%s873_s1 + $0x38] sm:$0xff]  ;;  %v613_v2 = vld [vmem:[%s873_s1 + $0x30] sm:$0xff]  ;;  %v612_v4 = vld [vmem:[%s873_s1 + $0x28] sm:$0xff] }
   0x2   :  { %v622_v1 = vld [vmem:[%s873_s1 + $0x78] sm:$0xff]  ;;  %274 = vmatpush.bf16.msra.mxu0 %v614_v0  ;;  %623 = vmatpush.bf16.msra.mxu2 %v614_v0  ;;  %v621_v3 = vld [vmem:[%s873_s1 + $0x70] sm:$0xff]  ;;  %v620_v5 = vld [vmem:[%s873_s1 + $0x68] sm:$0xff] }
   0x3   :  { %323 = vmatpush.bf16.msra.mxu1 %v622_v1  ;;  %631 = vmatpush.bf16.msra.mxu3 %v622_v1  ;;  %v611_v6 = vld [vmem:[%s873_s1 + $0x20] sm:$0xff]  ;;  %v610_v8 = vld [vmem:[%s873_s1 + $0x18] sm:$0xff]  ;;  %v609_v10 = vld [vmem:[%s873_s1 + $0x10] sm:$0xff] }
   0x4   :  { %v619_v7 = vld [vmem:[%s873_s1 + $0x60] sm:$0xff]  ;;  %v618_v9 = vld [vmem:[%s873_s1 + $0x58] sm:$0xff]  ;;  %v617_v11 = vld [vmem:[%s873_s1 + $0x50] sm:$0xff] }
   0x5   :  { %v608_v12 = vld [vmem:[%s873_s1 + $0x8] sm:$0xff]  ;;  %v607_v14 = vld [vmem:[%s873_s1] sm:$0xff]  ;;  %v473_v28 = vld [vmem:[%s874_s0 + $0x10] sm:$0xf] }
   0x6   :  { %275 = vmatpush.bf16.msra.mxu0 %v613_v2  ;;  %624 = vmatpush.bf16.msra.mxu2 %v613_v2  ;;  %v616_v13 = vld [vmem:[%s873_s1 + $0x48] sm:$0xff]  ;;  %v615_v15 = vld [vmem:[%s873_s1 + $0x40] sm:$0xff]  ;;  %v594_v29 = vld [vmem:[%s874_s0 + $0x14] sm:$0xf0] }
   0x7   :  { %324 = vmatpush.bf16.msra.mxu1 %v621_v3  ;;  %632 = vmatpush.bf16.msra.mxu3 %v621_v3  ;;  %v465_v16 = vld [vmem:[%s874_s0] sm:$0xf]  ;;  %v592_v17 = vld [vmem:[%s874_s0 + $0x4] sm:$0xf0]  ;;  %v591_v20 = vld [vmem:[%s874_s0 + $0x4] sm:$0xf]  ;;  %v474_v36 = vor.u32 %v594_v29, %v473_v28 }
   0x8   :  { %v497_v18 = vld [vmem:[%s874_s0 + $0x40] sm:$0xf]  ;;  %v600_v19 = vld [vmem:[%s874_s0 + $0x44] sm:$0xf0]  ;;  %v467_v21 = vld [vmem:[%s874_s0 + $0x8] sm:$0xf0]  ;;  %v466_v24 = vor.u32 %v592_v17, %v465_v16 }
   0x9   :  { %v599_v22 = vld [vmem:[%s874_s0 + $0x44] sm:$0xf]  ;;  %v499_v23 = vld [vmem:[%s874_s0 + $0x48] sm:$0xf0]  ;;  %v498_v25 = vor.u32 %v600_v19, %v497_v18  ;;  %v470_v26 = vor.u32 %v591_v20, %v467_v21  ;;  %v505_v30 = vld [vmem:[%s874_s0 + $0x50] sm:$0xf] }
   0xa   :  { %276 = vmatpush.bf16.msra.mxu0 %v612_v4  ;;  %625 = vmatpush.bf16.msra.mxu2 %v612_v4  ;;  %v502_v27 = vor.u32 %v599_v22, %v499_v23  ;;  %v602_v31 = vld [vmem:[%s874_s0 + $0x54] sm:$0xf0]  ;;  %v593_v32 = vld [vmem:[%s874_s0 + $0x14] sm:$0xf]  ;;  %v475_v33 = vld [vmem:[%s874_s0 + $0x18] sm:$0xf0] }
   0xb   :  { %325 = vmatpush.bf16.msra.mxu1 %v620_v5  ;;  %633 = vmatpush.bf16.msra.mxu3 %v620_v5  ;;  %v601_v34 = vld [vmem:[%s874_s0 + $0x54] sm:$0xf]  ;;  %v507_v35 = vld [vmem:[%s874_s0 + $0x58] sm:$0xf0]  ;;  %v506_v37 = vor.u32 %v602_v31, %v505_v30  ;;  %v478_v38 = vor.u32 %v593_v32, %v475_v33  ;;  %v481_v40 = vld [vmem:[%s874_s0 + $0x20] sm:$0xf] }
   0xc   :  { %v510_v39 = vor.u32 %v601_v34, %v507_v35  ;;  %v596_v41 = vld [vmem:[%s874_s0 + $0x24] sm:$0xf0]  ;;  %v513_v42 = vld [vmem:[%s874_s0 + $0x60] sm:$0xf]  ;;  %v595_v44 = vld [vmem:[%s874_s0 + $0x24] sm:$0xf] }
   0xd   :  { %v604_v43 = vld [vmem:[%s874_s0 + $0x64] sm:$0xf0]  ;;  %v483_v45 = vld [vmem:[%s874_s0 + $0x28] sm:$0xf0]  ;;  %v603_v46 = vld [vmem:[%s874_s0 + $0x64] sm:$0xf]  ;;  %v482_v48 = vor.u32 %v596_v41, %v481_v40 }
   0xe   :  { %277 = vmatpush.bf16.msra.mxu0 %v611_v6  ;;  %626 = vmatpush.bf16.msra.mxu2 %v611_v6  ;;  %v515_v47 = vld [vmem:[%s874_s0 + $0x68] sm:$0xf0]  ;;  %v514_v49 = vor.u32 %v604_v43, %v513_v42  ;;  %v486_v50 = vor.u32 %v595_v44, %v483_v45  ;;  %v489_v52 = vld [vmem:[%s874_s0 + $0x30] sm:$0xf]  ;;  %v598_v53 = vld [vmem:[%s874_s0 + $0x34] sm:$0xf0] }
   0xf   :  { %326 = vmatpush.bf16.msra.mxu1 %v619_v7  ;;  %634 = vmatpush.bf16.msra.mxu3 %v619_v7  ;;  %v518_v51 = vor.u32 %v603_v46, %v515_v47  ;;  %v521_v54 = vld [vmem:[%s874_s0 + $0x70] sm:$0xf]  ;;  %v606_v55 = vld [vmem:[%s874_s0 + $0x74] sm:$0xf0]  ;;  %v597_v56 = vld [vmem:[%s874_s0 + $0x34] sm:$0xf]  ;;  %v490_v60 = vor.u32 %v598_v53, %v489_v52 }
  0x10   :  { %v491_v57 = vld [vmem:[%s874_s0 + $0x38] sm:$0xf0]  ;;  %v605_v58 = vld [vmem:[%s874_s0 + $0x74] sm:$0xf]  ;;  %v522_v61 = vor.u32 %v606_v55, %v521_v54  ;;  %v807_v1 = vld [vmem:[%s875_s2] ss:$0 sm:$0xff] }
  0x11   :  { %v523_v59 = vld [vmem:[%s874_s0 + $0x78] sm:$0xf0]  ;;  %v494_v62 = vor.u32 %v597_v56, %v491_v57 }
  0x12   :  { %278 = vmatpush.bf16.msra.mxu0 %v610_v8  ;;  %627 = vmatpush.bf16.msra.mxu2 %v610_v8  ;;  %v526_v63 = vor.u32 %v605_v58, %v523_v59 }
  0x13   :  { %327 = vmatpush.bf16.msra.mxu1 %v618_v9  ;;  %635 = vmatpush.bf16.msra.mxu3 %v618_v9 }
  0x16   :  { %279 = vmatpush.bf16.msra.mxu0 %v609_v10  ;;  %628 = vmatpush.bf16.msra.mxu2 %v609_v10 }
  0x17   :  { %328 = vmatpush.bf16.msra.mxu1 %v617_v11  ;;  %636 = vmatpush.bf16.msra.mxu3 %v617_v11 }
  0x1a   :  { %280 = vmatpush.bf16.msra.mxu0 %v608_v12  ;;  %629 = vmatpush.bf16.msra.mxu2 %v608_v12 }
  0x1b   :  { %329 = vmatpush.bf16.msra.mxu1 %v616_v13  ;;  %637 = vmatpush.bf16.msra.mxu3 %v616_v13 }
  0x1e   :  { %281 = vmatpush.bf16.msra.mxu0 %v607_v14  ;;  %630 = vmatpush.bf16.msra.mxu2 %v607_v14 }
  0x1f   :  { %330 = vmatpush.bf16.msra.mxu1 %v615_v15  ;;  %638 = vmatpush.bf16.msra.mxu3 %v615_v15 }
  0x21   :  { %282 = vmatmul.bf16.vlgmr.msra.gmra.mxu0 %v466_v24  ;;  %302 = vmatmul.bf16.vlgmr.msra.gmra.mxu2 %v498_v25 }
  0x22   :  { %331 = vmatmul.bf16.vlgmr.msra.gmra.mxu1 %v470_v26  ;;  %351 = vmatmul.bf16.vlgmr.msra.gmra.mxu3 %v502_v27 }
  0x31   :  { %287 = vmatmul.bf16.gmra.mxu0 %v474_v36  ;;  %307 = vmatmul.bf16.gmra.mxu2 %v506_v37 }
  0x32   :  { %336 = vmatmul.bf16.gmra.mxu1 %v478_v38  ;;  %356 = vmatmul.bf16.gmra.mxu3 %v510_v39 }
  0x41   :  { %292 = vmatmul.bf16.gmra.mxu0 %v482_v48  ;;  %312 = vmatmul.bf16.gmra.mxu2 %v514_v49 }
  0x42   :  { %341 = vmatmul.bf16.gmra.mxu1 %v486_v50  ;;  %361 = vmatmul.bf16.gmra.mxu3 %v518_v51 }
  0x51   :  { %297 = vmatmul.bf16.gmra.mxu0 %v490_v60  ;;  %317 = vmatmul.bf16.gmra.mxu2 %v522_v61 }
  0x52   :  { %346 = vmatmul.bf16.gmra.mxu1 %v494_v62  ;;  %366 = vmatmul.bf16.gmra.mxu3 %v526_v63 }
  0x9e   :  { %v283_v0 = vpop.f32.mrf.mxu0 }
  0x9f   :  { %v332_v2 = vpop.f32.mrf.mxu1 }
  0xa0   :  { %v333_v3 = vadd.f32 %v332_v2, %v283_v0 }
  0xa2   :  { %v427_v4 = vadd.f32 %v807_v1, %v333_v3 }
  0xa4   :  { %443 = vst [vmem:[%s876_s3] sm:$0xff] %v427_v4  ;;  %v303_v5 = vpop.f32.mrf.mxu2 }
  0xa5   :  { %v352_v6 = vpop.f32.mrf.mxu3 }
  0xa6   :  { %v353_v7 = vadd.f32 %v352_v6, %v303_v5  ;;  %v285_v8 = vpop.f32.mrf.mxu0 }
  0xa7   :  { %v334_v9 = vpop.f32.mrf.mxu1 }
  0xa8   :  { %v435_v10 = vadd.f32 %v807_v1, %v353_v7  ;;  %v335_v11 = vadd.f32 %v334_v9, %v285_v8 }
  0xaa   :  { %451 = vst [vmem:[%s876_s3 + $0x40] sm:$0xff] %v435_v10  ;;  %v428_v12 = vadd.f32 %v807_v1, %v335_v11 }
  0xac   :  { %444 = vst [vmem:[%s876_s3 + $0x8] sm:$0xff] %v428_v12  ;;  %v305_v13 = vpop.f32.mrf.mxu2 }
  0xad   :  { %v354_v14 = vpop.f32.mrf.mxu3 }
  0xae   :  { %v355_v15 = vadd.f32 %v354_v14, %v305_v13  ;;  %v288_v16 = vpop.f32.mrf.mxu0 }
  0xaf   :  { %v337_v17 = vpop.f32.mrf.mxu1 }
  0xb0   :  { %v436_v18 = vadd.f32 %v807_v1, %v355_v15  ;;  %v338_v19 = vadd.f32 %v337_v17, %v288_v16 }
  0xb2   :  { %452 = vst [vmem:[%s876_s3 + $0x48] sm:$0xff] %v436_v18  ;;  %v429_v20 = vadd.f32 %v807_v1, %v338_v19 }
  0xb4   :  { %445 = vst [vmem:[%s876_s3 + $0x10] sm:$0xff] %v429_v20  ;;  %v308_v21 = vpop.f32.mrf.mxu2 }
  0xb5   :  { %v357_v22 = vpop.f32.mrf.mxu3 }
  0xb6   :  { %v358_v23 = vadd.f32 %v357_v22, %v308_v21  ;;  %v290_v24 = vpop.f32.mrf.mxu0 }
  0xb7   :  { %v339_v25 = vpop.f32.mrf.mxu1 }
  0xb8   :  { %v437_v26 = vadd.f32 %v807_v1, %v358_v23  ;;  %v340_v27 = vadd.f32 %v339_v25, %v290_v24 }
  0xba   :  { %453 = vst [vmem:[%s876_s3 + $0x50] sm:$0xff] %v437_v26  ;;  %v430_v28 = vadd.f32 %v807_v1, %v340_v27 }
  0xbc   :  { %446 = vst [vmem:[%s876_s3 + $0x18] sm:$0xff] %v430_v28  ;;  %v310_v29 = vpop.f32.mrf.mxu2 }
  0xbd   :  { %v359_v30 = vpop.f32.mrf.mxu3 }
  0xbe   :  { %v360_v31 = vadd.f32 %v359_v30, %v310_v29  ;;  %v293_v32 = vpop.f32.mrf.mxu0 }
  0xbf   :  { %v342_v33 = vpop.f32.mrf.mxu1 }
  0xc0   :  { %v438_v34 = vadd.f32 %v807_v1, %v360_v31  ;;  %v343_v35 = vadd.f32 %v342_v33, %v293_v32 }
  0xc2   :  { %454 = vst [vmem:[%s876_s3 + $0x58] sm:$0xff] %v438_v34  ;;  %v431_v36 = vadd.f32 %v807_v1, %v343_v35 }
  0xc4   :  { %447 = vst [vmem:[%s876_s3 + $0x20] sm:$0xff] %v431_v36  ;;  %v313_v37 = vpop.f32.mrf.mxu2 }
  0xc5   :  { %v362_v38 = vpop.f32.mrf.mxu3 }
  0xc6   :  { %v363_v39 = vadd.f32 %v362_v38, %v313_v37  ;;  %v295_v40 = vpop.f32.mrf.mxu0 }
  0xc7   :  { %v344_v41 = vpop.f32.mrf.mxu1 }
  0xc8   :  { %v439_v42 = vadd.f32 %v807_v1, %v363_v39  ;;  %v345_v43 = vadd.f32 %v344_v41, %v295_v40 }
  0xca   :  { %455 = vst [vmem:[%s876_s3 + $0x60] sm:$0xff] %v439_v42  ;;  %v432_v44 = vadd.f32 %v807_v1, %v345_v43 }
  0xcc   :  { %448 = vst [vmem:[%s876_s3 + $0x28] sm:$0xff] %v432_v44  ;;  %v315_v45 = vpop.f32.mrf.mxu2 }
  0xcd   :  { %v364_v46 = vpop.f32.mrf.mxu3 }
  0xce   :  { %v365_v47 = vadd.f32 %v364_v46, %v315_v45  ;;  %v298_v48 = vpop.f32.mrf.mxu0 }
  0xcf   :  { %v347_v49 = vpop.f32.mrf.mxu1 }
  0xd0   :  { %v440_v50 = vadd.f32 %v807_v1, %v365_v47  ;;  %v348_v51 = vadd.f32 %v347_v49, %v298_v48 }
  0xd2   :  { %456 = vst [vmem:[%s876_s3 + $0x68] sm:$0xff] %v440_v50  ;;  %v433_v52 = vadd.f32 %v807_v1, %v348_v51 }
  0xd4   :  { %449 = vst [vmem:[%s876_s3 + $0x30] sm:$0xff] %v433_v52  ;;  %v318_v53 = vpop.f32.mrf.mxu2 }
  0xd5   :  { %v367_v54 = vpop.f32.mrf.mxu3 }
  0xd6   :  { %v368_v55 = vadd.f32 %v367_v54, %v318_v53  ;;  %v300_v56 = vpop.f32.mrf.mxu0 }
  0xd7   :  { %v349_v57 = vpop.f32.mrf.mxu1 }
  0xd8   :  { %v441_v58 = vadd.f32 %v807_v1, %v368_v55  ;;  %v350_v59 = vadd.f32 %v349_v57, %v300_v56 }
  0xda   :  { %457 = vst [vmem:[%s876_s3 + $0x70] sm:$0xff] %v441_v58  ;;  %v434_v60 = vadd.f32 %v807_v1, %v350_v59 }
  0xdc   :  { %450 = vst [vmem:[%s876_s3 + $0x38] sm:$0xff] %v434_v60  ;;  %v320_v61 = vpop.f32.mrf.mxu2 }
  0xdd   :  { %v369_v62 = vpop.f32.mrf.mxu3 }
  0xde   :  { %v370_v63 = vadd.f32 %v369_v62, %v320_v61 }
  0xe0   :  { %v442_v0 = vadd.f32 %v807_v1, %v370_v63 }
  0xe2   :  { %458 = vst [vmem:[%s876_s3 + $0x78] sm:$0xff] %v442_v0 }

</bundles_post_ra>
